<compile_context>
chip_gen: v7x
topology: tpu7x:2x2x1
jax: 0.10.0
libtpu: 0.0.40
codegen_flags: <defaults>
</compile_context>

<pallas_src>
import jax
import jax.numpy as jnp
from jax.experimental import pallas as pl
from jax.experimental.pallas import tpu as pltpu

EPS = 1e-5


def _write_reflect_pad1(xp_ref, a):
    """Write ReflectionPad2d(1) of an (H, W, C) value into the (H+2, W+2, C) scratch.

    The scratch is bf16; the cast happens exactly once, here, so the MXU
    operands are produced without any later whole-matrix astype pass.
    """
    H, W, _ = a.shape
    a = a.astype(xp_ref.dtype)
    xp_ref[1:H + 1, 1:W + 1, :] = a                          # interior
    xp_ref[1:H + 1, 0:1, :] = a[:, 1:2, :]                   # left   <- column 1
    xp_ref[1:H + 1, W + 1:W + 2, :] = a[:, W - 2:W - 1, :]   # right  <- column W-2
    # Top/bottom rows are copied from already W-reflected padded rows, which
    # also fills the four corners correctly (reflection padding is separable).
    xp_ref[0:1, :, :] = xp_ref[2:3, :, :]                    # top    <- x row 1
    xp_ref[H + 1:H + 2, :, :] = xp_ref[H - 1:H, :, :]        # bottom <- x row H-2


def _conv3x3_9dot(xp_ref, w_ref, H, W, C):
    """3x3 'valid' conv over the bf16 padded scratch as 9 accumulated MXU dots.

    Every tap is a windowed load straight from xp_ref (no staging copy, every
    operand starts at lane offset 0), dotted against the (C, C) tap weight and
    accumulated in f32.  K = C (>=128 in production) keeps MXU shapes healthy.
    """
    acc = jnp.zeros((H * W, C), jnp.float32)
    for t in range(9):
        dy, dx = divmod(t, 3)
        # (H, W, C) window -> (H*W, C): only leading dims collapse, lane dim C
        # is untouched.  Already bf16 — no cast on the hot path.
        tap = xp_ref[dy:dy + H, dx:dx + W, :].reshape(H * W, C)
        acc = acc + jnp.dot(tap, w_ref[t], preferred_element_type=jnp.float32)
    return acc                                                # (H*W, C) f32


def _instance_norm(y, hw):
    """InstanceNorm2d(affine=False): per-channel, biased variance, fused stats."""
    inv_n = 1.0 / float(hw)
    mean = jnp.sum(y, axis=0, keepdims=True) * inv_n          # (1, C)
    mean_sq = jnp.sum(y * y, axis=0, keepdims=True) * inv_n   # (1, C)
    # Clamp: E[y^2] - mean^2 can round slightly negative in f32.
    var = jnp.maximum(mean_sq - mean * mean, 0.0)
    return (y - mean) * jax.lax.rsqrt(var + EPS)


def resnet_block_kernel(x_ref, w1_ref, w2_ref, o_ref, xp_ref):
    _, H, W, C = x_ref.shape
    hw = H * W

    # conv1 -> IN -> ReLU
    _write_reflect_pad1(xp_ref, x_ref[0])
    h = _conv3x3_9dot(xp_ref, w1_ref, H, W, C)
    h = jnp.maximum(_instance_norm(h, hw), 0.0)

    # conv2 -> IN (the padded scratch is reused for the second conv)
    _write_reflect_pad1(xp_ref, h.reshape(H, W, C))
    h = _conv3x3_9dot(xp_ref, w2_ref, H, W, C)
    h = _instance_norm(h, hw)

    # Residual: re-read the VMEM-resident input block at the point of use so
    # the full f32 input value is not kept live across both convs.
    o_ref[0] = (x_ref[0] + h.reshape(H, W, C)).astype(o_ref.dtype)


def _prep_weight(w, C):
    """PyTorch Conv2d (C_out, C_in, 3, 3) -> (9, C_in, C_out) bf16 tap stack."""
    w = jnp.asarray(w, jnp.float32)
    assert w.shape == (C, C, 3, 3), (
        f"expected PyTorch Conv2d weight layout (C_out, C_in, 3, 3)={(C, C, 3, 3)}, "
        f"got {w.shape}")
    # [co, ci, kh, kw] -> [kh, kw, ci, co] -> [t, ci, co], t = kh*3 + kw
    return jnp.transpose(w, (2, 3, 1, 0)).reshape(9, C, C).astype(jnp.bfloat16)


def resnet_block_nhwc(x_nhwc, w1, b1, w2, b2):
    """ResnetBlock forward on NHWC activations (native layout for this kernel).

    Args:
      x_nhwc: (N, H, W, C) float32 input.
      w1, w2: (C, C, 3, 3) conv weights in the PyTorch (c_out, c_in, kh, kw) layout.
      b1, b2: (C,) conv biases. Accepted for interface parity with the PyTorch
        module but unused: with InstanceNorm(affine=False) a per-channel bias
        is removed exactly by the mean subtraction (mathematical no-op).
    Returns:
      (N, H, W, C) float32 output.
    """
    del b1, b2  # provably no-ops under InstanceNorm(affine=False)

    x = jnp.asarray(x_nhwc, jnp.float32)
    N, H, W, C = x.shape
    assert H >= 2 and W >= 2, "ReflectionPad2d(1) needs H, W >= 2"

    w1_s = _prep_weight(w1, C)
    w2_s = _prep_weight(w2, C)

    # VMEM budget: double-buffered in/out blocks, resident bf16 tap weights
    # (counted twice in case they get double-buffered), bf16 pad scratch, and
    # headroom for the live f32 conv accumulator.  Clamped at the v5e/v6e
    # physical 128 MiB, not the v7x 64 MiB figure (see row-tiling TODO).
    block_bytes = H * W * C * 4
    weight_bytes = 9 * C * C * 2
    pad_bytes = (H + 2) * (W + 2) * C * 2
    footprint = 4 * block_bytes + 4 * weight_bytes + pad_bytes + 2 * block_bytes
    vmem_limit = int(min(128 * 2**20, max(4 * footprint, 16 * 2**20)))

    cost = pl.CostEstimate(
        flops=int(N * 2 * (2 * H * W * 9 * C * C)),        # two 3x3 convs
        transcendentals=int(N * 2 * C),                    # rsqrt per channel per IN
        bytes_accessed=int(2 * N * H * W * C * 4 + 2 * 9 * C * C * 2),
    )

    out = pl.pallas_call(
        resnet_block_kernel,
        out_shape=jax.ShapeDtypeStruct((N, H, W, C), jnp.float32),
        grid_spec=pltpu.PrefetchScalarGridSpec(
            num_scalar_prefetch=0,
            grid=(N,),
            in_specs=[
                pl.BlockSpec((1, H, W, C), lambda n: (n, 0, 0, 0)),
                # Constant index_map: weight blocks stay VMEM-resident across the grid.
                pl.BlockSpec((9, C, C), lambda n: (0, 0, 0)),
                pl.BlockSpec((9, C, C), lambda n: (0, 0, 0)),
            ],
            out_specs=pl.BlockSpec((1, H, W, C), lambda n: (n, 0, 0, 0)),
            scratch_shapes=[
                pltpu.VMEM((H + 2, W + 2, C), jnp.bfloat16),   # reflect-padded act (bf16)
            ],
        ),
        compiler_params=pltpu.CompilerParams(
            dimension_semantics=("parallel",),
            vmem_limit_bytes=vmem_limit,
        ),
        cost_estimate=cost,
    )(x, w1_s, w2_s)
    return out


def resnet_block(x_nchw, w1, b1, w2, b2):
    """NCHW wrapper for PyTorch-interface parity.

    In a trunk of stacked ResnetBlocks, call resnet_block_nhwc directly and
    keep activations NHWC end-to-end so the two full-tensor relayouts below
    are paid once (or never), not twice per block.
    """
    x = jnp.transpose(jnp.asarray(x_nchw, jnp.float32), (0, 2, 3, 1))  # NCHW -> NHWC
    y = resnet_block_nhwc(x, w1, b1, w2, b2)
    return jnp.transpose(y, (0, 3, 1, 2))                              # NHWC -> NCHW


if __name__ == "__main__":
    key = jax.random.PRNGKey(0)
    N, C, H, W = 2, 4, 16, 16   # dim = 4

    kx, kw1, kb1, kw2, kb2 = jax.random.split(key, 5)
    x = jax.random.normal(kx, (N, C, H, W), dtype=jnp.float32)

    # Deterministic synthetic Conv2d(dim, dim, 3) parameters in the PyTorch
    # (c_out, c_in, kh, kw) layout, scaled roughly like kaiming-uniform fan-in.
    fan_in = C * 3 * 3
    bound = 1.0 / jnp.sqrt(float(fan_in))
    w1 = jax.random.uniform(kw1, (C, C, 3, 3), jnp.float32, -bound, bound)
    b1 = jax.random.uniform(kb1, (C,), jnp.float32, -bound, bound)
    w2 = jax.random.uniform(kw2, (C, C, 3, 3), jnp.float32, -bound, bound)
    b2 = jax.random.uniform(kb2, (C,), jnp.float32, -bound, bound)

    out = resnet_block(x, w1, b1, w2, b2)
    jax.block_until_ready(out)
    assert out.shape == (N, C, H, W)
    assert bool(jnp.isfinite(out).all())
    print("KERNEL_OK")
</pallas_src>

<mosaic_0001>
module attributes {stable_mosaic.version = 11 : i64} {
  func.func @resnet_block_kernel(%arg0: i32, %arg1: memref<1x16x16x4xf32, #tpu.memory_space<vmem>>, %arg2: memref<9x4x4xbf16, #tpu.memory_space<vmem>>, %arg3: memref<9x4x4xbf16, #tpu.memory_space<vmem>>, %arg4: memref<1x16x16x4xf32, #tpu.memory_space<vmem>>, %arg5: memref<18x18x4xbf16, #tpu.memory_space<vmem>>) attributes {dimension_semantics = [#tpu.dimension_semantics<parallel>], iteration_bounds = array<i64: 2>, scalar_prefetch = 0 : i64, scratch_operands = 1 : i64, tpu.core_type = #tpu.core_type<tc>, window_params = [{transform_indices = @transform_0, window_bounds = array<i64: 1, 16, 16, 4>}, {pipeline_mode = #tpu.pipeline_mode<synchronous>, transform_indices = @transform_1, window_bounds = array<i64: 9, 4, 4>}, {pipeline_mode = #tpu.pipeline_mode<synchronous>, transform_indices = @transform_2, window_bounds = array<i64: 9, 4, 4>}, {transform_indices = @transform_3, window_bounds = array<i64: 1, 16, 16, 4>}]} {
    %c0 = arith.constant 0 : index
    %c0_0 = arith.constant 0 : index
    %c0_1 = arith.constant 0 : index
    %c0_2 = arith.constant 0 : index
    %0 = vector.load %arg1[%c0, %c0_0, %c0_1, %c0_2] : memref<1x16x16x4xf32, #tpu.memory_space<vmem>>, vector<1x16x16x4xf32>
    %1 = vector.shape_cast %0 : vector<1x16x16x4xf32> to vector<16x16x4xf32>
    %2 = arith.truncf %1 : vector<16x16x4xf32> to vector<16x16x4xbf16>
    %c1 = arith.constant 1 : index
    %c1_3 = arith.constant 1 : index
    %c0_4 = arith.constant 0 : index
    %3 = vector.load %arg5[%c1, %c1_3, %c0_4] : memref<18x18x4xbf16, #tpu.memory_space<vmem>>, vector<16x16x4xbf16>
    tpu.vector_store %arg5[%c1, %c1_3, %c0_4], %2 {strides = array<i32>} : memref<18x18x4xbf16, #tpu.memory_space<vmem>>, vector<16x16x4xbf16>,
    %4 = vector.extract_strided_slice %2 {offsets = [0, 1, 0], sizes = [16, 1, 4], strides = [1, 1, 1]} : vector<16x16x4xbf16> to vector<16x1x4xbf16>
    %c1_5 = arith.constant 1 : index
    %c0_6 = arith.constant 0 : index
    %c0_7 = arith.constant 0 : index
    %5 = vector.load %arg5[%c1_5, %c0_6, %c0_7] : memref<18x18x4xbf16, #tpu.memory_space<vmem>>, vector<16x1x4xbf16>
    tpu.vector_store %arg5[%c1_5, %c0_6, %c0_7], %4 {strides = array<i32>} : memref<18x18x4xbf16, #tpu.memory_space<vmem>>, vector<16x1x4xbf16>,
    %6 = vector.extract_strided_slice %2 {offsets = [0, 14, 0], sizes = [16, 1, 4], strides = [1, 1, 1]} : vector<16x16x4xbf16> to vector<16x1x4xbf16>
    %c1_8 = arith.constant 1 : index
    %c17 = arith.constant 17 : index
    %c0_9 = arith.constant 0 : index
    %7 = vector.load %arg5[%c1_8, %c17, %c0_9] : memref<18x18x4xbf16, #tpu.memory_space<vmem>>, vector<16x1x4xbf16>
    tpu.vector_store %arg5[%c1_8, %c17, %c0_9], %6 {strides = array<i32>} : memref<18x18x4xbf16, #tpu.memory_space<vmem>>, vector<16x1x4xbf16>,
    %c2 = arith.constant 2 : index
    %c0_10 = arith.constant 0 : index
    %c0_11 = arith.constant 0 : index
    %8 = vector.load %arg5[%c2, %c0_10, %c0_11] : memref<18x18x4xbf16, #tpu.memory_space<vmem>>, vector<1x18x4xbf16>
    %c0_12 = arith.constant 0 : index
    %c0_13 = arith.constant 0 : index
    %c0_14 = arith.constant 0 : index
    %9 = vector.load %arg5[%c0_12, %c0_13, %c0_14] : memref<18x18x4xbf16, #tpu.memory_space<vmem>>, vector<1x18x4xbf16>
    tpu.vector_store %arg5[%c0_12, %c0_13, %c0_14], %8 {strides = array<i32>} : memref<18x18x4xbf16, #tpu.memory_space<vmem>>, vector<1x18x4xbf16>,
    %c15 = arith.constant 15 : index
    %c0_15 = arith.constant 0 : index
    %c0_16 = arith.constant 0 : index
    %10 = vector.load %arg5[%c15, %c0_15, %c0_16] : memref<18x18x4xbf16, #tpu.memory_space<vmem>>, vector<1x18x4xbf16>
    %c17_17 = arith.constant 17 : index
    %c0_18 = arith.constant 0 : index
    %c0_19 = arith.constant 0 : index
    %11 = vector.load %arg5[%c17_17, %c0_18, %c0_19] : memref<18x18x4xbf16, #tpu.memory_space<vmem>>, vector<1x18x4xbf16>
    tpu.vector_store %arg5[%c17_17, %c0_18, %c0_19], %10 {strides = array<i32>} : memref<18x18x4xbf16, #tpu.memory_space<vmem>>, vector<1x18x4xbf16>,
    %cst = arith.constant 0.000000e+00 : f32
    %12 = vector.broadcast %cst : f32 to vector<256x4xf32>
    %c0_20 = arith.constant 0 : index
    %c0_21 = arith.constant 0 : index
    %c0_22 = arith.constant 0 : index
    %13 = vector.load %arg5[%c0_20, %c0_21, %c0_22] : memref<18x18x4xbf16, #tpu.memory_space<vmem>>, vector<16x16x4xbf16>
    %14 = vector.shape_cast %13 : vector<16x16x4xbf16> to vector<256x4xbf16>
    %c0_23 = arith.constant 0 : index
    %c0_24 = arith.constant 0 : index
    %c0_25 = arith.constant 0 : index
    %15 = vector.load %arg2[%c0_23, %c0_24, %c0_25] : memref<9x4x4xbf16, #tpu.memory_space<vmem>>, vector<1x4x4xbf16>
    %16 = vector.shape_cast %15 : vector<1x4x4xbf16> to vector<4x4xbf16>
    %cst_26 = arith.constant dense<0.000000e+00> : vector<256x4xf32>
    %17 = tpu.matmul %14, %16, %cst_26 {dimension_numbers = #tpu.dot_dimension_numbers<[1], [0], [0], [1], [0, 0, 1, 1], [], []>} : vector<256x4xbf16>, vector<4x4xbf16>, vector<256x4xf32> -> vector<256x4xf32>
    %18 = arith.addf %12, %17 : vector<256x4xf32>
    %c0_27 = arith.constant 0 : index
    %c1_28 = arith.constant 1 : index
    %c0_29 = arith.constant 0 : index
    %19 = vector.load %arg5[%c0_27, %c1_28, %c0_29] : memref<18x18x4xbf16, #tpu.memory_space<vmem>>, vector<16x16x4xbf16>
    %20 = vector.shape_cast %19 : vector<16x16x4xbf16> to vector<256x4xbf16>
    %c1_30 = arith.constant 1 : index
    %c0_31 = arith.constant 0 : index
    %c0_32 = arith.constant 0 : index
    %21 = vector.load %arg2[%c1_30, %c0_31, %c0_32] : memref<9x4x4xbf16, #tpu.memory_space<vmem>>, vector<1x4x4xbf16>
    %22 = vector.shape_cast %21 : vector<1x4x4xbf16> to vector<4x4xbf16>
    %cst_33 = arith.constant dense<0.000000e+00> : vector<256x4xf32>
    %23 = tpu.matmul %20, %22, %cst_33 {dimension_numbers = #tpu.dot_dimension_numbers<[1], [0], [0], [1], [0, 0, 1, 1], [], []>} : vector<256x4xbf16>, vector<4x4xbf16>, vector<256x4xf32> -> vector<256x4xf32>
    %24 = arith.addf %18, %23 : vector<256x4xf32>
    %c0_34 = arith.constant 0 : index
    %c2_35 = arith.constant 2 : index
    %c0_36 = arith.constant 0 : index
    %25 = vector.load %arg5[%c0_34, %c2_35, %c0_36] : memref<18x18x4xbf16, #tpu.memory_space<vmem>>, vector<16x16x4xbf16>
    %26 = vector.shape_cast %25 : vector<16x16x4xbf16> to vector<256x4xbf16>
    %c2_37 = arith.constant 2 : index
    %c0_38 = arith.constant 0 : index
    %c0_39 = arith.constant 0 : index
    %27 = vector.load %arg2[%c2_37, %c0_38, %c0_39] : memref<9x4x4xbf16, #tpu.memory_space<vmem>>, vector<1x4x4xbf16>
    %28 = vector.shape_cast %27 : vector<1x4x4xbf16> to vector<4x4xbf16>
    %cst_40 = arith.constant dense<0.000000e+00> : vector<256x4xf32>
    %29 = tpu.matmul %26, %28, %cst_40 {dimension_numbers = #tpu.dot_dimension_numbers<[1], [0], [0], [1], [0, 0, 1, 1], [], []>} : vector<256x4xbf16>, vector<4x4xbf16>, vector<256x4xf32> -> vector<256x4xf32>
    %30 = arith.addf %24, %29 : vector<256x4xf32>
    %c1_41 = arith.constant 1 : index
    %c0_42 = arith.constant 0 : index
    %c0_43 = arith.constant 0 : index
    %31 = vector.load %arg5[%c1_41, %c0_42, %c0_43] : memref<18x18x4xbf16, #tpu.memory_space<vmem>>, vector<16x16x4xbf16>
    %32 = vector.shape_cast %31 : vector<16x16x4xbf16> to vector<256x4xbf16>
    %c3 = arith.constant 3 : index
    %c0_44 = arith.constant 0 : index
    %c0_45 = arith.constant 0 : index
    %33 = vector.load %arg2[%c3, %c0_44, %c0_45] : memref<9x4x4xbf16, #tpu.memory_space<vmem>>, vector<1x4x4xbf16>
    %34 = vector.shape_cast %33 : vector<1x4x4xbf16> to vector<4x4xbf16>
    %cst_46 = arith.constant dense<0.000000e+00> : vector<256x4xf32>
    %35 = tpu.matmul %32, %34, %cst_46 {dimension_numbers = #tpu.dot_dimension_numbers<[1], [0], [0], [1], [0, 0, 1, 1], [], []>} : vector<256x4xbf16>, vector<4x4xbf16>, vector<256x4xf32> -> vector<256x4xf32>
    %36 = arith.addf %30, %35 : vector<256x4xf32>
    %c1_47 = arith.constant 1 : index
    %c1_48 = arith.constant 1 : index
    %c0_49 = arith.constant 0 : index
    %37 = vector.load %arg5[%c1_47, %c1_48, %c0_49] : memref<18x18x4xbf16, #tpu.memory_space<vmem>>, vector<16x16x4xbf16>
    %38 = vector.shape_cast %37 : vector<16x16x4xbf16> to vector<256x4xbf16>
    %c4 = arith.constant 4 : index
    %c0_50 = arith.constant 0 : index
    %c0_51 = arith.constant 0 : index
    %39 = vector.load %arg2[%c4, %c0_50, %c0_51] : memref<9x4x4xbf16, #tpu.memory_space<vmem>>, vector<1x4x4xbf16>
    %40 = vector.shape_cast %39 : vector<1x4x4xbf16> to vector<4x4xbf16>
    %cst_52 = arith.constant dense<0.000000e+00> : vector<256x4xf32>
    %41 = tpu.matmul %38, %40, %cst_52 {dimension_numbers = #tpu.dot_dimension_numbers<[1], [0], [0], [1], [0, 0, 1, 1], [], []>} : vector<256x4xbf16>, vector<4x4xbf16>, vector<256x4xf32> -> vector<256x4xf32>
    %42 = arith.addf %36, %41 : vector<256x4xf32>
    %c1_53 = arith.constant 1 : index
    %c2_54 = arith.constant 2 : index
    %c0_55 = arith.constant 0 : index
    %43 = vector.load %arg5[%c1_53, %c2_54, %c0_55] : memref<18x18x4xbf16, #tpu.memory_space<vmem>>, vector<16x16x4xbf16>
    %44 = vector.shape_cast %43 : vector<16x16x4xbf16> to vector<256x4xbf16>
    %c5 = arith.constant 5 : index
    %c0_56 = arith.constant 0 : index
    %c0_57 = arith.constant 0 : index
    %45 = vector.load %arg2[%c5, %c0_56, %c0_57] : memref<9x4x4xbf16, #tpu.memory_space<vmem>>, vector<1x4x4xbf16>
    %46 = vector.shape_cast %45 : vector<1x4x4xbf16> to vector<4x4xbf16>
    %cst_58 = arith.constant dense<0.000000e+00> : vector<256x4xf32>
    %47 = tpu.matmul %44, %46, %cst_58 {dimension_numbers = #tpu.dot_dimension_numbers<[1], [0], [0], [1], [0, 0, 1, 1], [], []>} : vector<256x4xbf16>, vector<4x4xbf16>, vector<256x4xf32> -> vector<256x4xf32>
    %48 = arith.addf %42, %47 : vector<256x4xf32>
    %c2_59 = arith.constant 2 : index
    %c0_60 = arith.constant 0 : index
    %c0_61 = arith.constant 0 : index
    %49 = vector.load %arg5[%c2_59, %c0_60, %c0_61] : memref<18x18x4xbf16, #tpu.memory_space<vmem>>, vector<16x16x4xbf16>
    %50 = vector.shape_cast %49 : vector<16x16x4xbf16> to vector<256x4xbf16>
    %c6 = arith.constant 6 : index
    %c0_62 = arith.constant 0 : index
    %c0_63 = arith.constant 0 : index
    %51 = vector.load %arg2[%c6, %c0_62, %c0_63] : memref<9x4x4xbf16, #tpu.memory_space<vmem>>, vector<1x4x4xbf16>
    %52 = vector.shape_cast %51 : vector<1x4x4xbf16> to vector<4x4xbf16>
    %cst_64 = arith.constant dense<0.000000e+00> : vector<256x4xf32>
    %53 = tpu.matmul %50, %52, %cst_64 {dimension_numbers = #tpu.dot_dimension_numbers<[1], [0], [0], [1], [0, 0, 1, 1], [], []>} : vector<256x4xbf16>, vector<4x4xbf16>, vector<256x4xf32> -> vector<256x4xf32>
    %54 = arith.addf %48, %53 : vector<256x4xf32>
    %c2_65 = arith.constant 2 : index
    %c1_66 = arith.constant 1 : index
    %c0_67 = arith.constant 0 : index
    %55 = vector.load %arg5[%c2_65, %c1_66, %c0_67] : memref<18x18x4xbf16, #tpu.memory_space<vmem>>, vector<16x16x4xbf16>
    %56 = vector.shape_cast %55 : vector<16x16x4xbf16> to vector<256x4xbf16>
    %c7 = arith.constant 7 : index
    %c0_68 = arith.constant 0 : index
    %c0_69 = arith.constant 0 : index
    %57 = vector.load %arg2[%c7, %c0_68, %c0_69] : memref<9x4x4xbf16, #tpu.memory_space<vmem>>, vector<1x4x4xbf16>
    %58 = vector.shape_cast %57 : vector<1x4x4xbf16> to vector<4x4xbf16>
    %cst_70 = arith.constant dense<0.000000e+00> : vector<256x4xf32>
    %59 = tpu.matmul %56, %58, %cst_70 {dimension_numbers = #tpu.dot_dimension_numbers<[1], [0], [0], [1], [0, 0, 1, 1], [], []>} : vector<256x4xbf16>, vector<4x4xbf16>, vector<256x4xf32> -> vector<256x4xf32>
    %60 = arith.addf %54, %59 : vector<256x4xf32>
    %c2_71 = arith.constant 2 : index
    %c2_72 = arith.constant 2 : index
    %c0_73 = arith.constant 0 : index
    %61 = vector.load %arg5[%c2_71, %c2_72, %c0_73] : memref<18x18x4xbf16, #tpu.memory_space<vmem>>, vector<16x16x4xbf16>
    %62 = vector.shape_cast %61 : vector<16x16x4xbf16> to vector<256x4xbf16>
    %c8 = arith.constant 8 : index
    %c0_74 = arith.constant 0 : index
    %c0_75 = arith.constant 0 : index
    %63 = vector.load %arg2[%c8, %c0_74, %c0_75] : memref<9x4x4xbf16, #tpu.memory_space<vmem>>, vector<1x4x4xbf16>
    %64 = vector.shape_cast %63 : vector<1x4x4xbf16> to vector<4x4xbf16>
    %cst_76 = arith.constant dense<0.000000e+00> : vector<256x4xf32>
    %65 = tpu.matmul %62, %64, %cst_76 {dimension_numbers = #tpu.dot_dimension_numbers<[1], [0], [0], [1], [0, 0, 1, 1], [], []>} : vector<256x4xbf16>, vector<4x4xbf16>, vector<256x4xf32> -> vector<256x4xf32>
    %66 = arith.addf %60, %65 : vector<256x4xf32>
    %cst_77 = arith.constant dense<0.000000e+00> : vector<4xf32>
    %67 = vector.multi_reduction <add>, %66, %cst_77 [0] : vector<256x4xf32> to vector<4xf32>
    %68 = vector.shape_cast %67 : vector<4xf32> to vector<1x4xf32>
    %cst_78 = arith.constant 3.906250e-03 : f32
    %69 = vector.broadcast %cst_78 : f32 to vector<1x4xf32>
    %70 = arith.mulf %68, %69 : vector<1x4xf32>
    %71 = arith.mulf %66, %66 : vector<256x4xf32>
    %cst_79 = arith.constant dense<0.000000e+00> : vector<4xf32>
    %72 = vector.multi_reduction <add>, %71, %cst_79 [0] : vector<256x4xf32> to vector<4xf32>
    %73 = vector.shape_cast %72 : vector<4xf32> to vector<1x4xf32>
    %cst_80 = arith.constant 3.906250e-03 : f32
    %74 = vector.broadcast %cst_80 : f32 to vector<1x4xf32>
    %75 = arith.mulf %73, %74 : vector<1x4xf32>
    %76 = arith.mulf %70, %70 : vector<1x4xf32>
    %77 = arith.subf %75, %76 : vector<1x4xf32>
    %cst_81 = arith.constant 0.000000e+00 : f32
    %78 = vector.broadcast %cst_81 : f32 to vector<1x4xf32>
    %79 = arith.maximumf %77, %78 : vector<1x4xf32>
    %80 = vector.broadcast %70 : vector<1x4xf32> to vector<256x4xf32>
    %81 = arith.subf %66, %80 : vector<256x4xf32>
    %cst_82 = arith.constant 9.99999974E-6 : f32
    %82 = vector.broadcast %cst_82 : f32 to vector<1x4xf32>
    %83 = arith.addf %79, %82 : vector<1x4xf32>
    %84 = math.rsqrt %83 : vector<1x4xf32>
    %85 = vector.broadcast %84 : vector<1x4xf32> to vector<256x4xf32>
    %86 = arith.mulf %81, %85 : vector<256x4xf32>
    %cst_83 = arith.constant 0.000000e+00 : f32
    %87 = vector.broadcast %cst_83 : f32 to vector<256x4xf32>
    %88 = arith.maximumf %86, %87 : vector<256x4xf32>
    %89 = vector.shape_cast %88 : vector<256x4xf32> to vector<16x16x4xf32>
    %90 = arith.truncf %89 : vector<16x16x4xf32> to vector<16x16x4xbf16>
    %c1_84 = arith.constant 1 : index
    %c1_85 = arith.constant 1 : index
    %c0_86 = arith.constant 0 : index
    %91 = vector.load %arg5[%c1_84, %c1_85, %c0_86] : memref<18x18x4xbf16, #tpu.memory_space<vmem>>, vector<16x16x4xbf16>
    tpu.vector_store %arg5[%c1_84, %c1_85, %c0_86], %90 {strides = array<i32>} : memref<18x18x4xbf16, #tpu.memory_space<vmem>>, vector<16x16x4xbf16>,
    %92 = vector.extract_strided_slice %90 {offsets = [0, 1, 0], sizes = [16, 1, 4], strides = [1, 1, 1]} : vector<16x16x4xbf16> to vector<16x1x4xbf16>
    %c1_87 = arith.constant 1 : index
    %c0_88 = arith.constant 0 : index
    %c0_89 = arith.constant 0 : index
    %93 = vector.load %arg5[%c1_87, %c0_88, %c0_89] : memref<18x18x4xbf16, #tpu.memory_space<vmem>>, vector<16x1x4xbf16>
    tpu.vector_store %arg5[%c1_87, %c0_88, %c0_89], %92 {strides = array<i32>} : memref<18x18x4xbf16, #tpu.memory_space<vmem>>, vector<16x1x4xbf16>,
    %94 = vector.extract_strided_slice %90 {offsets = [0, 14, 0], sizes = [16, 1, 4], strides = [1, 1, 1]} : vector<16x16x4xbf16> to vector<16x1x4xbf16>
    %c1_90 = arith.constant 1 : index
    %c17_91 = arith.constant 17 : index
    %c0_92 = arith.constant 0 : index
    %95 = vector.load %arg5[%c1_90, %c17_91, %c0_92] : memref<18x18x4xbf16, #tpu.memory_space<vmem>>, vector<16x1x4xbf16>
    tpu.vector_store %arg5[%c1_90, %c17_91, %c0_92], %94 {strides = array<i32>} : memref<18x18x4xbf16, #tpu.memory_space<vmem>>, vector<16x1x4xbf16>,
    %c2_93 = arith.constant 2 : index
    %c0_94 = arith.constant 0 : index
    %c0_95 = arith.constant 0 : index
    %96 = vector.load %arg5[%c2_93, %c0_94, %c0_95] : memref<18x18x4xbf16, #tpu.memory_space<vmem>>, vector<1x18x4xbf16>
    %c0_96 = arith.constant 0 : index
    %c0_97 = arith.constant 0 : index
    %c0_98 = arith.constant 0 : index
    %97 = vector.load %arg5[%c0_96, %c0_97, %c0_98] : memref<18x18x4xbf16, #tpu.memory_space<vmem>>, vector<1x18x4xbf16>
    tpu.vector_store %arg5[%c0_96, %c0_97, %c0_98], %96 {strides = array<i32>} : memref<18x18x4xbf16, #tpu.memory_space<vmem>>, vector<1x18x4xbf16>,
    %c15_99 = arith.constant 15 : index
    %c0_100 = arith.constant 0 : index
    %c0_101 = arith.constant 0 : index
    %98 = vector.load %arg5[%c15_99, %c0_100, %c0_101] : memref<18x18x4xbf16, #tpu.memory_space<vmem>>, vector<1x18x4xbf16>
    %c17_102 = arith.constant 17 : index
    %c0_103 = arith.constant 0 : index
    %c0_104 = arith.constant 0 : index
    %99 = vector.load %arg5[%c17_102, %c0_103, %c0_104] : memref<18x18x4xbf16, #tpu.memory_space<vmem>>, vector<1x18x4xbf16>
    tpu.vector_store %arg5[%c17_102, %c0_103, %c0_104], %98 {strides = array<i32>} : memref<18x18x4xbf16, #tpu.memory_space<vmem>>, vector<1x18x4xbf16>,
    %cst_105 = arith.constant 0.000000e+00 : f32
    %100 = vector.broadcast %cst_105 : f32 to vector<256x4xf32>
    %c0_106 = arith.constant 0 : index
    %c0_107 = arith.constant 0 : index
    %c0_108 = arith.constant 0 : index
    %101 = vector.load %arg5[%c0_106, %c0_107, %c0_108] : memref<18x18x4xbf16, #tpu.memory_space<vmem>>, vector<16x16x4xbf16>
    %102 = vector.shape_cast %101 : vector<16x16x4xbf16> to vector<256x4xbf16>
    %c0_109 = arith.constant 0 : index
    %c0_110 = arith.constant 0 : index
    %c0_111 = arith.constant 0 : index
    %103 = vector.load %arg3[%c0_109, %c0_110, %c0_111] : memref<9x4x4xbf16, #tpu.memory_space<vmem>>, vector<1x4x4xbf16>
    %104 = vector.shape_cast %103 : vector<1x4x4xbf16> to vector<4x4xbf16>
    %cst_112 = arith.constant dense<0.000000e+00> : vector<256x4xf32>
    %105 = tpu.matmul %102, %104, %cst_112 {dimension_numbers = #tpu.dot_dimension_numbers<[1], [0], [0], [1], [0, 0, 1, 1], [], []>} : vector<256x4xbf16>, vector<4x4xbf16>, vector<256x4xf32> -> vector<256x4xf32>
    %106 = arith.addf %100, %105 : vector<256x4xf32>
    %c0_113 = arith.constant 0 : index
    %c1_114 = arith.constant 1 : index
    %c0_115 = arith.constant 0 : index
    %107 = vector.load %arg5[%c0_113, %c1_114, %c0_115] : memref<18x18x4xbf16, #tpu.memory_space<vmem>>, vector<16x16x4xbf16>
    %108 = vector.shape_cast %107 : vector<16x16x4xbf16> to vector<256x4xbf16>
    %c1_116 = arith.constant 1 : index
    %c0_117 = arith.constant 0 : index
    %c0_118 = arith.constant 0 : index
    %109 = vector.load %arg3[%c1_116, %c0_117, %c0_118] : memref<9x4x4xbf16, #tpu.memory_space<vmem>>, vector<1x4x4xbf16>
    %110 = vector.shape_cast %109 : vector<1x4x4xbf16> to vector<4x4xbf16>
    %cst_119 = arith.constant dense<0.000000e+00> : vector<256x4xf32>
    %111 = tpu.matmul %108, %110, %cst_119 {dimension_numbers = #tpu.dot_dimension_numbers<[1], [0], [0], [1], [0, 0, 1, 1], [], []>} : vector<256x4xbf16>, vector<4x4xbf16>, vector<256x4xf32> -> vector<256x4xf32>
    %112 = arith.addf %106, %111 : vector<256x4xf32>
    %c0_120 = arith.constant 0 : index
    %c2_121 = arith.constant 2 : index
    %c0_122 = arith.constant 0 : index
    %113 = vector.load %arg5[%c0_120, %c2_121, %c0_122] : memref<18x18x4xbf16, #tpu.memory_space<vmem>>, vector<16x16x4xbf16>
    %114 = vector.shape_cast %113 : vector<16x16x4xbf16> to vector<256x4xbf16>
    %c2_123 = arith.constant 2 : index
    %c0_124 = arith.constant 0 : index
    %c0_125 = arith.constant 0 : index
    %115 = vector.load %arg3[%c2_123, %c0_124, %c0_125] : memref<9x4x4xbf16, #tpu.memory_space<vmem>>, vector<1x4x4xbf16>
    %116 = vector.shape_cast %115 : vector<1x4x4xbf16> to vector<4x4xbf16>
    %cst_126 = arith.constant dense<0.000000e+00> : vector<256x4xf32>
    %117 = tpu.matmul %114, %116, %cst_126 {dimension_numbers = #tpu.dot_dimension_numbers<[1], [0], [0], [1], [0, 0, 1, 1], [], []>} : vector<256x4xbf16>, vector<4x4xbf16>, vector<256x4xf32> -> vector<256x4xf32>
    %118 = arith.addf %112, %117 : vector<256x4xf32>
    %c1_127 = arith.constant 1 : index
    %c0_128 = arith.constant 0 : index
    %c0_129 = arith.constant 0 : index
    %119 = vector.load %arg5[%c1_127, %c0_128, %c0_129] : memref<18x18x4xbf16, #tpu.memory_space<vmem>>, vector<16x16x4xbf16>
    %120 = vector.shape_cast %119 : vector<16x16x4xbf16> to vector<256x4xbf16>
    %c3_130 = arith.constant 3 : index
    %c0_131 = arith.constant 0 : index
    %c0_132 = arith.constant 0 : index
    %121 = vector.load %arg3[%c3_130, %c0_131, %c0_132] : memref<9x4x4xbf16, #tpu.memory_space<vmem>>, vector<1x4x4xbf16>
    %122 = vector.shape_cast %121 : vector<1x4x4xbf16> to vector<4x4xbf16>
    %cst_133 = arith.constant dense<0.000000e+00> : vector<256x4xf32>
    %123 = tpu.matmul %120, %122, %cst_133 {dimension_numbers = #tpu.dot_dimension_numbers<[1], [0], [0], [1], [0, 0, 1, 1], [], []>} : vector<256x4xbf16>, vector<4x4xbf16>, vector<256x4xf32> -> vector<256x4xf32>
    %124 = arith.addf %118, %123 : vector<256x4xf32>
    %c1_134 = arith.constant 1 : index
    %c1_135 = arith.constant 1 : index
    %c0_136 = arith.constant 0 : index
    %125 = vector.load %arg5[%c1_134, %c1_135, %c0_136] : memref<18x18x4xbf16, #tpu.memory_space<vmem>>, vector<16x16x4xbf16>
    %126 = vector.shape_cast %125 : vector<16x16x4xbf16> to vector<256x4xbf16>
    %c4_137 = arith.constant 4 : index
    %c0_138 = arith.constant 0 : index
    %c0_139 = arith.constant 0 : index
    %127 = vector.load %arg3[%c4_137, %c0_138, %c0_139] : memref<9x4x4xbf16, #tpu.memory_space<vmem>>, vector<1x4x4xbf16>
    %128 = vector.shape_cast %127 : vector<1x4x4xbf16> to vector<4x4xbf16>
    %cst_140 = arith.constant dense<0.000000e+00> : vector<256x4xf32>
    %129 = tpu.matmul %126, %128, %cst_140 {dimension_numbers = #tpu.dot_dimension_numbers<[1], [0], [0], [1], [0, 0, 1, 1], [], []>} : vector<256x4xbf16>, vector<4x4xbf16>, vector<256x4xf32> -> vector<256x4xf32>
    %130 = arith.addf %124, %129 : vector<256x4xf32>
    %c1_141 = arith.constant 1 : index
    %c2_142 = arith.constant 2 : index
    %c0_143 = arith.constant 0 : index
    %131 = vector.load %arg5[%c1_141, %c2_142, %c0_143] : memref<18x18x4xbf16, #tpu.memory_space<vmem>>, vector<16x16x4xbf16>
    %132 = vector.shape_cast %131 : vector<16x16x4xbf16> to vector<256x4xbf16>
    %c5_144 = arith.constant 5 : index
    %c0_145 = arith.constant 0 : index
    %c0_146 = arith.constant 0 : index
    %133 = vector.load %arg3[%c5_144, %c0_145, %c0_146] : memref<9x4x4xbf16, #tpu.memory_space<vmem>>, vector<1x4x4xbf16>
    %134 = vector.shape_cast %133 : vector<1x4x4xbf16> to vector<4x4xbf16>
    %cst_147 = arith.constant dense<0.000000e+00> : vector<256x4xf32>
    %135 = tpu.matmul %132, %134, %cst_147 {dimension_numbers = #tpu.dot_dimension_numbers<[1], [0], [0], [1], [0, 0, 1, 1], [], []>} : vector<256x4xbf16>, vector<4x4xbf16>, vector<256x4xf32> -> vector<256x4xf32>
    %136 = arith.addf %130, %135 : vector<256x4xf32>
    %c2_148 = arith.constant 2 : index
    %c0_149 = arith.constant 0 : index
    %c0_150 = arith.constant 0 : index
    %137 = vector.load %arg5[%c2_148, %c0_149, %c0_150] : memref<18x18x4xbf16, #tpu.memory_space<vmem>>, vector<16x16x4xbf16>
    %138 = vector.shape_cast %137 : vector<16x16x4xbf16> to vector<256x4xbf16>
    %c6_151 = arith.constant 6 : index
    %c0_152 = arith.constant 0 : index
    %c0_153 = arith.constant 0 : index
    %139 = vector.load %arg3[%c6_151, %c0_152, %c0_153] : memref<9x4x4xbf16, #tpu.memory_space<vmem>>, vector<1x4x4xbf16>
    %140 = vector.shape_cast %139 : vector<1x4x4xbf16> to vector<4x4xbf16>
    %cst_154 = arith.constant dense<0.000000e+00> : vector<256x4xf32>
    %141 = tpu.matmul %138, %140, %cst_154 {dimension_numbers = #tpu.dot_dimension_numbers<[1], [0], [0], [1], [0, 0, 1, 1], [], []>} : vector<256x4xbf16>, vector<4x4xbf16>, vector<256x4xf32> -> vector<256x4xf32>
    %142 = arith.addf %136, %141 : vector<256x4xf32>
    %c2_155 = arith.constant 2 : index
    %c1_156 = arith.constant 1 : index
    %c0_157 = arith.constant 0 : index
    %143 = vector.load %arg5[%c2_155, %c1_156, %c0_157] : memref<18x18x4xbf16, #tpu.memory_space<vmem>>, vector<16x16x4xbf16>
    %144 = vector.shape_cast %143 : vector<16x16x4xbf16> to vector<256x4xbf16>
    %c7_158 = arith.constant 7 : index
    %c0_159 = arith.constant 0 : index
    %c0_160 = arith.constant 0 : index
    %145 = vector.load %arg3[%c7_158, %c0_159, %c0_160] : memref<9x4x4xbf16, #tpu.memory_space<vmem>>, vector<1x4x4xbf16>
    %146 = vector.shape_cast %145 : vector<1x4x4xbf16> to vector<4x4xbf16>
    %cst_161 = arith.constant dense<0.000000e+00> : vector<256x4xf32>
    %147 = tpu.matmul %144, %146, %cst_161 {dimension_numbers = #tpu.dot_dimension_numbers<[1], [0], [0], [1], [0, 0, 1, 1], [], []>} : vector<256x4xbf16>, vector<4x4xbf16>, vector<256x4xf32> -> vector<256x4xf32>
    %148 = arith.addf %142, %147 : vector<256x4xf32>
    %c2_162 = arith.constant 2 : index
    %c2_163 = arith.constant 2 : index
    %c0_164 = arith.constant 0 : index
    %149 = vector.load %arg5[%c2_162, %c2_163, %c0_164] : memref<18x18x4xbf16, #tpu.memory_space<vmem>>, vector<16x16x4xbf16>
    %150 = vector.shape_cast %149 : vector<16x16x4xbf16> to vector<256x4xbf16>
    %c8_165 = arith.constant 8 : index
    %c0_166 = arith.constant 0 : index
    %c0_167 = arith.constant 0 : index
    %151 = vector.load %arg3[%c8_165, %c0_166, %c0_167] : memref<9x4x4xbf16, #tpu.memory_space<vmem>>, vector<1x4x4xbf16>
    %152 = vector.shape_cast %151 : vector<1x4x4xbf16> to vector<4x4xbf16>
    %cst_168 = arith.constant dense<0.000000e+00> : vector<256x4xf32>
    %153 = tpu.matmul %150, %152, %cst_168 {dimension_numbers = #tpu.dot_dimension_numbers<[1], [0], [0], [1], [0, 0, 1, 1], [], []>} : vector<256x4xbf16>, vector<4x4xbf16>, vector<256x4xf32> -> vector<256x4xf32>
    %154 = arith.addf %148, %153 : vector<256x4xf32>
    %cst_169 = arith.constant dense<0.000000e+00> : vector<4xf32>
    %155 = vector.multi_reduction <add>, %154, %cst_169 [0] : vector<256x4xf32> to vector<4xf32>
    %156 = vector.shape_cast %155 : vector<4xf32> to vector<1x4xf32>
    %cst_170 = arith.constant 3.906250e-03 : f32
    %157 = vector.broadcast %cst_170 : f32 to vector<1x4xf32>
    %158 = arith.mulf %156, %157 : vector<1x4xf32>
    %159 = arith.mulf %154, %154 : vector<256x4xf32>
    %cst_171 = arith.constant dense<0.000000e+00> : vector<4xf32>
    %160 = vector.multi_reduction <add>, %159, %cst_171 [0] : vector<256x4xf32> to vector<4xf32>
    %161 = vector.shape_cast %160 : vector<4xf32> to vector<1x4xf32>
    %cst_172 = arith.constant 3.906250e-03 : f32
    %162 = vector.broadcast %cst_172 : f32 to vector<1x4xf32>
    %163 = arith.mulf %161, %162 : vector<1x4xf32>
    %164 = arith.mulf %158, %158 : vector<1x4xf32>
    %165 = arith.subf %163, %164 : vector<1x4xf32>
    %cst_173 = arith.constant 0.000000e+00 : f32
    %166 = vector.broadcast %cst_173 : f32 to vector<1x4xf32>
    %167 = arith.maximumf %165, %166 : vector<1x4xf32>
    %168 = vector.broadcast %158 : vector<1x4xf32> to vector<256x4xf32>
    %169 = arith.subf %154, %168 : vector<256x4xf32>
    %cst_174 = arith.constant 9.99999974E-6 : f32
    %170 = vector.broadcast %cst_174 : f32 to vector<1x4xf32>
    %171 = arith.addf %167, %170 : vector<1x4xf32>
    %172 = math.rsqrt %171 : vector<1x4xf32>
    %173 = vector.broadcast %172 : vector<1x4xf32> to vector<256x4xf32>
    %174 = arith.mulf %169, %173 : vector<256x4xf32>
    %c0_175 = arith.constant 0 : index
    %c0_176 = arith.constant 0 : index
    %c0_177 = arith.constant 0 : index
    %c0_178 = arith.constant 0 : index
    %175 = vector.load %arg1[%c0_175, %c0_176, %c0_177, %c0_178] : memref<1x16x16x4xf32, #tpu.memory_space<vmem>>, vector<1x16x16x4xf32>
    %176 = vector.shape_cast %175 : vector<1x16x16x4xf32> to vector<16x16x4xf32>
    %177 = vector.shape_cast %174 : vector<256x4xf32> to vector<16x16x4xf32>
    %178 = arith.addf %176, %177 : vector<16x16x4xf32>
    %c0_179 = arith.constant 0 : index
    %c0_180 = arith.constant 0 : index
    %c0_181 = arith.constant 0 : index
    %c0_182 = arith.constant 0 : index
    %179 = vector.load %arg4[%c0_179, %c0_180, %c0_181, %c0_182] : memref<1x16x16x4xf32, #tpu.memory_space<vmem>>, vector<1x16x16x4xf32>
    %180 = vector.shape_cast %179 : vector<1x16x16x4xf32> to vector<16x16x4xf32>
    %181 = vector.shape_cast %178 : vector<16x16x4xf32> to vector<1x16x16x4xf32>
    tpu.vector_store %arg4[%c0_179, %c0_180, %c0_181, %c0_182], %181 {strides = array<i32>} : memref<1x16x16x4xf32, #tpu.memory_space<vmem>>, vector<1x16x16x4xf32>,
    return
  }
  func.func @transform_0(%arg0: i32) -> (i32, i32, i32, i32) {
    %c0_i32 = arith.constant 0 : i32
    %c0_i32_0 = arith.constant 0 : i32
    %c0_i32_1 = arith.constant 0 : i32
    %c0_i32_2 = arith.constant 0 : i32
    return %arg0, %c0_i32, %c0_i32_0, %c0_i32_1 : i32, i32, i32, i32
  }
  func.func @transform_1(%arg0: i32) -> (i32, i32, i32) {
    %c0_i32 = arith.constant 0 : i32
    %c0_i32_0 = arith.constant 0 : i32
    %c0_i32_1 = arith.constant 0 : i32
    %c0_i32_2 = arith.constant 0 : i32
    return %c0_i32, %c0_i32_0, %c0_i32_1 : i32, i32, i32
  }
  func.func @transform_2(%arg0: i32) -> (i32, i32, i32) {
    %c0_i32 = arith.constant 0 : i32
    %c0_i32_0 = arith.constant 0 : i32
    %c0_i32_1 = arith.constant 0 : i32
    %c0_i32_2 = arith.constant 0 : i32
    return %c0_i32, %c0_i32_0, %c0_i32_1 : i32, i32, i32
  }
  func.func @transform_3(%arg0: i32) -> (i32, i32, i32, i32) {
    %c0_i32 = arith.constant 0 : i32
    %c0_i32_0 = arith.constant 0 : i32
    %c0_i32_1 = arith.constant 0 : i32
    %c0_i32_2 = arith.constant 0 : i32
    return %arg0, %c0_i32, %c0_i32_0, %c0_i32_1 : i32, i32, i32, i32
  }
}

</mosaic_0001>

<bundles_post_ra>
// kernel: tpu_custom_call.1
= control target key start
LH: loop header
LB: loop body
LE: loop exit
PB: predicated region body
PF: predicated region fallthrough
CT: control target
= control target key end

     0   :  { %s13946_s12 = smov 0   ;;  %s18730_s0 = inlined_call_operand.vmem [shape: f32[2,16,16,4], index: 0, kind: input, shape index: {}]   ;;  %s18731_s1 = inlined_call_operand.vmem [shape: bf16[9,4,4], index: 1, kind: input, shape index: {}]   ;;  %s18732_s2 = inlined_call_operand.vmem [shape: bf16[9,4,4], index: 2, kind: input, shape index: {}]   ;;  %s18733_s3 = inlined_call_operand.vmem [shape: f32[2,16,16,4], index: 3, kind: output, shape index: {}]  }
   0x1 LB: > { %s11453_s13 = sadd.s32 4294967295, %s13924_s12   ;;  %p11457_p0 = scmp.ge.s32.totalorder %s13924_s12, 1  ;;  %s13924_s12 = sphi %s13946_s12, %s13_s12  }
   0x2   : > { %p137_p1 = scmp.lt.s32.totalorder %s13924_s12, 3 }
   0x4   : > { %p138_p2 = pnand %p11457_p0, %p137_p1 }
   0x6   : > { %141 = sbr.rel (%p138_p2) target bundleno = 1936 (0x790), region = 32 }
   0xd   : > { %v11526_v0 = vld [vmem:[%s18731_s1 + $0x2] sm:$0x3]  ;;  %vm1486_vm0 = vcmask 1041408   ;;  %p161_p3 = scmp.lt.s32.totalorder %s11453_s13, 1  ;;  %v13965_v2 = vld [vmem:[%s18731_s1] sm:$0x3] }
   0xe   : > { %13776 = vmatprep.subr.msk.bf16.mxu0 %vm1486_vm0, %v11526_v0  ;;  %v1488_v1 = vsel %vm1486_vm0, %v11526_v0, 0  ;;  %vm300_vm1 = vsmask.f32 256  ;;  %vm301_vm2 = vsmask.f32 4368  ;;  %vm624_vm3 = vcmask 27648  }
   0xf   : > { %12653 = vmatpush3.bf16.msra.mxu0 %v1488_v1  ;;  %s19249_s13 = smov (!%p161_p3, %s11453_s13), 1  ;;  %vm625_vm4 = vsmask.f32 7938  ;;  %vm632_vm5 = vcmask 24576   ;;  %vm13992_vm6 = vmor %vm300_vm1, %vm301_vm2  ;;  %v18887_v18 = vmov 0  ;;  %v18890_v25 = vmov 0 }
  0x10   : > { %s12280_s16 = sshll.u32 %s19249_s13, 8  ;;  %13777 = vmatprep.subr.msk.bf16.mxu0 %vm1486_vm0, %v13965_v2  ;;  %v18888_v18 = vsel %vm13992_vm6, 4294967295, %v18887_v18  ;;  %vm14002_vm7 = vmand %vm624_vm3, %vm625_vm4  ;;  %v637_v26 = vld [vmem:[#allocation2 + $0x18] sm:$0xf]  ;;  %v18893_v28 = vmov 0  ;;  %vm1437_vm13 = vcmask 31744  }
  0x11   : > { %s13972_s21 = scalar_lea.vmem %s18730_s0, %s12280_s16  ;;  %18889 = vst [vmem:[#allocation3_spill] sm:$0xff] %v18888_v18  ;;  %v18891_v25 = vsel %vm14002_vm7, 4294967295, %v18890_v25  ;;  %vm14010_vm8 = vmand %vm632_vm5, %vm300_vm1  ;;  %v641_v29 = vld [vmem:[#allocation2 + $0x20] sm:$0x1]  ;;  %v627_v38 = vld [vmem:[#allocation2 + $0xc] sm:$0xf]  ;;  %s18615_s10 = scalar_lea.vmem %s18733_s3, %s12280_s16 }
  0x12   : > { %v174_v3 = vld [vmem:[%s13972_s21 + $0x10] sm:$0xff]  ;;  %v175_v4 = vld [vmem:[%s13972_s21 + $0x18] sm:$0xff]  ;;  %v172_v7 = vld [vmem:[%s13972_s21] sm:$0xff]  ;;  %18892 = vst [vmem:[#allocation4_spill] sm:$0xff] %v18891_v25  ;;  %v18894_v28 = vsel %vm14010_vm8, 4294967295, %v18893_v28  ;;  %vm1991_vm14 = vcmask 1042432  }
  0x13   : > { %v13978_v5 = vpack.c.bf16 %v174_v3, %v174_v3  ;;  %v12285_v6 = vpack.c.bf16 %v175_v4, %v175_v4  ;;  %v173_v8 = vld [vmem:[%s13972_s21 + $0x8] sm:$0xff]  ;;  %v176_v9 = vld [vmem:[%s13972_s21 + $0x20] sm:$0xff]  ;;  %v13983_v10 = vpack.c.bf16 %v172_v7, %v172_v7  ;;  %18895 = vst [vmem:[#allocation5_spill] sm:$0xff] %v18894_v28  ;;  %v634_v39 = vld [vmem:[#allocation2 + $0x14] sm:$0x1]  ;;  %vm1992_vm15 = vcmask 1046532  }
  0x14   : > { %v12283_v11 = vpack.c.bf16 %v173_v8, %v173_v8  ;;  %v13985_v12 = vpack.c.bf16 %v176_v9, %v176_v9  ;;  %v177_v17 = vld [vmem:[%s13972_s21 + $0x28] sm:$0xff]  ;;  %v178_v44 = vld [vmem:[%s13972_s21 + $0x30] sm:$0xff]  ;;  %v179_v49 = vld [vmem:[%s13972_s21 + $0x38] sm:$0xff]  ;;  %vm1000_vm10 = vsmask.f32 3328 }
  0x15   : > { %v321_v13 = vshrl.u32 %v13978_v5, 16  ;;  %v324_v14 = vshll.u32 %v13978_v5, 16  ;;  %v329_v15 = vshrl.u32 %v12285_v6, 16  ;;  %v332_v16 = vshll.u32 %v12285_v6, 16  ;;  %v180_v50 = vld [vmem:[%s13972_s21 + $0x40] sm:$0xff]  ;;  %v181_v51 = vld [vmem:[%s13972_s21 + $0x48] sm:$0xff]  ;;  %vm14056_vm9 = vmand %vm632_vm5, %vm625_vm4 }
  0x16   : > { %v304_v19 = vshrl.u32 %v13983_v10, 16  ;;  %v307_v20 = vshll.u32 %v13983_v10, 16  ;;  %v312_v21 = vshrl.u32 %v12283_v11, 16  ;;  %v315_v22 = vshll.u32 %v12283_v11, 16  ;;  %v644_v59 = vld [vmem:[#allocation2 + $0x24] sm:$0xf]  ;;  %vm14726_vm1 = vmor %vm1991_vm14, %vm1992_vm15 }
  0x17   : > { %v323_v23 = vrot.slane %v321_v13, 7  ;;  %v331_v24 = vrot.slane %v329_v15, 7  ;;  %v14006_v27 = vrot.slane %v332_v16, 11  ;;  %v12287_v32 = vpack.c.bf16 %v177_v17, %v177_v17  ;;  %v648_v8 = vld [vmem:[#allocation2 + $0x2c] sm:$0x1]  ;;  %v182_v15 = vld [vmem:[%s13972_s21 + $0x50] sm:$0xff] }
  0x18   : > { %v306_v30 = vrot.slane %v304_v19, 7  ;;  %v314_v31 = vrot.slane %v312_v21, 7  ;;  %v338_v33 = vshrl.u32 %v13985_v12, 16  ;;  %v341_v55 = vshll.u32 %v13985_v12, 16 }
  0x19   : > { %v326_v34 = vor.u32 %v324_v14, %v323_v23  ;;  %v327_v35 = vrot.slane %v323_v23, 4  ;;  %v334_v36 = vor.u32 %v332_v16, %v331_v24  ;;  %v336_v37 = vrot.slane %v331_v24, 4 }
  0x1a   : > { %v309_v40 = vor.u32 %v307_v20, %v306_v30  ;;  %v310_v41 = vrot.slane %v306_v30, 4  ;;  %v317_v42 = vor.u32 %v315_v22, %v314_v31  ;;  %v319_v43 = vrot.slane %v314_v31, 4 }
  0x1b   : > { %v335_v45 = vsel %vm13992_vm6, %v327_v35, %v334_v36  ;;  %v638_v46 = vsel %vm14002_vm7, %v326_v34, %v637_v26  ;;  %v642_v47 = vsel %vm14010_vm8, %v336_v37, %v641_v29  ;;  %v340_v48 = vrot.slane %v338_v33, 7  ;;  %v651_v26 = vld [vmem:[#allocation2 + $0x30] sm:$0xf] }
  0x1c   : > { %639 = vst [vmem:[#allocation2 + $0x18] sm:$0xf] %v638_v46  ;;  %640 = vst.msk [vmem:[#allocation2 + $0x1c] sm:$0xf] %vm624_vm3, %v335_v45  ;;  %v318_v52 = vsel %vm13992_vm6, %v310_v41, %v317_v42  ;;  %v628_v53 = vsel %vm14002_vm7, %v309_v40, %v627_v38  ;;  %v635_v54 = vsel %vm14010_vm8, %v319_v43, %v634_v39  ;;  %v11510_v56 = vrot.slane %v315_v22, 11 }
  0x1d   : > { %643 = vst [vmem:[#allocation2 + $0x20] sm:$0x1] %v642_v47  ;;  %629 = vst [vmem:[#allocation2 + $0xc] sm:$0xf] %v628_v53  ;;  %v346_v57 = vshrl.u32 %v12287_v32, 16  ;;  %v349_v58 = vshll.u32 %v12287_v32, 16  ;;  %v14038_v60 = vpack.c.bf16 %v178_v44, %v178_v44  ;;  %v343_v61 = vor.u32 %v341_v55, %v340_v48 }
  0x1e   : > { %631 = vst.msk [vmem:[#allocation2 + $0x10] sm:$0xf] %vm624_vm3, %v318_v52  ;;  %636 = vst [vmem:[#allocation2 + $0x14] sm:$0x1] %v635_v54  ;;  %v14040_v62 = vpack.c.bf16 %v179_v49, %v179_v49  ;;  %v14042_v63 = vpack.c.bf16 %v180_v50, %v180_v50  ;;  %v14044_v0 = vpack.c.bf16 %v181_v51, %v181_v51  ;;  %v344_v1 = vrot.slane %v340_v48, 4 }
  0x1f   : > { %v348_v3 = vrot.slane %v346_v57, 7  ;;  %v355_v4 = vshrl.u32 %v14038_v60, 16  ;;  %v358_v6 = vshll.u32 %v14038_v60, 16  ;;  %v645_v7 = vsel %vm14002_vm7, %v343_v61, %v644_v59  ;;  %v655_v48 = vld [vmem:[#allocation2 + $0x38] sm:$0x1] }
  0x20   : > { %v363_v9 = vshrl.u32 %v14040_v62, 16  ;;  %v366_v11 = vshll.u32 %v14040_v62, 16  ;;  %v372_v14 = vshrl.u32 %v14042_v63, 16  ;;  %v18896_v16 = vmov 0  ;;  %646 = vst [vmem:[#allocation2 + $0x24] sm:$0xf] %v645_v7 }
  0x21   : > { %v18897_v16 = vsel %vm14056_vm9, 4294967295, %v18896_v16  ;;  %v351_v17 = vor.u32 %v349_v58, %v348_v3  ;;  %v353_v20 = vrot.slane %v348_v3, 4  ;;  %v357_v21 = vrot.slane %v355_v4, 7  ;;  %v658_v55 = vld [vmem:[#allocation2 + $0x3c] sm:$0xf] }
  0x22   : > { %18898 = vst [vmem:[#allocation6_spill] sm:$0xff] %v18897_v16  ;;  %v375_v22 = vshll.u32 %v14042_v63, 16  ;;  %v14063_v23 = vrot.slane %v349_v58, 11  ;;  %v365_v24 = vrot.slane %v363_v9, 7  ;;  %v14067_v29 = vrot.slane %v372_v14, 7  ;;  %v183_v9 = vld [vmem:[%s13972_s21 + $0x58] sm:$0xff] }
  0x23   : > { %v380_v30 = vshrl.u32 %v14044_v0, 16  ;;  %v793_v31 = vld [vmem:[#allocation2 + $0x18] sm:$0x1]  ;;  %v937_v34 = vld [vmem:[#allocation2 + $0x1c] sm:$0xf]  ;;  %v352_v35 = vsel %vm13992_vm6, %v344_v1, %v351_v17  ;;  %v649_v36 = vsel %vm14010_vm8, %v353_v20, %v648_v8  ;;  %v360_v37 = vor.u32 %v358_v6, %v357_v21  ;;  %v184_v20 = vld [vmem:[%s13972_s21 + $0x60] sm:$0xff] }
  0x24   : > { %v890_v32 = vld [vmem:[#allocation2 + $0x20] sm:$0x1]  ;;  %v14074_v38 = vpack.c.bf16 %v182_v15, %v182_v15  ;;  %v794_v39 = vsel %vm14010_vm8, %v321_v13, %v793_v31  ;;  %940 = vst.msk [vmem:[#allocation2 + $0x4] sm:$0xf] %vm624_vm3, %v937_v34  ;;  %v790_v41 = vld [vmem:[#allocation2 + $0xc] sm:$0x1]  ;;  %v368_v44 = vor.u32 %v366_v11, %v365_v24  ;;  %v377_v5 = vor.u32 %v375_v22, %v14067_v29 }
  0x25   : > { %v891_v40 = vsel %vm14056_vm9, %v14006_v27, %v890_v32  ;;  %v887_v42 = vld [vmem:[#allocation2 + $0x14] sm:$0x1]  ;;  %v954_v43 = vld [vmem:[#allocation2 + $0x10] sm:$0xf]  ;;  %647 = vst.msk [vmem:[#allocation2 + $0x28] sm:$0xf] %vm624_vm3, %v352_v35  ;;  %v791_v13 = vsel %vm14010_vm8, %v304_v19, %v790_v41  ;;  %v652_v10 = vsel %vm14002_vm7, %v360_v37, %v651_v26  ;;  %v14139_v37 = vpack.c.bf16 %v183_v9, %v183_v9 }
  0x26   : > { %650 = vst [vmem:[#allocation2 + $0x2c] sm:$0x1] %v649_v36  ;;  %795 = vst [vmem:[#allocation2 + $0x18] sm:$0x1] %v794_v39  ;;  %vm1001_vm11 = vsmask.f32 7440  ;;  %v888_v27 = vsel %vm14056_vm9, %v11510_v56, %v887_v42 }
  0x27   : > { %892 = vst [vmem:[#allocation2 + $0x20] sm:$0x1] %v891_v40  ;;  %v1037_v45 = vshll.u32 %v954_v43, 16  ;;  %v1041_v46 = vshrl.u32 %v954_v43, 16  ;;  %v956_v47 = vld [vmem:[#allocation2 + $0x1c] sm:$0xf]  ;;  %vm14158_vm12 = vmor %vm1000_vm10, %vm1001_vm11 }
  0x28   : > { %792 = vst [vmem:[#allocation2 + $0xc] sm:$0x1] %v791_v13  ;;  %889 = vst [vmem:[#allocation2 + $0x14] sm:$0x1] %v888_v27  ;;  %v1061_v49 = vshll.u32 %v956_v47, 16  ;;  %v1065_v50 = vshrl.u32 %v956_v47, 16 }
  0x29   : > { %v361_v51 = vrot.slane %v357_v21, 4  ;;  %v370_v52 = vrot.slane %v365_v24, 4  ;;  %v14094_v53 = vrot.slane %v1037_v45, 5  ;;  %v1043_v54 = vrot.slane %v1041_v46, 4  ;;  %v796_v58 = vld [vmem:[#allocation2 + $0x24] sm:$0x1] }
  0x2a   : > { %v378_v19 = vrot.slane %v14067_v29, 4  ;;  %v14099_v56 = vrot.slane %v1061_v49, 5  ;;  %v14101_v57 = vrot.slane %v1065_v50, 4  ;;  %653 = vst [vmem:[#allocation2 + $0x30] sm:$0xf] %v652_v10  ;;  %v797_v3 = vsel %vm14010_vm8, %v338_v33, %v796_v58  ;;  %v185_v21 = vld [vmem:[%s13972_s21 + $0x68] sm:$0xff] }
  0x2b   : > { %v369_v59 = vsel %vm13992_vm6, %v361_v51, %v368_v44  ;;  %v656_v61 = vsel %vm14010_vm8, %v370_v52, %v655_v48  ;;  %v1044_v1 = vor.u32 %v1043_v54, %v14094_v53  ;;  %v382_v6 = vrot.slane %v380_v30, 7  ;;  %v662_v8 = vld [vmem:[#allocation2 + $0x44] sm:$0x1]  ;;  %798 = vst [vmem:[#allocation2 + $0x24] sm:$0x1] %v797_v3  ;;  %v186_v22 = vld [vmem:[%s13972_s21 + $0x70] sm:$0xff] }
  0x2c   : > { %654 = vst.msk [vmem:[#allocation2 + $0x34] sm:$0xf] %vm624_vm3, %v369_v59  ;;  %657 = vst [vmem:[#allocation2 + $0x38] sm:$0x1] %v656_v61  ;;  %v383_v7 = vshll.u32 %v14044_v0, 16  ;;  %v14117_v15 = vsel %vm1486_vm0, %v13965_v2, 0  ;;  %v659_v33 = vsel %vm14002_vm7, %v377_v5, %v658_v55  ;;  %v1068_v2 = vor.u32 %v14101_v57, %v14099_v56 }
  0x2d   : > { %v14121_v12 = vrot.slane %v366_v11, 11  ;;  %v389_v17 = vshrl.u32 %v14074_v38, 16  ;;  %v952_v24 = vld [vmem:[#allocation2 + $0x4] sm:$0xf]  ;;  %v14129_v26 = vrot.slane %v1044_v1, 4  ;;  %v387_v11 = vrot.slane %v382_v6, 4 }
  0x2e   : > { %v893_v29 = vld [vmem:[#allocation2 + $0x2c] sm:$0x1]  ;;  %v385_v62 = vor.u32 %v383_v7, %v382_v6  ;;  %660 = vst [vmem:[#allocation2 + $0x3c] sm:$0xf] %v659_v33  ;;  %v187_v30 = vld [vmem:[%s13972_s21 + $0x78] sm:$0xff]  ;;  %v1013_v34 = vshll.u32 %v952_v24, 16  ;;  %v14147_v44 = vpack.c.bf16 %v184_v20, %v184_v20  ;;  %v14149_v5 = vpack.c.bf16 %v185_v21, %v185_v21 }
  0x2f   : > { %v936_v31 = vld [vmem:[#allocation2 + $0x18] sm:$0xf]  ;;  %v938_v32 = vld [vmem:[#allocation2 + $0x20] sm:$0x1]  ;;  %v1017_v35 = vshrl.u32 %v952_v24, 16  ;;  %v894_v36 = vsel %vm14056_vm9, %v14063_v23, %v893_v29  ;;  %v663_v43 = vsel %vm14010_vm8, %v387_v11, %v662_v8  ;;  %v14154_v50 = vpack.c.bf16 %v186_v22, %v186_v22 }
  0x30   : > { %939 = vst.msk [vmem:[#allocation2] sm:$0xf] %vm624_vm3, %v936_v31  ;;  %v953_v39 = vld [vmem:[#allocation2 + $0xc] sm:$0xf]  ;;  %v985_v40 = vld [vmem:[#allocation2 + $0x14] sm:$0x1]  ;;  %v386_v42 = vsel %vm13992_vm6, %v378_v19, %v385_v62  ;;  %v14163_v57 = vpack.c.bf16 %v187_v30, %v187_v30 }
  0x31   : > { %942 = vst.msk [vmem:[#allocation2 + $0x8] sm:$0x1] %vm632_vm5, %v938_v32  ;;  %v955_v41 = vld [vmem:[#allocation2 + $0x18] sm:$0xf]  ;;  %895 = vst [vmem:[#allocation2 + $0x2c] sm:$0x1] %v894_v36 }
  0x32   : > { %v14151_v23 = vrot.slane %v1013_v34, 5  ;;  %v1019_v13 = vrot.slane %v1017_v35, 4  ;;  %v1028_v27 = vshrl.u32 %v953_v39, 16  ;;  %v1031_v45 = vshll.u32 %v953_v39, 16  ;;  %v986_v46 = vld [vmem:[#allocation2 + $0x20] sm:$0x1] }
  0x33   : > { %661 = vst.msk [vmem:[#allocation2 + $0x40] sm:$0xf] %vm624_vm3, %v386_v42  ;;  %664 = vst [vmem:[#allocation2 + $0x44] sm:$0x1] %v663_v43  ;;  %v1047_v47 = vshll.u32 %v985_v40, 16  ;;  %v1052_v48 = vshrl.u32 %v955_v41, 16 }
  0x34   : > { %v1055_v49 = vshll.u32 %v955_v41, 16  ;;  %v18899_v51 = vmov 0  ;;  %v1020_v52 = vor.u32 %v1019_v13, %v14151_v23  ;;  %v1030_v54 = vrot.slane %v1028_v27, 4  ;;  %v958_v19 = vld [vmem:[#allocation2 + $0x28] sm:$0xf] }
  0x35   : > { %v18900_v51 = vsel %vm14158_vm12, 4294967295, %v18899_v51  ;;  %v1033_v10 = vrot.slane %v1031_v45, 5  ;;  %v799_v55 = vld [vmem:[#allocation2 + $0x30] sm:$0x1]  ;;  %v1049_v58 = vrot.slane %v1047_v47, 5  ;;  %v1054_v59 = vrot.slane %v1052_v48, 4 }
  0x36   : > { %18901 = vst [vmem:[#allocation7_spill] sm:$0xff] %v18900_v51  ;;  %v1057_v61 = vrot.slane %v1055_v49, 5  ;;  %v1071_v1 = vshll.u32 %v986_v46, 16  ;;  %v957_v3 = vld [vmem:[#allocation2 + $0x24] sm:$0xf]  ;;  %v1069_v8 = vrot.slane %v1068_v2, 4  ;;  %v800_v32 = vsel %vm14010_vm8, %v355_v4, %v799_v55 }
  0x37   : > { %v1034_v6 = vor.u32 %v1033_v10, %v1030_v54  ;;  %v1076_v9 = vshrl.u32 %v957_v3, 16  ;;  %v1079_v33 = vshll.u32 %v957_v3, 16  ;;  %v896_v20 = vld [vmem:[#allocation2 + $0x38] sm:$0x1]  ;;  %v1050_v21 = vsel %vm14158_vm12, %v14129_v26, %v1049_v58  ;;  %v951_v62 = vld [vmem:[#allocation2] sm:$0xf] }
  0x38   : > { %v1058_v22 = vor.u32 %v1057_v61, %v1054_v59  ;;  %v1073_v24 = vrot.slane %v1071_v1, 5  ;;  %v1085_v29 = vshll.u32 %v958_v19, 16  ;;  %v984_v11 = vld [vmem:[#allocation2 + $0x8] sm:$0x1]  ;;  %v897_v2 = vsel %vm14056_vm9, %v14121_v12, %v896_v20  ;;  %801 = vst [vmem:[#allocation2 + $0x30] sm:$0x1] %v800_v32 }
  0x39   : > { %v1035_v30 = vrot.slane %v1034_v6, 4  ;;  %v1078_v31 = vrot.slane %v1076_v9, 4  ;;  %v1004_v34 = vshrl.u32 %v951_v62, 16  ;;  %v1007_v35 = vshll.u32 %v951_v62, 16  ;;  %898 = vst [vmem:[#allocation2 + $0x38] sm:$0x1] %v897_v2 }
  0x3a   : > { %v1021_v36 = vrot.slane %v1020_v52, 4  ;;  %v1023_v26 = vshll.u32 %v984_v11, 16  ;;  %v1059_v40 = vrot.slane %v1058_v22, 4  ;;  %v1074_v60 = vsel %vm14158_vm12, %v1069_v8, %v1073_v24  ;;  %v987_v4 = vld [vmem:[#allocation2 + $0x2c] sm:$0x1] }
  0x3b   : > { %v1040_v39 = vsel %vm14158_vm12, %v1035_v30, %v14094_v53  ;;  %v1081_v41 = vrot.slane %v1079_v33, 5  ;;  %v1006_v42 = vrot.slane %v1004_v34, 4  ;;  %v1009_v43 = vrot.slane %v1007_v35, 5  ;;  %v960_v27 = vld [vmem:[#allocation2 + $0x34] sm:$0xf] }
  0x3c   : > { %v1025_v12 = vrot.slane %v1023_v26, 5  ;;  %v11528_v13 = vcombine.low %v1040_v39, %v1050_v21  ;;  %v1064_v45 = vsel %vm14158_vm12, %v1059_v40, %v14099_v56  ;;  %v1087_v47 = vrot.slane %v1085_v29, 5  ;;  %v802_v49 = vld [vmem:[#allocation2 + $0x3c] sm:$0x1]  ;;  %v899_v55 = vld [vmem:[#allocation2 + $0x44] sm:$0x1] }
  0x3d   : > { %v1082_v46 = vor.u32 %v1081_v41, %v1078_v31  ;;  %v1089_v48 = vshrl.u32 %v958_v19, 16  ;;  %v1010_v53 = vor.u32 %v1009_v43, %v1006_v42  ;;  %v11529_v54 = vcombine.low %v1064_v45, %v1074_v60  ;;  %v962_v3 = vld [vmem:[#allocation2 + $0x40] sm:$0xf]  ;;  %v11607_v31 = vld [vmem:[%s18731_s1 + $0x4] sm:$0x3] }
  0x3e   : > { %v1026_v52 = vsel %vm14158_vm12, %v1021_v36, %v1025_v12  ;;  %v1095_v10 = vshll.u32 %v987_v4, 16  ;;  %v1109_v61 = vshll.u32 %v960_v27, 16  ;;  %v1113_v1 = vshrl.u32 %v960_v27, 16  ;;  %v665_v40 = vld [vmem:[#allocation2 + $0x48] sm:$0xf] }
  0x3f   : > { %v1083_v58 = vrot.slane %v1082_v46, 4  ;;  %v1091_v59 = vrot.slane %v1089_v48, 4  ;;  %v1011_v6 = vrot.slane %v1010_v53, 4  ;;  %v803_v56 = vsel %vm14010_vm8, %v372_v14, %v802_v49  ;;  %v959_v20 = vld [vmem:[#allocation2 + $0x30] sm:$0xf] }
  0x40   : > { %v1097_v8 = vrot.slane %v1095_v10, 5  ;;  %v11514_v19 = vrot.slane %v383_v7, 11  ;;  %v988_v21 = vld [vmem:[#allocation2 + $0x38] sm:$0x1]  ;;  %v1111_v22 = vrot.slane %v1109_v61, 5  ;;  %v1115_v24 = vrot.slane %v1113_v1, 4 }
  0x41   : > { %v1088_v9 = vsel %vm14158_vm12, %v1083_v58, %v1087_v47  ;;  %v1092_v33 = vor.u32 %v1091_v59, %v1087_v47  ;;  %804 = vst [vmem:[#allocation2 + $0x3c] sm:$0x1] %v803_v56  ;;  %v1016_v29 = vsel %vm14158_vm12, %v1011_v6, %v14151_v23  ;;  %v1100_v63 = vshrl.u32 %v959_v20, 16  ;;  %v669_v10 = vld [vmem:[#allocation2 + $0x50] sm:$0x1] }
  0x42   : > { %v1103_v62 = vshll.u32 %v959_v20, 16  ;;  %v1119_v11 = vshll.u32 %v988_v21, 16  ;;  %v11527_v14 = vcombine.low %v1016_v29, %v1026_v52  ;;  %v1116_v0 = vor.u32 %v1115_v24, %v1111_v22  ;;  %v672_v56 = vld [vmem:[#allocation2 + $0x54] sm:$0xf] }
  0x43   : > { %v1093_v30 = vrot.slane %v1092_v33, 4  ;;  %v900_v7 = vsel %vm14056_vm9, %v11514_v19, %v899_v55  ;;  %v1102_v32 = vrot.slane %v1100_v63, 4  ;;  %v1133_v35 = vshll.u32 %v962_v3, 16 }
  0x44   : > { %v1105_v2 = vrot.slane %v1103_v62, 5  ;;  %v1121_v34 = vrot.slane %v1119_v11, 5  ;;  %901 = vst [vmem:[#allocation2 + $0x44] sm:$0x1] %v900_v7  ;;  %12654 = vmatprep.mubr.msk.bf16.mxu0 %vm1437_vm13, %v11527_v14  ;;  %v1117_v36 = vrot.slane %v1116_v0, 4  ;;  %v1137_v26 = vshrl.u32 %v962_v3, 16 }
  0x45   : > { %v1098_v23 = vsel %vm14158_vm12, %v1093_v30, %v1097_v8  ;;  %v391_v39 = vrot.slane %v389_v17, 7  ;;  %12655 = vmatmul.mubr.msk.bf16.vlgmr.msra.gmra.mrb[0].mxu0 %vm1437_vm13, %v11528_v13  ;;  %v14207_v41 = vrot.slane %v1133_v35, 5  ;;  %v392_v42 = vshll.u32 %v14074_v38, 16  ;;  %v188_v30 = vld [vmem:[%s13972_s21 + $0x80] sm:$0xff] }
  0x46   : > { %v11530_v60 = vcombine.low %v1088_v9, %v1098_v23  ;;  %v1106_v4 = vor.u32 %v1105_v2, %v1102_v32  ;;  %12687 = vmatpush3.bf16.msra.mxu0 %v14117_v15  ;;  %12658 = vmatprep.mubr.msk.bf16.mxu0 %vm1437_vm13, %v11529_v54  ;;  %v1122_v43 = vsel %vm14158_vm12, %v1117_v36, %v1121_v34  ;;  %v1139_v12 = vrot.slane %v1137_v26, 4  ;;  %v676_v34 = vld [vmem:[#allocation2 + $0x5c] sm:$0x1] }
  0x47   : > { %v395_v27 = vrot.slane %v391_v39, 4  ;;  %v397_v45 = vshrl.u32 %v14139_v37, 16  ;;  %v394_v13 = vor.u32 %v392_v42, %v391_v39  ;;  %v400_v48 = vshll.u32 %v14139_v37, 16  ;;  %13778 = vmatprep.subr.msk.bf16.mxu0 %vm1486_vm0, %v11607_v31 }
  0x48   : > { %v1107_v46 = vrot.slane %v1106_v4, 4  ;;  %v961_v47 = vld [vmem:[#allocation2 + $0x3c] sm:$0xf]  ;;  %v406_v49 = vshrl.u32 %v14147_v44, 16  ;;  %v1140_v52 = vor.u32 %v1139_v12, %v14207_v41  ;;  %v409_v20 = vshll.u32 %v14147_v44, 16 }
  0x49   : > { %v1124_v53 = vshrl.u32 %v961_v47, 16  ;;  %v1127_v15 = vshll.u32 %v961_v47, 16  ;;  %v399_v54 = vrot.slane %v397_v45, 7  ;;  %v666_v58 = vsel %vm14002_vm7, %v394_v13, %v665_v40 }
  0x4a   : > { %v1112_v55 = vsel %vm14158_vm12, %v1107_v46, %v1111_v22  ;;  %v14223_v59 = vrot.slane %v400_v48, 11  ;;  %v408_v37 = vrot.slane %v406_v49, 7  ;;  %v1141_v8 = vrot.slane %v1140_v52, 4  ;;  %667 = vst [vmem:[#allocation2 + $0x48] sm:$0xf] %v666_v58 }
  0x4b   : > { %v11531_v61 = vcombine.low %v1112_v55, %v1122_v43  ;;  %v989_v1 = vld [vmem:[#allocation2 + $0x44] sm:$0x1]  ;;  %v1126_v3 = vrot.slane %v1124_v53, 4  ;;  %v1129_v6 = vrot.slane %v1127_v15, 5  ;;  %v402_v9 = vor.u32 %v400_v48, %v399_v54  ;;  %v683_v48 = vld [vmem:[#allocation2 + $0x68] sm:$0x1] }
  0x4c   : > { %v1143_v19 = vshll.u32 %v989_v1, 16  ;;  %v404_v33 = vrot.slane %v399_v54, 4  ;;  %v412_v22 = vrot.slane %v408_v37, 4  ;;  %v414_v24 = vshrl.u32 %v14149_v5, 16  ;;  %v190_v53 = vld [vmem:[%s13972_s21 + $0x90] sm:$0xff]  ;;  %v191_v15 = vld [vmem:[%s13972_s21 + $0x98] sm:$0xff] }
  0x4d   : > { %v1130_v21 = vor.u32 %v1129_v6, %v1126_v3  ;;  %v417_v29 = vshll.u32 %v14149_v5, 16  ;;  %12659 = vmatmul.mubr.msk.bf16.gmra.mrb[4].mxu0 %vm1437_vm13, %v11530_v60  ;;  %v403_v62 = vsel %vm13992_vm6, %v395_v27, %v402_v9  ;;  %v411_v14 = vor.u32 %v409_v20, %v408_v37  ;;  %v679_v60 = vld [vmem:[#allocation2 + $0x60] sm:$0xf]  ;;  %v189_v27 = vld [vmem:[%s13972_s21 + $0x88] sm:$0xff] }
  0x4e   : > { %v1145_v63 = vrot.slane %v1143_v19, 5  ;;  %v670_v11 = vsel %vm14010_vm8, %v404_v33, %v669_v10  ;;  %12662 = vmatprep.mubr.msk.bf16.mxu0 %vm1437_vm13, %v11531_v61  ;;  %668 = vst.msk [vmem:[#allocation2 + $0x4c] sm:$0xf] %vm624_vm3, %v403_v62  ;;  %v416_v7 = vrot.slane %v414_v24, 7  ;;  %v423_v5 = vshrl.u32 %v14154_v50, 16  ;;  %v192_v19 = vld [vmem:[%s13972_s21 + $0xa0] sm:$0xff] }
  0x4f   : > { %v1131_v0 = vrot.slane %v1130_v21, 4  ;;  %671 = vst [vmem:[#allocation2 + $0x50] sm:$0x1] %v670_v11  ;;  %v14238_v31 = vrot.slane %v417_v29, 11  ;;  %v673_v2 = vsel %vm14002_vm7, %v411_v14, %v672_v56  ;;  %v426_v35 = vshll.u32 %v14154_v50, 16 }
  0x50   : > { %v1146_v32 = vsel %vm14158_vm12, %v1141_v8, %v1145_v63  ;;  %v431_v23 = vshrl.u32 %v14163_v57, 16  ;;  %v419_v26 = vor.u32 %v417_v29, %v416_v7  ;;  %v421_v39 = vrot.slane %v416_v7, 4  ;;  %674 = vst [vmem:[#allocation2 + $0x54] sm:$0xf] %v673_v2  ;;  %v686_v6 = vld [vmem:[#allocation2 + $0x6c] sm:$0xf] }
  0x51   : > { %v1136_v36 = vsel %vm14158_vm12, %v1131_v0, %v14207_v41  ;;  %v425_v40 = vrot.slane %v423_v5, 7  ;;  %v805_v42 = vld [vmem:[#allocation2 + $0x48] sm:$0x1]  ;;  %v434_v12 = vshll.u32 %v14163_v57, 16  ;;  %v14254_v45 = vpack.c.bf16 %v188_v30, %v188_v30  ;;  %v690_v2 = vld [vmem:[#allocation2 + $0x74] sm:$0x1] }
  0x52   : > { %v11532_v4 = vcombine.low %v1136_v36, %v1146_v32  ;;  %v433_v43 = vrot.slane %v431_v23, 7  ;;  %v806_v41 = vsel %vm14010_vm8, %v389_v17, %v805_v42  ;;  %v420_v46 = vsel %vm13992_vm6, %v412_v22, %v419_v26  ;;  %v193_v22 = vld [vmem:[%s13972_s21 + $0xa8] sm:$0xff] }
  0x53   : > { %v677_v47 = vsel %vm14010_vm8, %v421_v39, %v676_v34  ;;  %v428_v13 = vor.u32 %v426_v35, %v425_v40  ;;  %807 = vst [vmem:[#allocation2 + $0x48] sm:$0x1] %v806_v41  ;;  %675 = vst.msk [vmem:[#allocation2 + $0x58] sm:$0xf] %vm624_vm3, %v420_v46  ;;  %v429_v57 = vrot.slane %v425_v40, 4  ;;  %v14267_v54 = vrot.slane %v434_v12, 11 }
  0x54   : > { %678 = vst [vmem:[#allocation2 + $0x5c] sm:$0x1] %v677_v47  ;;  %v436_v52 = vor.u32 %v434_v12, %v433_v43  ;;  %v438_v38 = vrot.slane %v433_v43, 4  ;;  %v12299_v10 = vpack.c.bf16 %v189_v27, %v189_v27  ;;  %v440_v55 = vshrl.u32 %v14254_v45, 16 }
  0x55   : > { %v680_v17 = vsel %vm14002_vm7, %v428_v13, %v679_v60  ;;  %v443_v58 = vshll.u32 %v14254_v45, 16  ;;  %12663 = vmatmul.mubr.msk.bf16.gmra.mrb[8].mxu0 %vm1437_vm13, %v11532_v4  ;;  %v14274_v61 = vld [vmem:[#allocation2 + $0x4c] sm:$0xf]  ;;  %v14280_v8 = vpack.c.bf16 %v190_v53, %v190_v53  ;;  %v14282_v56 = vpack.c.bf16 %v191_v15, %v191_v15 }
  0x56   : > { %v902_v37 = vld [vmem:[#allocation2 + $0x50] sm:$0x1]  ;;  %v437_v1 = vsel %vm13992_vm6, %v429_v57, %v436_v52  ;;  %681 = vst [vmem:[#allocation2 + $0x60] sm:$0xf] %v680_v17  ;;  %v684_v3 = vsel %vm14010_vm8, %v438_v38, %v683_v48  ;;  %v1157_v33 = vshll.u32 %v14274_v61, 16  ;;  %v1161_v20 = vshrl.u32 %v14274_v61, 16 }
  0x57   : > { %v903_v9 = vsel %vm14056_vm9, %v14223_v59, %v902_v37  ;;  %682 = vst.msk [vmem:[#allocation2 + $0x64] sm:$0xf] %vm624_vm3, %v437_v1  ;;  %685 = vst [vmem:[#allocation2 + $0x68] sm:$0x1] %v684_v3  ;;  %v442_v21 = vrot.slane %v440_v55, 7  ;;  %v448_v29 = vshrl.u32 %v12299_v10, 16  ;;  %v14315_v39 = vpack.c.bf16 %v192_v19, %v192_v19 }
  0x58   : > { %904 = vst [vmem:[#allocation2 + $0x50] sm:$0x1] %v903_v9  ;;  %v808_v24 = vld [vmem:[#allocation2 + $0x54] sm:$0x1]  ;;  %v451_v63 = vshll.u32 %v12299_v10, 16  ;;  %v457_v62 = vshrl.u32 %v14280_v8, 16  ;;  %v14317_v40 = vpack.c.bf16 %v193_v22, %v193_v22 }
  0x59   : > { %v460_v11 = vshll.u32 %v14280_v8, 16  ;;  %v14296_v59 = vrot.slane %v1157_v33, 5  ;;  %v1163_v14 = vrot.slane %v1161_v20, 4  ;;  %v809_v30 = vsel %vm14010_vm8, %v406_v49, %v808_v24  ;;  %v693_v33 = vld [vmem:[#allocation2 + $0x78] sm:$0xf] }
  0x5a   : > { %v445_v0 = vor.u32 %v443_v58, %v442_v21  ;;  %810 = vst [vmem:[#allocation2 + $0x54] sm:$0x1] %v809_v30  ;;  %v446_v7 = vrot.slane %v442_v21, 4  ;;  %v450_v32 = vrot.slane %v448_v29, 7  ;;  %v14302_v34 = vrot.slane %v451_v63, 11 }
  0x5b   : > { %v14306_v35 = vrot.slane %v457_v62, 7  ;;  %v14308_v23 = vld [vmem:[#allocation2 + $0x48] sm:$0xf]  ;;  %v1164_v36 = vor.u32 %v1163_v14, %v14296_v59  ;;  %v905_v26 = vld [vmem:[#allocation2 + $0x5c] sm:$0x1]  ;;  %v465_v9 = vshrl.u32 %v14282_v56, 16 }
  0x5c   : > { %v14311_v44 = vld [vmem:[#allocation2 + $0x58] sm:$0xf]  ;;  %v687_v49 = vsel %vm14002_vm7, %v445_v0, %v686_v6  ;;  %v1148_v60 = vshrl.u32 %v14308_v23, 16  ;;  %v1151_v4 = vshll.u32 %v14308_v23, 16  ;;  %v906_v42 = vsel %vm14056_vm9, %v14238_v31, %v905_v26 }
  0x5d   : > { %v1181_v43 = vshll.u32 %v14311_v44, 16  ;;  %688 = vst [vmem:[#allocation2 + $0x6c] sm:$0xf] %v687_v49  ;;  %v1165_v12 = vrot.slane %v1164_v36, 4  ;;  %907 = vst [vmem:[#allocation2 + $0x5c] sm:$0x1] %v906_v42  ;;  %v453_v46 = vor.u32 %v451_v63, %v450_v32  ;;  %v462_v6 = vor.u32 %v460_v11, %v14306_v35 }
  0x5e   : > { %v1185_v27 = vshrl.u32 %v14311_v44, 16  ;;  %v811_v41 = vld [vmem:[#allocation2 + $0x60] sm:$0x1]  ;;  %v455_v47 = vrot.slane %v450_v32, 4  ;;  %v1150_v13 = vrot.slane %v1148_v60, 4  ;;  %v1153_v48 = vrot.slane %v1151_v4, 5 }
  0x5f   : > { %v14326_v53 = vrot.slane %v1181_v43, 5  ;;  %v812_v15 = vsel %vm14010_vm8, %v423_v5, %v811_v41  ;;  %v908_v31 = vld [vmem:[#allocation2 + $0x68] sm:$0x1]  ;;  %v990_v57 = vld [vmem:[#allocation2 + $0x50] sm:$0x1]  ;;  %v454_v10 = vsel %vm13992_vm6, %v446_v7, %v453_v46  ;;  %v463_v19 = vrot.slane %v14306_v35, 4 }
  0x60   : > { %v1187_v52 = vrot.slane %v1185_v27, 4  ;;  %813 = vst [vmem:[#allocation2 + $0x60] sm:$0x1] %v812_v15  ;;  %v909_v38 = vsel %vm14056_vm9, %v14267_v54, %v908_v31  ;;  %v14335_v17 = vld [vmem:[#allocation2 + $0x64] sm:$0xf]  ;;  %v691_v58 = vsel %vm14010_vm8, %v455_v47, %v690_v2  ;;  %v1154_v50 = vor.u32 %v1153_v48, %v1150_v13 }
  0x61   : > { %v1167_v37 = vshll.u32 %v990_v57, 16  ;;  %910 = vst [vmem:[#allocation2 + $0x68] sm:$0x1] %v909_v38  ;;  %v1205_v5 = vshll.u32 %v14335_v17, 16  ;;  %v1209_v1 = vshrl.u32 %v14335_v17, 16  ;;  %v467_v0 = vrot.slane %v465_v9, 7 }
  0x62   : > { %689 = vst.msk [vmem:[#allocation2 + $0x70] sm:$0xf] %vm624_vm3, %v454_v10  ;;  %692 = vst [vmem:[#allocation2 + $0x74] sm:$0x1] %v691_v58  ;;  %v14344_v3 = vld [vmem:[#allocation2 + $0x54] sm:$0xf]  ;;  %v1188_v54 = vor.u32 %v1187_v52, %v14326_v53  ;;  %v694_v27 = vsel %vm14002_vm7, %v462_v6, %v693_v33 }
  0x63   : > { %v1155_v20 = vrot.slane %v1154_v50, 4  ;;  %v1169_v21 = vrot.slane %v1167_v37, 5  ;;  %v1172_v22 = vshrl.u32 %v14344_v3, 16  ;;  %v1175_v24 = vshll.u32 %v14344_v3, 16  ;;  %v697_v7 = vld [vmem:[#allocation2 + $0x80] sm:$0x1] }
  0x64   : > { %v1189_v29 = vrot.slane %v1188_v54, 4  ;;  %v14352_v63 = vrot.slane %v1205_v5, 5  ;;  %v1211_v14 = vrot.slane %v1209_v1, 4  ;;  %v814_v30 = vld [vmem:[#allocation2 + $0x6c] sm:$0x1] }
  0x65   : > { %v1160_v11 = vsel %vm14158_vm12, %v1155_v20, %v14296_v59  ;;  %v1170_v32 = vsel %vm14158_vm12, %v1165_v12, %v1169_v21  ;;  %v14359_v2 = vld [vmem:[#allocation2 + $0x5c] sm:$0x1]  ;;  %v1174_v35 = vrot.slane %v1172_v22, 4  ;;  %v1177_v36 = vrot.slane %v1175_v24, 5  ;;  %695 = vst [vmem:[#allocation2 + $0x78] sm:$0xf] %v694_v27 }
  0x66   : > { %v11533_v26 = vcombine.low %v1160_v11, %v1170_v32  ;;  %v1191_v49 = vshll.u32 %v14359_v2, 16  ;;  %v1212_v60 = vor.u32 %v1211_v14, %v14352_v63  ;;  %v815_v4 = vsel %vm14010_vm8, %v440_v55, %v814_v30 }
  0x67   : > { %v1178_v42 = vor.u32 %v1177_v36, %v1174_v35  ;;  %v14367_v43 = vld [vmem:[#allocation2 + $0x60] sm:$0xf]  ;;  %816 = vst [vmem:[#allocation2 + $0x6c] sm:$0x1] %v815_v4  ;;  %v468_v59 = vshll.u32 %v14282_v56, 16  ;;  %v472_v12 = vrot.slane %v467_v0, 4 }
  0x68   : > { %12666 = vmatprep.mubr.msk.bf16.mxu0 %vm1437_vm13, %v11533_v26  ;;  %v1193_v41 = vrot.slane %v1191_v49, 5  ;;  %v14373_v46 = vld [vmem:[#allocation2 + $0x68] sm:$0x1]  ;;  %v1196_v45 = vshrl.u32 %v14367_v43, 16  ;;  %v1199_v47 = vshll.u32 %v14367_v43, 16  ;;  %v1213_v55 = vrot.slane %v1212_v60, 4 }
  0x69   : > { %v1179_v13 = vrot.slane %v1178_v42, 4  ;;  %v1215_v48 = vshll.u32 %v14373_v46, 16  ;;  %v911_v15 = vld [vmem:[#allocation2 + $0x74] sm:$0x1]  ;;  %v14378_v56 = vld [vmem:[#allocation2 + $0x70] sm:$0xf]  ;;  %v470_v31 = vor.u32 %v468_v59, %v467_v0  ;;  %v698_v57 = vsel %vm14010_vm8, %v472_v12, %v697_v7 }
  0x6a   : > { %v1194_v52 = vsel %vm14158_vm12, %v1189_v29, %v1193_v41  ;;  %v1198_v38 = vrot.slane %v1196_v45, 4  ;;  %v1201_v10 = vrot.slane %v1199_v47, 5  ;;  %v912_v58 = vsel %vm14056_vm9, %v14302_v34, %v911_v15  ;;  %699 = vst [vmem:[#allocation2 + $0x80] sm:$0x1] %v698_v57  ;;  %v700_v26 = vld [vmem:[#allocation2 + $0x84] sm:$0xf] }
  0x6b   : > { %v1184_v50 = vsel %vm14158_vm12, %v1179_v13, %v14326_v53  ;;  %v1217_v37 = vrot.slane %v1215_v48, 5  ;;  %913 = vst [vmem:[#allocation2 + $0x74] sm:$0x1] %v912_v58  ;;  %v1229_v5 = vshll.u32 %v14378_v56, 16  ;;  %v1233_v1 = vshrl.u32 %v14378_v56, 16  ;;  %v194_v60 = vld [vmem:[%s13972_s21 + $0xb0] sm:$0xff] }
  0x6c   : > { %v11534_v54 = vcombine.low %v1184_v50, %v1194_v52  ;;  %v1202_v6 = vor.u32 %v1201_v10, %v1198_v38  ;;  %v471_v9 = vsel %vm13992_vm6, %v463_v19, %v470_v31  ;;  %v11519_v33 = vrot.slane %v468_v59, 11  ;;  %v817_v11 = vld [vmem:[#allocation2 + $0x78] sm:$0x1]  ;;  %v196_v45 = vld [vmem:[%s13972_s21 + $0xc0] sm:$0xff]  ;;  %v704_v13 = vld [vmem:[#allocation2 + $0x8c] sm:$0x1] }
  0x6d   : > { %v1218_v34 = vsel %vm14158_vm12, %v1213_v55, %v1217_v37  ;;  %v14396_v20 = vrot.slane %v1229_v5, 5  ;;  %v1235_v21 = vrot.slane %v1233_v1, 4  ;;  %696 = vst.msk [vmem:[#allocation2 + $0x7c] sm:$0xf] %vm624_vm3, %v471_v9  ;;  %v474_v53 = vshrl.u32 %v14315_v39, 16  ;;  %v195_v4 = vld [vmem:[%s13972_s21 + $0xb8] sm:$0xff] }
  0x6e   : > { %12667 = vmatmul.mubr.msk.bf16.gmra.mrb[12].mxu0 %vm1437_vm13, %v11534_v54  ;;  %v1203_v22 = vrot.slane %v1202_v6, 4  ;;  %v14401_v24 = vld [vmem:[#allocation2 + $0x6c] sm:$0xf]  ;;  %v477_v19 = vshll.u32 %v14315_v39, 16  ;;  %v482_v29 = vshrl.u32 %v14317_v40, 16  ;;  %v485_v14 = vshll.u32 %v14317_v40, 16 }
  0x6f   : > { %v1220_v30 = vshrl.u32 %v14401_v24, 16  ;;  %v1223_v0 = vshll.u32 %v14401_v24, 16  ;;  %v1236_v7 = vor.u32 %v1235_v21, %v14396_v20  ;;  %v476_v32 = vrot.slane %v474_v53, 7  ;;  %v197_v21 = vld [vmem:[%s13972_s21 + $0xc8] sm:$0xff] }
  0x70   : > { %v1208_v35 = vsel %vm14158_vm12, %v1203_v22, %v14352_v63  ;;  %v818_v40 = vsel %vm14010_vm8, %v457_v62, %v817_v11  ;;  %v484_v36 = vrot.slane %v482_v29, 7  ;;  %v14418_v49 = vrot.slane %v485_v14, 11 }
  0x71   : > { %v11535_v42 = vcombine.low %v1208_v35, %v1218_v34  ;;  %v1222_v59 = vrot.slane %v1220_v30, 4  ;;  %v1225_v12 = vrot.slane %v1223_v0, 5  ;;  %v1237_v27 = vrot.slane %v1236_v7, 4  ;;  %819 = vst [vmem:[#allocation2 + $0x78] sm:$0x1] %v818_v40 }
  0x72   : > { %v914_v41 = vld [vmem:[#allocation2 + $0x80] sm:$0x1]  ;;  %v14423_v47 = vld [vmem:[#allocation2 + $0x74] sm:$0x1]  ;;  %v479_v63 = vor.u32 %v477_v19, %v476_v32  ;;  %v480_v62 = vrot.slane %v476_v32, 4  ;;  %v487_v55 = vor.u32 %v485_v14, %v484_v36  ;;  %v489_v31 = vrot.slane %v484_v36, 4 }
  0x73   : > { %v915_v8 = vsel %vm14056_vm9, %v11519_v33, %v914_v41  ;;  %12670 = vmatprep.mubr.msk.bf16.mxu0 %vm1437_vm13, %v11535_v42  ;;  %v1226_v48 = vor.u32 %v1225_v12, %v1222_v59  ;;  %v1239_v15 = vshll.u32 %v14423_v47, 16  ;;  %v14429_v57 = vpack.c.bf16 %v194_v60, %v194_v60  ;;  %v707_v30 = vld [vmem:[#allocation2 + $0x90] sm:$0xf]  ;;  %v711_v0 = vld [vmem:[#allocation2 + $0x98] sm:$0x1] }
  0x74   : > { %916 = vst [vmem:[#allocation2 + $0x80] sm:$0x1] %v915_v8  ;;  %v14431_v52 = vld [vmem:[#allocation2 + $0x7c] sm:$0xf]  ;;  %v488_v38 = vsel %vm13992_vm6, %v480_v62, %v487_v55  ;;  %v701_v10 = vsel %vm14002_vm7, %v479_v63, %v700_v26  ;;  %v12305_v58 = vpack.c.bf16 %v195_v4, %v195_v4  ;;  %v14437_v50 = vpack.c.bf16 %v196_v45, %v196_v45 }
  0x75   : > { %v1227_v37 = vrot.slane %v1226_v48, 4  ;;  %v1241_v5 = vrot.slane %v1239_v15, 5  ;;  %v1253_v1 = vshll.u32 %v14431_v52, 16  ;;  %v1257_v54 = vshrl.u32 %v14431_v52, 16  ;;  %702 = vst [vmem:[#allocation2 + $0x84] sm:$0xf] %v701_v10 }
  0x76   : > { %703 = vst.msk [vmem:[#allocation2 + $0x88] sm:$0xf] %vm624_vm3, %v488_v38  ;;  %v705_v6 = vsel %vm14010_vm8, %v489_v31, %v704_v13  ;;  %v491_v9 = vshrl.u32 %v14429_v57, 16  ;;  %v494_v33 = vshll.u32 %v14429_v57, 16  ;;  %v499_v34 = vshrl.u32 %v12305_v58, 16  ;;  %v198_v38 = vld [vmem:[%s13972_s21 + $0xd0] sm:$0xff] }
  0x77   : > { %v1232_v22 = vsel %vm14158_vm12, %v1227_v37, %v14396_v20  ;;  %v1242_v19 = vsel %vm14158_vm12, %v1237_v27, %v1241_v5  ;;  %v1255_v29 = vrot.slane %v1253_v1, 5  ;;  %v1259_v14 = vrot.slane %v1257_v54, 4  ;;  %706 = vst [vmem:[#allocation2 + $0x8c] sm:$0x1] %v705_v6  ;;  %v199_v10 = vld [vmem:[%s13972_s21 + $0xd8] sm:$0xff] }
  0x78   : > { %v11536_v7 = vcombine.low %v1232_v22, %v1242_v19  ;;  %v14452_v11 = vld [vmem:[#allocation2 + $0x78] sm:$0xf]  ;;  %v493_v32 = vrot.slane %v491_v9, 7  ;;  %v501_v35 = vrot.slane %v499_v34, 7  ;;  %v502_v40 = vshll.u32 %v12305_v58, 16  ;;  %v200_v58 = vld [vmem:[%s13972_s21 + $0xe0] sm:$0xff] }
  0x79   : > { %v1244_v36 = vshrl.u32 %v14452_v11, 16  ;;  %v1247_v20 = vshll.u32 %v14452_v11, 16  ;;  %v1260_v26 = vor.u32 %v1259_v14, %v1255_v29  ;;  %v12307_v60 = vpack.c.bf16 %v197_v21, %v197_v21 }
  0x7a   : > { %12671 = vmatmul.mubr.msk.bf16.gmra.mrb[16].mxu0 %vm1437_vm13, %v11536_v7  ;;  %v496_v42 = vor.u32 %v494_v33, %v493_v32  ;;  %v497_v59 = vrot.slane %v493_v32, 4  ;;  %v504_v12 = vor.u32 %v502_v40, %v501_v35  ;;  %v506_v27 = vrot.slane %v501_v35, 4 }
  0x7b   : > { %v14459_v4 = vld [vmem:[#allocation2 + $0x80] sm:$0x1]  ;;  %v1246_v41 = vrot.slane %v1244_v36, 4  ;;  %v1249_v45 = vrot.slane %v1247_v20, 5  ;;  %v1261_v8 = vrot.slane %v1260_v26, 4  ;;  %v11521_v31 = vrot.slane %v502_v40, 11 }
  0x7c   : > { %v1263_v63 = vshll.u32 %v14459_v4, 16  ;;  %v820_v62 = vld [vmem:[#allocation2 + $0x84] sm:$0x1]  ;;  %v505_v13 = vsel %vm13992_vm6, %v497_v59, %v504_v12  ;;  %v708_v48 = vsel %vm14002_vm7, %v496_v42, %v707_v30  ;;  %v712_v15 = vsel %vm14010_vm8, %v506_v27, %v711_v0  ;;  %v714_v40 = vld [vmem:[#allocation2 + $0x9c] sm:$0xf] }
  0x7d   : > { %v14462_v55 = vld [vmem:[#allocation2 + $0x88] sm:$0xf]  ;;  %v1250_v37 = vor.u32 %v1249_v45, %v1246_v41  ;;  %v821_v1 = vsel %vm14010_vm8, %v474_v53, %v820_v62  ;;  %709 = vst [vmem:[#allocation2 + $0x90] sm:$0xf] %v708_v48  ;;  %710 = vst.msk [vmem:[#allocation2 + $0x94] sm:$0xf] %vm624_vm3, %v505_v13  ;;  %v14493_v36 = vpack.c.bf16 %v198_v38, %v198_v38 }
  0x7e   : > { %v1265_v5 = vrot.slane %v1263_v63, 5  ;;  %v1277_v54 = vshll.u32 %v14462_v55, 16  ;;  %713 = vst [vmem:[#allocation2 + $0x98] sm:$0x1] %v712_v15  ;;  %822 = vst [vmem:[#allocation2 + $0x84] sm:$0x1] %v821_v1  ;;  %v14495_v20 = vpack.c.bf16 %v199_v10, %v199_v10  ;;  %v14497_v26 = vpack.c.bf16 %v200_v58, %v200_v58 }
  0x7f   : > { %v917_v6 = vld [vmem:[#allocation2 + $0x8c] sm:$0x1]  ;;  %v1281_v33 = vshrl.u32 %v14462_v55, 16  ;;  %v508_v34 = vshrl.u32 %v14437_v50, 16  ;;  %v511_v21 = vshll.u32 %v14437_v50, 16  ;;  %v516_v22 = vshrl.u32 %v12307_v60, 16 }
  0x80   : > { %v1251_v19 = vrot.slane %v1250_v37, 4  ;;  %v1266_v39 = vsel %vm14158_vm12, %v1261_v8, %v1265_v5  ;;  %v918_v53 = vsel %vm14056_vm9, %v14418_v49, %v917_v6  ;;  %v14487_v14 = vrot.slane %v1277_v54, 5  ;;  %v718_v27 = vld [vmem:[#allocation2 + $0xa4] sm:$0x1] }
  0x81   : > { %919 = vst [vmem:[#allocation2 + $0x8c] sm:$0x1] %v918_v53  ;;  %v1283_v30 = vrot.slane %v1281_v33, 4  ;;  %v510_v0 = vrot.slane %v508_v34, 7  ;;  %v518_v7 = vrot.slane %v516_v22, 7  ;;  %v519_v32 = vshll.u32 %v12307_v60, 16 }
  0x82   : > { %v1256_v35 = vsel %vm14158_vm12, %v1251_v19, %v1255_v29  ;;  %v525_v60 = vshrl.u32 %v14493_v36, 16  ;;  %v528_v48 = vshll.u32 %v14493_v36, 16  ;;  %v536_v22 = vshll.u32 %v14495_v20, 16 }
  0x83   : > { %v11537_v49 = vcombine.low %v1256_v35, %v1266_v39  ;;  %v1284_v42 = vor.u32 %v1283_v30, %v14487_v14  ;;  %v513_v59 = vor.u32 %v511_v21, %v510_v0  ;;  %v514_v12 = vrot.slane %v510_v0, 4 }
  0x84   : > { %v521_v41 = vor.u32 %v519_v32, %v518_v7  ;;  %v523_v45 = vrot.slane %v518_v7, 4  ;;  %v14500_v8 = vrot.slane %v519_v32, 11  ;;  %v823_v63 = vld [vmem:[#allocation2 + $0x90] sm:$0x1]  ;;  %v14517_v58 = vld [vmem:[#allocation2 + $0x94] sm:$0xf] }
  0x85   : > { %12674 = vmatprep.mubr.msk.bf16.mxu0 %vm1437_vm13, %v11537_v49  ;;  %v14504_v29 = vrot.slane %v1284_v42, 4  ;;  %v920_v62 = vld [vmem:[#allocation2 + $0x98] sm:$0x1]  ;;  %v715_v13 = vsel %vm14002_vm7, %v513_v59, %v714_v40  ;;  %v14509_v15 = vld [vmem:[#allocation2 + $0x84] sm:$0xf]  ;;  %v824_v38 = vsel %vm14010_vm8, %v491_v9, %v823_v63  ;;  %v1301_v57 = vshll.u32 %v14517_v58, 16 }
  0x86   : > { %v921_v10 = vsel %vm14056_vm9, %v11521_v31, %v920_v62  ;;  %v522_v37 = vsel %vm13992_vm6, %v514_v12, %v521_v41  ;;  %716 = vst [vmem:[#allocation2 + $0x9c] sm:$0xf] %v715_v13  ;;  %v719_v5 = vsel %vm14010_vm8, %v523_v45, %v718_v27  ;;  %v1268_v1 = vshrl.u32 %v14509_v15, 16  ;;  %825 = vst [vmem:[#allocation2 + $0x90] sm:$0x1] %v824_v38  ;;  %v201_v31 = vld [vmem:[%s13972_s21 + $0xe8] sm:$0xff] }
  0x87   : > { %v1271_v54 = vshll.u32 %v14509_v15, 16  ;;  %922 = vst [vmem:[#allocation2 + $0x98] sm:$0x1] %v921_v10  ;;  %v1305_v9 = vshrl.u32 %v14517_v58, 16  ;;  %717 = vst.msk [vmem:[#allocation2 + $0xa0] sm:$0xf] %vm624_vm3, %v522_v37  ;;  %v14539_v27 = vpack.c.bf16 %v201_v31, %v201_v31 }
  0x88   : > { %720 = vst [vmem:[#allocation2 + $0xa4] sm:$0x1] %v719_v5  ;;  %v14529_v6 = vld [vmem:[#allocation2 + $0x8c] sm:$0x1]  ;;  %v527_v33 = vrot.slane %v525_v60, 7  ;;  %v533_v21 = vshrl.u32 %v14495_v20, 16 }
  0x89   : > { %v542_v19 = vshrl.u32 %v14497_v26, 16  ;;  %v1270_v39 = vrot.slane %v1268_v1, 4  ;;  %v1273_v53 = vrot.slane %v1271_v54, 5  ;;  %v1287_v30 = vshll.u32 %v14529_v6, 16  ;;  %v721_v7 = vld [vmem:[#allocation2 + $0xa8] sm:$0xf] }
  0x8a   : > { %v14537_v0 = vrot.slane %v1301_v57, 5  ;;  %v1307_v32 = vrot.slane %v1305_v9, 4  ;;  %v530_v35 = vor.u32 %v528_v48, %v527_v33  ;;  %v531_v40 = vrot.slane %v527_v33, 4  ;;  %v725_v12 = vld [vmem:[#allocation2 + $0xb0] sm:$0x1] }
  0x8b   : > { %v535_v49 = vrot.slane %v533_v21, 7  ;;  %v1274_v42 = vor.u32 %v1273_v53, %v1270_v39  ;;  %v1289_v59 = vrot.slane %v1287_v30, 5  ;;  %v544_v20 = vrot.slane %v542_v19, 7  ;;  %v728_v5 = vld [vmem:[#allocation2 + $0xb4] sm:$0xf] }
  0x8c   : > { %v1308_v41 = vor.u32 %v1307_v32, %v14537_v0  ;;  %v722_v62 = vsel %vm14002_vm7, %v530_v35, %v721_v7  ;;  %v545_v10 = vshll.u32 %v14497_v26, 16 }
  0x8d   : > { %v538_v45 = vor.u32 %v536_v22, %v535_v49  ;;  %v540_v63 = vrot.slane %v535_v49, 4  ;;  %v1275_v13 = vrot.slane %v1274_v42, 4  ;;  %v1290_v48 = vsel %vm14158_vm12, %v14504_v29, %v1289_v59  ;;  %v826_v38 = vld [vmem:[#allocation2 + $0x9c] sm:$0x1]  ;;  %723 = vst [vmem:[#allocation2 + $0xa8] sm:$0xf] %v722_v62 }
  0x8e   : > { %v548_v37 = vrot.slane %v544_v20, 4  ;;  %v14550_v1 = vld [vmem:[#allocation2 + $0x90] sm:$0xf]  ;;  %v14552_v54 = vld [vmem:[#allocation2 + $0x98] sm:$0x1]  ;;  %v1309_v57 = vrot.slane %v1308_v41, 4  ;;  %v827_v9 = vsel %vm14010_vm8, %v508_v34, %v826_v38  ;;  %v547_v32 = vor.u32 %v545_v10, %v544_v20 }
  0x8f   : > { %v539_v31 = vsel %vm13992_vm6, %v531_v40, %v538_v45  ;;  %v726_v29 = vsel %vm14010_vm8, %v540_v63, %v725_v12  ;;  %v1280_v33 = vsel %vm14158_vm12, %v1275_v13, %v14487_v14  ;;  %v1292_v21 = vshrl.u32 %v14550_v1, 16  ;;  %828 = vst [vmem:[#allocation2 + $0x9c] sm:$0x1] %v827_v9  ;;  %v923_v50 = vld [vmem:[#allocation2 + $0xa4] sm:$0x1] }
  0x90   : > { %v1295_v39 = vshll.u32 %v14550_v1, 16  ;;  %v1311_v53 = vshll.u32 %v14552_v54, 16  ;;  %724 = vst.msk [vmem:[#allocation2 + $0xac] sm:$0xf] %vm624_vm3, %v539_v31  ;;  %727 = vst [vmem:[#allocation2 + $0xb0] sm:$0x1] %v726_v29  ;;  %v11538_v34 = vcombine.low %v1280_v33, %v1290_v48  ;;  %v924_v30 = vsel %vm14056_vm9, %v14500_v8, %v923_v50 }
  0x91   : > { %v14572_v7 = vld [vmem:[#allocation2 + $0xa0] sm:$0xf]  ;;  %v550_v14 = vshrl.u32 %v14539_v27, 16  ;;  %v1294_v35 = vrot.slane %v1292_v21, 4  ;;  %925 = vst [vmem:[#allocation2 + $0xa4] sm:$0x1] %v924_v30  ;;  %v729_v8 = vsel %vm14002_vm7, %v547_v32, %v728_v5 }
  0x92   : > { %v1297_v40 = vrot.slane %v1295_v39, 5  ;;  %v1313_v49 = vrot.slane %v1311_v53, 5  ;;  %v1325_v42 = vshll.u32 %v14572_v7, 16  ;;  %v732_v59 = vld [vmem:[#allocation2 + $0xbc] sm:$0x1]  ;;  %12675 = vmatmul.mubr.msk.bf16.gmra.mrb[20].mxu0 %vm1437_vm13, %v11538_v34  ;;  %v1329_v12 = vshrl.u32 %v14572_v7, 16 }
  0x93   : > { %v552_v41 = vrot.slane %v550_v14, 7  ;;  %v553_v45 = vshll.u32 %v14539_v27, 16  ;;  %v11523_v62 = vrot.slane %v536_v22, 11  ;;  %730 = vst [vmem:[#allocation2 + $0xb4] sm:$0xf] %v729_v8 }
  0x94   : > { %v1298_v20 = vor.u32 %v1297_v40, %v1294_v35  ;;  %v1327_v63 = vrot.slane %v1325_v42, 5  ;;  %v1331_v13 = vrot.slane %v1329_v12, 4  ;;  %v829_v48 = vld [vmem:[#allocation2 + $0xa8] sm:$0x1]  ;;  %v1314_v31 = vsel %vm14158_vm12, %v1309_v57, %v1313_v49 }
  0x95   : > { %v555_v38 = vor.u32 %v553_v45, %v552_v41  ;;  %v557_v10 = vrot.slane %v552_v41, 4  ;;  %v830_v27 = vsel %vm14010_vm8, %v525_v60, %v829_v48  ;;  %v11524_v8 = vrot.slane %v553_v45, 11 }
  0x96   : > { %v1299_v9 = vrot.slane %v1298_v20, 4  ;;  %v14587_v29 = vld [vmem:[#allocation2 + $0x9c] sm:$0xf]  ;;  %v1332_v5 = vor.u32 %v1331_v13, %v1327_v63  ;;  %831 = vst [vmem:[#allocation2 + $0xa8] sm:$0x1] %v830_v27 }
  0x97   : > { %v926_v33 = vld [vmem:[#allocation2 + $0xb0] sm:$0x1]  ;;  %v14589_v22 = vld [vmem:[#allocation2 + $0xac] sm:$0xf]  ;;  %v556_v21 = vsel %vm13992_vm6, %v548_v37, %v555_v38  ;;  %v733_v39 = vsel %vm14010_vm8, %v557_v10, %v732_v59  ;;  %v1316_v57 = vshrl.u32 %v14587_v29, 16  ;;  %v1319_v60 = vshll.u32 %v14587_v29, 16 }
  0x98   : > { %v1304_v36 = vsel %vm14158_vm12, %v1299_v9, %v14537_v0  ;;  %v927_v53 = vsel %vm14056_vm9, %v11523_v62, %v926_v33  ;;  %731 = vst.msk [vmem:[#allocation2 + $0xb8] sm:$0xf] %vm624_vm3, %v556_v21  ;;  %734 = vst [vmem:[#allocation2 + $0xbc] sm:$0x1] %v733_v39  ;;  %v14603_v34 = vld [vmem:[#allocation2 + $0xa4] sm:$0x1] }
  0x99   : > { %v11539_v50 = vcombine.low %v1304_v36, %v1314_v31  ;;  %928 = vst [vmem:[#allocation2 + $0xb0] sm:$0x1] %v927_v53  ;;  %v1349_v37 = vshll.u32 %v14589_v22, 16  ;;  %v1353_v30 = vshrl.u32 %v14589_v22, 16  ;;  %v1318_v32 = vrot.slane %v1316_v57, 4 }
  0x9a   : > { %v1321_v0 = vrot.slane %v1319_v60, 5  ;;  %v1333_v14 = vrot.slane %v1332_v5, 4  ;;  %v1335_v35 = vshll.u32 %v14603_v34, 16  ;;  %v832_v42 = vld [vmem:[#allocation2 + $0xb4] sm:$0x1] }
  0x9b   : > { %12678 = vmatprep.mubr.msk.bf16.mxu0 %vm1437_vm13, %v11539_v50  ;;  %v1351_v40 = vrot.slane %v1349_v37, 5  ;;  %v1355_v49 = vrot.slane %v1353_v30, 4  ;;  %v833_v41 = vsel %vm14010_vm8, %v542_v19, %v832_v42 }
  0x9c   : > { %v1322_v59 = vor.u32 %v1321_v0, %v1318_v32  ;;  %v1337_v12 = vrot.slane %v1335_v35, 5  ;;  %834 = vst [vmem:[#allocation2 + $0xb4] sm:$0x1] %v833_v41 }
  0x9d   : > { %v1356_v20 = vor.u32 %v1355_v49, %v1351_v40  ;;  %v14615_v48 = vld [vmem:[#allocation2 + $0xa8] sm:$0xf] }
  0x9e   : > { %v1323_v62 = vrot.slane %v1322_v59, 4  ;;  %v1338_v13 = vsel %vm14158_vm12, %v1333_v14, %v1337_v12  ;;  %v1340_v38 = vshrl.u32 %v14615_v48, 16  ;;  %v1343_v10 = vshll.u32 %v14615_v48, 16  ;;  %v2797_v25 = vld [vmem:[#allocation2 + $0xa8] sm:$0xf] }
  0x9f   : > { %v929_v9 = vld [vmem:[#allocation2 + $0xbc] sm:$0x1]  ;;  %v1357_v19 = vrot.slane %v1356_v20, 4  ;;  %v14625_v27 = vld [vmem:[#allocation2 + $0xb8] sm:$0xf] }
  0xa0   : > { %v1328_v26 = vsel %vm14158_vm12, %v1323_v62, %v1327_v63  ;;  %v14621_v31 = vld [vmem:[#allocation2 + $0xb0] sm:$0x1]  ;;  %v930_v45 = vsel %vm14056_vm9, %v11524_v8, %v929_v9  ;;  %v1342_v33 = vrot.slane %v1340_v38, 4  ;;  %v1345_v21 = vrot.slane %v1343_v10, 5 }
  0xa1   : > { %v11540_v5 = vcombine.low %v1328_v26, %v1338_v13  ;;  %v1359_v39 = vshll.u32 %v14621_v31, 16  ;;  %931 = vst [vmem:[#allocation2 + $0xbc] sm:$0x1] %v930_v45  ;;  %v1373_v36 = vshll.u32 %v14625_v27, 16  ;;  %v1377_v57 = vshrl.u32 %v14625_v27, 16 }
  0xa2   : > { %v1346_v63 = vor.u32 %v1345_v21, %v1342_v33  ;;  %v13888_v26 = vld [vmem:[#allocation2] sm:$0xf]  ;;  %v13890_v33 = vld [vmem:[#allocation2 + $0xc] sm:$0xf]  ;;  %v15098_v28 = vld [vmem:[#allocation2 + $0xb0] sm:$0x1] }
  0xa3   : > { %12679 = vmatmul.mubr.msk.bf16.gmra.mrb[24].mxu0 %vm1437_vm13, %v11540_v5  ;;  %v1361_v60 = vrot.slane %v1359_v39, 5  ;;  %v14631_v53 = vld [vmem:[#allocation2 + $0xb4] sm:$0xf]  ;;  %v1375_v50 = vrot.slane %v1373_v36, 5  ;;  %v1379_v37 = vrot.slane %v1377_v57, 4 }
  0xa4   : > { %v1347_v30 = vrot.slane %v1346_v63, 4  ;;  %v1364_v0 = vshrl.u32 %v14631_v53, 16  ;;  %v1367_v14 = vshll.u32 %v14631_v53, 16  ;;  %v14652_v5 = vld [vmem:[#allocation2 + $0x10] sm:$0xf] }
  0xa5   : > { %v1362_v32 = vsel %vm14158_vm12, %v1357_v19, %v1361_v60  ;;  %v1380_v35 = vor.u32 %v1379_v37, %v1375_v50  ;;  %v11560_v21 = vcombine.low %v13890_v33, %v14652_v5  ;;  %v14655_v39 = vld [vmem:[#allocation2 + $0x1c] sm:$0xf]  ;;  %v13892_v36 = vld [vmem:[#allocation2 + $0x18] sm:$0xf]  ;;  %v13893_v63 = vld [vmem:[%s18731_s1 + $0x4] sm:$0x3] }
  0xa6   : > { %v1352_v49 = vsel %vm14158_vm12, %v1347_v30, %v1351_v40  ;;  %v1366_v42 = vrot.slane %v1364_v0, 4  ;;  %v1369_v59 = vrot.slane %v1367_v14, 5  ;;  %v14647_v40 = vld [vmem:[#allocation2 + $0x4] sm:$0xf]  ;;  %v11561_v57 = vcombine.low %v13892_v36, %v14655_v39  ;;  %v14671_v37 = vld [vmem:[#allocation2 + $0x28] sm:$0xf] }
  0xa7   : > { %v11541_v12 = vcombine.low %v1352_v49, %v1362_v32  ;;  %v1381_v20 = vrot.slane %v1380_v35, 4  ;;  %v11559_v19 = vcombine.low %v13888_v26, %v14647_v40  ;;  %v2205_v60 = vsel %vm1486_vm0, %v13893_v63, 0  ;;  %v13895_v30 = vld [vmem:[#allocation2 + $0x24] sm:$0xf]  ;;  %v14674_v0 = vld [vmem:[#allocation2 + $0x34] sm:$0xf] }
  0xa8   : > { %v14639_v41 = vld [vmem:[#allocation2 + $0xbc] sm:$0x1]  ;;  %v1370_v8 = vor.u32 %v1369_v59, %v1366_v42  ;;  %v11562_v32 = vcombine.low %v13895_v30, %v14671_v37  ;;  %v13897_v14 = vld [vmem:[#allocation2 + $0x30] sm:$0xf]  ;;  %v14679_v49 = vld [vmem:[#allocation2 + $0x40] sm:$0xf] }
  0xa9   : > { %v1383_v62 = vshll.u32 %v14639_v41, 16  ;;  %12682 = vmatprep.mubr.msk.bf16.mxu0 %vm1437_vm13, %v11541_v12  ;;  %v11563_v35 = vcombine.low %v13897_v14, %v14674_v0  ;;  %v13899_v42 = vld [vmem:[#allocation2 + $0x3c] sm:$0xf]  ;;  %v11565_v12 = vcombine.low %v14308_v23, %v14274_v61  ;;  %v11569_v61 = vcombine.low %v14452_v11, %v14431_v52  ;;  %v13900_v63 = vld [vmem:[#allocation2 + $0x8] sm:$0x1] }
  0xaa   : > { %v1371_v13 = vrot.slane %v1370_v8, 4  ;;  %v11564_v59 = vcombine.low %v13899_v42, %v14679_v49  ;;  %v11566_v8 = vcombine.low %v14344_v3, %v14311_v44  ;;  %v18902_v42 = vmov 0 }
  0xab   : > { %v1385_v38 = vrot.slane %v1383_v62, 5  ;;  %v11568_v62 = vcombine.low %v14401_v24, %v14378_v56  ;;  %v11571_v24 = vcombine.low %v14550_v1, %v14517_v58  ;;  %v11572_v1 = vcombine.low %v14587_v29, %v14572_v7 }
  0xac   : > { %v1376_v10 = vsel %vm14158_vm12, %v1371_v13, %v1375_v50  ;;  %v14665_v50 = vld [vmem:[%s18731_s1 + $0x6] sm:$0x3]  ;;  %v202_v13 = vld [vmem:[%s13972_s21 + $0xf0] sm:$0xff]  ;;  %v18903_v42 = vsel %vm14726_vm1, 4294967295, %v18902_v42 }
  0xad   : > { %v1386_v9 = vsel %vm14158_vm12, %v1381_v20, %v1385_v38  ;;  %v11567_v20 = vcombine.low %v14367_v43, %v14335_v17  ;;  %v12312_v23 = vpack.c.bf16 %v202_v13, %v202_v13  ;;  %v11570_v43 = vcombine.low %v14509_v15, %v14462_v55  ;;  %18904 = vst [vmem:[#allocation8_spill] sm:$0xff] %v18903_v42  ;;  %v13901_v13 = vld [vmem:[#allocation2 + $0x14] sm:$0x1] }
  0xae   : > { %v11542_v45 = vcombine.low %v1376_v10, %v1386_v9  ;;  %v735_v10 = vld [vmem:[#allocation2 + $0xc0] sm:$0xf]  ;;  %v203_v9 = vld [vmem:[%s13972_s21 + $0xf8] sm:$0xff] }
  0xaf   : > { %v559_v38 = vshrl.u32 %v12312_v23, 16  ;;  %v562_v17 = vshll.u32 %v12312_v23, 16  ;;  %v14706_v26 = vpack.c.bf16 %v203_v9, %v203_v9  ;;  %v11574_v23 = vcombine.low %v14631_v53, %v14625_v27 }
  0xb0   : > { %12683 = vmatmul.mubr.msk.bf16.gmra.mrb[28].mxu0 %vm1437_vm13, %v11542_v45  ;;  %v1996_v45 = vrot.slane %v14647_v40, 5  ;;  %v11573_v40 = vcombine.low %v14615_v48, %v14589_v22  ;;  %v2003_v48 = vrot.slane %v14652_v5, 5  ;;  %v2017_v9 = vrot.slane %v14671_v37, 5 }
  0xb1   : > { %12688 = vmatprep.mubr.msk.bf16.mxu0 %vm1437_vm13, %v11559_v19  ;;  %v561_v44 = vrot.slane %v559_v38, 7  ;;  %v567_v19 = vshrl.u32 %v14706_v26, 16  ;;  %v570_v33 = vshll.u32 %v14706_v26, 16  ;;  %v13806_v26 = vld [vmem:[#allocation2 + $0x30] sm:$0xff]  }
  0xb2   : > { %v1998_v14 = vrot.slane %v1996_v45, 4 }
  0xb3   : > { %v564_v3 = vor.u32 %v562_v17, %v561_v44  ;;  %v14712_v15 = vrot.slane %v567_v19, 7  ;;  %v565_v36 = vrot.slane %v561_v44, 4  ;;  %v2005_v17 = vrot.slane %v2003_v48, 4  ;;  %v1946_v19 = vld [vmem:[#allocation2 + $0x24] sm:$0xe] }
  0xb5   : > { %v736_v11 = vsel %vm14002_vm7, %v564_v3, %v735_v10 }
  0xb6   : > { %737 = vst [vmem:[#allocation2 + $0xc0] sm:$0xf] %v736_v11 }
  0xb8   : > { %12689 = vmatmul.mubr.msk.bf16.vlgmr.msra.gmra.mrb[0].mxu0 %vm1437_vm13, %v11560_v21  ;;  %v1943_v21 = vld [vmem:[#allocation2] sm:$0xe] }
  0xb9   : > { %12721 = vmatpush3.bf16.msra.mxu0 %v2205_v60  ;;  %12692 = vmatprep.mubr.msk.bf16.mxu0 %vm1437_vm13, %v11561_v57  ;;  %v572_v57 = vor.u32 %v570_v33, %v14712_v15  ;;  %v1999_v60 = vrot.slane %v13900_v63, 5  ;;  %v2019_v63 = vrot.slane %v2017_v9, 4 }
  0xba   : > { %13779 = vmatprep.subr.msk.bf16.mxu0 %vm1486_vm0, %v14665_v50 }
  0xbd   : > { %v835_v30 = vld [vmem:[#allocation2 + $0xc0] sm:$0x1] }
  0xbe   : > { %v836_v29 = vsel %vm14010_vm8, %v559_v38, %v835_v30  ;;  %v2563_v30 = vsel %vm1486_vm0, %v14665_v50, 0 }
  0xbf   : > { %837 = vst [vmem:[#allocation2 + $0xc0] sm:$0x1] %v836_v29  ;;  %v14758_v29 = vld [vmem:[%s18731_s1 + $0x8] sm:$0x3] }
  0xc0   : > { %12693 = vmatmul.mubr.msk.bf16.gmra.mrb[4].mxu0 %vm1437_vm13, %v11562_v32  ;;  %v11591_v32 = vrot.slane %v1943_v21, 9 }
  0xc1   : > { %12696 = vmatprep.mubr.msk.bf16.mxu0 %vm1437_vm13, %v11563_v35  ;;  %v573_v35 = vsel %vm13992_vm6, %v565_v36, %v572_v57  ;;  %v11594_v57 = vrot.slane %v1946_v19, 9 }
  0xc2   : > { %738 = vst.msk [vmem:[#allocation2 + $0xc4] sm:$0xf] %vm624_vm3, %v573_v35 }
  0xc8   : > { %12697 = vmatmul.mubr.msk.bf16.gmra.mrb[8].mxu0 %vm1437_vm13, %v11564_v59  ;;  %v1997_v59 = vsel %vm14726_vm1, %v11591_v32, %v1996_v45  ;;  %v2024_v45 = vrot.slane %v14674_v0, 5  ;;  %v2018_v0 = vsel %vm14726_vm1, %v11594_v57, %v2017_v9  ;;  %v13908_v9 = vld [vmem:[#allocation2 + $0x58] sm:$0xf] }
  0xc9   : > { %12700 = vmatprep.mubr.msk.bf16.mxu0 %vm1437_vm13, %v11565_v12  ;;  %v2000_v12 = vsel %vm14726_vm1, %v1998_v14, %v1999_v60  ;;  %v13903_v60 = vld [vmem:[#allocation2 + $0x2c] sm:$0x1]  ;;  %v13904_v14 = vld [vmem:[#allocation2 + $0x38] sm:$0x1] }
  0xca   : > { %v11608_v38 = vcombine.low %v1997_v59, %v2000_v12  ;;  %v2026_v32 = vrot.slane %v2024_v45, 4  ;;  %v2027_v35 = vrot.slane %v13904_v14, 5  ;;  %v2055_v14 = vrot.slane %v14373_v46, 5 }
  0xcb   : > { %v2066_v46 = vrot.slane %v14431_v52, 5 }
  0xcc   : > { %v2028_v12 = vsel %vm14726_vm1, %v2026_v32, %v2027_v35 }
  0xd0   : > { %12701 = vmatmul.mubr.msk.bf16.gmra.mrb[12].mxu0 %vm1437_vm13, %v11566_v8  ;;  %v1944_v8 = vld [vmem:[#allocation2 + $0xc] sm:$0xe] }
  0xd1   : > { %12704 = vmatprep.mubr.msk.bf16.mxu0 %vm1437_vm13, %v11567_v20  ;;  %v1945_v20 = vld [vmem:[#allocation2 + $0x18] sm:$0xe]  ;;  %v11592_v44 = vrot.slane %v1944_v8, 9  ;;  %v1948_v8 = vld [vmem:[#allocation2 + $0x3c] sm:$0xe] }
  0xd2   : > { %v11593_v3 = vrot.slane %v1945_v20, 9  ;;  %v13905_v20 = vld [vmem:[#allocation2 + $0x4c] sm:$0xf] }
  0xd8   : > { %12705 = vmatmul.mubr.msk.bf16.gmra.mrb[16].mxu0 %vm1437_vm13, %v11568_v62  ;;  %v2010_v62 = vrot.slane %v14655_v39, 5 }
  0xd9   : > { %12708 = vmatprep.mubr.msk.bf16.mxu0 %vm1437_vm13, %v11569_v61  ;;  %v2006_v61 = vrot.slane %v13901_v13, 5  ;;  %v1949_v13 = vld [vmem:[#allocation2 + $0x48] sm:$0xe] }
  0xda   : > { %v2012_v5 = vrot.slane %v2010_v62, 4  ;;  %v2011_v53 = vsel %vm14726_vm1, %v11593_v3, %v2010_v62  ;;  %v2038_v62 = vrot.slane %v13905_v20, 5 }
  0xdb   : > { %v2007_v39 = vsel %vm14726_vm1, %v2005_v17, %v2006_v61  ;;  %v13906_v17 = vld [vmem:[#allocation2 + $0x44] sm:$0x1] }
  0xdc   : > { %v2034_v3 = vrot.slane %v13906_v17, 5  ;;  %v2073_v17 = vrot.slane %v14462_v55, 5  ;;  %v2083_v55 = vrot.slane %v14552_v54, 5  ;;  %v2094_v54 = vrot.slane %v14589_v22, 5 }
  0xe0   : > { %12709 = vmatmul.mubr.msk.bf16.gmra.mrb[20].mxu0 %vm1437_vm13, %v11570_v43  ;;  %v13902_v43 = vld [vmem:[#allocation2 + $0x20] sm:$0x1] }
  0xe1   : > { %12712 = vmatprep.mubr.msk.bf16.mxu0 %vm1437_vm13, %v11571_v24  ;;  %v2013_v10 = vrot.slane %v13902_v43, 5  ;;  %v2004_v24 = vsel %vm14726_vm1, %v11592_v44, %v2003_v48  ;;  %v2031_v48 = vrot.slane %v14679_v49, 5  ;;  %v11597_v49 = vrot.slane %v1949_v13, 9  ;;  %v13907_v43 = vld [vmem:[#allocation2 + $0x50] sm:$0x1] }
  0xe2   : > { %v11609_v21 = vcombine.low %v2004_v24, %v2007_v39 }
  0xe3   : > { %v2014_v11 = vsel %vm14726_vm1, %v2012_v5, %v2013_v10  ;;  %v2033_v44 = vrot.slane %v2031_v48, 4  ;;  %v2040_v5 = vrot.slane %v2038_v62, 4  ;;  %v2041_v10 = vrot.slane %v13907_v43, 5 }
  0xe4   : > { %v11610_v36 = vcombine.low %v2011_v53, %v2014_v11  ;;  %v2045_v53 = vrot.slane %v13908_v9, 5  ;;  %v2039_v11 = vsel %vm14726_vm1, %v11597_v49, %v2038_v62  ;;  %v1954_v49 = vld [vmem:[#allocation2 + $0x84] sm:$0xe]  ;;  %v2076_v9 = vrot.slane %v14529_v6, 5 }
  0xe5   : > { %v2035_v39 = vsel %vm14726_vm1, %v2033_v44, %v2034_v3  ;;  %v2042_v19 = vsel %vm14726_vm1, %v2040_v5, %v2041_v10  ;;  %v1955_v5 = vld [vmem:[#allocation2 + $0x90] sm:$0xe] }
  0xe8   : > { %12713 = vmatmul.mubr.msk.bf16.gmra.mrb[24].mxu0 %vm1437_vm13, %v11572_v1  ;;  %v1947_v1 = vld [vmem:[#allocation2 + $0x30] sm:$0xe] }
  0xe9   : > { %12716 = vmatprep.mubr.msk.bf16.mxu0 %vm1437_vm13, %v11573_v40  ;;  %v2020_v40 = vrot.slane %v13903_v60, 5  ;;  %v11595_v37 = vrot.slane %v1947_v1, 9  ;;  %v13909_v1 = vld [vmem:[#allocation2 + $0x64] sm:$0xf] }
  0xeb   : > { %v2021_v50 = vsel %vm14726_vm1, %v2019_v63, %v2020_v40  ;;  %v2025_v59 = vsel %vm14726_vm1, %v11595_v37, %v2024_v45  ;;  %v1950_v45 = vld [vmem:[#allocation2 + $0x54] sm:$0xe]  ;;  %v11614_v63 = vcombine.low %v2039_v11, %v2042_v19  ;;  %v2047_v40 = vrot.slane %v2045_v53, 4 }
  0xec   : > { %v11611_v61 = vcombine.low %v2018_v0, %v2021_v50  ;;  %v11598_v60 = vrot.slane %v1950_v45, 9  ;;  %v2059_v50 = vrot.slane %v14378_v56, 5  ;;  %v2069_v56 = vrot.slane %v14459_v4, 5 }
  0xed   : > { %v2080_v4 = vrot.slane %v14517_v58, 5  ;;  %v2087_v45 = vrot.slane %v14572_v7, 5  ;;  %v2097_v7 = vrot.slane %v14621_v31, 5 }
  0xee   : > { %v2046_v35 = vsel %vm14726_vm1, %v11598_v60, %v2045_v53  ;;  %v2061_v13 = vrot.slane %v2059_v50, 4  ;;  %v11603_v53 = vrot.slane %v1955_v5, 9  ;;  %v13812_v5 = vld [vmem:[#allocation2 + $0x78] sm:$0xff]  }
  0xef   : > { %v2082_v11 = vrot.slane %v2080_v4, 4 }
  0xf0   : > { %12717 = vmatmul.mubr.msk.bf16.gmra.mrb[28].mxu0 %vm1437_vm13, %v11574_v23  ;;  %v11612_v23 = vcombine.low %v2025_v59, %v2028_v12  ;;  %v1952_v59 = vld [vmem:[#allocation2 + $0x6c] sm:$0xe]  ;;  %v1953_v12 = vld [vmem:[#allocation2 + $0x78] sm:$0xe] }
  0xf1   : > { %12722 = vmatprep.mubr.msk.bf16.mxu0 %vm1437_vm13, %v11608_v38  ;;  %v11596_v38 = vrot.slane %v1948_v8, 9  ;;  %v11600_v62 = vrot.slane %v1952_v59, 9  ;;  %v2084_v6 = vsel %vm14726_vm1, %v2082_v11, %v2083_v55  ;;  %v14875_v11 = vld [vmem:[#allocation2 + $0x1c] sm:$0xf] }
  0xf3   : > { %v2032_v24 = vsel %vm14726_vm1, %v11596_v38, %v2031_v48  ;;  %v2068_v38 = vrot.slane %v2066_v46, 4  ;;  %v2060_v44 = vsel %vm14726_vm1, %v11600_v62, %v2059_v50  ;;  %v1958_v50 = vld [vmem:[#allocation2 + $0xb4] sm:$0xe] }
  0xf4   : > { %v11613_v57 = vcombine.low %v2032_v24, %v2035_v39  ;;  %v11602_v24 = vrot.slane %v1954_v49, 9  ;;  %v2075_v39 = vrot.slane %v2073_v17, 4  ;;  %v2758_v49 = vld [vmem:[#allocation2 + $0xc] sm:$0xf] }
  0xf6   : > { %v2074_v19 = vsel %vm14726_vm1, %v11602_v24, %v2073_v17  ;;  %v2077_v58 = vsel %vm14726_vm1, %v2075_v39, %v2076_v9  ;;  %v13809_v17 = vld [vmem:[#allocation2 + $0x54] sm:$0xff]   ;;  %v13813_v24 = vld [vmem:[#allocation2 + $0x84] sm:$0xff]  }
  0xf8   : > { %12723 = vmatmul.mubr.msk.bf16.vlgmr.msra.gmra.mrb[0].mxu0 %vm1437_vm13, %v11609_v21  ;;  %v2052_v21 = vrot.slane %v13909_v1, 5  ;;  %v2081_v1 = vsel %vm14726_vm1, %v11603_v53, %v2080_v4  ;;  %v14871_v4 = vld [vmem:[#allocation2 + $0x10] sm:$0xf]  ;;  %v2761_v53 = vld [vmem:[#allocation2 + $0x18] sm:$0xf] }
  0xf9   : > { %12755 = vmatpush3.bf16.msra.mxu0 %v2563_v30  ;;  %12726 = vmatprep.mubr.msk.bf16.mxu0 %vm1437_vm13, %v11610_v36  ;;  %v1951_v36 = vld [vmem:[#allocation2 + $0x60] sm:$0xe]  ;;  %v2048_v30 = vrot.slane %v14359_v2, 5  ;;  %v2816_v39 = vshll.u32 %v14871_v4, 16  ;;  %v2820_v9 = vshrl.u32 %v14871_v4, 16 }
  0xfa   : > { %13780 = vmatprep.subr.msk.bf16.mxu0 %vm1486_vm0, %v14758_v29  ;;  %v11599_v37 = vrot.slane %v1951_v36, 9  ;;  %v2054_v32 = vrot.slane %v2052_v21, 4  ;;  %v1957_v36 = vld [vmem:[#allocation2 + $0xa8] sm:$0xe] }
  0xfb   : > { %v2049_v0 = vsel %vm14726_vm1, %v2047_v40, %v2048_v30  ;;  %v2089_v40 = vrot.slane %v2087_v45, 4  ;;  %v2090_v30 = vrot.slane %v14603_v34, 5 }
  0xfc   : > { %v2053_v48 = vsel %vm14726_vm1, %v11599_v37, %v2052_v21  ;;  %v2056_v2 = vsel %vm14726_vm1, %v2054_v32, %v2055_v14  ;;  %v11615_v8 = vcombine.low %v2046_v35, %v2049_v0  ;;  %v1956_v21 = vld [vmem:[#allocation2 + $0x9c] sm:$0xe]  ;;  %v11605_v37 = vrot.slane %v1957_v36, 9 }
  0xfd   : > { %v11616_v20 = vcombine.low %v2053_v48, %v2056_v2  ;;  %v11604_v60 = vrot.slane %v1956_v21, 9  ;;  %v2096_v32 = vrot.slane %v2094_v54, 4  ;;  %v2091_v22 = vsel %vm14726_vm1, %v2089_v40, %v2090_v30 }
  0xfe   : > { %v2101_v35 = vrot.slane %v14625_v27, 5  ;;  %v2095_v0 = vsel %vm14726_vm1, %v11605_v37, %v2094_v54  ;;  %v11606_v2 = vrot.slane %v1958_v50, 9  ;;  %v2822_v21 = vrot.slane %v2820_v9, 4 }
  0xff   : > { %v2088_v14 = vsel %vm14726_vm1, %v11604_v60, %v2087_v45  ;;  %v2098_v34 = vsel %vm14726_vm1, %v2096_v32, %v2097_v7  ;;  %v2834_v45 = vshll.u32 %v2761_v53, 16  ;;  %v2840_v54 = vshll.u32 %v14875_v11, 16  ;;  %v13814_v60 = vld [vmem:[#allocation2 + $0x90] sm:$0xff]   ;;  %v13815_v32 = vld [vmem:[#allocation2 + $0x9c] sm:$0xff]  }
 0x100   : > { %12727 = vmatmul.mubr.msk.bf16.gmra.mrb[4].mxu0 %vm1437_vm13, %v11611_v61  ;;  %v2062_v61 = vrot.slane %v14423_v47, 5  ;;  %v2070_v47 = vsel %vm14726_vm1, %v2068_v38, %v2069_v56  ;;  %v11621_v31 = vcombine.low %v2088_v14, %v2091_v22  ;;  %v11622_v48 = vcombine.low %v2095_v0, %v2098_v34  ;;  %v13805_v56 = vld [vmem:[#allocation2 + $0x24] sm:$0xff]   ;;  %v14889_v22 = vld [vmem:[#allocation2 + $0x20] sm:$0x1] }
 0x101   : > { %12730 = vmatprep.mubr.msk.bf16.mxu0 %vm1437_vm13, %v11612_v23  ;;  %v11601_v23 = vrot.slane %v1953_v12, 9  ;;  %v2103_v59 = vrot.slane %v2101_v35, 4  ;;  %v574_v12 = vrot.slane %v14712_v15, 4  ;;  %v2102_v27 = vsel %vm14726_vm1, %v11606_v2, %v2101_v35 }
 0x102   : > { %v2063_v52 = vsel %vm14726_vm1, %v2061_v13, %v2062_v61  ;;  %v13803_v61 = vld [vmem:[#allocation2 + $0xc] sm:$0xff]   ;;  %v2844_v36 = vshrl.u32 %v14875_v11, 16  ;;  %v2836_v37 = vrot.slane %v2834_v45, 5  ;;  %v14891_v35 = vrot.slane %v2840_v54, 5 }
 0x103   : > { %v2067_v3 = vsel %vm14726_vm1, %v11601_v23, %v2066_v46  ;;  %v11617_v43 = vcombine.low %v2060_v44, %v2063_v52  ;;  %v2104_v46 = vrot.slane %v14639_v41, 5  ;;  %v11525_v41 = vrot.slane %v570_v33, 11  ;;  %v13804_v23 = vld [vmem:[#allocation2 + $0x18] sm:$0xff]   ;;  %v14859_v52 = vld [vmem:[%s18731_s1 + $0xa] sm:$0x3] }
 0x104   : > { %v11618_v10 = vcombine.low %v2067_v3, %v2070_v47  ;;  %v3289_v44 = vsel %vm1486_vm0, %v14758_v29, 0  ;;  %v13807_v33 = vld [vmem:[#allocation2 + $0x3c] sm:$0xff]   ;;  %v13808_v29 = vld [vmem:[#allocation2 + $0x48] sm:$0xff]   ;;  %v2846_v0 = vrot.slane %v2844_v36, 4 }
 0x105   : > { %v13810_v3 = vld [vmem:[#allocation2 + $0x60] sm:$0xff]   ;;  %v13811_v47 = vld [vmem:[#allocation2 + $0x6c] sm:$0xff]  }
 0x108   : > { %12731 = vmatmul.mubr.msk.bf16.gmra.mrb[8].mxu0 %vm1437_vm13, %v11613_v57  ;;  %v11619_v57 = vcombine.low %v2074_v19, %v2077_v58  ;;  %v2831_v58 = vshrl.u32 %v2761_v53, 16  ;;  %v2773_v53 = vld [vmem:[#allocation2 + $0x48] sm:$0xf] }
 0x109   : > { %12734 = vmatprep.mubr.msk.bf16.mxu0 %vm1437_vm13, %v11614_v63  ;;  %v11620_v63 = vcombine.low %v2081_v1, %v2084_v6  ;;  %v14879_v1 = vld [vmem:[#allocation2 + $0x14] sm:$0x1]  ;;  %v14881_v6 = vrot.slane %v2816_v39, 5 }
 0x10a   : > { %v2826_v40 = vshll.u32 %v14879_v1, 16  ;;  %v2833_v30 = vrot.slane %v2831_v58, 4 }
 0x10b   : > { %v2823_v14 = vor.u32 %v2822_v21, %v14881_v6 }
 0x10c   : > { %v2837_v2 = vor.u32 %v2836_v37, %v2833_v30  ;;  %v2927_v30 = vshrl.u32 %v2773_v53, 16  ;;  %v2930_v37 = vshll.u32 %v2773_v53, 16 }
 0x110   : > { %12735 = vmatmul.mubr.msk.bf16.gmra.mrb[12].mxu0 %vm1437_vm13, %v11615_v8  ;;  %v739_v8 = vld [vmem:[#allocation2 + $0xc8] sm:$0x1] }
 0x111   : > { %12738 = vmatprep.mubr.msk.bf16.mxu0 %vm1437_vm13, %v11616_v20  ;;  %v2105_v20 = vsel %vm14726_vm1, %v2103_v59, %v2104_v46  ;;  %v740_v62 = vsel %vm14010_vm8, %v574_v12, %v739_v8  ;;  %v2850_v59 = vshll.u32 %v14889_v22, 16  ;;  %v2767_v46 = vld [vmem:[#allocation2 + $0x30] sm:$0xf]  ;;  %v14897_v12 = vld [vmem:[#allocation2 + $0x34] sm:$0xf] }
 0x112   : > { %v11623_v13 = vcombine.low %v2102_v27, %v2105_v20  ;;  %741 = vst [vmem:[#allocation2 + $0xc8] sm:$0x1] %v740_v62  ;;  %v2824_v27 = vrot.slane %v2823_v14, 4  ;;  %v2828_v20 = vrot.slane %v2826_v40, 5  ;;  %v2847_v62 = vor.u32 %v2846_v0, %v14891_v35  ;;  %v14927_v14 = vld [vmem:[#allocation2 + $0x44] sm:$0x1] }
 0x118   : > { %12739 = vmatmul.mubr.msk.bf16.gmra.mrb[16].mxu0 %vm1437_vm13, %v11617_v43  ;;  %v2807_v43 = vshrl.u32 %v2758_v49, 16 }
 0x119   : > { %12742 = vmatprep.mubr.msk.bf16.mxu0 %vm1437_vm13, %v11618_v10  ;;  %v932_v15 = vld [vmem:[#allocation2 + $0xc8] sm:$0x1]  ;;  %v2810_v10 = vshll.u32 %v2758_v49, 16 }
 0x11a   : > { %v933_v38 = vsel %vm14056_vm9, %v11525_v41, %v932_v15  ;;  %v2809_v55 = vrot.slane %v2807_v43, 4  ;;  %v13817_v43 = vld [vmem:[#allocation2 + $0xb4] sm:$0xff]  }
 0x11b   : > { %934 = vst [vmem:[#allocation2 + $0xc8] sm:$0x1] %v933_v38  ;;  %v2812_v19 = vrot.slane %v2810_v10, 5  ;;  %v14903_v38 = vld [vmem:[#allocation2 + $0x40] sm:$0xf] }
 0x11c   : > { %v2912_v39 = vshll.u32 %v14903_v38, 16  ;;  %v2916_v9 = vshrl.u32 %v14903_v38, 16 }
 0x11d   : > { %v2813_v7 = vor.u32 %v2812_v19, %v2809_v55  ;;  %v2848_v55 = vrot.slane %v2847_v62, 4  ;;  %v13818_v62 = vld [vmem:[#allocation2 + $0xc0] sm:$0xff]  }
 0x11e   : > { %v14929_v0 = vrot.slane %v2912_v39, 5 }
 0x11f   : > { %v2814_v8 = vrot.slane %v2813_v7, 4 }
 0x120   : > { %12743 = vmatmul.mubr.msk.bf16.gmra.mrb[20].mxu0 %vm1437_vm13, %v11619_v57  ;;  %v2764_v57 = vld [vmem:[#allocation2 + $0x24] sm:$0xf] }
 0x121   : > { %12746 = vmatprep.mubr.msk.bf16.mxu0 %vm1437_vm13, %v11620_v63  ;;  %v14885_v63 = vld [vmem:[#allocation2 + $0x28] sm:$0xf]  ;;  %v2855_v34 = vshrl.u32 %v2764_v57, 16  ;;  %v2858_v50 = vshll.u32 %v2764_v57, 16  ;;  %v2819_v10 = vsel %vm14158_vm12, %v2814_v8, %v14881_v6  ;;  %v14921_v6 = vld [vmem:[#allocation2 + $0x38] sm:$0x1] }
 0x123   : > { %v2860_v41 = vrot.slane %v2858_v50, 5 }
 0x128   : > { %12747 = vmatmul.mubr.msk.bf16.gmra.mrb[24].mxu0 %vm1437_vm13, %v11621_v31  ;;  %v2864_v31 = vshll.u32 %v14885_v63, 16 }
 0x129   : > { %12750 = vmatprep.mubr.msk.bf16.mxu0 %vm1437_vm13, %v11622_v48  ;;  %v2868_v48 = vshrl.u32 %v14885_v63, 16 }
 0x12a   : > { %v14901_v15 = vrot.slane %v2864_v31, 5 }
 0x130   : > { %12751 = vmatmul.mubr.msk.bf16.gmra.mrb[28].mxu0 %vm1437_vm13, %v11623_v13  ;;  %v2770_v13 = vld [vmem:[#allocation2 + $0x3c] sm:$0xf] }
 0x131   : > { %12756 = vmatprep.mubr.msk.bf16.mxu0 %vm1437_vm13, %v13803_v61  ;;  %v2857_v61 = vrot.slane %v2855_v34, 4  ;;  %v2903_v49 = vshrl.u32 %v2770_v13, 16  ;;  %v2918_v34 = vrot.slane %v2916_v9, 4  ;;  %v2779_v9 = vld [vmem:[#allocation2 + $0x60] sm:$0xf] }
 0x133   : > { %v2861_v19 = vor.u32 %v2860_v41, %v2857_v61  ;;  %v2922_v61 = vshll.u32 %v14927_v14, 16  ;;  %v2929_v41 = vrot.slane %v2927_v30, 4  ;;  %v2975_v30 = vshrl.u32 %v2779_v9, 16 }
 0x135   : > { %v2862_v31 = vrot.slane %v2861_v19, 4  ;;  %v2924_v19 = vrot.slane %v2922_v61, 5  ;;  %v2782_v61 = vld [vmem:[#allocation2 + $0x6c] sm:$0xf] }
 0x138   : > { %12757 = vmatmul.mubr.msk.bf16.vlgmr.msra.gmra.mrb[0].mxu0 %vm1437_vm13, %v13804_v23  ;;  %v2870_v23 = vrot.slane %v2868_v48, 4 }
 0x139   : > { %12789 = vmatpush3.bf16.msra.mxu0 %v3289_v44  ;;  %12760 = vmatprep.mubr.msk.bf16.mxu0 %vm1437_vm13, %v13805_v56  ;;  %v14905_v56 = vld [vmem:[#allocation2 + $0x2c] sm:$0x1]  ;;  %v2879_v44 = vshrl.u32 %v2767_v46, 16 }
 0x13a   : > { %13781 = vmatprep.subr.msk.bf16.mxu0 %vm1486_vm0, %v14859_v52  ;;  %v2871_v58 = vor.u32 %v2870_v23, %v14901_v15  ;;  %v2874_v45 = vshll.u32 %v14905_v56, 16  ;;  %v2932_v23 = vrot.slane %v2930_v37, 5  ;;  %v2978_v37 = vshll.u32 %v2779_v9, 16 }
 0x13b   : > { %v2881_v21 = vrot.slane %v2879_v44, 4  ;;  %v14942_v44 = vld [vmem:[#allocation2 + $0x58] sm:$0xf] }
 0x13c   : > { %v2872_v48 = vrot.slane %v2871_v58, 4  ;;  %v2964_v39 = vshrl.u32 %v14942_v44, 16  ;;  %v14957_v58 = vld [vmem:[#allocation2 + $0x64] sm:$0xf] }
 0x140   : > { %12761 = vmatmul.mubr.msk.bf16.gmra.mrb[4].mxu0 %vm1437_vm13, %v13806_v26  ;;  %v2882_v26 = vshll.u32 %v2767_v46, 16  ;;  %v14937_v46 = vsel %vm1486_vm0, %v14859_v52, 0 }
 0x141   : > { %12764 = vmatprep.mubr.msk.bf16.mxu0 %vm1437_vm13, %v13807_v33  ;;  %v2888_v33 = vshll.u32 %v14897_v12, 16 }
 0x142   : > { %v2884_v54 = vrot.slane %v2882_v26, 5 }
 0x143   : > { %v14918_v36 = vrot.slane %v2888_v33, 5  ;;  %v2919_v33 = vor.u32 %v2918_v34, %v14929_v0 }
 0x144   : > { %v2885_v8 = vor.u32 %v2884_v54, %v2881_v21 }
 0x148   : > { %12765 = vmatmul.mubr.msk.bf16.gmra.mrb[8].mxu0 %vm1437_vm13, %v13808_v29  ;;  %v2892_v29 = vshrl.u32 %v14897_v12, 16 }
 0x149   : > { %12768 = vmatprep.mubr.msk.bf16.mxu0 %vm1437_vm13, %v13809_v17  ;;  %v13816_v17 = vld [vmem:[#allocation2 + $0xa8] sm:$0xff]  }
 0x14a   : > { %v2894_v57 = vrot.slane %v2892_v29, 4 }
 0x150   : > { %12769 = vmatmul.mubr.msk.bf16.gmra.mrb[12].mxu0 %vm1437_vm13, %v13810_v3  ;;  %v2838_v3 = vrot.slane %v2837_v2, 4  ;;  %v2876_v2 = vrot.slane %v2874_v45, 5  ;;  %v2920_v45 = vrot.slane %v2919_v33, 4  ;;  %v2977_v33 = vrot.slane %v2975_v30, 4 }
 0x151   : > { %12772 = vmatprep.mubr.msk.bf16.mxu0 %vm1437_vm13, %v13811_v47  ;;  %v2852_v47 = vrot.slane %v2850_v59, 5  ;;  %v14933_v59 = vld [vmem:[#allocation2 + $0x4c] sm:$0xf] }
 0x152   : > { %v2843_v7 = vsel %vm14158_vm12, %v2838_v3, %v14891_v35  ;;  %v2895_v35 = vor.u32 %v2894_v57, %v14918_v36  ;;  %v2936_v52 = vshll.u32 %v14933_v59, 16  ;;  %v2940_v29 = vshrl.u32 %v14933_v59, 16 }
 0x153   : > { %v2853_v50 = vsel %vm14158_vm12, %v2848_v55, %v2852_v47  ;;  %v2877_v3 = vsel %vm14158_vm12, %v2872_v48, %v2876_v2  ;;  %v14952_v47 = vld [vmem:[#allocation2 + $0x50] sm:$0x1]  ;;  %v2988_v48 = vshrl.u32 %v14957_v58, 16 }
 0x154   : > { %v11675_v26 = vcombine.low %v2843_v7, %v2853_v50  ;;  %v2896_v53 = vrot.slane %v2895_v35, 4  ;;  %v14960_v21 = vrot.slane %v2936_v52, 5  ;;  %v2942_v54 = vrot.slane %v2940_v29, 4  ;;  %v14963_v7 = vld [vmem:[#allocation2 + $0x5c] sm:$0x1] }
 0x155   : > { %v2946_v57 = vshll.u32 %v14952_v47, 16  ;;  %v2966_v50 = vrot.slane %v2964_v39, 4  ;;  %v2980_v52 = vrot.slane %v2978_v37, 5  ;;  %v2785_v29 = vld [vmem:[#allocation2 + $0x78] sm:$0xf]  ;;  %v3002_v39 = vshll.u32 %v2782_v61, 16 }
 0x157   : > { %v2981_v30 = vor.u32 %v2980_v52, %v2977_v33  ;;  %v15025_v52 = vld [vmem:[#allocation2 + $0x88] sm:$0xf] }
 0x158   : > { %12773 = vmatmul.mubr.msk.bf16.gmra.mrb[16].mxu0 %vm1437_vm13, %v13812_v5  ;;  %v2906_v5 = vshll.u32 %v2770_v13, 16 }
 0x159   : > { %12776 = vmatprep.mubr.msk.bf16.mxu0 %vm1437_vm13, %v13813_v24  ;;  %v2829_v24 = vsel %vm14158_vm12, %v2824_v27, %v2828_v20  ;;  %v2898_v27 = vshll.u32 %v14921_v6, 16  ;;  %v2776_v20 = vld [vmem:[#allocation2 + $0x54] sm:$0xf] }
 0x15a   : > { %v2908_v40 = vrot.slane %v2906_v5, 5  ;;  %v2954_v5 = vshll.u32 %v2776_v20, 16 }
 0x160   : > { %12777 = vmatmul.mubr.msk.bf16.gmra.mrb[20].mxu0 %vm1437_vm13, %v13814_v60  ;;  %v2905_v60 = vrot.slane %v2903_v49, 4  ;;  %v2951_v49 = vshrl.u32 %v2776_v20, 16 }
 0x161   : > { %12780 = vmatprep.mubr.msk.bf16.mxu0 %vm1437_vm13, %v13815_v32  ;;  %v11674_v32 = vcombine.low %v2819_v10, %v2829_v24  ;;  %v2900_v10 = vrot.slane %v2898_v27, 5  ;;  %v2960_v24 = vshll.u32 %v14942_v44, 16  ;;  %v2925_v27 = vsel %vm14158_vm12, %v2920_v45, %v2924_v19 }
 0x162   : > { %v2909_v13 = vor.u32 %v2908_v40, %v2905_v60  ;;  %v2953_v60 = vrot.slane %v2951_v49, 4  ;;  %v2956_v40 = vrot.slane %v2954_v5, 5  ;;  %v2990_v49 = vrot.slane %v2988_v48, 4  ;;  %v14990_v5 = vld [vmem:[#allocation2 + $0x7c] sm:$0xf] }
 0x163   : > { %v14965_v34 = vrot.slane %v2960_v24, 5  ;;  %v2999_v24 = vshrl.u32 %v2782_v61, 16  ;;  %v3026_v45 = vshll.u32 %v2785_v29, 16 }
 0x164   : > { %v2910_v55 = vrot.slane %v2909_v13, 4  ;;  %v14982_v13 = vrot.slane %v2946_v57, 5 }
 0x165   : > { %v3001_v48 = vrot.slane %v2999_v24, 4  ;;  %v2982_v24 = vrot.slane %v2981_v30, 4 }
 0x166   : > { %v2915_v35 = vsel %vm14158_vm12, %v2910_v55, %v14929_v0  ;;  %v2967_v0 = vor.u32 %v2966_v50, %v14965_v34  ;;  %v2788_v50 = vld [vmem:[#allocation2 + $0x84] sm:$0xf] }
 0x167   : > { %v11678_v55 = vcombine.low %v2915_v35, %v2925_v27 }
 0x168   : > { %12781 = vmatmul.mubr.msk.bf16.gmra.mrb[24].mxu0 %vm1437_vm13, %v13816_v17  ;;  %v2867_v17 = vsel %vm14158_vm12, %v2862_v31, %v14901_v15  ;;  %v2933_v15 = vor.u32 %v2932_v23, %v2929_v41  ;;  %v2984_v31 = vshll.u32 %v14957_v58, 16  ;;  %v14984_v41 = vld [vmem:[#allocation2 + $0x70] sm:$0xf]  ;;  %v2970_v23 = vshll.u32 %v14963_v7, 16 }
 0x169   : > { %12784 = vmatprep.mubr.msk.bf16.mxu0 %vm1437_vm13, %v13817_v43  ;;  %v2886_v43 = vrot.slane %v2885_v8, 4  ;;  %v2901_v8 = vsel %vm14158_vm12, %v2896_v53, %v2900_v10  ;;  %v14998_v10 = vld [vmem:[#allocation2 + $0x68] sm:$0x1]  ;;  %v3008_v9 = vshll.u32 %v14984_v41, 16  ;;  %v3012_v53 = vshrl.u32 %v14984_v41, 16 }
 0x16a   : > { %v14979_v20 = vrot.slane %v2933_v15, 4  ;;  %v3023_v15 = vshrl.u32 %v2785_v29, 16  ;;  %v2972_v57 = vrot.slane %v2970_v23, 5  ;;  %v3047_v29 = vshrl.u32 %v2788_v50, 16 }
 0x16b   : > { %v2891_v2 = vsel %vm14158_vm12, %v2886_v43, %v14918_v36  ;;  %v2957_v36 = vor.u32 %v2956_v40, %v2953_v60  ;;  %v14995_v43 = vld [vmem:[%s18731_s1 + $0xc] sm:$0x3]  ;;  %v3036_v60 = vshrl.u32 %v14990_v5, 16  ;;  %v2968_v40 = vrot.slane %v2967_v0, 4 }
 0x16c   : > { %v2939_v35 = vsel %vm14158_vm12, %v14979_v20, %v14960_v21  ;;  %v3025_v61 = vrot.slane %v3023_v15, 4  ;;  %v3050_v0 = vshll.u32 %v2788_v50, 16  ;;  %v3056_v15 = vshll.u32 %v15025_v52, 16 }
 0x16d   : > { %v3038_v33 = vrot.slane %v3036_v60, 4  ;;  %v2791_v60 = vld [vmem:[#allocation2 + $0x90] sm:$0xf] }
 0x170   : > { %12785 = vmatmul.mubr.msk.bf16.gmra.mrb[28].mxu0 %vm1437_vm13, %v13818_v62  ;;  %v2943_v62 = vor.u32 %v2942_v54, %v14960_v21  ;;  %v2958_v54 = vrot.slane %v2957_v36, 4  ;;  %v3028_v36 = vrot.slane %v3026_v45, 5  ;;  %v2973_v21 = vsel %vm14158_vm12, %v2968_v40, %v2972_v57 }
 0x171   : > { %12790 = vmatprep.mubr.msk.bf16.mxu0 %vm1437_vm13, %v11674_v32  ;;  %v11676_v32 = vcombine.low %v2867_v17, %v2877_v3  ;;  %v11677_v17 = vcombine.low %v2891_v2, %v2901_v8  ;;  %v14988_v3 = vrot.slane %v2984_v31, 5  ;;  %v15010_v31 = vld [vmem:[#allocation2 + $0x74] sm:$0x1]  ;;  %v15012_v2 = vrot.slane %v3008_v9, 5 }
 0x172   : > { %v2944_v19 = vrot.slane %v2943_v62, 4  ;;  %v3014_v8 = vrot.slane %v3012_v53, 4  ;;  %v15021_v62 = vld [vmem:[#allocation2 + $0x80] sm:$0x1]  ;;  %v3029_v45 = vor.u32 %v3028_v36, %v3025_v61  ;;  %v3049_v57 = vrot.slane %v3047_v29, 4 }
 0x173   : > { %v2991_v37 = vor.u32 %v2990_v49, %v14988_v3  ;;  %v2963_v49 = vsel %vm14158_vm12, %v2958_v54, %v14965_v34  ;;  %v3060_v34 = vshrl.u32 %v15025_v52, 16  ;;  %v3071_v36 = vshrl.u32 %v2791_v60, 16 }
 0x174   : > { %v2949_v27 = vsel %vm14158_vm12, %v2944_v19, %v14982_v13  ;;  %v3018_v13 = vshll.u32 %v15010_v31, 16  ;;  %v3015_v53 = vor.u32 %v3014_v8, %v15012_v2  ;;  %v3042_v19 = vshll.u32 %v15021_v62, 16 }
 0x175   : > { %v11680_v40 = vcombine.low %v2963_v49, %v2973_v21  ;;  %v15047_v8 = vrot.slane %v3056_v15, 5  ;;  %v3062_v61 = vrot.slane %v3060_v34, 4  ;;  %v15051_v49 = vld [vmem:[#allocation2 + $0x8c] sm:$0x1] }
 0x176   : > { %v3020_v30 = vrot.slane %v3018_v13, 5  ;;  %v3016_v50 = vrot.slane %v3015_v53, 4  ;;  %v3066_v34 = vshll.u32 %v15051_v49, 16 }
 0x177   : > { %v3063_v15 = vor.u32 %v3062_v61, %v15047_v8  ;;  %v15075_v61 = vld [vmem:[#allocation2 + $0xa4] sm:$0x1] }
 0x178   : > { %12791 = vmatmul.mubr.msk.bf16.vlgmr.msra.gmra.mrb[0].mxu0 %vm1437_vm13, %v11675_v26  ;;  %v3032_v26 = vshll.u32 %v14990_v5, 16  ;;  %18905 = vst [vmem:[#allocation9_spill] sm:$0xff] %v15075_v61 }
 0x179   : > { %12823 = vmatpush3.bf16.msra.mxu0 %v14937_v46  ;;  %12794 = vmatprep.mubr.msk.bf16.mxu0 %vm1437_vm13, %v11676_v32  ;;  %v2994_v46 = vshll.u32 %v14998_v10, 16  ;;  %v3004_v32 = vrot.slane %v3002_v39, 5  ;;  %v2992_v39 = vrot.slane %v2991_v37, 4  ;;  %v2987_v37 = vsel %vm14158_vm12, %v2982_v24, %v14988_v3 }
 0x17a   : > { %13782 = vmatprep.subr.msk.bf16.mxu0 %vm1486_vm0, %v14995_v43  ;;  %v15023_v23 = vrot.slane %v3032_v26, 5  ;;  %v3052_v26 = vrot.slane %v3050_v0, 5  ;;  %v3044_v0 = vrot.slane %v3042_v19, 5 }
 0x17b   : > { %v2996_v20 = vrot.slane %v2994_v46, 5  ;;  %v3005_v9 = vor.u32 %v3004_v32, %v3001_v48  ;;  %v15045_v48 = vld [vmem:[#allocation2 + $0x94] sm:$0xf]  ;;  %v2794_v32 = vld [vmem:[#allocation2 + $0x9c] sm:$0xf] }
 0x17c   : > { %v3039_v54 = vor.u32 %v3038_v33, %v15023_v23  ;;  %v3074_v33 = vshll.u32 %v2791_v60, 16  ;;  %v3053_v3 = vor.u32 %v3052_v26, %v3049_v57  ;;  %v3080_v21 = vshll.u32 %v15045_v48, 16  ;;  %v15071_v60 = vld [vmem:[#allocation2 + $0x98] sm:$0x1] }
 0x17d   : > { %v3006_v46 = vrot.slane %v3005_v9, 4  ;;  %v3095_v13 = vshrl.u32 %v2794_v32, 16  ;;  %v3098_v24 = vshll.u32 %v2794_v32, 16  ;;  %v3021_v9 = vsel %vm14158_vm12, %v3016_v50, %v3020_v30 }
 0x17e   : > { %v3040_v29 = vrot.slane %v3039_v54, 4  ;;  %v3076_v54 = vrot.slane %v3074_v33, 5  ;;  %v3054_v26 = vrot.slane %v3053_v3, 4 }
 0x180   : > { %12795 = vmatmul.mubr.msk.bf16.gmra.mrb[4].mxu0 %vm1437_vm13, %v11677_v17  ;;  %v11679_v17 = vcombine.low %v2939_v35, %v2949_v27  ;;  %v15049_v35 = vld [vmem:[#allocation2 + $0xa0] sm:$0xf]  ;;  %v3030_v27 = vrot.slane %v3029_v45, 4  ;;  %v3073_v45 = vrot.slane %v3071_v36, 4 }
 0x181   : > { %12798 = vmatprep.mubr.msk.bf16.mxu0 %vm1437_vm13, %v11678_v55  ;;  %v2997_v55 = vsel %vm14158_vm12, %v2992_v39, %v2996_v20  ;;  %v3084_v20 = vshrl.u32 %v15045_v48, 16  ;;  %v3011_v39 = vsel %vm14158_vm12, %v3006_v46, %v15012_v2  ;;  %v3104_v53 = vshll.u32 %v15049_v35, 16 }
 0x182   : > { %v3108_v19 = vshrl.u32 %v15049_v35, 16  ;;  %v3035_v57 = vsel %vm14158_vm12, %v3030_v27, %v15023_v23  ;;  %v3045_v2 = vsel %vm14158_vm12, %v3040_v29, %v3044_v0  ;;  %v3100_v46 = vrot.slane %v3098_v24, 5  ;;  %v15080_v0 = vld [vmem:[#allocation2 + $0xac] sm:$0xf]  ;;  %v15084_v24 = vld [vmem:[#allocation2 + $0xb8] sm:$0xf] }
 0x183   : > { %v3086_v30 = vrot.slane %v3084_v20, 4  ;;  %v11681_v50 = vcombine.low %v2987_v37, %v2997_v55  ;;  %v11682_v32 = vcombine.low %v3011_v39, %v3021_v9  ;;  %v15077_v36 = vrot.slane %v3104_v53, 5  ;;  %18906 = vst [vmem:[#allocation10_spill] sm:$0xff] %v15080_v0 }
 0x184   : > { %v3110_v33 = vrot.slane %v3108_v19, 4  ;;  %v3064_v23 = vrot.slane %v3063_v15, 4  ;;  %v3068_v27 = vrot.slane %v3066_v34, 5  ;;  %v3077_v16 = vor.u32 %v3076_v54, %v3073_v45 }
 0x185   : > { %v3090_v29 = vshll.u32 %v15071_v60, 16  ;;  %v11683_v3 = vcombine.low %v3035_v57, %v3045_v2  ;;  %v3114_v37 = vshll.u32 %v15075_v61, 16  ;;  %v3119_v55 = vshrl.u32 %v2797_v25, 16  ;;  %v15100_v61 = vld [vmem:[#allocation2 + $0xc4] sm:$0xf] }
 0x186   : > { %v3111_v39 = vor.u32 %v3110_v33, %v15077_v36  ;;  %v3122_v9 = vshll.u32 %v2797_v25, 16  ;;  %v3128_v53 = vshll.u32 %v15080_v0, 16  ;;  %v3132_v19 = vshrl.u32 %v15080_v0, 16 }
 0x187   : > { %v3059_v15 = vsel %vm14158_vm12, %v3054_v26, %v15047_v8  ;;  %v3069_v34 = vsel %vm14158_vm12, %v3064_v23, %v3068_v27  ;;  %v3078_v45 = vrot.slane %v3077_v16, 4  ;;  %v3092_v54 = vrot.slane %v3090_v29, 5  ;;  %v2803_v23 = vld [vmem:[#allocation2 + $0xc0] sm:$0xf] }
 0x188   : > { %12799 = vmatmul.mubr.msk.bf16.gmra.mrb[8].mxu0 %vm1437_vm13, %v11679_v17  ;;  %v15073_v17 = vrot.slane %v3080_v21, 5  ;;  %v3156_v25 = vshrl.u32 %v15084_v24, 16  ;;  %v3121_v33 = vrot.slane %v3119_v55, 4  ;;  %v3124_v18 = vrot.slane %v3122_v9, 5  ;;  %v15108_v55 = vld [vmem:[#allocation2 + $0xbc] sm:$0x1] }
 0x189   : > { %12802 = vmatprep.mubr.msk.bf16.mxu0 %vm1437_vm13, %v11680_v40  ;;  %v3097_v40 = vrot.slane %v3095_v13, 4  ;;  %v2800_v13 = vld [vmem:[#allocation2 + $0xb4] sm:$0xf]  ;;  %v3130_v8 = vrot.slane %v3128_v53, 5  ;;  %v3134_v26 = vrot.slane %v3132_v19, 4  ;;  %v11684_v0 = vcombine.low %v3059_v15, %v3069_v34 }
 0x18a   : > { %v3087_v21 = vor.u32 %v3086_v30, %v15073_v17  ;;  %v3143_v57 = vshrl.u32 %v2800_v13, 16  ;;  %v3146_v2 = vshll.u32 %v2800_v13, 16  ;;  %v3152_v30 = vshll.u32 %v15084_v24, 16 }
 0x18b   : > { %v3101_v20 = vor.u32 %v3100_v46, %v3097_v40  ;;  %v3158_v13 = vrot.slane %v3156_v25, 4  ;;  %v3125_v53 = vor.u32 %v3124_v18, %v3121_v33  ;;  %v3135_v19 = vor.u32 %v3134_v26, %v3130_v8 }
 0x18c   : > { %v3088_v40 = vrot.slane %v3087_v21, 4  ;;  %v3145_v16 = vrot.slane %v3143_v57, 4  ;;  %v3148_v27 = vrot.slane %v3146_v2, 5  ;;  %v3154_v29 = vrot.slane %v3152_v30, 5 }
 0x18d   : > { %v3102_v46 = vrot.slane %v3101_v20, 4  ;;  %v3083_v21 = vsel %vm14158_vm12, %v3078_v45, %v15073_v17  ;;  %v3167_v17 = vshrl.u32 %v2803_v23, 16  ;;  %v3170_v15 = vshll.u32 %v2803_v23, 16  ;;  %v15120_v23 = vld [vmem:[#allocation2 + $0xc8] sm:$0x1] }
 0x18e   : > { %v3093_v20 = vsel %vm14158_vm12, %v3088_v40, %v3092_v54  ;;  %v3176_v34 = vshll.u32 %v15100_v61, 16  ;;  %v3180_v45 = vshrl.u32 %v15100_v61, 16  ;;  %v3149_v54 = vor.u32 %v3148_v27, %v3145_v16 }
 0x18f   : > { %v3159_v57 = vor.u32 %v3158_v13, %v3154_v29  ;;  %v11685_v2 = vcombine.low %v3083_v21, %v3093_v20  ;;  %v3136_v25 = vrot.slane %v3135_v19, 4  ;;  %v3172_v18 = vrot.slane %v3170_v15, 5 }
 0x190   : > { %12803 = vmatmul.mubr.msk.bf16.gmra.mrb[12].mxu0 %vm1437_vm13, %v11681_v50  ;;  %v3116_v50 = vrot.slane %v3114_v37, 5  ;;  %v3138_v37 = vshll.u32 %v15098_v28, 16  ;;  %v3182_v33 = vrot.slane %v3180_v45, 4  ;;  %v3186_v20 = vshll.u32 %v15120_v23, 16 }
 0x191   : > { %12806 = vmatprep.mubr.msk.bf16.mxu0 %vm1437_vm13, %v11682_v32  ;;  %v3112_v32 = vrot.slane %v3111_v39, 4  ;;  %v3107_v39 = vsel %vm14158_vm12, %v3102_v46, %v15077_v36  ;;  %v3126_v36 = vrot.slane %v3125_v53, 4  ;;  %v3169_v46 = vrot.slane %v3167_v17, 4 }
 0x192   : > { %v3140_v40 = vrot.slane %v3138_v37, 5  ;;  %v3484_v37 = vld [vmem:[#allocation2 + $0xc] sm:$0xe]  ;;  %v3550_v53 = vrot.slane %v14871_v4, 5  ;;  %v3188_v45 = vrot.slane %v3186_v20, 5  ;;  %v3578_v20 = vrot.slane %v14903_v38, 5 }
 0x193   : > { %v3117_v9 = vsel %vm14158_vm12, %v3112_v32, %v3116_v50  ;;  %v3178_v50 = vrot.slane %v3176_v34, 5  ;;  %v3160_v32 = vrot.slane %v3159_v57, 4  ;;  %v3131_v16 = vsel %vm14158_vm12, %v3126_v36, %v3130_v8 }
 0x194   : > { %v11686_v30 = vcombine.low %v3107_v39, %v3117_v9  ;;  %v3141_v27 = vsel %vm14158_vm12, %v3136_v25, %v3140_v40  ;;  %v3173_v13 = vor.u32 %v3172_v18, %v3169_v46  ;;  %v11706_v8 = vrot.slane %v3484_v37, 9  ;;  %v3486_v46 = vld [vmem:[#allocation2 + $0x24] sm:$0xe]  ;;  %v3488_v37 = vld [vmem:[#allocation2 + $0x3c] sm:$0xe] }
 0x195   : > { %v3183_v21 = vor.u32 %v3182_v33, %v3178_v50  ;;  %v11687_v19 = vcombine.low %v3131_v16, %v3141_v27  ;;  %v3553_v57 = vrot.slane %v14879_v1, 5  ;;  %v3557_v36 = vrot.slane %v14875_v11, 5 }
 0x196   : > { %v3174_v15 = vrot.slane %v3173_v13, 4  ;;  %v3551_v1 = vsel %vm14726_vm1, %v11706_v8, %v3550_v53  ;;  %v3564_v40 = vrot.slane %v14885_v63, 5  ;;  %v11708_v16 = vrot.slane %v3486_v46, 9 }
 0x197   : > { %v3184_v34 = vrot.slane %v3183_v21, 4  ;;  %v3571_v13 = vrot.slane %v14897_v12, 5  ;;  %v3574_v8 = vrot.slane %v14921_v6, 5  ;;  %v11710_v12 = vrot.slane %v3488_v37, 9  ;;  %v3494_v37 = vld [vmem:[#allocation2 + $0x84] sm:$0xe] }
 0x198   : > { %12807 = vmatmul.mubr.msk.bf16.gmra.mrb[16].mxu0 %vm1437_vm13, %v11683_v3  ;;  %v3162_v3 = vshll.u32 %v15108_v55, 16  ;;  %v3179_v4 = vsel %vm14158_vm12, %v3174_v15, %v3178_v50  ;;  %v3560_v50 = vrot.slane %v14889_v22, 5  ;;  %v3566_v27 = vrot.slane %v3564_v40, 4 }
 0x199   : > { %12810 = vmatprep.mubr.msk.bf16.mxu0 %vm1437_vm13, %v11684_v0  ;;  %v3150_v0 = vrot.slane %v3149_v54, 4  ;;  %v3552_v54 = vrot.slane %v3550_v53, 4  ;;  %v3565_v21 = vsel %vm14726_vm1, %v11708_v16, %v3564_v40  ;;  %v3580_v15 = vrot.slane %v3578_v20, 4 }
 0x19a   : > { %v3164_v26 = vrot.slane %v3162_v3, 5  ;;  %v944_v3 = vld [vmem:[#allocation2 + $0xb4] sm:$0xf]  ;;  %v3595_v40 = vrot.slane %v14963_v7, 5  ;;  %v3606_v7 = vrot.slane %v14984_v41, 5 }
 0x19b   : > { %v3155_v39 = vsel %vm14158_vm12, %v3150_v0, %v3154_v29  ;;  %948 = vst.msk [vmem:[#allocation2 + $0xcc] sm:$0xf] %vm624_vm3, %v944_v3  ;;  %v3189_v29 = vsel %vm14158_vm12, %v3184_v34, %v3188_v45  ;;  %v3554_v25 = vsel %vm14726_vm1, %v3552_v54, %v3553_v57  ;;  %v3581_v34 = vrot.slane %v14927_v14, 5  ;;  %v15170_v45 = vld [vmem:[%s18731_s1 + $0xe] sm:$0x3] }
 0x19c   : > { %v3165_v9 = vsel %vm14158_vm12, %v3160_v32, %v3164_v26  ;;  %v11689_v18 = vcombine.low %v3179_v4, %v3189_v29  ;;  %v11723_v0 = vcombine.low %v3551_v1, %v3554_v25  ;;  %v3559_v32 = vrot.slane %v3557_v36, 4  ;;  %v3489_v57 = vld [vmem:[#allocation2 + $0x48] sm:$0xe] }
 0x19d   : > { %v11688_v17 = vcombine.low %v3155_v39, %v3165_v9  ;;  %v3567_v26 = vrot.slane %v14905_v56, 5  ;;  %v3487_v56 = vld [vmem:[#allocation2 + $0x30] sm:$0xe]  ;;  %v3579_v14 = vsel %vm14726_vm1, %v11710_v12, %v3578_v20  ;;  %v3582_v54 = vsel %vm14726_vm1, %v3580_v15, %v3581_v34  ;;  %v3493_v20 = vld [vmem:[#allocation2 + $0x78] sm:$0xe] }
 0x19e   : > { %v3561_v63 = vsel %vm14726_vm1, %v3559_v32, %v3560_v50  ;;  %v11709_v53 = vrot.slane %v3487_v56, 9  ;;  %v3592_v3 = vrot.slane %v14942_v44, 5  ;;  %v11727_v29 = vcombine.low %v3579_v14, %v3582_v54  ;;  %v3492_v32 = vld [vmem:[#allocation2 + $0x6c] sm:$0xe] }
 0x19f   : > { %v3568_v22 = vsel %vm14726_vm1, %v3566_v27, %v3567_v26  ;;  %v3588_v1 = vrot.slane %v14952_v47, 5  ;;  %v3627_v34 = vrot.slane %v15045_v48, 5 }
 0x1a0   : > { %12811 = vmatmul.mubr.msk.bf16.gmra.mrb[20].mxu0 %vm1437_vm13, %v11685_v2  ;;  %v945_v2 = vld [vmem:[#allocation2 + $0xb8] sm:$0xf]  ;;  %v11725_v9 = vcombine.low %v3565_v21, %v3568_v22  ;;  %v3572_v38 = vsel %vm14726_vm1, %v11709_v53, %v3571_v13  ;;  %v3594_v25 = vrot.slane %v3592_v3, 4  ;;  %v3613_v22 = vrot.slane %v14990_v5, 5 }
 0x1a1   : > { %12814 = vmatprep.mubr.msk.bf16.mxu0 %vm1437_vm13, %v11686_v30  ;;  %949 = vst.msk [vmem:[#allocation2 + $0xd0] sm:$0xf] %vm624_vm3, %v945_v2  ;;  %v3485_v30 = vld [vmem:[#allocation2 + $0x18] sm:$0xe]  ;;  %v3490_v2 = vld [vmem:[#allocation2 + $0x54] sm:$0xe] }
 0x1a2   : > { %v11707_v33 = vrot.slane %v3485_v30, 9  ;;  %v11711_v30 = vrot.slane %v3489_v57, 9  ;;  %v3596_v47 = vsel %vm14726_vm1, %v3594_v25, %v3595_v40  ;;  %v11715_v53 = vrot.slane %v3493_v20, 9  ;;  %v3497_v40 = vld [vmem:[#allocation2 + $0xa8] sm:$0xe]  ;;  %v13819_v20 = vld [vmem:[#allocation2 + $0x18] sm:$0xff]  }
 0x1a3   : > { %v3623_v5 = vrot.slane %v15051_v49, 5  ;;  %v3634_v49 = vrot.slane %v15049_v35, 5 }
 0x1a4   : > { %v3558_v11 = vsel %vm14726_vm1, %v11707_v33, %v3557_v36  ;;  %v3614_v15 = vsel %vm14726_vm1, %v11715_v53, %v3613_v22  ;;  %v13823_v53 = vld [vmem:[#allocation2 + $0x48] sm:$0xff]  }
 0x1a5   : > { %v11724_v39 = vcombine.low %v3558_v11, %v3561_v63  ;;  %v3602_v11 = vrot.slane %v14998_v10, 5  ;;  %v11714_v63 = vrot.slane %v3492_v32, 9 }
 0x1a7   : > { %v3607_v56 = vsel %vm14726_vm1, %v11714_v63, %v3606_v7 }
 0x1a8   : > { %12815 = vmatmul.mubr.msk.bf16.gmra.mrb[24].mxu0 %vm1437_vm13, %v11687_v19  ;;  %v3573_v19 = vrot.slane %v3571_v13, 4  ;;  %v3608_v13 = vrot.slane %v3606_v7, 4  ;;  %v3644_v7 = vrot.slane %v15098_v28, 5 }
 0x1a9   : > { %12818 = vmatprep.mubr.msk.bf16.mxu0 %vm1437_vm13, %v11688_v17  ;;  %v4117_v17 = vsel %vm1486_vm0, %v14995_v43, 0  ;;  %v3585_v43 = vrot.slane %v14933_v59, 5  ;;  %v11712_v59 = vrot.slane %v3490_v2, 9  ;;  %v3630_v2 = vrot.slane %v15071_v60, 5 }
 0x1aa   : > { %v3575_v6 = vsel %vm14726_vm1, %v3573_v19, %v3574_v8  ;;  %v3615_v19 = vrot.slane %v3613_v22, 4  ;;  %v3616_v8 = vrot.slane %v15021_v62, 5  ;;  %v3658_v22 = vrot.slane %v15120_v23, 5 }
 0x1ab   : > { %v11726_v4 = vcombine.low %v3572_v38, %v3575_v6  ;;  %v3587_v36 = vrot.slane %v3585_v43, 4  ;;  %v3586_v44 = vsel %vm14726_vm1, %v11711_v30, %v3585_v43  ;;  %v3593_v33 = vsel %vm14726_vm1, %v11712_v59, %v3592_v3  ;;  %v3495_v6 = vld [vmem:[#allocation2 + $0x90] sm:$0xe]  ;;  %v3496_v43 = vld [vmem:[#allocation2 + $0x9c] sm:$0xe]  ;;  %v18907_v30 = vld [vmem:[#allocation9_spill] sm:$0xff] }
 0x1ac   : > { %v11729_v26 = vcombine.low %v3593_v33, %v3596_v47  ;;  %v11717_v57 = vrot.slane %v3495_v6, 9  ;;  %v3629_v3 = vrot.slane %v3627_v34, 4  ;;  %v3637_v48 = vrot.slane %v18907_v30, 5  ;;  %v13830_v30 = vld [vmem:[#allocation2 + $0x9c] sm:$0xff]  }
 0x1ad   : > { %v3589_v46 = vsel %vm14726_vm1, %v3587_v36, %v3588_v1  ;;  %v18908_v1 = vld [vmem:[#allocation10_spill] sm:$0xff]  ;;  %v11719_v47 = vrot.slane %v3497_v40, 9  ;;  %v4843_v23 = vsel %vm1486_vm0, %v15170_v45, 0  ;;  %v13831_v40 = vld [vmem:[#allocation2 + $0xa8] sm:$0xff]  }
 0x1ae   : > { %v11728_v50 = vcombine.low %v3586_v44, %v3589_v46  ;;  %v3628_v36 = vsel %vm14726_vm1, %v11717_v57, %v3627_v34  ;;  %v3631_v35 = vsel %vm14726_vm1, %v3629_v3, %v3630_v2  ;;  %v3641_v59 = vrot.slane %v18908_v1, 5  ;;  %v3498_v46 = vld [vmem:[#allocation2 + $0xb4] sm:$0xe] }
 0x1af   : > { %v3648_v44 = vrot.slane %v15084_v24, 5  ;;  %v11720_v32 = vrot.slane %v3498_v46, 9 }
 0x1b0   : > { %12819 = vmatmul.mubr.msk.bf16.gmra.mrb[28].mxu0 %vm1437_vm13, %v11689_v18  ;;  %v3599_v18 = vrot.slane %v14957_v58, 5  ;;  %v3609_v58 = vrot.slane %v15010_v31, 5  ;;  %v3620_v31 = vrot.slane %v15025_v52, 5  ;;  %v3617_v52 = vsel %vm14726_vm1, %v3615_v19, %v3616_v8  ;;  %v13825_v19 = vld [vmem:[#allocation2 + $0x60] sm:$0xff]   ;;  %v13826_v8 = vld [vmem:[#allocation2 + $0x6c] sm:$0xff]  }
 0x1b1   : > { %12824 = vmatprep.mubr.msk.bf16.mxu0 %vm1437_vm13, %v11723_v0  ;;  %v3491_v0 = vld [vmem:[#allocation2 + $0x60] sm:$0xe]  ;;  %v11732_v14 = vcombine.low %v3614_v15, %v3617_v52  ;;  %v3649_v28 = vsel %vm14726_vm1, %v11720_v32, %v3648_v44  ;;  %v13828_v15 = vld [vmem:[#allocation2 + $0x84] sm:$0xff]   ;;  %v13829_v52 = vld [vmem:[#allocation2 + $0x90] sm:$0xff]  }
 0x1b2   : > { %v11713_v16 = vrot.slane %v3491_v0, 9  ;;  %v3601_v27 = vrot.slane %v3599_v18, 4  ;;  %v3610_v10 = vsel %vm14726_vm1, %v3608_v13, %v3609_v58  ;;  %v3622_v12 = vrot.slane %v3620_v31, 4 }
 0x1b3   : > { %v3643_v0 = vrot.slane %v3641_v59, 4 }
 0x1b4   : > { %v3600_v21 = vsel %vm14726_vm1, %v11713_v16, %v3599_v18  ;;  %v3603_v41 = vsel %vm14726_vm1, %v3601_v27, %v3602_v11  ;;  %v3624_v62 = vsel %vm14726_vm1, %v3622_v12, %v3623_v5  ;;  %v11734_v18 = vcombine.low %v3628_v36, %v3631_v35  ;;  %v946_v11 = vld [vmem:[#allocation2 + $0xbc] sm:$0x1]  ;;  %v4312_v12 = vld [vmem:[#allocation2 + $0x18] sm:$0xf]  ;;  %v4318_v36 = vld [vmem:[#allocation2 + $0x30] sm:$0xf] }
 0x1b5   : > { %v3642_v16 = vsel %vm14726_vm1, %v11719_v47, %v3641_v59  ;;  %v3645_v24 = vsel %vm14726_vm1, %v3643_v0, %v3644_v7  ;;  %v3655_v27 = vrot.slane %v15100_v61, 5  ;;  %950 = vst.msk [vmem:[#allocation2 + $0xd4] sm:$0x1] %vm632_vm5, %v946_v11  ;;  %v15282_v5 = vld [vmem:[#allocation2 + $0x1c] sm:$0xf]  ;;  %v4361_v34 = vshrl.u32 %v4312_v12, 16 }
 0x1b6   : > { %v11736_v13 = vcombine.low %v3642_v16, %v3645_v24  ;;  %v4374_v6 = vshrl.u32 %v15282_v5, 16  ;;  %v15295_v35 = vld [vmem:[#allocation2 + $0x34] sm:$0xf]  ;;  %v4409_v0 = vshrl.u32 %v4318_v36, 16  ;;  %v4412_v7 = vshll.u32 %v4318_v36, 16 }
 0x1b7   : > { %v4363_v57 = vrot.slane %v4361_v34, 4  ;;  %v4418_v32 = vshll.u32 %v15295_v35, 16 }
 0x1b8   : > { %12825 = vmatmul.mubr.msk.bf16.vlgmr.msra.gmra.mrb[0].mxu0 %vm1437_vm13, %v11724_v39  ;;  %v11730_v39 = vcombine.low %v3600_v21, %v3603_v41  ;;  %v3657_v41 = vrot.slane %v3655_v27, 4 }
 0x1b9   : > { %12857 = vmatpush3.bf16.msra.mxu0 %v4117_v17  ;;  %12828 = vmatprep.mubr.msk.bf16.mxu0 %vm1437_vm13, %v11725_v9  ;;  %v11731_v9 = vcombine.low %v3607_v56, %v3610_v10  ;;  %v11716_v17 = vrot.slane %v3494_v37, 9  ;;  %v13821_v37 = vld [vmem:[#allocation2 + $0x30] sm:$0xff]  }
 0x1ba   : > { %13783 = vmatprep.subr.msk.bf16.mxu0 %vm1486_vm0, %v15170_v45  ;;  %v3659_v56 = vsel %vm14726_vm1, %v3657_v41, %v3658_v22  ;;  %v13824_v45 = vld [vmem:[#allocation2 + $0x54] sm:$0xff]   ;;  %v4324_v41 = vld [vmem:[#allocation2 + $0x48] sm:$0xf]  ;;  %v4411_v22 = vrot.slane %v4409_v0, 4 }
 0x1bb   : > { %v3621_v38 = vsel %vm14726_vm1, %v11716_v17, %v3620_v31  ;;  %v13820_v31 = vld [vmem:[#allocation2 + $0x24] sm:$0xff]   ;;  %v13827_v17 = vld [vmem:[#allocation2 + $0x78] sm:$0xff]  }
 0x1bc   : > { %v11733_v54 = vcombine.low %v3621_v38, %v3624_v62  ;;  %v4364_v38 = vshll.u32 %v4312_v12, 16  ;;  %v4370_v62 = vshll.u32 %v15282_v5, 16  ;;  %v13833_v12 = vld [vmem:[#allocation2 + $0xc0] sm:$0xff]  }
 0x1be   : > { %v4366_v3 = vrot.slane %v4364_v38, 5  ;;  %v15290_v2 = vrot.slane %v4370_v62, 5  ;;  %v4327_v62 = vld [vmem:[#allocation2 + $0x54] sm:$0xf] }
 0x1c0   : > { %12829 = vmatmul.mubr.msk.bf16.gmra.mrb[4].mxu0 %vm1437_vm13, %v11726_v4  ;;  %v11718_v4 = vrot.slane %v3496_v43, 9  ;;  %v15287_v43 = vld [vmem:[#allocation2 + $0x20] sm:$0x1] }
 0x1c1   : > { %12832 = vmatprep.mubr.msk.bf16.mxu0 %vm1437_vm13, %v11727_v29  ;;  %v3636_v29 = vrot.slane %v3634_v49, 4 }
 0x1c2   : > { %v3635_v25 = vsel %vm14726_vm1, %v11718_v4, %v3634_v49  ;;  %v4315_v49 = vld [vmem:[#allocation2 + $0x24] sm:$0xf]  ;;  %v4376_v4 = vrot.slane %v4374_v6, 4 }
 0x1c3   : > { %v3638_v60 = vsel %vm14726_vm1, %v3636_v29, %v3637_v48  ;;  %v15292_v29 = vld [vmem:[#allocation2 + $0x28] sm:$0xf]  ;;  %v4380_v48 = vshll.u32 %v15287_v43, 16 }
 0x1c4   : > { %v11735_v33 = vcombine.low %v3635_v25, %v3638_v60  ;;  %v4394_v1 = vshll.u32 %v15292_v29, 16  ;;  %v4398_v59 = vshrl.u32 %v15292_v29, 16  ;;  %v4321_v25 = vld [vmem:[#allocation2 + $0x3c] sm:$0xf]  ;;  %v15299_v60 = vld [vmem:[#allocation2 + $0x40] sm:$0xf]  ;;  %v4377_v46 = vor.u32 %v4376_v4, %v15290_v2 }
 0x1c5   : > { %v4436_v16 = vshll.u32 %v4321_v25, 16  ;;  %v4442_v24 = vshll.u32 %v15299_v60, 16  ;;  %v4382_v11 = vrot.slane %v4380_v48, 5 }
 0x1c8   : > { %12833 = vmatmul.mubr.msk.bf16.gmra.mrb[8].mxu0 %vm1437_vm13, %v11728_v50  ;;  %v3650_v50 = vrot.slane %v3648_v44, 4  ;;  %v4367_v44 = vor.u32 %v4366_v3, %v4363_v57 }
 0x1c9   : > { %12836 = vmatprep.mubr.msk.bf16.mxu0 %vm1437_vm13, %v11729_v26  ;;  %v3651_v26 = vrot.slane %v15108_v55, 5  ;;  %v3499_v55 = vld [vmem:[#allocation2 + $0xc0] sm:$0xe] }
 0x1ca   : > { %v11721_v21 = vrot.slane %v3499_v55, 9 }
 0x1cb   : > { %v3652_v63 = vsel %vm14726_vm1, %v3650_v50, %v3651_v26  ;;  %v4422_v50 = vshrl.u32 %v15295_v35, 16  ;;  %v4433_v26 = vshrl.u32 %v4321_v25, 16 }
 0x1cc   : > { %v11737_v58 = vcombine.low %v3649_v28, %v3652_v63  ;;  %v3656_v61 = vsel %vm14726_vm1, %v11721_v21, %v3655_v27  ;;  %v4446_v27 = vshrl.u32 %v15299_v60, 16  ;;  %v15309_v28 = vrot.slane %v4394_v1, 5  ;;  %v15313_v21 = vld [vmem:[#allocation2 + $0x38] sm:$0x1] }
 0x1cd   : > { %v11738_v10 = vcombine.low %v3656_v61, %v3659_v56  ;;  %v4400_v63 = vrot.slane %v4398_v59, 4  ;;  %v4414_v61 = vrot.slane %v4412_v7, 5  ;;  %v15315_v56 = vrot.slane %v4418_v32, 5  ;;  %v15343_v32 = vld [vmem:[#allocation2 + $0x58] sm:$0xf] }
 0x1ce   : > { %v4481_v1 = vshrl.u32 %v4327_v62, 16  ;;  %v4484_v59 = vshll.u32 %v4327_v62, 16 }
 0x1cf   : > { %v4415_v6 = vor.u32 %v4414_v61, %v4411_v22  ;;  %v4490_v61 = vshll.u32 %v15343_v32, 16 }
 0x1d0   : > { %12837 = vmatmul.mubr.msk.bf16.gmra.mrb[12].mxu0 %vm1437_vm13, %v11730_v39  ;;  %v15270_v39 = vld [vmem:[%s18731_s1 + $0x10] sm:$0x3] }
 0x1d1   : > { %12840 = vmatprep.mubr.msk.bf16.mxu0 %vm1437_vm13, %v11731_v9  ;;  %v13822_v9 = vld [vmem:[#allocation2 + $0x3c] sm:$0xff]  }
 0x1d8   : > { %12841 = vmatmul.mubr.msk.bf16.gmra.mrb[16].mxu0 %vm1437_vm13, %v11732_v14  ;;  %v4385_v14 = vshrl.u32 %v4315_v49, 16 }
 0x1d9   : > { %12844 = vmatprep.mubr.msk.bf16.mxu0 %vm1437_vm13, %v11733_v54  ;;  %v4388_v54 = vshll.u32 %v4315_v49, 16 }
 0x1db   : > { %v4390_v47 = vrot.slane %v4388_v54, 5 }
 0x1e0   : > { %12845 = vmatmul.mubr.msk.bf16.gmra.mrb[20].mxu0 %vm1437_vm13, %v11734_v18  ;;  %v15302_v18 = vld [vmem:[#allocation2 + $0x2c] sm:$0x1] }
 0x1e1   : > { %12848 = vmatprep.mubr.msk.bf16.mxu0 %vm1437_vm13, %v11735_v33  ;;  %v4387_v33 = vrot.slane %v4385_v14, 4  ;;  %v4404_v55 = vshll.u32 %v15302_v18, 16  ;;  %v4428_v14 = vshll.u32 %v15313_v21, 16 }
 0x1e3   : > { %v4430_v0 = vrot.slane %v4428_v14, 5 }
 0x1e8   : > { %12849 = vmatmul.mubr.msk.bf16.gmra.mrb[24].mxu0 %vm1437_vm13, %v11736_v13  ;;  %v4368_v13 = vrot.slane %v4367_v44, 4  ;;  %v15339_v44 = vld [vmem:[#allocation2 + $0x50] sm:$0x1] }
 0x1e9   : > { %12852 = vmatprep.mubr.msk.bf16.mxu0 %vm1437_vm13, %v11737_v58  ;;  %v4378_v58 = vrot.slane %v4377_v46, 4 }
 0x1ea   : > { %v4373_v57 = vsel %vm14158_vm12, %v4368_v13, %v15290_v2  ;;  %v4483_v13 = vrot.slane %v4481_v1, 4 }
 0x1eb   : > { %v4383_v3 = vsel %vm14158_vm12, %v4378_v58, %v4382_v11  ;;  %v13834_v11 = vld [vmem:[#allocation2 + $0xcc] sm:$0xff]   ;;  %v4486_v58 = vrot.slane %v4484_v59, 5 }
 0x1ed   : > { %v4487_v62 = vor.u32 %v4486_v58, %v4483_v13 }
 0x1f0   : > { %12853 = vmatmul.mubr.msk.bf16.gmra.mrb[28].mxu0 %vm1437_vm13, %v11738_v10  ;;  %v4424_v10 = vrot.slane %v4422_v50, 4  ;;  %v11789_v50 = vcombine.low %v4373_v57, %v4383_v3 }
 0x1f1   : > { %12858 = vmatprep.mubr.msk.bf16.mxu0 %vm1437_vm13, %v13819_v20  ;;  %v15317_v20 = vld [vmem:[#allocation2 + $0x4c] sm:$0xf] }
 0x1f2   : > { %v4466_v34 = vshll.u32 %v15317_v20, 16  ;;  %v4470_v38 = vshrl.u32 %v15317_v20, 16  ;;  %v4425_v49 = vor.u32 %v4424_v10, %v15315_v56  ;;  %v4494_v10 = vshrl.u32 %v15343_v32, 16 }
 0x1f4   : > { %v15341_v46 = vrot.slane %v4466_v34, 5  ;;  %v4472_v2 = vrot.slane %v4470_v38, 4  ;;  %v4496_v14 = vrot.slane %v4494_v10, 4 }
 0x1f6   : > { %v4473_v22 = vor.u32 %v4472_v2, %v15341_v46 }
 0x1f8   : > { %12859 = vmatmul.mubr.msk.bf16.vlgmr.msra.gmra.mrb[0].mxu0 %vm1437_vm13, %v13820_v31  ;;  %v15319_v31 = vld [vmem:[#allocation2 + $0x44] sm:$0x1] }
 0x1f9   : > { %12891 = vmatpush3.bf16.msra.mxu0 %v4843_v23  ;;  %12862 = vmatprep.mubr.msk.bf16.mxu0 %vm1437_vm13, %v13821_v37  ;;  %v4435_v37 = vrot.slane %v4433_v26, 4  ;;  %v4438_v23 = vrot.slane %v4436_v16, 5  ;;  %v4452_v54 = vshll.u32 %v15319_v31, 16 }
 0x1fa   : > { %13784 = vmatprep.subr.msk.bf16.mxu0 %vm1486_vm0, %v15270_v39 }
 0x1fb   : > { %v4439_v4 = vor.u32 %v4438_v23, %v4435_v37  ;;  %v4454_v7 = vrot.slane %v4452_v54, 5  ;;  %v15354_v37 = vld [vmem:[#allocation2 + $0x5c] sm:$0x1] }
 0x1fc   : > { %v4500_v54 = vshll.u32 %v15354_v37, 16 }
 0x1fd   : > { %v4440_v26 = vrot.slane %v4439_v4, 4 }
 0x200   : > { %12863 = vmatmul.mubr.msk.bf16.gmra.mrb[4].mxu0 %vm1437_vm13, %v13822_v9  ;;  %v15321_v9 = vrot.slane %v4442_v24, 5  ;;  %v4330_v24 = vld [vmem:[#allocation2 + $0x60] sm:$0xf] }
 0x201   : > { %12866 = vmatprep.mubr.msk.bf16.mxu0 %vm1437_vm13, %v13823_v53  ;;  %v4448_v53 = vrot.slane %v4446_v27, 4  ;;  %v15345_v27 = vld [vmem:[#allocation2 + $0x64] sm:$0xf]  ;;  %v4505_v23 = vshrl.u32 %v4330_v24, 16 }
 0x208   : > { %12867 = vmatmul.mubr.msk.bf16.gmra.mrb[8].mxu0 %vm1437_vm13, %v13824_v45  ;;  %v13832_v45 = vld [vmem:[#allocation2 + $0xb4] sm:$0xff]  }
 0x209   : > { %12870 = vmatprep.mubr.msk.bf16.mxu0 %vm1437_vm13, %v13825_v19  ;;  %v4391_v19 = vor.u32 %v4390_v47, %v4387_v33  ;;  %v4416_v33 = vrot.slane %v4415_v6, 4  ;;  %v4426_v47 = vrot.slane %v4425_v49, 4  ;;  %v15372_v6 = vld [vmem:[#allocation2 + $0x70] sm:$0xf]  ;;  %v15375_v49 = vrot.slane %v4490_v61, 5 }
 0x20a   : > { %v4538_v1 = vshll.u32 %v15372_v6, 16  ;;  %v4542_v59 = vshrl.u32 %v15372_v6, 16  ;;  %v15405_v61 = vld [vmem:[#allocation2 + $0x74] sm:$0x1] }
 0x20b   : > { %v4392_v25 = vrot.slane %v4391_v19, 4  ;;  %v4518_v19 = vshrl.u32 %v15345_v27, 16 }
 0x20c   : > { %v15400_v58 = vrot.slane %v4538_v1, 5 }
 0x20d   : > { %v4520_v4 = vrot.slane %v4518_v19, 4 }
 0x210   : > { %12871 = vmatmul.mubr.msk.bf16.gmra.mrb[12].mxu0 %vm1437_vm13, %v13826_v8  ;;  %v4457_v8 = vshrl.u32 %v4324_v41, 16 }
 0x211   : > { %12874 = vmatprep.mubr.msk.bf16.mxu0 %vm1437_vm13, %v13827_v17  ;;  %v4460_v17 = vshll.u32 %v4324_v41, 16  ;;  %v4397_v41 = vsel %vm14158_vm12, %v4392_v25, %v15309_v28 }
 0x212   : > { %v4459_v48 = vrot.slane %v4457_v8, 4 }
 0x213   : > { %v4462_v36 = vrot.slane %v4460_v17, 5  ;;  %v4431_v17 = vsel %vm14158_vm12, %v4426_v47, %v4430_v0  ;;  %v15389_v0 = vrot.slane %v4487_v62, 4 }
 0x215   : > { %v4493_v1 = vsel %vm14158_vm12, %v15389_v0, %v15375_v49 }
 0x218   : > { %12875 = vmatmul.mubr.msk.bf16.gmra.mrb[16].mxu0 %vm1437_vm13, %v13828_v15  ;;  %v4401_v15 = vor.u32 %v4400_v63, %v15309_v28  ;;  %v4463_v63 = vor.u32 %v4462_v36, %v4459_v48  ;;  %v4421_v28 = vsel %vm14158_vm12, %v4416_v33, %v15315_v56  ;;  %v4474_v56 = vrot.slane %v4473_v22, 4  ;;  %v15402_v22 = vld [vmem:[#allocation2 + $0x88] sm:$0xf] }
 0x219   : > { %12878 = vmatprep.mubr.msk.bf16.mxu0 %vm1437_vm13, %v13829_v52  ;;  %v15324_v52 = vrot.slane %v4404_v55, 5  ;;  %v4476_v55 = vshll.u32 %v15339_v44, 16  ;;  %v11791_v2 = vcombine.low %v4421_v28, %v4431_v17 }
 0x21a   : > { %v4464_v34 = vrot.slane %v4463_v63, 4 }
 0x21b   : > { %v4478_v38 = vrot.slane %v4476_v55, 5  ;;  %v4339_v55 = vld [vmem:[#allocation2 + $0x84] sm:$0xf] }
 0x21c   : > { %v4469_v47 = vsel %vm14158_vm12, %v4464_v34, %v15341_v46  ;;  %v4577_v28 = vshrl.u32 %v4339_v55, 16  ;;  %v4580_v17 = vshll.u32 %v4339_v55, 16  ;;  %v4586_v34 = vshll.u32 %v15402_v22, 16 }
 0x220   : > { %12879 = vmatmul.mubr.msk.bf16.gmra.mrb[20].mxu0 %vm1437_vm13, %v13830_v30  ;;  %v4449_v30 = vor.u32 %v4448_v53, %v15321_v9  ;;  %v4508_v53 = vshll.u32 %v4330_v24, 16  ;;  %v4479_v24 = vsel %vm14158_vm12, %v4474_v56, %v4478_v38  ;;  %v4590_v38 = vshrl.u32 %v15402_v22, 16 }
 0x221   : > { %12882 = vmatprep.mubr.msk.bf16.mxu0 %vm1437_vm13, %v13831_v40  ;;  %v4402_v40 = vrot.slane %v4401_v15, 4  ;;  %v11793_v19 = vcombine.low %v4469_v47, %v4479_v24  ;;  %v15427_v47 = vrot.slane %v4586_v34, 5 }
 0x222   : > { %v4450_v16 = vrot.slane %v4449_v30, 4  ;;  %v4510_v57 = vrot.slane %v4508_v53, 5  ;;  %v15380_v30 = vld [vmem:[#allocation2 + $0x68] sm:$0x1] }
 0x223   : > { %v4407_v8 = vsel %vm14158_vm12, %v4402_v40, %v15324_v52  ;;  %v4333_v52 = vld [vmem:[#allocation2 + $0x6c] sm:$0xf]  ;;  %v5313_v40 = vsel %vm1486_vm0, %v15270_v39, 0  ;;  %v4524_v63 = vshll.u32 %v15380_v30, 16 }
 0x224   : > { %v4455_v15 = vsel %vm14158_vm12, %v4450_v16, %v4454_v7  ;;  %v4529_v48 = vshrl.u32 %v4333_v52, 16  ;;  %v4532_v36 = vshll.u32 %v4333_v52, 16  ;;  %v11790_v25 = vcombine.low %v4397_v41, %v4407_v8  ;;  %v15394_v16 = vld [vmem:[#allocation2 + $0x7c] sm:$0xf] }
 0x225   : > { %v4497_v7 = vor.u32 %v4496_v14, %v15375_v49  ;;  %v4544_v41 = vrot.slane %v4542_v59, 4  ;;  %v4562_v53 = vshll.u32 %v15394_v16, 16  ;;  %v4548_v14 = vshll.u32 %v15405_v61, 16 }
 0x226   : > { %v4531_v13 = vrot.slane %v4529_v48, 4  ;;  %v4534_v46 = vrot.slane %v4532_v36, 5 }
 0x227   : > { %v4498_v8 = vrot.slane %v4497_v7, 4  ;;  %v4545_v56 = vor.u32 %v4544_v41, %v15400_v58  ;;  %v15416_v48 = vrot.slane %v4562_v53, 5  ;;  %v4592_v7 = vrot.slane %v4590_v38, 4 }
 0x228   : > { %12883 = vmatmul.mubr.msk.bf16.gmra.mrb[24].mxu0 %vm1437_vm13, %v13832_v45  ;;  %v4514_v45 = vshll.u32 %v15345_v27, 16  ;;  %v4535_v52 = vor.u32 %v4534_v46, %v4531_v13  ;;  %v4550_v0 = vrot.slane %v4548_v14, 5 }
 0x229   : > { %12886 = vmatprep.mubr.msk.bf16.mxu0 %vm1437_vm13, %v13833_v12  ;;  %v4445_v12 = vsel %vm14158_vm12, %v4440_v26, %v15321_v9  ;;  %v4507_v9 = vrot.slane %v4505_v23, 4  ;;  %v4336_v26 = vld [vmem:[#allocation2 + $0x78] sm:$0xf]  ;;  %v4546_v55 = vrot.slane %v4545_v56, 4  ;;  %v4593_v53 = vor.u32 %v4592_v7, %v15427_v47 }
 0x22a   : > { %v15378_v3 = vrot.slane %v4514_v45, 5  ;;  %v11792_v33 = vcombine.low %v4445_v12, %v4455_v15  ;;  %v4553_v10 = vshrl.u32 %v4336_v26, 16  ;;  %v4556_v23 = vshll.u32 %v4336_v26, 16  ;;  %v15429_v26 = vld [vmem:[#allocation2 + $0x94] sm:$0xf] }
 0x22b   : > { %v4566_v45 = vshrl.u32 %v15394_v16, 16  ;;  %v4526_v15 = vrot.slane %v4524_v63, 5  ;;  %v4536_v63 = vrot.slane %v4535_v52, 4  ;;  %v4348_v52 = vld [vmem:[#allocation2 + $0xa8] sm:$0xf] }
 0x22c   : > { %v4521_v39 = vor.u32 %v4520_v4, %v15378_v3  ;;  %v4558_v4 = vrot.slane %v4556_v23, 5 }
 0x22d   : > { %v4568_v36 = vrot.slane %v4566_v45, 4 }
 0x22e   : > { %v4522_v62 = vrot.slane %v4521_v39, 4 }
 0x22f   : > { %v4569_v46 = vor.u32 %v4568_v36, %v15416_v48 }
 0x230   : > { %12887 = vmatmul.mubr.msk.bf16.gmra.mrb[28].mxu0 %vm1437_vm13, %v13834_v11  ;;  %v4511_v11 = vor.u32 %v4510_v57, %v4507_v9  ;;  %v15414_v9 = vld [vmem:[#allocation2 + $0x80] sm:$0x1]  ;;  %v4555_v57 = vrot.slane %v4553_v10, 4  ;;  %v4527_v49 = vsel %vm14158_vm12, %v4522_v62, %v4526_v15  ;;  %v4610_v10 = vshll.u32 %v15429_v26, 16 }
 0x231   : > { %12892 = vmatprep.mubr.msk.bf16.mxu0 %vm1437_vm13, %v11789_v50  ;;  %v15392_v50 = vrot.slane %v4500_v54, 5  ;;  %v4342_v54 = vld [vmem:[#allocation2 + $0x90] sm:$0xf]  ;;  %v4541_v15 = vsel %vm14158_vm12, %v4536_v63, %v15400_v58  ;;  %v4570_v38 = vrot.slane %v4569_v46, 4  ;;  %v15449_v62 = vld [vmem:[#allocation2 + $0xa0] sm:$0xf] }
 0x232   : > { %v4512_v12 = vrot.slane %v4511_v11, 4  ;;  %v4601_v24 = vshrl.u32 %v4342_v54, 16  ;;  %v4604_v11 = vshll.u32 %v4342_v54, 16  ;;  %v4559_v13 = vor.u32 %v4558_v4, %v4555_v57  ;;  %v15453_v4 = vld [vmem:[#allocation2 + $0xac] sm:$0xf] }
 0x233   : > { %v4503_v59 = vsel %vm14158_vm12, %v4498_v8, %v15392_v50  ;;  %v4572_v50 = vshll.u32 %v15414_v9, 16  ;;  %v15451_v56 = vrot.slane %v4610_v10, 5  ;;  %v4638_v7 = vshrl.u32 %v15449_v62, 16 }
 0x234   : > { %v4517_v39 = vsel %vm14158_vm12, %v4512_v12, %v15378_v3  ;;  %v4614_v3 = vshrl.u32 %v15429_v26, 16  ;;  %v4603_v45 = vrot.slane %v4601_v24, 4  ;;  %v4606_v8 = vrot.slane %v4604_v11, 5 }
 0x235   : > { %v4574_v12 = vrot.slane %v4572_v50, 5  ;;  %v4560_v34 = vrot.slane %v4559_v13, 4  ;;  %v4649_v24 = vshrl.u32 %v4348_v52, 16  ;;  %v4652_v11 = vshll.u32 %v4348_v52, 16 }
 0x236   : > { %v4616_v14 = vrot.slane %v4614_v3, 4  ;;  %v4607_v58 = vor.u32 %v4606_v8, %v4603_v45  ;;  %v4662_v50 = vshrl.u32 %v15453_v4, 16  ;;  %v15475_v3 = vld [vmem:[#allocation2 + $0xa4] sm:$0x1] }
 0x237   : > { %v4651_v45 = vrot.slane %v4649_v24, 4  ;;  %v4654_v8 = vrot.slane %v4652_v11, 5 }
 0x238   : > { %12893 = vmatmul.mubr.msk.bf16.vlgmr.msra.gmra.mrb[0].mxu0 %vm1437_vm13, %v11790_v25  ;;  %v15425_v25 = vld [vmem:[#allocation2 + $0x8c] sm:$0x1]  ;;  %v4617_v63 = vor.u32 %v4616_v14, %v15451_v56  ;;  %v4608_v10 = vrot.slane %v4607_v58, 4  ;;  %v4354_v58 = vld [vmem:[#allocation2 + $0xc0] sm:$0xf] }
 0x239   : > { %12925 = vmatpush3.bf16.msra.mxu0 %v5313_v40  ;;  %12896 = vmatprep.mubr.msk.bf16.mxu0 %vm1437_vm13, %v11791_v2  ;;  %v4579_v40 = vrot.slane %v4577_v28, 4  ;;  %v4582_v2 = vrot.slane %v4580_v17, 5  ;;  %v4596_v41 = vshll.u32 %v15425_v25, 16  ;;  %v4345_v28 = vld [vmem:[#allocation2 + $0x9c] sm:$0xf]  ;;  %v11795_v17 = vcombine.low %v4517_v39, %v4527_v49 }
 0x23a   : > { %v4625_v54 = vshrl.u32 %v4345_v28, 16  ;;  %v4628_v57 = vshll.u32 %v4345_v28, 16  ;;  %v4565_v39 = vsel %vm14158_vm12, %v4560_v34, %v15416_v48  ;;  %v4575_v49 = vsel %vm14158_vm12, %v4570_v38, %v4574_v12  ;;  %v4351_v38 = vld [vmem:[#allocation2 + $0xb4] sm:$0xf] }
 0x23b   : > { %v4583_v23 = vor.u32 %v4582_v2, %v4579_v40  ;;  %v15455_v40 = vld [vmem:[#allocation2 + $0x98] sm:$0x1]  ;;  %v4634_v2 = vshll.u32 %v15449_v62, 16  ;;  %v4664_v34 = vrot.slane %v4662_v50, 4  ;;  %v4676_v24 = vshll.u32 %v4351_v38, 16 }
 0x23c   : > { %v4627_v13 = vrot.slane %v4625_v54, 4  ;;  %v4630_v46 = vrot.slane %v4628_v57, 5  ;;  %v4644_v54 = vshll.u32 %v15475_v3, 16  ;;  %v15484_v57 = vld [vmem:[#allocation2 + $0xb8] sm:$0xf] }
 0x23d   : > { %v4584_v36 = vrot.slane %v4583_v23, 4  ;;  %v15477_v23 = vrot.slane %v4634_v2, 5  ;;  %18909 = vst [vmem:[#allocation9_spill] sm:$0xff] %v15484_v57  ;;  %v15488_v2 = vld [vmem:[#allocation2 + $0xc4] sm:$0xf]  ;;  %v4682_v11 = vshll.u32 %v15484_v57, 16 }
 0x23e   : > { %v4631_v14 = vor.u32 %v4630_v46, %v4627_v13  ;;  %v4700_v13 = vshll.u32 %v4354_v58, 16  ;;  %v4706_v46 = vshll.u32 %v15488_v2, 16 }
 0x240   : > { %12897 = vmatmul.mubr.msk.bf16.gmra.mrb[4].mxu0 %vm1437_vm13, %v11792_v33  ;;  %v11794_v33 = vcombine.low %v4493_v1, %v4503_v59  ;;  %v4594_v1 = vrot.slane %v4593_v53, 4  ;;  %v4598_v59 = vrot.slane %v4596_v41, 5  ;;  %v4589_v41 = vsel %vm14158_vm12, %v4584_v36, %v15427_v47 }
 0x241   : > { %12900 = vmatprep.mubr.msk.bf16.mxu0 %vm1437_vm13, %v11793_v19  ;;  %v4551_v19 = vsel %vm14158_vm12, %v4546_v55, %v4550_v0  ;;  %v4658_v0 = vshll.u32 %v15453_v4, 16  ;;  %v4620_v55 = vshll.u32 %v15455_v40, 16  ;;  %v4640_v53 = vrot.slane %v4638_v7, 4 }
 0x242   : > { %v4599_v48 = vsel %vm14158_vm12, %v4594_v1, %v4598_v59  ;;  %v11796_v28 = vcombine.low %v4541_v15, %v4551_v19  ;;  %v4618_v47 = vrot.slane %v4617_v63, 4  ;;  %v4655_v59 = vor.u32 %v4654_v8, %v4651_v45 }
 0x243   : > { %v15481_v12 = vrot.slane %v4658_v0, 5  ;;  %v4622_v52 = vrot.slane %v4620_v55, 5  ;;  %v11798_v36 = vcombine.low %v4589_v41, %v4599_v48  ;;  %v4641_v1 = vor.u32 %v4640_v53, %v15477_v23 }
 0x244   : > { %v4673_v19 = vshrl.u32 %v4351_v38, 16  ;;  %v4632_v50 = vrot.slane %v4631_v14, 4  ;;  %v4646_v63 = vrot.slane %v4644_v54, 5  ;;  %v4697_v55 = vshrl.u32 %v4354_v58, 16 }
 0x245   : > { %v4665_v7 = vor.u32 %v4664_v34, %v15481_v12  ;;  %v4623_v0 = vsel %vm14158_vm12, %v4618_v47, %v4622_v52  ;;  %v4710_v41 = vshrl.u32 %v15488_v2, 16  ;;  %v4642_v48 = vrot.slane %v4641_v1, 4  ;;  %v4357_v47 = vld [vmem:[#allocation2 + $0xcc] sm:$0xf] }
 0x246   : > { %v4656_v53 = vrot.slane %v4655_v59, 4  ;;  %v4675_v8 = vrot.slane %v4673_v19, 4  ;;  %v4678_v34 = vrot.slane %v4676_v24, 5  ;;  %v4699_v52 = vrot.slane %v4697_v55, 4  ;;  %v15512_v19 = vld [vmem:[#allocation2 + $0xc8] sm:$0x1] }
 0x247   : > { %v4702_v14 = vrot.slane %v4700_v13, 5  ;;  %v4708_v54 = vrot.slane %v4706_v46, 5  ;;  %v4712_v58 = vrot.slane %v4710_v41, 4  ;;  %v4637_v1 = vsel %vm14158_vm12, %v4632_v50, %v15477_v23 }
 0x248   : > { %12901 = vmatmul.mubr.msk.bf16.gmra.mrb[8].mxu0 %vm1437_vm13, %v11794_v33  ;;  %v11797_v33 = vcombine.low %v4565_v39, %v4575_v49  ;;  %v4686_v39 = vshrl.u32 %v15484_v57, 16  ;;  %v4613_v49 = vsel %vm14158_vm12, %v4608_v10, %v15451_v56  ;;  %v4684_v56 = vrot.slane %v4682_v11, 5  ;;  %v15504_v57 = vld [vmem:[#allocation2 + $0xd0] sm:$0xf] }
 0x249   : > { %12904 = vmatprep.mubr.msk.bf16.mxu0 %vm1437_vm13, %v11795_v17  ;;  %v15479_v17 = vld [vmem:[#allocation2 + $0xb0] sm:$0x1]  ;;  %v11799_v38 = vcombine.low %v4613_v49, %v4623_v0  ;;  %v4647_v59 = vsel %vm14158_vm12, %v4642_v48, %v4646_v63  ;;  %v4679_v11 = vor.u32 %v4678_v34, %v4675_v8  ;;  %v4721_v23 = vshrl.u32 %v4357_v47, 16 }
 0x24a   : > { %v4668_v15 = vshll.u32 %v15479_v17, 16  ;;  %v4688_v10 = vrot.slane %v4686_v39, 4  ;;  %v4724_v49 = vshll.u32 %v4357_v47, 16  ;;  %v4730_v0 = vshll.u32 %v15504_v57, 16  ;;  %v15524_v47 = vld [vmem:[#allocation2 + $0xd4] sm:$0x1] }
 0x24b   : > { %v4734_v50 = vshrl.u32 %v15504_v57, 16  ;;  %v4703_v63 = vor.u32 %v4702_v14, %v4699_v52  ;;  %v4713_v55 = vor.u32 %v4712_v58, %v4708_v54  ;;  %v11800_v13 = vcombine.low %v4637_v1, %v4647_v59 }
 0x24c   : > { %v4670_v45 = vrot.slane %v4668_v15, 5  ;;  %v4689_v39 = vor.u32 %v4688_v10, %v4684_v56  ;;  %v4732_v8 = vrot.slane %v4730_v0, 5  ;;  %v4740_v59 = vshll.u32 %v15524_v47, 16 }
 0x24d   : > { %v4704_v34 = vrot.slane %v4703_v63, 4  ;;  %v4714_v10 = vrot.slane %v4713_v55, 4  ;;  %v5107_v55 = vrot.slane %v15287_v43, 5  ;;  %v5118_v43 = vrot.slane %v15295_v35, 5 }
 0x24e   : > { %v4690_v41 = vrot.slane %v4689_v39, 4  ;;  %v4742_v0 = vrot.slane %v4740_v59, 5 }
 0x250   : > { %12905 = vmatmul.mubr.msk.bf16.gmra.mrb[12].mxu0 %vm1437_vm13, %v11796_v28  ;;  %v4666_v28 = vrot.slane %v4665_v7, 4  ;;  %v4661_v7 = vsel %vm14158_vm12, %v4656_v53, %v15481_v12  ;;  %v4680_v12 = vrot.slane %v4679_v11, 4  ;;  %v4723_v53 = vrot.slane %v4721_v23, 4  ;;  %v5038_v11 = vld [vmem:[#allocation2 + $0x18] sm:$0xe] }
 0x251   : > { %12908 = vmatprep.mubr.msk.bf16.mxu0 %vm1437_vm13, %v11797_v33  ;;  %v15502_v33 = vld [vmem:[#allocation2 + $0xbc] sm:$0x1] }
 0x252   : > { %v4692_v15 = vshll.u32 %v15502_v33, 16  ;;  %v4671_v24 = vsel %vm14158_vm12, %v4666_v28, %v4670_v45  ;;  %v4726_v45 = vrot.slane %v4724_v49, 5  ;;  %v4736_v28 = vrot.slane %v4734_v50, 4 }
 0x253   : > { %v11801_v46 = vcombine.low %v4661_v7, %v4671_v24  ;;  %v4685_v52 = vsel %vm14158_vm12, %v4680_v12, %v4684_v56  ;;  %v5104_v24 = vrot.slane %v15282_v5, 5  ;;  %v11821_v50 = vrot.slane %v5038_v11, 9  ;;  %v5039_v12 = vld [vmem:[#allocation2 + $0x24] sm:$0xe] }
 0x254   : > { %v4694_v48 = vrot.slane %v4692_v15, 5  ;;  %v4727_v58 = vor.u32 %v4726_v45, %v4723_v53  ;;  %v4737_v1 = vor.u32 %v4736_v28, %v4732_v8  ;;  %v4709_v15 = vsel %vm14158_vm12, %v4704_v34, %v4708_v54 }
 0x255   : > { %v5106_v63 = vrot.slane %v5104_v24, 4  ;;  %v11822_v45 = vrot.slane %v5039_v12, 9  ;;  %v5128_v11 = vrot.slane %v15319_v31, 5 }
 0x256   : > { %v4695_v14 = vsel %vm14158_vm12, %v4690_v41, %v4694_v48  ;;  %v4728_v23 = vrot.slane %v4727_v58, 4  ;;  %v4738_v49 = vrot.slane %v4737_v1, 4  ;;  %v5040_v41 = vld [vmem:[#allocation2 + $0x30] sm:$0xe]  ;;  %v5041_v58 = vld [vmem:[#allocation2 + $0x3c] sm:$0xe] }
 0x257   : > { %v11802_v39 = vcombine.low %v4685_v52, %v4695_v14  ;;  %v11823_v34 = vrot.slane %v5040_v41, 9  ;;  %v5125_v52 = vrot.slane %v15299_v60, 5  ;;  %v5042_v1 = vld [vmem:[#allocation2 + $0x48] sm:$0xe]  ;;  %v5135_v60 = vrot.slane %v15339_v44, 5 }
 0x258   : > { %12909 = vmatmul.mubr.msk.bf16.gmra.mrb[16].mxu0 %vm1437_vm13, %v11798_v36  ;;  %v4716_v36 = vshll.u32 %v15512_v19, 16  ;;  %v4733_v54 = vsel %vm14158_vm12, %v4728_v23, %v4732_v8  ;;  %v4743_v5 = vsel %vm14158_vm12, %v4738_v49, %v4742_v0  ;;  %v5114_v8 = vrot.slane %v15302_v18, 5 }
 0x259   : > { %12912 = vmatprep.mubr.msk.bf16.mxu0 %vm1437_vm13, %v11799_v38  ;;  %v11804_v48 = vcombine.low %v4733_v54, %v4743_v5  ;;  %v5119_v14 = vsel %vm14726_vm1, %v11823_v34, %v5118_v43  ;;  %v5139_v49 = vrot.slane %v15343_v32, 5  ;;  %v5146_v44 = vrot.slane %v15345_v27, 5 }
 0x25a   : > { %v4718_v38 = vrot.slane %v4716_v36, 5  ;;  %v5111_v36 = vrot.slane %v15292_v29, 5  ;;  %v5121_v29 = vrot.slane %v15313_v21, 5  ;;  %v5132_v21 = vrot.slane %v15317_v20, 5 }
 0x25b   : > { %v5148_v12 = vrot.slane %v5146_v44, 4  ;;  %v5149_v32 = vrot.slane %v15380_v30, 5  ;;  %v5153_v41 = vrot.slane %v15372_v6, 5  ;;  %v5160_v30 = vrot.slane %v15394_v16, 5 }
 0x25c   : > { %v4719_v7 = vsel %vm14158_vm12, %v4714_v10, %v4718_v38  ;;  %v5113_v28 = vrot.slane %v5111_v36, 4  ;;  %v5120_v10 = vrot.slane %v5118_v43, 4  ;;  %v5112_v38 = vsel %vm14726_vm1, %v11822_v45, %v5111_v36  ;;  %v5046_v45 = vld [vmem:[#allocation2 + $0x78] sm:$0xe] }
 0x25d   : > { %v11803_v56 = vcombine.low %v4709_v15, %v4719_v7  ;;  %v11824_v7 = vrot.slane %v5041_v58, 9  ;;  %v5141_v36 = vrot.slane %v5139_v49, 4  ;;  %v5163_v6 = vrot.slane %v15414_v9, 5  ;;  %v5047_v58 = vld [vmem:[#allocation2 + $0x84] sm:$0xe] }
 0x25e   : > { %v5115_v35 = vsel %vm14726_vm1, %v5113_v28, %v5114_v8  ;;  %v5122_v18 = vsel %vm14726_vm1, %v5120_v10, %v5121_v29  ;;  %v5155_v10 = vrot.slane %v5153_v41, 4  ;;  %v5156_v29 = vrot.slane %v15405_v61, 5 }
 0x25f   : > { %v11839_v59 = vcombine.low %v5112_v38, %v5115_v35  ;;  %v11840_v15 = vcombine.low %v5119_v14, %v5122_v18  ;;  %v5126_v23 = vsel %vm14726_vm1, %v11824_v7, %v5125_v52  ;;  %v11829_v38 = vrot.slane %v5046_v45, 9 }
 0x260   : > { %12913 = vmatmul.mubr.msk.bf16.gmra.mrb[20].mxu0 %vm1437_vm13, %v11800_v13  ;;  %v5105_v13 = vsel %vm14726_vm1, %v11821_v50, %v5104_v24  ;;  %v5127_v24 = vrot.slane %v5125_v52, 4  ;;  %v5043_v50 = vld [vmem:[#allocation2 + $0x54] sm:$0xe]  ;;  %v5162_v35 = vrot.slane %v5160_v30, 4  ;;  %v5157_v16 = vsel %vm14726_vm1, %v5155_v10, %v5156_v29  ;;  %v5053_v10 = vld [vmem:[#allocation2 + $0xcc] sm:$0xe] }
 0x261   : > { %12916 = vmatprep.mubr.msk.bf16.mxu0 %vm1437_vm13, %v11801_v46  ;;  %v5108_v46 = vsel %vm14726_vm1, %v5106_v63, %v5107_v55  ;;  %v5044_v63 = vld [vmem:[#allocation2 + $0x60] sm:$0xe]  ;;  %v11826_v5 = vrot.slane %v5043_v50, 9  ;;  %v5167_v14 = vrot.slane %v15402_v22, 5  ;;  %v5161_v18 = vsel %vm14726_vm1, %v11829_v38, %v5160_v30 }
 0x262   : > { %v11838_v53 = vcombine.low %v5105_v13, %v5108_v46  ;;  %v5129_v20 = vsel %vm14726_vm1, %v5127_v24, %v5128_v11  ;;  %v5142_v13 = vrot.slane %v15354_v37, 5  ;;  %v11827_v46 = vrot.slane %v5044_v63, 9 }
 0x263   : > { %v11841_v55 = vcombine.low %v5126_v23, %v5129_v20  ;;  %v5140_v43 = vsel %vm14726_vm1, %v11826_v5, %v5139_v49  ;;  %v5150_v37 = vsel %vm14726_vm1, %v5148_v12, %v5149_v32  ;;  %v5164_v61 = vsel %vm14726_vm1, %v5162_v35, %v5163_v6  ;;  %v5049_v20 = vld [vmem:[#allocation2 + $0x9c] sm:$0xe]  ;;  %v5050_v49 = vld [vmem:[#allocation2 + $0xa8] sm:$0xe]  ;;  %v5051_v12 = vld [vmem:[#allocation2 + $0xb4] sm:$0xe] }
 0x264   : > { %v5143_v27 = vsel %vm14726_vm1, %v5141_v36, %v5142_v13  ;;  %v5174_v9 = vrot.slane %v15429_v26, 5  ;;  %v5169_v7 = vrot.slane %v5167_v14, 4  ;;  %v5170_v24 = vrot.slane %v15425_v25, 5  ;;  %v18910_v36 = vld [vmem:[#allocation9_spill] sm:$0xff]  ;;  %v5052_v32 = vld [vmem:[#allocation2 + $0xc0] sm:$0xe] }
 0x265   : > { %v11843_v28 = vcombine.low %v5140_v43, %v5143_v27  ;;  %v5177_v22 = vrot.slane %v15455_v40, 5  ;;  %v5188_v40 = vrot.slane %v15453_v4, 5  ;;  %v11832_v50 = vrot.slane %v5049_v20, 9 }
 0x266   : > { %v5171_v26 = vsel %vm14726_vm1, %v5169_v7, %v5170_v24  ;;  %v5184_v63 = vrot.slane %v15475_v3, 5  ;;  %v5195_v13 = vrot.slane %v18910_v36, 5  ;;  %v5205_v45 = vrot.slane %v15512_v19, 5 }
 0x267   : > { %v11836_v38 = vrot.slane %v5053_v10, 9  ;;  %v5212_v6 = vrot.slane %v15524_v47, 5 }
 0x268   : > { %12917 = vmatmul.mubr.msk.bf16.gmra.mrb[24].mxu0 %vm1437_vm13, %v11802_v39  ;;  %v11825_v39 = vrot.slane %v5042_v1, 9 }
 0x269   : > { %12920 = vmatprep.mubr.msk.bf16.mxu0 %vm1437_vm13, %v11803_v56  ;;  %v5134_v56 = vrot.slane %v5132_v21, 4 }
 0x26a   : > { %v5133_v0 = vsel %vm14726_vm1, %v11825_v39, %v5132_v21  ;;  %v5048_v21 = vld [vmem:[#allocation2 + $0x90] sm:$0xe]  ;;  %v5176_v39 = vrot.slane %v5174_v9, 4 }
 0x26b   : > { %v5136_v31 = vsel %vm14726_vm1, %v5134_v56, %v5135_v60  ;;  %v11831_v11 = vrot.slane %v5048_v21, 9  ;;  %v5181_v60 = vrot.slane %v15449_v62, 5  ;;  %v5191_v62 = vrot.slane %v15479_v17, 5 }
 0x26c   : > { %v11842_v54 = vcombine.low %v5133_v0, %v5136_v31  ;;  %v5178_v25 = vsel %vm14726_vm1, %v5176_v39, %v5177_v22  ;;  %v5202_v17 = vrot.slane %v15488_v2, 5 }
 0x26d   : > { %v5175_v23 = vsel %vm14726_vm1, %v11831_v11, %v5174_v9  ;;  %v5182_v5 = vsel %vm14726_vm1, %v11832_v50, %v5181_v60 }
 0x26e   : > { %v11848_v31 = vcombine.low %v5175_v23, %v5178_v25  ;;  %v5204_v30 = vrot.slane %v5202_v17, 4 }
 0x270   : > { %12921 = vmatmul.mubr.msk.bf16.gmra.mrb[28].mxu0 %vm1437_vm13, %v11804_v48  ;;  %v5147_v48 = vsel %vm14726_vm1, %v11827_v46, %v5146_v44  ;;  %v5183_v44 = vrot.slane %v5181_v60, 4 }
 0x271   : > { %12926 = vmatprep.mubr.msk.bf16.mxu0 %vm1437_vm13, %v11838_v53  ;;  %v5045_v53 = vld [vmem:[#allocation2 + $0x6c] sm:$0xe]  ;;  %v11844_v8 = vcombine.low %v5147_v48, %v5150_v37  ;;  %v5197_v48 = vrot.slane %v5195_v13, 4  ;;  %v5198_v37 = vrot.slane %v15502_v33, 5  ;;  %v5206_v33 = vsel %vm14726_vm1, %v5204_v30, %v5205_v45 }
 0x272   : > { %v11828_v34 = vrot.slane %v5045_v53, 9  ;;  %v5185_v4 = vsel %vm14726_vm1, %v5183_v44, %v5184_v63  ;;  %v11835_v53 = vrot.slane %v5052_v32, 9 }
 0x273   : > { %v11849_v43 = vcombine.low %v5182_v5, %v5185_v4  ;;  %v5199_v2 = vsel %vm14726_vm1, %v5197_v48, %v5198_v37 }
 0x274   : > { %v5154_v52 = vsel %vm14726_vm1, %v11828_v34, %v5153_v41  ;;  %v11834_v41 = vrot.slane %v5051_v12, 9  ;;  %v5203_v34 = vsel %vm14726_vm1, %v11835_v53, %v5202_v17 }
 0x275   : > { %v11845_v1 = vcombine.low %v5154_v52, %v5157_v16  ;;  %v11852_v29 = vcombine.low %v5203_v34, %v5206_v33 }
 0x278   : > { %12927 = vmatmul.mubr.msk.bf16.vlgmr.msra.gmra.mrb[0].mxu0 %vm1437_vm13, %v11839_v59  ;;  %v11846_v59 = vcombine.low %v5161_v18, %v5164_v61 }
 0x279   : > { %12930 = vmatprep.mubr.msk.bf16.mxu0 %vm1437_vm13, %v11840_v15  ;;  %v11830_v15 = vrot.slane %v5047_v58, 9 }
 0x27b   : > { %v5168_v56 = vsel %vm14726_vm1, %v11830_v15, %v5167_v14 }
 0x27c   : > { %v11847_v0 = vcombine.low %v5168_v56, %v5171_v26 }
 0x280   : > { %12931 = vmatmul.mubr.msk.bf16.gmra.mrb[4].mxu0 %vm1437_vm13, %v11841_v55  ;;  %v11833_v55 = vrot.slane %v5050_v49, 9 }
 0x281   : > { %12934 = vmatprep.mubr.msk.bf16.mxu0 %vm1437_vm13, %v11842_v54  ;;  %v5190_v54 = vrot.slane %v5188_v40, 4 }
 0x282   : > { %v5189_v46 = vsel %vm14726_vm1, %v11833_v55, %v5188_v40 }
 0x283   : > { %v5192_v3 = vsel %vm14726_vm1, %v5190_v54, %v5191_v62 }
 0x284   : > { %v11850_v27 = vcombine.low %v5189_v46, %v5192_v3 }
 0x288   : > { %12935 = vmatmul.mubr.msk.bf16.gmra.mrb[8].mxu0 %vm1437_vm13, %v11843_v28  ;;  %v5196_v28 = vsel %vm14726_vm1, %v11834_v41, %v5195_v13 }
 0x289   : > { %12938 = vmatprep.mubr.msk.bf16.mxu0 %vm1437_vm13, %v11844_v8  ;;  %v5209_v8 = vrot.slane %v15504_v57, 5  ;;  %v11851_v19 = vcombine.low %v5196_v28, %v5199_v2 }
 0x28b   : > { %v5211_v35 = vrot.slane %v5209_v8, 4  ;;  %v5210_v57 = vsel %vm14726_vm1, %v11836_v38, %v5209_v8 }
 0x28d   : > { %v5213_v52 = vsel %vm14726_vm1, %v5211_v35, %v5212_v6 }
 0x28e   : > { %v11853_v16 = vcombine.low %v5210_v57, %v5213_v52 }
 0x290   : > { %12939 = vmatmul.mubr.msk.bf16.gmra.mrb[12].mxu0 %vm1437_vm13, %v11845_v1 }
 0x291   : > { %12942 = vmatprep.mubr.msk.bf16.mxu0 %vm1437_vm13, %v11846_v59 }
 0x298   : > { %12943 = vmatmul.mubr.msk.bf16.gmra.mrb[16].mxu0 %vm1437_vm13, %v11847_v0 }
 0x299   : > { %12946 = vmatprep.mubr.msk.bf16.mxu0 %vm1437_vm13, %v11848_v31 }
 0x2a0   : > { %12947 = vmatmul.mubr.msk.bf16.gmra.mrb[20].mxu0 %vm1437_vm13, %v11849_v43 }
 0x2a1   : > { %12950 = vmatprep.mubr.msk.bf16.mxu0 %vm1437_vm13, %v11850_v27 }
 0x2a8   : > { %12951 = vmatmul.mubr.msk.bf16.gmra.mrb[24].mxu0 %vm1437_vm13, %v11851_v19 }
 0x2a9   : > { %12954 = vmatprep.mubr.msk.bf16.mxu0 %vm1437_vm13, %v11852_v29 }
 0x2b0   : > { %12955 = vmatmul.mubr.msk.bf16.gmra.mrb[28].mxu0 %vm1437_vm13, %v11853_v16 }
 0x34b   : > { %v15656_v14 = vpop.f32.mrb[0].mxu0 }
 0x34c   : > { %v15658_v18 = vpop.f32.mrb[1].mxu0  ;;  %v5580_v9 = vmul.f32 %v15656_v14, %v15656_v14  ;;  %v5511_v7 = vsel %vm1437_vm13, %v15656_v14, 0.0 }
 0x34d   : > { %v5578_v47 = vmul.f32 %v15658_v18, %v15658_v18  ;;  %v15662_v61 = vpop.f32.mrb[2].mxu0  ;;  %v5508_v21 = vsel %vm1437_vm13, %v15658_v18, 0.0 }
 0x34e   : > { %v15664_v58 = vpop.f32.mrb[3].mxu0  ;;  %v5581_v11 = vmul.f32 %v15662_v61, %v15662_v61  ;;  %v5613_v26 = vsel %vm1437_vm13, %v5580_v9, 0.0  ;;  %v5513_v60 = vsel %vm1437_vm13, %v15662_v61, 0.0 }
 0x34f   : > { %v5509_v1 = vsel %vm1437_vm13, %v15664_v58, 0.0  ;;  %v5579_v59 = vmul.f32 %v15664_v58, %v15664_v58  ;;  %v5610_v24 = vsel %vm1437_vm13, %v5578_v47, 0.0 }
 0x350   : > { %v5510_v15 = vadd.f32 %v5509_v1, %v5508_v21  ;;  %v5615_v49 = vsel %vm1437_vm13, %v5581_v11, 0.0 }
 0x351   : > { %v5611_v39 = vsel %vm1437_vm13, %v5579_v59, 0.0 }
 0x352   : > { %v5512_v22 = vadd.f32 %v5511_v7, %v5510_v15  ;;  %v5612_v56 = vadd.f32 %v5611_v39, %v5610_v24 }
 0x353   : > { %v15683_v23 = vpop.f32.mrb[4].mxu0 }
 0x354   : > { %v5614_v25 = vadd.f32 %v5613_v26, %v5612_v56  ;;  %v15685_v20 = vpop.f32.mrb[5].mxu0  ;;  %v5514_v40 = vadd.f32 %v5513_v60, %v5512_v22  ;;  %v5584_v54 = vmul.f32 %v15683_v23, %v15683_v23  ;;  %v5519_v46 = vsel %vm1437_vm13, %v15683_v23, 0.0 }
 0x355   : > { %v5515_v0 = vsel %vm1437_vm13, %v15685_v20, 0.0  ;;  %v5582_v31 = vmul.f32 %v15685_v20, %v15685_v20  ;;  %v15692_v50 = vpop.f32.mrb[6].mxu0 }
 0x356   : > { %v5516_v44 = vadd.f32 %v5515_v0, %v5514_v40  ;;  %v5616_v63 = vadd.f32 %v5615_v49, %v5614_v25  ;;  %v15694_v55 = vpop.f32.mrb[7].mxu0  ;;  %v5585_v3 = vmul.f32 %v15692_v50, %v15692_v50  ;;  %v5621_v43 = vsel %vm1437_vm13, %v5584_v54, 0.0 }
 0x357   : > { %v5617_v62 = vsel %vm1437_vm13, %v5582_v31, 0.0  ;;  %v5517_v5 = vsel %vm1437_vm13, %v15694_v55, 0.0  ;;  %v5583_v4 = vmul.f32 %v15694_v55, %v15694_v55  ;;  %v5521_v27 = vsel %vm1437_vm13, %v15692_v50, 0.0 }
 0x358   : > { %v5618_v36 = vadd.f32 %v5617_v62, %v5616_v63  ;;  %v5518_v13 = vadd.f32 %v5517_v5, %v5516_v44  ;;  %v5623_v30 = vsel %vm1437_vm13, %v5585_v3, 0.0 }
 0x359   : > { %v5619_v12 = vsel %vm1437_vm13, %v5583_v4, 0.0 }
 0x35a   : > { %v5520_v17 = vadd.f32 %v5519_v46, %v5518_v13  ;;  %v5620_v32 = vadd.f32 %v5619_v12, %v5618_v36 }
 0x35b   : > { %v15711_v41 = vpop.f32.mrb[8].mxu0 }
 0x35c   : > { %v5622_v48 = vadd.f32 %v5621_v43, %v5620_v32  ;;  %v15713_v37 = vpop.f32.mrb[9].mxu0  ;;  %v5522_v53 = vadd.f32 %v5521_v27, %v5520_v17  ;;  %v5588_v10 = vmul.f32 %v15711_v41, %v15711_v41  ;;  %v5527_v57 = vsel %vm1437_vm13, %v15711_v41, 0.0 }
 0x35d   : > { %v5523_v45 = vsel %vm1437_vm13, %v15713_v37, 0.0  ;;  %v5586_v28 = vmul.f32 %v15713_v37, %v15713_v37  ;;  %v15720_v2 = vpop.f32.mrb[10].mxu0 }
 0x35e   : > { %v5524_v8 = vadd.f32 %v5523_v45, %v5522_v53  ;;  %v5624_v34 = vadd.f32 %v5623_v30, %v5622_v48  ;;  %v15722_v33 = vpop.f32.mrb[11].mxu0  ;;  %v5589_v52 = vmul.f32 %v15720_v2, %v15720_v2  ;;  %v5629_v21 = vsel %vm1437_vm13, %v5588_v10, 0.0 }
 0x35f   : > { %v5625_v19 = vsel %vm1437_vm13, %v5586_v28, 0.0  ;;  %v5525_v29 = vsel %vm1437_vm13, %v15722_v33, 0.0  ;;  %v5587_v38 = vmul.f32 %v15722_v33, %v15722_v33  ;;  %v5529_v1 = vsel %vm1437_vm13, %v15720_v2, 0.0 }
 0x360   : > { %v5626_v35 = vadd.f32 %v5625_v19, %v5624_v34  ;;  %v5526_v6 = vadd.f32 %v5525_v29, %v5524_v8  ;;  %v5631_v11 = vsel %vm1437_vm13, %v5589_v52, 0.0 }
 0x361   : > { %v5627_v16 = vsel %vm1437_vm13, %v5587_v38, 0.0 }
 0x362   : > { %v5528_v47 = vadd.f32 %v5527_v57, %v5526_v6  ;;  %v5628_v9 = vadd.f32 %v5627_v16, %v5626_v35 }
 0x363   : > { %v15739_v59 = vpop.f32.mrb[12].mxu0 }
 0x364   : > { %v5630_v15 = vadd.f32 %v5629_v21, %v5628_v9  ;;  %v15741_v7 = vpop.f32.mrb[13].mxu0  ;;  %v5530_v24 = vadd.f32 %v5529_v1, %v5528_v47  ;;  %v5592_v40 = vmul.f32 %v15739_v59, %v15739_v59  ;;  %v5535_v54 = vsel %vm1437_vm13, %v15739_v59, 0.0 }
 0x365   : > { %v5531_v39 = vsel %vm1437_vm13, %v15741_v7, 0.0  ;;  %v5590_v22 = vmul.f32 %v15741_v7, %v15741_v7  ;;  %v15748_v56 = vpop.f32.mrb[14].mxu0 }
 0x366   : > { %v5532_v26 = vadd.f32 %v5531_v39, %v5530_v24  ;;  %v5632_v60 = vadd.f32 %v5631_v11, %v5630_v15  ;;  %v15750_v25 = vpop.f32.mrb[15].mxu0  ;;  %v5593_v62 = vmul.f32 %v15748_v56, %v15748_v56  ;;  %v5637_v13 = vsel %vm1437_vm13, %v5592_v40, 0.0 }
 0x367   : > { %v5633_v49 = vsel %vm1437_vm13, %v5590_v22, 0.0  ;;  %v5533_v0 = vsel %vm1437_vm13, %v15750_v25, 0.0  ;;  %v5591_v31 = vmul.f32 %v15750_v25, %v15750_v25  ;;  %v5537_v46 = vsel %vm1437_vm13, %v15748_v56, 0.0 }
 0x368   : > { %v5634_v44 = vadd.f32 %v5633_v49, %v5632_v60  ;;  %v5534_v63 = vadd.f32 %v5533_v0, %v5532_v26  ;;  %v5639_v43 = vsel %vm1437_vm13, %v5593_v62, 0.0 }
 0x369   : > { %v5635_v5 = vsel %vm1437_vm13, %v5591_v31, 0.0 }
 0x36a   : > { %v5536_v4 = vadd.f32 %v5535_v54, %v5534_v63  ;;  %v5636_v36 = vadd.f32 %v5635_v5, %v5634_v44 }
 0x36b   : > { %v15767_v3 = vpop.f32.mrb[16].mxu0 }
 0x36c   : > { %v5638_v12 = vadd.f32 %v5637_v13, %v5636_v36  ;;  %v15769_v17 = vpop.f32.mrb[17].mxu0  ;;  %v5538_v32 = vadd.f32 %v5537_v46, %v5536_v4  ;;  %v5596_v8 = vmul.f32 %v15767_v3, %v15767_v3  ;;  %v5543_v35 = vsel %vm1437_vm13, %v15767_v3, 0.0 }
 0x36d   : > { %v5539_v27 = vsel %vm1437_vm13, %v15769_v17, 0.0  ;;  %v5594_v48 = vmul.f32 %v15769_v17, %v15769_v17  ;;  %v15776_v53 = vpop.f32.mrb[18].mxu0 }
 0x36e   : > { %v5540_v30 = vadd.f32 %v5539_v27, %v5538_v32  ;;  %v5640_v45 = vadd.f32 %v5639_v43, %v5638_v12  ;;  %v15778_v28 = vpop.f32.mrb[19].mxu0  ;;  %v5597_v6 = vmul.f32 %v15776_v53, %v15776_v53  ;;  %v5645_v47 = vsel %vm1437_vm13, %v5596_v8, 0.0 }
 0x36f   : > { %v5641_v34 = vsel %vm1437_vm13, %v5594_v48, 0.0  ;;  %v5541_v10 = vsel %vm1437_vm13, %v15778_v28, 0.0  ;;  %v5595_v19 = vmul.f32 %v15778_v28, %v15778_v28  ;;  %v5545_v9 = vsel %vm1437_vm13, %v15776_v53, 0.0 }
 0x370   : > { %v5642_v29 = vadd.f32 %v5641_v34, %v5640_v45  ;;  %v5542_v38 = vadd.f32 %v5541_v10, %v5540_v30  ;;  %v5647_v11 = vsel %vm1437_vm13, %v5597_v6, 0.0 }
 0x371   : > { %v5643_v57 = vsel %vm1437_vm13, %v5595_v19, 0.0 }
 0x372   : > { %v5544_v52 = vadd.f32 %v5543_v35, %v5542_v38  ;;  %v5644_v16 = vadd.f32 %v5643_v57, %v5642_v29 }
 0x373   : > { %v15795_v21 = vpop.f32.mrb[20].mxu0 }
 0x374   : > { %v5646_v1 = vadd.f32 %v5645_v47, %v5644_v16  ;;  %v15797_v15 = vpop.f32.mrb[21].mxu0  ;;  %v5546_v24 = vadd.f32 %v5545_v9, %v5544_v52  ;;  %v5600_v0 = vmul.f32 %v15795_v21, %v15795_v21  ;;  %v5551_v5 = vsel %vm1437_vm13, %v15795_v21, 0.0 }
 0x375   : > { %v5547_v39 = vsel %vm1437_vm13, %v15797_v15, 0.0  ;;  %v5598_v22 = vmul.f32 %v15797_v15, %v15797_v15  ;;  %v15804_v26 = vpop.f32.mrb[22].mxu0 }
 0x376   : > { %v5548_v60 = vadd.f32 %v5547_v39, %v5546_v24  ;;  %v5648_v40 = vadd.f32 %v5647_v11, %v5646_v1  ;;  %v15806_v49 = vpop.f32.mrb[23].mxu0  ;;  %v5601_v4 = vmul.f32 %v15804_v26, %v15804_v26  ;;  %v5653_v12 = vsel %vm1437_vm13, %v5600_v0, 0.0 }
 0x377   : > { %v5649_v31 = vsel %vm1437_vm13, %v5598_v22, 0.0  ;;  %v5549_v44 = vsel %vm1437_vm13, %v15806_v49, 0.0  ;;  %v5599_v63 = vmul.f32 %v15806_v49, %v15806_v49  ;;  %v5553_v32 = vsel %vm1437_vm13, %v15804_v26, 0.0 }
 0x378   : > { %v5650_v54 = vadd.f32 %v5649_v31, %v5648_v40  ;;  %v5550_v62 = vadd.f32 %v5549_v44, %v5548_v60  ;;  %v5655_v45 = vsel %vm1437_vm13, %v5601_v4, 0.0 }
 0x379   : > { %v5651_v36 = vsel %vm1437_vm13, %v5599_v63, 0.0 }
 0x37a   : > { %v5552_v13 = vadd.f32 %v5551_v5, %v5550_v62  ;;  %v5652_v46 = vadd.f32 %v5651_v36, %v5650_v54 }
 0x37b   : > { %v15823_v43 = vpop.f32.mrb[24].mxu0 }
 0x37c   : > { %v5654_v27 = vadd.f32 %v5653_v12, %v5652_v46  ;;  %v15825_v48 = vpop.f32.mrb[25].mxu0  ;;  %v5554_v30 = vadd.f32 %v5553_v32, %v5552_v13  ;;  %v5604_v35 = vmul.f32 %v15823_v43, %v15823_v43  ;;  %v5559_v9 = vsel %vm1437_vm13, %v15823_v43, 0.0 }
 0x37d   : > { %v5555_v8 = vsel %vm1437_vm13, %v15825_v48, 0.0  ;;  %v5602_v34 = vmul.f32 %v15825_v48, %v15825_v48  ;;  %v15832_v10 = vpop.f32.mrb[26].mxu0 }
 0x37e   : > { %v5556_v19 = vadd.f32 %v5555_v8, %v5554_v30  ;;  %v5656_v29 = vadd.f32 %v5655_v45, %v5654_v27  ;;  %v15834_v38 = vpop.f32.mrb[27].mxu0  ;;  %v5605_v1 = vmul.f32 %v15832_v10, %v15832_v10  ;;  %v5661_v22 = vsel %vm1437_vm13, %v5604_v35, 0.0 }
 0x37f   : > { %v5657_v6 = vsel %vm1437_vm13, %v5602_v34, 0.0  ;;  %v5557_v57 = vsel %vm1437_vm13, %v15834_v38, 0.0  ;;  %v5603_v52 = vmul.f32 %v15834_v38, %v15834_v38  ;;  %v5561_v60 = vsel %vm1437_vm13, %v15832_v10, 0.0 }
 0x380   : > { %v5658_v16 = vadd.f32 %v5657_v6, %v5656_v29  ;;  %v5558_v47 = vadd.f32 %v5557_v57, %v5556_v19  ;;  %v5663_v63 = vsel %vm1437_vm13, %v5605_v1, 0.0  ;;  %v11934_v29 = vld [vmem:[%s18732_s2 + $0x2] sm:$0x3] }
 0x381   : > { %v5659_v24 = vsel %vm1437_vm13, %v5603_v52, 0.0  ;;  %13785 = vmatprep.subr.msk.bf16.mxu1 %vm1486_vm0, %v11934_v29  ;;  %v7044_v57 = vsel %vm1486_vm0, %v11934_v29, 0 }
 0x382   : > { %v5560_v11 = vadd.f32 %v5559_v9, %v5558_v47  ;;  %v5660_v39 = vadd.f32 %v5659_v24, %v5658_v16  ;;  %12959 = vmatpush3.bf16.msra.mxu1 %v7044_v57 }
 0x383   : > { %v15851_v40 = vpop.f32.mrb[28].mxu0 }
 0x384   : > { %v5662_v0 = vadd.f32 %v5661_v22, %v5660_v39  ;;  %v15853_v31 = vpop.f32.mrb[29].mxu0  ;;  %v5562_v44 = vadd.f32 %v5561_v60, %v5560_v11  ;;  %v5608_v46 = vmul.f32 %v15851_v40, %v15851_v40  ;;  %v5567_v8 = vsel %vm1437_vm13, %v15851_v40, 0.0 }
 0x385   : > { %v5563_v54 = vsel %vm1437_vm13, %v15853_v31, 0.0  ;;  %v5606_v62 = vmul.f32 %v15853_v31, %v15853_v31  ;;  %v15860_v5 = vpop.f32.mrb[30].mxu0 }
 0x386   : > { %v5564_v4 = vadd.f32 %v5563_v54, %v5562_v44  ;;  %v5664_v36 = vadd.f32 %v5663_v63, %v5662_v0  ;;  %v15862_v13 = vpop.f32.mrb[31].mxu0  ;;  %v5609_v34 = vmul.f32 %v15860_v5, %v15860_v5  ;;  %v5669_v52 = vsel %vm1437_vm13, %v5608_v46, 0.0 }
 0x387   : > { %v5665_v12 = vsel %vm1437_vm13, %v5606_v62, 0.0  ;;  %v5565_v32 = vsel %vm1437_vm13, %v15862_v13, 0.0  ;;  %v5607_v27 = vmul.f32 %v15862_v13, %v15862_v13  ;;  %v5569_v16 = vsel %vm1437_vm13, %v15860_v5, 0.0 }
 0x388   : > { %v5666_v30 = vadd.f32 %v5665_v12, %v5664_v36  ;;  %v5566_v45 = vadd.f32 %v5565_v32, %v5564_v4  ;;  %v5671_v1 = vsel %vm1437_vm13, %v5609_v34, 0.0  ;;  %v6544_v32 = vld [vmem:[%s18732_s2] sm:$0x3] }
 0x389   : > { %v5667_v19 = vsel %vm1437_vm13, %v5607_v27, 0.0  ;;  %13786 = vmatprep.subr.msk.bf16.mxu1 %vm1486_vm0, %v6544_v32 }
 0x38a   : > { %v5568_v35 = vadd.f32 %v5567_v8, %v5566_v45  ;;  %v5668_v6 = vadd.f32 %v5667_v19, %v5666_v30 }
 0x38c   : > { %v5570_v47 = vadd.f32 %v5569_v16, %v5568_v35  ;;  %v5670_v9 = vadd.f32 %v5669_v52, %v5668_v6 }
 0x38e   : > { %v5571_v24 = vrot.slane %v5570_v47, 4  ;;  %v5672_v11 = vadd.f32 %v5671_v1, %v5670_v9 }
 0x390   : > { %v5572_v39 = vadd.f32 %v5571_v24, %v5570_v47  ;;  %v5673_v22 = vrot.slane %v5672_v11, 4 }
 0x392   : > { %v5573_v60 = vrot.slane %v5572_v39, 2  ;;  %v5674_v0 = vadd.f32 %v5673_v22, %v5672_v11 }
 0x394   : > { %v5574_v44 = vadd.f32 %v5573_v60, %v5572_v39  ;;  %v5675_v63 = vrot.slane %v5674_v0, 2 }
 0x396   : > { %v5575_v54 = vrot.slane %v5574_v44, 1  ;;  %v5676_v62 = vadd.f32 %v5675_v63, %v5674_v0 }
 0x398   : > { %v5576_v4 = vadd.f32 %v5575_v54, %v5574_v44  ;;  %v5677_v36 = vrot.slane %v5676_v62, 1 }
 0x39a   : > { %v15885_v46 = vmul.f32 0.00390625, %v5576_v4  ;;  %v5678_v12 = vadd.f32 %v5677_v36, %v5676_v62 }
 0x39c   : > { %v5679_v27 = vmul.f32 0.00390625, %v5678_v12  ;;  %v5680_v30 = vmul.f32 %v15885_v46, %v15885_v46  ;;  %v5711_v45 = vsub.f32 %v15853_v31, %v15885_v46  ;;  %v5712_v8 = vsub.f32 %v15862_v13, %v15885_v46 }
 0x39d   : > { %v5683_v34 = vsub.f32 %v15658_v18, %v15885_v46  ;;  %v5684_v19 = vsub.f32 %v15664_v58, %v15885_v46  ;;  %v5685_v29 = vsub.f32 %v15656_v14, %v15885_v46  ;;  %v5686_v35 = vsub.f32 %v15662_v61, %v15885_v46 }
 0x39e   : > { %v5681_v6 = vsub.f32 %v5679_v27, %v5680_v30  ;;  %v5687_v31 = vsub.f32 %v15685_v20, %v15885_v46  ;;  %v5688_v13 = vsub.f32 %v15694_v55, %v15885_v46  ;;  %v5689_v57 = vsub.f32 %v15683_v23, %v15885_v46 }
 0x39f   : > { %v5690_v18 = vsub.f32 %v15692_v50, %v15885_v46  ;;  %v5691_v58 = vsub.f32 %v15713_v37, %v15885_v46  ;;  %v5692_v14 = vsub.f32 %v15722_v33, %v15885_v46  ;;  %v5693_v61 = vsub.f32 %v15711_v41, %v15885_v46 }
 0x3a0   : > { %v5682_v52 = vmax.f32 %v5681_v6, 0.0  ;;  %v5694_v20 = vsub.f32 %v15720_v2, %v15885_v46  ;;  %v5695_v55 = vsub.f32 %v15741_v7, %v15885_v46  ;;  %v5696_v23 = vsub.f32 %v15750_v25, %v15885_v46 }
 0x3a1   : > { %v5697_v50 = vsub.f32 %v15739_v59, %v15885_v46  ;;  %v5698_v37 = vsub.f32 %v15748_v56, %v15885_v46  ;;  %v5699_v33 = vsub.f32 %v15769_v17, %v15885_v46  ;;  %v5700_v41 = vsub.f32 %v15778_v28, %v15885_v46 }
 0x3a2   : > { %v5715_v16 = vadd.f32 1e-05, %v5682_v52  ;;  %v5701_v2 = vsub.f32 %v15767_v3, %v15885_v46  ;;  %v5702_v7 = vsub.f32 %v15776_v53, %v15885_v46  ;;  %v5703_v25 = vsub.f32 %v15797_v15, %v15885_v46 }
 0x3a3   : > { %v5704_v59 = vsub.f32 %v15806_v49, %v15885_v46  ;;  %v5705_v56 = vsub.f32 %v15795_v21, %v15885_v46  ;;  %v5706_v17 = vsub.f32 %v15804_v26, %v15885_v46  ;;  %v5707_v28 = vsub.f32 %v15825_v48, %v15885_v46 }
 0x3a4   : > { %13883 = vrsqrt.f32 %v5715_v16  ;;  %v5708_v3 = vsub.f32 %v15834_v38, %v15885_v46  ;;  %v5709_v53 = vsub.f32 %v15823_v43, %v15885_v46  ;;  %v5710_v15 = vsub.f32 %v15832_v10, %v15885_v46 }
 0x3a5   : > { %v5713_v49 = vsub.f32 %v15851_v40, %v15885_v46  ;;  %v5714_v21 = vsub.f32 %v15860_v5, %v15885_v46 }
 0x3ae   : > { %v13884_v26 = vpop.eup %13883 }
 0x3af   : > { %v5745_v47 = vmul.f32 %v13884_v26, %v5711_v45  ;;  %v5746_v9 = vmul.f32 %v13884_v26, %v5712_v8  ;;  %v15957_v48 = vmul.f32 %v13884_v26, %v5683_v34  ;;  %v15959_v1 = vmul.f32 %v13884_v26, %v5684_v19 }
 0x3b0   : > { %v15961_v38 = vmul.f32 %v13884_v26, %v5685_v29  ;;  %v15963_v24 = vmul.f32 %v13884_v26, %v5686_v35  ;;  %v15965_v43 = vmul.f32 %v13884_v26, %v5687_v31  ;;  %v15967_v10 = vmul.f32 %v13884_v26, %v5688_v13 }
 0x3b1   : > { %v5777_v11 = vmax.f32 %v5745_v47, 0.0  ;;  %v5778_v40 = vmax.f32 %v5746_v9, 0.0  ;;  %v15969_v39 = vmul.f32 %v13884_v26, %v5689_v57  ;;  %v15971_v5 = vmul.f32 %v13884_v26, %v5690_v18  ;;  %v6298_v18 = vld [vmem:[#allocation2 + $0xbc] sm:$0x1] }
 0x3b2   : > { %v15973_v22 = vmul.f32 %v13884_v26, %v5691_v58  ;;  %v15975_v60 = vmul.f32 %v13884_v26, %v5692_v14  ;;  %v15977_v0 = vmul.f32 %v13884_v26, %v5693_v61  ;;  %v15979_v44 = vmul.f32 %v13884_v26, %v5694_v20 }
 0x3b3   : > { %v15981_v63 = vpack.c.bf16 %v5777_v11, %v5777_v11  ;;  %v12343_v54 = vpack.c.bf16 %v5778_v40, %v5778_v40  ;;  %v15983_v62 = vmul.f32 %v13884_v26, %v5695_v55  ;;  %v15985_v4 = vmul.f32 %v13884_v26, %v5696_v23 }
 0x3b4   : > { %v15987_v36 = vmul.f32 %v13884_v26, %v5697_v50  ;;  %v15989_v46 = vmul.f32 %v13884_v26, %v5698_v37  ;;  %v15991_v12 = vmul.f32 %v13884_v26, %v5699_v33  ;;  %v15993_v32 = vmul.f32 %v13884_v26, %v5700_v41 }
 0x3b5   : > { %18911 = vst [vmem:[#allocation10_spill] sm:$0xff] %v15981_v63  ;;  %v18745_v27 = vshrl.u32 %v15981_v63, 16  ;;  %v6124_v30 = vshrl.u32 %v12343_v54, 16  ;;  %v6127_v45 = vshll.u32 %v12343_v54, 16  ;;  %v15997_v34 = vmul.f32 %v13884_v26, %v5701_v2  ;;  %v6301_v2 = vld [vmem:[#allocation2 + $0xc0] sm:$0xf] }
 0x3b6   : > { %v15999_v19 = vmul.f32 %v13884_v26, %v5702_v7  ;;  %v16001_v29 = vmul.f32 %v13884_v26, %v5703_v25  ;;  %v16003_v35 = vmul.f32 %v13884_v26, %v5704_v59  ;;  %v16009_v57 = vmul.f32 %v13884_v26, %v5705_v56 }
 0x3b7   : > { %v16007_v6 = vrot.slane %v18745_v27, 7  ;;  %v6126_v31 = vrot.slane %v6124_v30, 7  ;;  %v11932_v13 = vrot.slane %v6127_v45, 11  ;;  %v16011_v58 = vmul.f32 %v13884_v26, %v5706_v17 }
 0x3b8   : > { %v16013_v14 = vmul.f32 %v13884_v26, %v5707_v28  ;;  %v16015_v61 = vmul.f32 %v13884_v26, %v5708_v3  ;;  %v16017_v52 = vmul.f32 %v13884_v26, %v5709_v53  ;;  %v16020_v50 = vmul.f32 %v13884_v26, %v5710_v15 }
 0x3b9   : > { %v6122_v20 = vrot.slane %v16007_v6, 4  ;;  %v6129_v55 = vor.u32 %v6127_v45, %v6126_v31  ;;  %v6131_v23 = vrot.slane %v6126_v31, 4  ;;  %v16022_v37 = vmul.f32 %v13884_v26, %v5713_v49 }
 0x3ba   : > { %v16024_v33 = vmul.f32 %v13884_v26, %v5714_v21  ;;  %v5749_v41 = vmax.f32 %v15957_v48, 0.0  ;;  %v5750_v16 = vmax.f32 %v15959_v1, 0.0  ;;  %v5751_v56 = vmax.f32 %v15961_v38, 0.0 }
 0x3bb   : > { %v6130_v7 = vsel %vm13992_vm6, %v6122_v20, %v6129_v55  ;;  %v6299_v59 = vsel %vm14010_vm8, %v6131_v23, %v6298_v18  ;;  %v5752_v17 = vmax.f32 %v15963_v24, 0.0  ;;  %v5753_v28 = vmax.f32 %v15965_v43, 0.0 }
 0x3bc   : > { %6297 = vst.msk [vmem:[#allocation2 + $0xb8] sm:$0xf] %vm624_vm3, %v6130_v7  ;;  %6300 = vst [vmem:[#allocation2 + $0xbc] sm:$0x1] %v6299_v59  ;;  %v5754_v3 = vmax.f32 %v15967_v10, 0.0  ;;  %v5755_v53 = vmax.f32 %v15969_v39, 0.0 }
 0x3bd   : > { %v5756_v15 = vmax.f32 %v15971_v5, 0.0  ;;  %v5757_v49 = vmax.f32 %v15973_v22, 0.0  ;;  %v5758_v21 = vmax.f32 %v15975_v60, 0.0  ;;  %v5759_v26 = vmax.f32 %v15977_v0, 0.0 }
 0x3be   : > { %v5760_v47 = vmax.f32 %v15979_v44, 0.0  ;;  %v5761_v9 = vmax.f32 %v15983_v62, 0.0  ;;  %v5762_v48 = vmax.f32 %v15985_v4, 0.0  ;;  %v5763_v1 = vmax.f32 %v15987_v36, 0.0 }
 0x3bf   : > { %v5764_v38 = vmax.f32 %v15989_v46, 0.0  ;;  %v5765_v24 = vmax.f32 %v15991_v12, 0.0  ;;  %v5766_v43 = vmax.f32 %v15993_v32, 0.0  ;;  %v5767_v10 = vmax.f32 %v15997_v34, 0.0 }
 0x3c0   : > { %v5768_v11 = vmax.f32 %v15999_v19, 0.0  ;;  %v5769_v40 = vmax.f32 %v16001_v29, 0.0  ;;  %v5770_v39 = vmax.f32 %v16003_v35, 0.0  ;;  %v5771_v5 = vmax.f32 %v16009_v57, 0.0 }
 0x3c1   : > { %v5772_v22 = vmax.f32 %v16011_v58, 0.0  ;;  %v5773_v60 = vmax.f32 %v16013_v14, 0.0  ;;  %v5774_v0 = vmax.f32 %v16015_v61, 0.0  ;;  %v5775_v44 = vmax.f32 %v16017_v52, 0.0 }
 0x3c2   : > { %v5776_v54 = vmax.f32 %v16020_v50, 0.0  ;;  %v5779_v62 = vmax.f32 %v16022_v37, 0.0  ;;  %v5780_v4 = vmax.f32 %v16024_v33, 0.0  ;;  %v16061_v36 = vpack.c.bf16 %v5749_v41, %v5749_v41 }
 0x3c3   : > { %v16063_v46 = vpack.c.bf16 %v5750_v16, %v5750_v16  ;;  %v6494_v12 = vld [vmem:[#allocation2 + $0xbc] sm:$0x1]  ;;  %v16065_v32 = vpack.c.bf16 %v5751_v56, %v5751_v56  ;;  %v16067_v30 = vpack.c.bf16 %v5752_v17, %v5752_v17  ;;  %v16069_v45 = vpack.c.bf16 %v5753_v28, %v5753_v28 }
 0x3c4   : > { %18914 = vst [vmem:[#allocation9_spill] sm:$0xff] %v16061_v36  ;;  %v16071_v34 = vpack.c.bf16 %v5754_v3, %v5754_v3  ;;  %v6495_v29 = vsel %vm14056_vm9, %v11932_v13, %v6494_v12  ;;  %v16075_v35 = vpack.c.bf16 %v5755_v53, %v5755_v53  ;;  %v16077_v31 = vpack.c.bf16 %v5756_v15, %v5756_v15 }
 0x3c5   : > { %18915 = vst [vmem:[#allocation3_spill] sm:$0xff] %v16063_v46  ;;  %18916 = vst [vmem:[#allocation5_spill] sm:$0xff] %v16065_v32  ;;  %v16079_v57 = vpack.c.bf16 %v5757_v49, %v5757_v49  ;;  %v16081_v18 = vpack.c.bf16 %v5758_v21, %v5758_v21  ;;  %v16083_v58 = vpack.c.bf16 %v5759_v26, %v5759_v26  ;;  %v18752_v15 = vshrl.u32 %v16061_v36, 16 }
 0x3c6   : > { %18917 = vst [vmem:[#allocation11_spill] sm:$0xff] %v16067_v30  ;;  %18918 = vst [vmem:[#allocation12_spill] sm:$0xff] %v16069_v45  ;;  %v16085_v14 = vpack.c.bf16 %v5760_v47, %v5760_v47  ;;  %v16087_v61 = vpack.c.bf16 %v5761_v9, %v5761_v9  ;;  %v16089_v52 = vpack.c.bf16 %v5762_v48, %v5762_v48  ;;  %v5881_v49 = vshll.u32 %v16061_v36, 16  ;;  %v6266_v36 = vld [vmem:[#allocation2 + $0x84] sm:$0xf] }
 0x3c7   : > { %18919 = vst [vmem:[#allocation13_spill] sm:$0xff] %v16071_v34  ;;  %18921 = vst [vmem:[#allocation14_spill] sm:$0xff] %v16075_v35  ;;  %v16091_v20 = vpack.c.bf16 %v5763_v1, %v5763_v1  ;;  %v16093_v13 = vpack.c.bf16 %v5764_v38, %v5764_v38  ;;  %v16095_v55 = vpack.c.bf16 %v5765_v24, %v5765_v24  ;;  %v5886_v21 = vshrl.u32 %v16063_v46, 16 }
 0x3c8   : > { %18922 = vst [vmem:[#allocation15_spill] sm:$0xff] %v16077_v31  ;;  %18923 = vst [vmem:[#allocation16_spill] sm:$0xff] %v16079_v57  ;;  %v16097_v23 = vpack.c.bf16 %v5766_v43, %v5766_v43  ;;  %v16099_v50 = vpack.c.bf16 %v5767_v10, %v5767_v10  ;;  %v16101_v37 = vpack.c.bf16 %v5768_v11, %v5768_v11  ;;  %v18749_v26 = vshll.u32 %v16063_v46, 16  ;;  %v13910_v46 = vld [vmem:[#allocation2 + $0xc] sm:$0xf] }
 0x3c9   : > { %6496 = vst [vmem:[#allocation2 + $0xbc] sm:$0x1] %v6495_v29  ;;  %18924 = vst [vmem:[#allocation17_spill] sm:$0xff] %v16081_v18  ;;  %v16103_v33 = vpack.c.bf16 %v5769_v40, %v5769_v40  ;;  %v16105_v41 = vpack.c.bf16 %v5770_v39, %v5770_v39  ;;  %v16107_v16 = vpack.c.bf16 %v5771_v5, %v5771_v5  ;;  %v18751_v47 = vshrl.u32 %v16065_v32, 16 }
 0x3ca   : > { %18925 = vst [vmem:[#allocation18_spill] sm:$0xff] %v16083_v58  ;;  %18926 = vst [vmem:[#allocation19_spill] sm:$0xff] %v16085_v14  ;;  %v16109_v7 = vpack.c.bf16 %v5772_v22, %v5772_v22  ;;  %v16111_v59 = vpack.c.bf16 %v5773_v60, %v5773_v60  ;;  %v16113_v56 = vpack.c.bf16 %v5774_v0, %v5774_v0  ;;  %v5898_v9 = vshll.u32 %v16065_v32, 16 }
 0x3cb   : > { %18927 = vst [vmem:[#allocation20_spill] sm:$0xff] %v16087_v61  ;;  %18928 = vst [vmem:[#allocation21_spill] sm:$0xff] %v16089_v52  ;;  %v16115_v17 = vpack.c.bf16 %v5775_v44, %v5775_v44  ;;  %v16117_v28 = vpack.c.bf16 %v5776_v54, %v5776_v54  ;;  %v16119_v3 = vpack.c.bf16 %v5779_v62, %v5779_v62  ;;  %v5903_v48 = vshrl.u32 %v16067_v30, 16 }
 0x3cc   : > { %18929 = vst [vmem:[#allocation22_spill] sm:$0xff] %v16091_v20  ;;  %18930 = vst [vmem:[#allocation23_spill] sm:$0xff] %v16093_v13  ;;  %v16121_v53 = vpack.c.bf16 %v5780_v4, %v5780_v4  ;;  %v5880_v1 = vrot.slane %v18752_v15, 7  ;;  %v16132_v38 = vrot.slane %v5886_v21, 7  ;;  %v18748_v24 = vshll.u32 %v16067_v30, 16 }
 0x3cd   : > { %18931 = vst [vmem:[#allocation24_spill] sm:$0xff] %v16095_v55  ;;  %18932 = vst [vmem:[#allocation25_spill] sm:$0xff] %v16097_v23  ;;  %v18746_v43 = vshrl.u32 %v16069_v45, 16  ;;  %v5897_v10 = vrot.slane %v18751_v47, 7  ;;  %v16138_v11 = vrot.slane %v5903_v48, 7  ;;  %v5915_v40 = vshll.u32 %v16069_v45, 16 }
 0x3ce   : > { %18933 = vst [vmem:[#allocation26_spill] sm:$0xff] %v16099_v50  ;;  %18934 = vst [vmem:[#allocation27_spill] sm:$0xff] %v16101_v37  ;;  %v5920_v39 = vshrl.u32 %v16071_v34, 16  ;;  %v16142_v5 = vor.u32 %v5881_v49, %v5880_v1  ;;  %v5884_v22 = vrot.slane %v5880_v1, 4  ;;  %v5891_v60 = vor.u32 %v18749_v26, %v16132_v38 }
 0x3cf   : > { %18935 = vst [vmem:[#allocation28_spill] sm:$0xff] %v16103_v33  ;;  %18936 = vst [vmem:[#allocation29_spill] sm:$0xff] %v16105_v41  ;;  %v16148_v44 = vor.u32 %v5898_v9, %v5897_v10  ;;  %v5901_v54 = vrot.slane %v5897_v10, 4  ;;  %v5908_v62 = vor.u32 %v18748_v24, %v16138_v11  ;;  %v5914_v29 = vrot.slane %v18746_v43, 7 }
 0x3d0   : > { %18937 = vst [vmem:[#allocation30_spill] sm:$0xff] %v16107_v16  ;;  %18938 = vst [vmem:[#allocation31_spill] sm:$0xff] %v16109_v7  ;;  %v5892_v12 = vsel %vm13992_vm6, %v5884_v22, %v5891_v60  ;;  %v16158_v49 = vrot.slane %v5920_v39, 7  ;;  %v18747_v21 = vshll.u32 %v16071_v34, 16  ;;  %v18750_v48 = vshrl.u32 %v16075_v35, 16 }
 0x3d1   : > { %18939 = vst [vmem:[#allocation32_spill] sm:$0xff] %v16111_v59  ;;  %18940 = vst [vmem:[#allocation33_spill] sm:$0xff] %v16113_v56  ;;  %v5909_v9 = vsel %vm13992_vm6, %v5901_v54, %v5908_v62  ;;  %v5932_v1 = vshll.u32 %v16075_v35, 16  ;;  %v5937_v10 = vshrl.u32 %v16077_v31, 16  ;;  %v16167_v27 = vor.u32 %v5915_v40, %v5914_v29  ;;  %v6259_v34 = vld [vmem:[#allocation2 + $0x78] sm:$0xf] }
 0x3d2   : > { %18941 = vst [vmem:[#allocation34_spill] sm:$0xff] %v16115_v17  ;;  %18942 = vst [vmem:[#allocation35_spill] sm:$0xff] %v16117_v28  ;;  %v5918_v22 = vrot.slane %v5914_v29, 4  ;;  %v5925_v39 = vor.u32 %v18747_v21, %v16158_v49  ;;  %v5931_v54 = vrot.slane %v18750_v48, 7  ;;  %v18753_v43 = vshll.u32 %v16077_v31, 16 }
 0x3d3   : > { %18943 = vst [vmem:[#allocation36_spill] sm:$0xff] %v16119_v3  ;;  %6199 = vst.msk [vmem:[#allocation2 + $0x10] sm:$0xf] %vm624_vm3, %v5892_v12  ;;  %v16176_v62 = vrot.slane %v5937_v10, 7  ;;  %v18754_v12 = vshrl.u32 %v16079_v57, 16  ;;  %v5949_v29 = vshll.u32 %v16079_v57, 16 }
 0x3d4   : > { %6206 = vst.msk [vmem:[#allocation2 + $0x1c] sm:$0xf] %vm624_vm3, %v5909_v9  ;;  %v5926_v40 = vsel %vm13992_vm6, %v5918_v22, %v5925_v39  ;;  %v5954_v21 = vshrl.u32 %v16081_v18, 16  ;;  %v18755_v24 = vshll.u32 %v16081_v18, 16  ;;  %v16185_v26 = vor.u32 %v5932_v1, %v5931_v54  ;;  %v6228_v57 = vld [vmem:[#allocation2 + $0x44] sm:$0x1] }
 0x3d5   : > { %v5935_v9 = vrot.slane %v5931_v54, 4  ;;  %v5942_v10 = vor.u32 %v18753_v43, %v16176_v62  ;;  %6213 = vst.msk [vmem:[#allocation2 + $0x28] sm:$0xf] %vm624_vm3, %v5926_v40  ;;  %v5948_v22 = vrot.slane %v18754_v12, 7  ;;  %v18756_v47 = vshrl.u32 %v16083_v58, 16 }
 0x3d6   : > { %v16194_v39 = vrot.slane %v5954_v21, 7  ;;  %v5966_v15 = vshll.u32 %v16083_v58, 16  ;;  %v5971_v54 = vshrl.u32 %v16085_v14, 16  ;;  %v18760_v43 = vshll.u32 %v16085_v14, 16  ;;  %v6231_v14 = vld [vmem:[#allocation2 + $0x48] sm:$0xf] }
 0x3d7   : > { %v5943_v1 = vsel %vm13992_vm6, %v5935_v9, %v5942_v10  ;;  %v18757_v48 = vshrl.u32 %v16087_v61, 16  ;;  %v16203_v60 = vor.u32 %v5949_v29, %v5948_v22  ;;  %v5952_v40 = vrot.slane %v5948_v22, 4 }
 0x3d8   : > { %v5959_v21 = vor.u32 %v18755_v24, %v16194_v39  ;;  %6220 = vst.msk [vmem:[#allocation2 + $0x34] sm:$0xf] %vm624_vm3, %v5943_v1  ;;  %v5965_v9 = vrot.slane %v18756_v47, 7  ;;  %v16212_v10 = vrot.slane %v5971_v54, 7  ;;  %v5983_v29 = vshll.u32 %v16087_v61, 16 }
 0x3d9   : > { %v5982_v4 = vrot.slane %v18757_v48, 7  ;;  %v5988_v24 = vshrl.u32 %v16089_v52, 16  ;;  %v18761_v1 = vshrl.u32 %v16091_v20, 16  ;;  %v18765_v8 = vshrl.u32 %v16095_v55, 16 }
 0x3da   : > { %v5960_v22 = vsel %vm13992_vm6, %v5952_v40, %v5959_v21  ;;  %v16223_v47 = vor.u32 %v5966_v15, %v5965_v9  ;;  %v5969_v54 = vrot.slane %v5965_v9, 4  ;;  %v5976_v48 = vor.u32 %v18760_v43, %v16212_v10 }
 0x3db   : > { %v6501_v0 = vld [vmem:[#allocation2 + $0x1c] sm:$0xf]  ;;  %6227 = vst.msk [vmem:[#allocation2 + $0x40] sm:$0xf] %vm624_vm3, %v5960_v22  ;;  %v16230_v40 = vor.u32 %v5983_v29, %v5982_v4  ;;  %v5986_v21 = vrot.slane %v5982_v4, 4  ;;  %v16232_v42 = vrot.slane %v5988_v24, 7 }
 0x3dc   : > { %6504 = vst.msk [vmem:[#allocation2 + $0x4] sm:$0xf] %vm624_vm3, %v6501_v0  ;;  %v5999_v12 = vrot.slane %v18761_v1, 7  ;;  %v5977_v15 = vsel %vm13992_vm6, %v5969_v54, %v5976_v48  ;;  %v6000_v0 = vshll.u32 %v16091_v20, 16  ;;  %v6005_v9 = vshrl.u32 %v16093_v13, 16 }
 0x3dd   : > { %v18944_v22 = vshll.u32 %v16089_v52, 16  ;;  %6234 = vst.msk [vmem:[#allocation2 + $0x4c] sm:$0xf] %vm624_vm3, %v5977_v15  ;;  %v6017_v54 = vshll.u32 %v16095_v55, 16  ;;  %v6022_v51 = vshrl.u32 %v16097_v23, 16  ;;  %v18768_v19 = vshrl.u32 %v16099_v50, 16 }
 0x3de   : > { %v6003_v24 = vrot.slane %v5999_v12, 4  ;;  %v16247_v1 = vor.u32 %v6000_v0, %v5999_v12  ;;  %v16249_v48 = vrot.slane %v6005_v9, 7  ;;  %v18945_v12 = vshll.u32 %v16093_v13, 16 }
 0x3df   : > { %v5993_v29 = vor.u32 %v18944_v22, %v16232_v42  ;;  %v6016_v22 = vrot.slane %v18765_v8, 7  ;;  %v16263_v9 = vrot.slane %v6022_v51, 7  ;;  %v6034_v20 = vshll.u32 %v16099_v50, 16 }
 0x3e0   : > { %v6010_v15 = vor.u32 %v18945_v12, %v16249_v48  ;;  %v6033_v8 = vrot.slane %v18768_v19, 7  ;;  %v6039_v4 = vshrl.u32 %v16101_v37, 16  ;;  %v18946_v12 = vshll.u32 %v16097_v23, 16 }
 0x3e1   : > { %v5994_v43 = vsel %vm13992_vm6, %v5986_v21, %v5993_v29  ;;  %v16267_v21 = vor.u32 %v6017_v54, %v6016_v22  ;;  %v6020_v29 = vrot.slane %v6016_v22, 4  ;;  %v18770_v61 = vshll.u32 %v16101_v37, 16 }
 0x3e2   : > { %6241 = vst.msk [vmem:[#allocation2 + $0x58] sm:$0xf] %vm624_vm3, %v5994_v43  ;;  %v6011_v55 = vsel %vm13992_vm6, %v6003_v24, %v6010_v15  ;;  %v6027_v51 = vor.u32 %v18946_v12, %v16263_v9  ;;  %v16279_v43 = vor.u32 %v6034_v20, %v6033_v8  ;;  %v6037_v54 = vrot.slane %v6033_v8, 4 }
 0x3e3   : > { %v16281_v22 = vrot.slane %v6039_v4, 7  ;;  %v18772_v19 = vshrl.u32 %v16103_v33, 16  ;;  %6248 = vst.msk [vmem:[#allocation2 + $0x64] sm:$0xf] %vm624_vm3, %v6011_v55  ;;  %v6051_v15 = vshll.u32 %v16103_v33, 16  ;;  %v6056_v12 = vshrl.u32 %v16105_v41, 16 }
 0x3e4   : > { %v6028_v24 = vsel %vm13992_vm6, %v6020_v29, %v6027_v51  ;;  %v18776_v55 = vshrl.u32 %v16107_v16, 16  ;;  %v6068_v51 = vshll.u32 %v16107_v16, 16  ;;  %v6073_v50 = vshrl.u32 %v16109_v7, 16 }
 0x3e5   : > { %v6044_v20 = vor.u32 %v18770_v61, %v16281_v22  ;;  %v6050_v4 = vrot.slane %v18772_v19, 7  ;;  %6255 = vst.msk [vmem:[#allocation2 + $0x70] sm:$0xf] %vm624_vm3, %v6028_v24  ;;  %v16298_v29 = vrot.slane %v6056_v12, 7  ;;  %v18947_v24 = vshll.u32 %v16105_v41, 16 }
 0x3e6   : > { %v6067_v19 = vrot.slane %v18776_v55, 7  ;;  %v16313_v23 = vrot.slane %v6073_v50, 7  ;;  %v18779_v58 = vshrl.u32 %v16111_v59, 16  ;;  %v6102_v16 = vshll.u32 %v16115_v17, 16 }
 0x3e7   : > { %v6045_v61 = vsel %vm13992_vm6, %v6037_v54, %v6044_v20  ;;  %v16305_v37 = vor.u32 %v6051_v15, %v6050_v4  ;;  %v6054_v8 = vrot.slane %v6050_v4, 4  ;;  %v6061_v12 = vor.u32 %v18947_v24, %v16298_v29 }
 0x3e8   : > { %6262 = vst.msk [vmem:[#allocation2 + $0x7c] sm:$0xf] %vm624_vm3, %v6045_v61  ;;  %v16317_v0 = vor.u32 %v6068_v51, %v6067_v19  ;;  %v6071_v54 = vrot.slane %v6067_v19, 4  ;;  %v6085_v15 = vshll.u32 %v16111_v59, 16  ;;  %v6090_v20 = vshrl.u32 %v16113_v56, 16 }
 0x3e9   : > { %v6062_v4 = vsel %vm13992_vm6, %v6054_v8, %v6061_v12  ;;  %v18948_v24 = vshll.u32 %v16109_v7, 16  ;;  %v6084_v33 = vrot.slane %v18779_v58, 7  ;;  %v18784_v19 = vshll.u32 %v16113_v56, 16  ;;  %v6203_v8 = vld [vmem:[#allocation2 + $0x18] sm:$0xf] }
 0x3ea   : > { %v16329_v61 = vrot.slane %v6090_v20, 7  ;;  %6269 = vst.msk [vmem:[#allocation2 + $0x88] sm:$0xf] %vm624_vm3, %v6062_v4  ;;  %v6200_v12 = vld [vmem:[#allocation2 + $0x14] sm:$0x1]  ;;  %v6107_v58 = vshrl.u32 %v16117_v28, 16 }
 0x3eb   : > { %v6078_v55 = vor.u32 %v18948_v24, %v16313_v23  ;;  %v16337_v7 = vor.u32 %v6085_v15, %v6084_v33  ;;  %v6088_v50 = vrot.slane %v6084_v33, 4  ;;  %v6207_v20 = vld [vmem:[#allocation2 + $0x20] sm:$0x1]  ;;  %v18949_v41 = vshrl.u32 %v16115_v17, 16  ;;  %v6217_v56 = vld [vmem:[#allocation2 + $0x30] sm:$0xf] }
 0x3ec   : > { %v6095_v59 = vor.u32 %v18784_v19, %v16329_v61  ;;  %v16348_v15 = vrot.slane %v6107_v58, 7  ;;  %v18951_v33 = vshll.u32 %v15981_v63, 16  ;;  %v6136_v51 = vshll.u32 %v16119_v3, 16  ;;  %v6221_v17 = vld [vmem:[#allocation2 + $0x38] sm:$0x1] }
 0x3ed   : > { %v6079_v24 = vsel %vm13992_vm6, %v6071_v54, %v6078_v55  ;;  %v6101_v4 = vrot.slane %v18949_v41, 7  ;;  %v6210_v55 = vld [vmem:[#allocation2 + $0x24] sm:$0xf]  ;;  %v6214_v54 = vld [vmem:[#allocation2 + $0x2c] sm:$0x1]  ;;  %v6141_v35 = vshrl.u32 %v16121_v53, 16 }
 0x3ee   : > { %6276 = vst.msk [vmem:[#allocation2 + $0x94] sm:$0xf] %vm624_vm3, %v6079_v24  ;;  %18950 = vst [vmem:[#allocation37_spill] sm:$0xff] %v16348_v15  ;;  %v16353_v52 = vor.u32 %v18951_v33, %v16007_v6  ;;  %v6224_v41 = vld [vmem:[#allocation2 + $0x3c] sm:$0xf]  ;;  %v6096_v24 = vsel %vm13992_vm6, %v6088_v50, %v6095_v59  ;;  %v18953_v33 = vshll.u32 %v16117_v28, 16 }
 0x3ef   : > { %v16359_v13 = vor.u32 %v6102_v16, %v6101_v4  ;;  %v6105_v58 = vrot.slane %v6101_v4, 4  ;;  %v6235_v63 = vld [vmem:[#allocation2 + $0x50] sm:$0x1]  ;;  %v6238_v6 = vld [vmem:[#allocation2 + $0x54] sm:$0xf]  ;;  %v18954_v45 = vshrl.u32 %v16119_v3, 16 }
 0x3f0   : > { %18952 = vst [vmem:[#allocation38_spill] sm:$0xff] %v16353_v52  ;;  %v6112_v19 = vor.u32 %v18953_v33, %v16348_v15  ;;  %6283 = vst.msk [vmem:[#allocation2 + $0xa0] sm:$0xf] %vm624_vm3, %v6096_v24  ;;  %v6245_v16 = vld [vmem:[#allocation2 + $0x60] sm:$0xf]  ;;  %v16370_v30 = vrot.slane %v6141_v35, 7  ;;  %v6197_v33 = vsel %vm14002_vm7, %v16142_v5, %v13910_v46  ;;  %v6204_v24 = vsel %vm14002_vm7, %v16148_v44, %v6203_v8 }
 0x3f1   : > { %v6135_v31 = vrot.slane %v18954_v45, 7  ;;  %v6249_v59 = vld [vmem:[#allocation2 + $0x68] sm:$0x1]  ;;  %v6242_v50 = vld [vmem:[#allocation2 + $0x5c] sm:$0x1]  ;;  %v18956_v18 = vrot.slane %v16132_v38, 4 }
 0x3f2   : > { %v6252_v4 = vld [vmem:[#allocation2 + $0x6c] sm:$0xf]  ;;  %v6263_v3 = vld [vmem:[#allocation2 + $0x80] sm:$0x1]  ;;  %v6256_v28 = vld [vmem:[#allocation2 + $0x74] sm:$0x1]  ;;  %v6113_v35 = vsel %vm13992_vm6, %v6105_v58, %v6112_v19 }
 0x3f3   : > { %v6201_v45 = vsel %vm14010_vm8, %v18956_v18, %v6200_v12  ;;  %v16384_v52 = vor.u32 %v6136_v51, %v6135_v31  ;;  %v6139_v15 = vrot.slane %v6135_v31, 4  ;;  %6198 = vst [vmem:[#allocation2 + $0xc] sm:$0xf] %v6197_v33  ;;  %6205 = vst [vmem:[#allocation2 + $0x18] sm:$0xf] %v6204_v24  ;;  %v18957_v46 = vrot.slane %v16138_v11, 4 }
 0x3f4   : > { %6202 = vst [vmem:[#allocation2 + $0x14] sm:$0x1] %v6201_v45  ;;  %v6273_v38 = vld [vmem:[#allocation2 + $0x90] sm:$0xf]  ;;  %v6277_v5 = vld [vmem:[#allocation2 + $0x98] sm:$0x1]  ;;  %v6211_v31 = vsel %vm14002_vm7, %v16167_v27, %v6210_v55  ;;  %v6225_v27 = vsel %vm14002_vm7, %v16203_v60, %v6224_v41 }
 0x3f5   : > { %v6208_v18 = vsel %vm14010_vm8, %v18957_v46, %v6207_v20  ;;  %v18958_v44 = vshll.u32 %v16121_v53, 16  ;;  %v6148_v12 = vrot.slane %v16370_v30, 4  ;;  %v18959_v19 = vrot.slane %v16158_v49, 4  ;;  %6290 = vst.msk [vmem:[#allocation2 + $0xac] sm:$0xf] %vm624_vm3, %v6113_v35  ;;  %v18973_v46 = vld [vmem:[#allocation9_spill] sm:$0xff] }
 0x3f6   : > { %6209 = vst [vmem:[#allocation2 + $0x20] sm:$0x1] %v6208_v18  ;;  %v6270_v51 = vld [vmem:[#allocation2 + $0x8c] sm:$0x1]  ;;  %6212 = vst [vmem:[#allocation2 + $0x24] sm:$0xf] %v6211_v31  ;;  %v6218_v20 = vsel %vm14002_vm7, %v16185_v26, %v6217_v56 }
 0x3f7   : > { %v6146_v8 = vor.u32 %v18958_v44, %v16370_v30  ;;  %v6215_v11 = vsel %vm14010_vm8, %v18959_v19, %v6214_v54  ;;  %v18960_v58 = vrot.slane %v16176_v62, 4  ;;  %v18961_v49 = vrot.slane %v16194_v39, 4  ;;  %v6287_v54 = vld [vmem:[#allocation2 + $0xa8] sm:$0xf]  ;;  %v6280_v45 = vld [vmem:[#allocation2 + $0x9c] sm:$0xf] }
 0x3f8   : > { %6216 = vst [vmem:[#allocation2 + $0x2c] sm:$0x1] %v6215_v11  ;;  %v6291_v24 = vld [vmem:[#allocation2 + $0xb0] sm:$0x1]  ;;  %6219 = vst [vmem:[#allocation2 + $0x30] sm:$0xf] %v6218_v20 }
 0x3f9   : > { %v6222_v33 = vsel %vm14010_vm8, %v18960_v58, %v6221_v17  ;;  %v6229_v55 = vsel %vm14010_vm8, %v18961_v49, %v6228_v57  ;;  %v6147_v56 = vsel %vm13992_vm6, %v6139_v15, %v6146_v8  ;;  %6226 = vst [vmem:[#allocation2 + $0x3c] sm:$0xf] %v6225_v27  ;;  %v6232_v17 = vsel %vm14002_vm7, %v16223_v47, %v6231_v14  ;;  %v6284_v62 = vld [vmem:[#allocation2 + $0xa4] sm:$0x1]  ;;  %v6294_v39 = vld [vmem:[#allocation2 + $0xb4] sm:$0xf] }
 0x3fa   : > { %6223 = vst [vmem:[#allocation2 + $0x38] sm:$0x1] %v6222_v33  ;;  %6230 = vst [vmem:[#allocation2 + $0x44] sm:$0x1] %v6229_v55  ;;  %v18962_v26 = vrot.slane %v16212_v10, 4  ;;  %v6239_v57 = vsel %vm14002_vm7, %v16230_v40, %v6238_v6  ;;  %v18963_v15 = vrot.slane %v16232_v42, 4  ;;  %v6246_v47 = vsel %vm14002_vm7, %v16247_v1, %v6245_v16 }
 0x3fb   : > { %6233 = vst [vmem:[#allocation2 + $0x48] sm:$0xf] %v6232_v17  ;;  %6240 = vst [vmem:[#allocation2 + $0x54] sm:$0xf] %v6239_v57  ;;  %v6253_v40 = vsel %vm14002_vm7, %v16267_v21, %v6252_v4  ;;  %v6305_v41 = vld [vmem:[#allocation2 + $0xc8] sm:$0x1]  ;;  %v6267_v16 = vsel %vm14002_vm7, %v16305_v37, %v6266_v36  ;;  %v6281_v36 = vsel %vm14002_vm7, %v16337_v7, %v6280_v45 }
 0x3fc   : > { %v6236_v60 = vsel %vm14010_vm8, %v18962_v26, %v6235_v63  ;;  %v6243_v14 = vsel %vm14010_vm8, %v18963_v15, %v6242_v50  ;;  %v18964_v63 = vrot.slane %v16249_v48, 4  ;;  %6304 = vst.msk [vmem:[#allocation2 + $0xc4] sm:$0xf] %vm624_vm3, %v6147_v56  ;;  %6247 = vst [vmem:[#allocation2 + $0x60] sm:$0xf] %v6246_v47  ;;  %v18965_v42 = vrot.slane %v16263_v9, 4 }
 0x3fd   : > { %6237 = vst [vmem:[#allocation2 + $0x50] sm:$0x1] %v6236_v60  ;;  %6244 = vst [vmem:[#allocation2 + $0x5c] sm:$0x1] %v6243_v14  ;;  %v6260_v48 = vsel %vm14002_vm7, %v16279_v43, %v6259_v34  ;;  %v18966_v6 = vrot.slane %v16281_v22, 4  ;;  %v18967_v9 = vrot.slane %v16298_v29, 4  ;;  %v6274_v34 = vsel %vm14002_vm7, %v16317_v0, %v6273_v38 }
 0x3fe   : > { %v6250_v10 = vsel %vm14010_vm8, %v18964_v63, %v6249_v59  ;;  %6254 = vst [vmem:[#allocation2 + $0x6c] sm:$0xf] %v6253_v40  ;;  %v6257_v1 = vsel %vm14010_vm8, %v18965_v42, %v6256_v28  ;;  %6261 = vst [vmem:[#allocation2 + $0x78] sm:$0xf] %v6260_v48  ;;  %v18968_v43 = vrot.slane %v16313_v23, 4  ;;  %v18969_v37 = vrot.slane %v16329_v61, 4 }
 0x3ff   : > { %6251 = vst [vmem:[#allocation2 + $0x68] sm:$0x1] %v6250_v10  ;;  %v6264_v21 = vsel %vm14010_vm8, %v18966_v6, %v6263_v3  ;;  %6258 = vst [vmem:[#allocation2 + $0x74] sm:$0x1] %v6257_v1  ;;  %v6271_v28 = vsel %vm14010_vm8, %v18967_v9, %v6270_v51  ;;  %v6288_v23 = vsel %vm14002_vm7, %v16359_v13, %v6287_v54  ;;  %v18970_v0 = vld [vmem:[#allocation37_spill] sm:$0xff]  ;;  %v18972_v50 = vld [vmem:[#allocation38_spill] sm:$0xff] }
 0x400   : > { %6265 = vst [vmem:[#allocation2 + $0x80] sm:$0x1] %v6264_v21  ;;  %6268 = vst [vmem:[#allocation2 + $0x84] sm:$0xf] %v6267_v16  ;;  %v6278_v3 = vsel %vm14010_vm8, %v18968_v43, %v6277_v5  ;;  %v6285_v22 = vsel %vm14010_vm8, %v18969_v37, %v6284_v62  ;;  %v18971_v29 = vrot.slane %v18970_v0, 4  ;;  %v6295_v7 = vsel %vm14002_vm7, %v18972_v50, %v6294_v39  ;;  %v18975_v5 = vld [vmem:[#allocation5_spill] sm:$0xff] }
 0x401   : > { %6272 = vst [vmem:[#allocation2 + $0x8c] sm:$0x1] %v6271_v28  ;;  %6275 = vst [vmem:[#allocation2 + $0x90] sm:$0xf] %v6274_v34  ;;  %v6356_v4 = vld [vmem:[#allocation2 + $0xc] sm:$0x1]  ;;  %v6302_v61 = vsel %vm14002_vm7, %v16384_v52, %v6301_v2  ;;  %v6306_v13 = vsel %vm14010_vm8, %v6148_v12, %v6305_v41 }
 0x402   : > { %6279 = vst [vmem:[#allocation2 + $0x98] sm:$0x1] %v6278_v3  ;;  %6282 = vst [vmem:[#allocation2 + $0x9c] sm:$0xf] %v6281_v36  ;;  %v6292_v59 = vsel %vm14010_vm8, %v18971_v29, %v6291_v24  ;;  %v6359_v35 = vld [vmem:[#allocation2 + $0x18] sm:$0x1] }
 0x403   : > { %6286 = vst [vmem:[#allocation2 + $0xa4] sm:$0x1] %v6285_v22  ;;  %6289 = vst [vmem:[#allocation2 + $0xa8] sm:$0xf] %v6288_v23  ;;  %v18974_v18 = vshrl.u32 %v18973_v46, 16  ;;  %v18976_v44 = vshrl.u32 %v18975_v5, 16 }
 0x404   : > { %6293 = vst [vmem:[#allocation2 + $0xb0] sm:$0x1] %v6292_v59  ;;  %6296 = vst [vmem:[#allocation2 + $0xb4] sm:$0xf] %v6295_v7  ;;  %v6362_v32 = vld [vmem:[#allocation2 + $0x24] sm:$0x1] }
 0x405   : > { %v6357_v38 = vsel %vm14010_vm8, %v18974_v18, %v6356_v4  ;;  %v6360_v8 = vsel %vm14010_vm8, %v18976_v44, %v6359_v35  ;;  %6303 = vst [vmem:[#allocation2 + $0xc0] sm:$0xf] %v6302_v61  ;;  %6307 = vst [vmem:[#allocation2 + $0xc8] sm:$0x1] %v6306_v13  ;;  %v18977_v52 = vld [vmem:[#allocation3_spill] sm:$0xff]  ;;  %v18981_v51 = vld [vmem:[#allocation13_spill] sm:$0xff] }
 0x406   : > { %6358 = vst [vmem:[#allocation2 + $0xc] sm:$0x1] %v6357_v38  ;;  %6361 = vst [vmem:[#allocation2 + $0x18] sm:$0x1] %v6360_v8  ;;  %v18978_v30 = vshll.u32 %v18977_v52, 16  ;;  %v18979_v19 = vld [vmem:[#allocation11_spill] sm:$0xff] }
 0x407   : > { %v18980_v12 = vshll.u32 %v18979_v19, 16  ;;  %v18982_v20 = vshll.u32 %v18981_v51, 16  ;;  %v18983_v33 = vld [vmem:[#allocation15_spill] sm:$0xff]  ;;  %v18985_v55 = vld [vmem:[#allocation12_spill] sm:$0xff]  ;;  %v6365_v24 = vld [vmem:[#allocation2 + $0x30] sm:$0x1] }
 0x408   : > { %v11918_v31 = vrot.slane %v18978_v30, 11  ;;  %v18984_v27 = vshll.u32 %v18983_v33, 16  ;;  %v18986_v54 = vshrl.u32 %v18985_v55, 16  ;;  %v6368_v56 = vld [vmem:[#allocation2 + $0x3c] sm:$0x1]  ;;  %v18987_v17 = vld [vmem:[#allocation17_spill] sm:$0xff] }
 0x409   : > { %v16504_v11 = vrot.slane %v18980_v12, 11  ;;  %v16508_v58 = vrot.slane %v18982_v20, 11  ;;  %v18988_v26 = vshll.u32 %v18987_v17, 16  ;;  %v18989_v57 = vld [vmem:[#allocation19_spill] sm:$0xff]  ;;  %v6452_v39 = vld [vmem:[#allocation2 + $0x14] sm:$0x1] }
 0x40a   : > { %v16512_v49 = vrot.slane %v18984_v27, 11  ;;  %v6363_v45 = vsel %vm14010_vm8, %v18986_v54, %v6362_v32  ;;  %v18990_v62 = vshll.u32 %v18989_v57, 16  ;;  %v18991_v15 = vld [vmem:[#allocation14_spill] sm:$0xff]  ;;  %v18993_v63 = vld [vmem:[#allocation16_spill] sm:$0xff]  ;;  %v6371_v41 = vld [vmem:[#allocation2 + $0x48] sm:$0x1] }
 0x40b   : > { %v16520_v60 = vrot.slane %v18988_v26, 11  ;;  %6364 = vst [vmem:[#allocation2 + $0x24] sm:$0x1] %v6363_v45  ;;  %v18992_v14 = vshrl.u32 %v18991_v15, 16  ;;  %v18994_v10 = vshrl.u32 %v18993_v63, 16  ;;  %v18995_v1 = vld [vmem:[#allocation21_spill] sm:$0xff] }
 0x40c   : > { %v16524_v2 = vrot.slane %v18990_v62, 11  ;;  %v6374_v42 = vld [vmem:[#allocation2 + $0x54] sm:$0x1]  ;;  %v18996_v48 = vshll.u32 %v18995_v1, 16  ;;  %v18997_v21 = vld [vmem:[#allocation23_spill] sm:$0xff]  ;;  %v19001_v36 = vld [vmem:[#allocation20_spill] sm:$0xff] }
 0x40d   : > { %v6366_v47 = vsel %vm14010_vm8, %v18992_v14, %v6365_v24  ;;  %v6369_v40 = vsel %vm14010_vm8, %v18994_v10, %v6368_v56  ;;  %v18998_v16 = vshll.u32 %v18997_v21, 16  ;;  %v6455_v28 = vld [vmem:[#allocation2 + $0x20] sm:$0x1]  ;;  %v18999_v34 = vld [vmem:[#allocation18_spill] sm:$0xff]  ;;  %v19002_v37 = vshrl.u32 %v19001_v36, 16  ;;  %v19003_v29 = vld [vmem:[#allocation25_spill] sm:$0xff] }
 0x40e   : > { %v16536_v6 = vrot.slane %v18996_v48, 11  ;;  %6367 = vst [vmem:[#allocation2 + $0x30] sm:$0x1] %v6366_v47  ;;  %6370 = vst [vmem:[#allocation2 + $0x3c] sm:$0x1] %v6369_v40  ;;  %v19000_v43 = vshrl.u32 %v18999_v34, 16 }
 0x40f   : > { %v16540_v9 = vrot.slane %v18998_v16, 11  ;;  %v6375_v22 = vsel %vm14010_vm8, %v19002_v37, %v6374_v42  ;;  %v6377_v23 = vld [vmem:[#allocation2 + $0x60] sm:$0x1]  ;;  %v6380_v0 = vld [vmem:[#allocation2 + $0x6c] sm:$0x1]  ;;  %v19004_v59 = vshll.u32 %v19003_v29, 16 }
 0x410   : > { %v6372_v3 = vsel %vm14010_vm8, %v19000_v43, %v6371_v41  ;;  %v19005_v7 = vld [vmem:[#allocation27_spill] sm:$0xff]  ;;  %6376 = vst [vmem:[#allocation2 + $0x54] sm:$0x1] %v6375_v22  ;;  %v19007_v61 = vld [vmem:[#allocation22_spill] sm:$0xff]  ;;  %v19009_v18 = vld [vmem:[#allocation24_spill] sm:$0xff]  ;;  %v19027_v21 = vshll.u32 %v16121_v53, 16  ;;  %v6453_v43 = vsel %vm14056_vm9, %v11918_v31, %v6452_v39  ;;  %v6456_v53 = vsel %vm14056_vm9, %v16504_v11, %v6455_v28 }
 0x411   : > { %v16552_v50 = vrot.slane %v19004_v59, 11  ;;  %v19006_v4 = vshll.u32 %v19005_v7, 16  ;;  %6373 = vst [vmem:[#allocation2 + $0x48] sm:$0x1] %v6372_v3  ;;  %v19008_v13 = vshrl.u32 %v19007_v61, 16  ;;  %v19010_v38 = vshrl.u32 %v19009_v18, 16 }
 0x412   : > { %v6383_v44 = vld [vmem:[#allocation2 + $0x78] sm:$0x1]  ;;  %v6386_v8 = vld [vmem:[#allocation2 + $0x84] sm:$0x1]  ;;  %v19011_v32 = vld [vmem:[#allocation29_spill] sm:$0xff]  ;;  %v11933_v16 = vrot.slane %v19027_v21, 11 }
 0x413   : > { %v16556_v35 = vrot.slane %v19006_v4, 11  ;;  %v6378_v46 = vsel %vm14010_vm8, %v19008_v13, %v6377_v23  ;;  %v6381_v5 = vsel %vm14010_vm8, %v19010_v38, %v6380_v0  ;;  %v19012_v52 = vshll.u32 %v19011_v32, 16  ;;  %v19013_v19 = vld [vmem:[#allocation31_spill] sm:$0xff]  ;;  %v19015_v20 = vld [vmem:[#allocation26_spill] sm:$0xff]  ;;  %v19017_v55 = vld [vmem:[#allocation28_spill] sm:$0xff] }
 0x414   : > { %v19014_v12 = vshll.u32 %v19013_v19, 16  ;;  %6379 = vst [vmem:[#allocation2 + $0x60] sm:$0x1] %v6378_v46  ;;  %6382 = vst [vmem:[#allocation2 + $0x6c] sm:$0x1] %v6381_v5  ;;  %v19016_v33 = vshrl.u32 %v19015_v20, 16 }
 0x415   : > { %v16568_v30 = vrot.slane %v19012_v52, 11  ;;  %v19018_v54 = vshrl.u32 %v19017_v55, 16  ;;  %v6389_v24 = vld [vmem:[#allocation2 + $0x90] sm:$0x1]  ;;  %v6392_v56 = vld [vmem:[#allocation2 + $0x9c] sm:$0x1] }
 0x416   : > { %v16572_v51 = vrot.slane %v19014_v12, 11  ;;  %v6384_v27 = vsel %vm14010_vm8, %v19016_v33, %v6383_v44  ;;  %v19019_v17 = vld [vmem:[#allocation33_spill] sm:$0xff]  ;;  %v19021_v62 = vld [vmem:[#allocation35_spill] sm:$0xff]  ;;  %v19023_v47 = vld [vmem:[#allocation30_spill] sm:$0xff]  ;;  %6454 = vst [vmem:[#allocation2 + $0x14] sm:$0x1] %v6453_v43 }
 0x417   : > { %v6387_v45 = vsel %vm14010_vm8, %v19018_v54, %v6386_v8  ;;  %v19020_v26 = vshll.u32 %v19019_v17, 16  ;;  %v19022_v15 = vshll.u32 %v19021_v62, 16  ;;  %6385 = vst [vmem:[#allocation2 + $0x78] sm:$0x1] %v6384_v27  ;;  %v19024_v63 = vshrl.u32 %v19023_v47, 16  ;;  %v19025_v40 = vld [vmem:[#allocation32_spill] sm:$0xff] }
 0x418   : > { %6388 = vst [vmem:[#allocation2 + $0x84] sm:$0x1] %v6387_v45  ;;  %v19026_v41 = vshrl.u32 %v19025_v40, 16  ;;  %v6395_v1 = vld [vmem:[#allocation2 + $0xa8] sm:$0x1]  ;;  %v19029_v3 = vld [vmem:[#allocation34_spill] sm:$0xff] }
 0x419   : > { %v11930_v57 = vrot.slane %v19020_v26, 11  ;;  %v16586_v14 = vrot.slane %v19022_v15, 11  ;;  %v6390_v10 = vsel %vm14010_vm8, %v19024_v63, %v6389_v24  ;;  %v6398_v48 = vld [vmem:[#allocation2 + $0xb4] sm:$0x1]  ;;  %v19030_v36 = vshrl.u32 %v19029_v3, 16  ;;  %v19033_v7 = vld [vmem:[#allocation36_spill] sm:$0xff] }
 0x41a   : > { %v6393_v42 = vsel %vm14010_vm8, %v19026_v41, %v6392_v56  ;;  %6391 = vst [vmem:[#allocation2 + $0x90] sm:$0x1] %v6390_v10  ;;  %v19031_v22 = vld [vmem:[#allocation10_spill] sm:$0xff]  ;;  %v6401_v29 = vld [vmem:[#allocation2 + $0xc0] sm:$0x1]  ;;  %v19034_v4 = vshrl.u32 %v19033_v7, 16 }
 0x41b   : > { %6394 = vst [vmem:[#allocation2 + $0x9c] sm:$0x1] %v6393_v42  ;;  %v6396_v37 = vsel %vm14010_vm8, %v19030_v36, %v6395_v1  ;;  %v19032_v23 = vshrl.u32 %v19031_v22, 16  ;;  %v6458_v59 = vld [vmem:[#allocation2 + $0x2c] sm:$0x1] }
 0x41c   : > { %v6461_v31 = vld [vmem:[#allocation2 + $0x38] sm:$0x1]  ;;  %v16611_v39 = vld [vmem:[#allocation2 + $0x4] sm:$0xf]  ;;  %6397 = vst [vmem:[#allocation2 + $0xa8] sm:$0x1] %v6396_v37  ;;  %v6402_v61 = vsel %vm14010_vm8, %v19034_v4, %v6401_v29  ;;  %v6459_v13 = vsel %vm14056_vm9, %v16508_v58, %v6458_v59 }
 0x41d   : > { %v6399_v0 = vsel %vm14010_vm8, %v19032_v23, %v6398_v48  ;;  %6457 = vst [vmem:[#allocation2 + $0x20] sm:$0x1] %v6456_v53  ;;  %v6462_v11 = vsel %vm14056_vm9, %v16512_v49, %v6461_v31  ;;  %v6464_v28 = vld [vmem:[#allocation2 + $0x44] sm:$0x1]  ;;  %v6467_v46 = vld [vmem:[#allocation2 + $0x50] sm:$0x1] }
 0x41e   : > { %6400 = vst [vmem:[#allocation2 + $0xb4] sm:$0x1] %v6399_v0  ;;  %v6470_v18 = vld [vmem:[#allocation2 + $0x5c] sm:$0x1]  ;;  %v16623_v38 = vld [vmem:[#allocation2 + $0x10] sm:$0xf]  ;;  %v6465_v25 = vsel %vm14056_vm9, %v16520_v60, %v6464_v28  ;;  %v6468_v58 = vsel %vm14056_vm9, %v16524_v2, %v6467_v46 }
 0x41f   : > { %6403 = vst [vmem:[#allocation2 + $0xc0] sm:$0x1] %v6402_v61  ;;  %6460 = vst [vmem:[#allocation2 + $0x2c] sm:$0x1] %v6459_v13  ;;  %v6471_v49 = vsel %vm14056_vm9, %v16536_v6, %v6470_v18  ;;  %v6473_v5 = vld [vmem:[#allocation2 + $0x68] sm:$0x1] }
 0x420   : > { %6463 = vst [vmem:[#allocation2 + $0x38] sm:$0x1] %v6462_v11  ;;  %v6476_v44 = vld [vmem:[#allocation2 + $0x74] sm:$0x1]  ;;  %v6479_v8 = vld [vmem:[#allocation2 + $0x80] sm:$0x1]  ;;  %v6474_v32 = vsel %vm14056_vm9, %v16540_v9, %v6473_v5 }
 0x421   : > { %6466 = vst [vmem:[#allocation2 + $0x44] sm:$0x1] %v6465_v25  ;;  %6469 = vst [vmem:[#allocation2 + $0x50] sm:$0x1] %v6468_v58  ;;  %v6477_v60 = vsel %vm14056_vm9, %v16552_v50, %v6476_v44  ;;  %v6480_v2 = vsel %vm14056_vm9, %v16556_v35, %v6479_v8  ;;  %v6482_v52 = vld [vmem:[#allocation2 + $0x8c] sm:$0x1] }
 0x422   : > { %6472 = vst [vmem:[#allocation2 + $0x5c] sm:$0x1] %v6471_v49  ;;  %v6485_v6 = vld [vmem:[#allocation2 + $0x98] sm:$0x1]  ;;  %v6488_v19 = vld [vmem:[#allocation2 + $0xa4] sm:$0x1]  ;;  %v6483_v12 = vsel %vm14056_vm9, %v16568_v30, %v6482_v52 }
 0x423   : > { %6475 = vst [vmem:[#allocation2 + $0x68] sm:$0x1] %v6474_v32  ;;  %6478 = vst [vmem:[#allocation2 + $0x74] sm:$0x1] %v6477_v60  ;;  %v6486_v9 = vsel %vm14056_vm9, %v16572_v51, %v6485_v6  ;;  %v6489_v50 = vsel %vm14056_vm9, %v11930_v57, %v6488_v19  ;;  %v6491_v20 = vld [vmem:[#allocation2 + $0xb0] sm:$0x1] }
 0x424   : > { %6481 = vst [vmem:[#allocation2 + $0x80] sm:$0x1] %v6480_v2  ;;  %v6497_v33 = vld [vmem:[#allocation2 + $0xc8] sm:$0x1]  ;;  %v6500_v35 = vld [vmem:[#allocation2 + $0x18] sm:$0xf]  ;;  %v6492_v27 = vsel %vm14056_vm9, %v16586_v14, %v6491_v20 }
 0x425   : > { %6484 = vst [vmem:[#allocation2 + $0x8c] sm:$0x1] %v6483_v12  ;;  %6487 = vst [vmem:[#allocation2 + $0x98] sm:$0x1] %v6486_v9  ;;  %v6498_v30 = vsel %vm14056_vm9, %v11933_v16, %v6497_v33  ;;  %v6571_v51 = vshll.u32 %v16611_v39, 16  ;;  %v6575_v55 = vshrl.u32 %v16611_v39, 16 }
 0x426   : > { %6490 = vst [vmem:[#allocation2 + $0xa4] sm:$0x1] %v6489_v50  ;;  %6503 = vst.msk [vmem:[#allocation2] sm:$0xf] %vm624_vm3, %v6500_v35  ;;  %v16659_v54 = vld [vmem:[#allocation2 + $0xc] sm:$0xf] }
 0x427   : > { %v16661_v45 = vld [vmem:[#allocation2 + $0x18] sm:$0xf]  ;;  %6493 = vst [vmem:[#allocation2 + $0xb0] sm:$0x1] %v6492_v27  ;;  %6499 = vst [vmem:[#allocation2 + $0xc8] sm:$0x1] %v6498_v30 }
 0x428   : > { %v6586_v24 = vshrl.u32 %v16659_v54, 16  ;;  %v6589_v56 = vshll.u32 %v16659_v54, 16  ;;  %v6595_v17 = vshll.u32 %v16623_v38, 16  ;;  %v6599_v26 = vshrl.u32 %v16623_v38, 16  ;;  %v16667_v57 = vld [vmem:[#allocation2 + $0x1c] sm:$0xf] }
 0x429   : > { %v16669_v62 = vrot.slane %v6571_v51, 5  ;;  %v6577_v15 = vrot.slane %v6575_v55, 4  ;;  %v6546_v14 = vld [vmem:[#allocation2 + $0x14] sm:$0x1]  ;;  %v6610_v47 = vshrl.u32 %v16661_v45, 16  ;;  %v6613_v3 = vshll.u32 %v16661_v45, 16 }
 0x42a   : > { %v6502_v63 = vld [vmem:[#allocation2 + $0x20] sm:$0x1]  ;;  %v6588_v10 = vrot.slane %v6586_v24, 4  ;;  %v6591_v40 = vrot.slane %v6589_v56, 5  ;;  %v6597_v41 = vrot.slane %v6595_v17, 5  ;;  %v6601_v42 = vrot.slane %v6599_v26, 4 }
 0x42b   : > { %6505 = vst.msk [vmem:[#allocation2 + $0x8] sm:$0x1] %vm632_vm5, %v6502_v63  ;;  %v6578_v1 = vor.u32 %v6577_v15, %v16669_v62  ;;  %v6605_v48 = vshll.u32 %v6546_v14, 16  ;;  %v16674_v21 = vld [vmem:[#allocation2 + $0x20] sm:$0x1]  ;;  %v6612_v16 = vrot.slane %v6610_v47, 4 }
 0x42c   : > { %19035 = vst [vmem:[#allocation4_spill] sm:$0xff] %v16674_v21  ;;  %v6592_v34 = vor.u32 %v6591_v40, %v6588_v10  ;;  %v6602_v43 = vor.u32 %v6601_v42, %v6597_v41  ;;  %v6619_v36 = vshll.u32 %v16667_v57, 16  ;;  %v13911_v22 = vld [vmem:[%s18732_s2] sm:$0x3]  ;;  %v6623_v0 = vshrl.u32 %v16667_v57, 16 }
 0x42d   : > { %v6607_v37 = vrot.slane %v6605_v48, 5  ;;  %v16682_v23 = vsel %vm1486_vm0, %v13911_v22, 0  ;;  %v6629_v29 = vshll.u32 %v16674_v21, 16  ;;  %v16686_v53 = vld [vmem:[#allocation2 + $0x24] sm:$0xf]  ;;  %v6579_v31 = vrot.slane %v6578_v1, 4 }
 0x42e   : > { %v16688_v59 = vld [vmem:[#allocation2] sm:$0xf]  ;;  %v6593_v7 = vrot.slane %v6592_v34, 4  ;;  %v6615_v4 = vrot.slane %v6613_v3, 5  ;;  %v6621_v61 = vrot.slane %v6619_v36, 5  ;;  %v6603_v28 = vrot.slane %v6602_v43, 4 }
 0x42f   : > { %v6562_v13 = vshrl.u32 %v16688_v59, 16  ;;  %v6565_v11 = vshll.u32 %v16688_v59, 16  ;;  %v6625_v46 = vrot.slane %v6623_v0, 4  ;;  %v16692_v18 = vld [vmem:[#allocation2 + $0x28] sm:$0xf]  ;;  %v6631_v5 = vrot.slane %v6629_v29, 5 }
 0x430   : > { %v6598_v58 = vsel %vm14158_vm12, %v6593_v7, %v6597_v41  ;;  %v6616_v49 = vor.u32 %v6615_v4, %v6612_v16  ;;  %v6634_v44 = vshrl.u32 %v16686_v53, 16  ;;  %v6608_v60 = vsel %vm14158_vm12, %v6603_v28, %v6607_v37  ;;  %v16699_v52 = vld [vmem:[#allocation2 + $0x2c] sm:$0x1]  ;;  %v16706_v30 = vld [vmem:[#allocation2 + $0x30] sm:$0xf] }
 0x431   : > { %v6564_v8 = vrot.slane %v6562_v13, 4  ;;  %v6567_v32 = vrot.slane %v6565_v11, 5  ;;  %v6626_v2 = vor.u32 %v6625_v46, %v6621_v61  ;;  %19037 = vst [vmem:[#allocation37_spill] sm:$0xff] %v16699_v52  ;;  %v6637_v9 = vshll.u32 %v16686_v53, 16  ;;  %v16714_v40 = vld [vmem:[#allocation2 + $0x34] sm:$0xf] }
 0x432   : > { %v16701_v6 = vld [vmem:[#allocation2 + $0x8] sm:$0x1]  ;;  %v6617_v19 = vrot.slane %v6616_v49, 4  ;;  %v6636_v12 = vrot.slane %v6634_v44, 4  ;;  %v6643_v50 = vshll.u32 %v16692_v18, 16  ;;  %v11936_v35 = vcombine.low %v6598_v58, %v6608_v60 }
 0x433   : > { %19038 = vst [vmem:[#allocation38_spill] sm:$0xff] %v16701_v6  ;;  %v6568_v20 = vor.u32 %v6567_v32, %v6564_v8  ;;  %v6581_v33 = vshll.u32 %v16701_v6, 16  ;;  %v6627_v27 = vrot.slane %v6626_v2, 4  ;;  %v6639_v55 = vrot.slane %v6637_v9, 5  ;;  %v16716_v41 = vld [vmem:[#allocation2 + $0x38] sm:$0x1] }
 0x434   : > { %v6622_v51 = vsel %vm14158_vm12, %v6617_v19, %v6621_v61  ;;  %v6645_v24 = vrot.slane %v6643_v50, 5  ;;  %v6647_v56 = vshrl.u32 %v16692_v18, 16  ;;  %v6653_v14 = vshll.u32 %v16699_v52, 16  ;;  %v16725_v43 = vld [vmem:[#allocation2 + $0x3c] sm:$0xf] }
 0x435   : > { %v6569_v17 = vrot.slane %v6568_v20, 4  ;;  %v6583_v26 = vrot.slane %v6581_v33, 5  ;;  %v6632_v15 = vsel %vm14158_vm12, %v6627_v27, %v6631_v5  ;;  %v6640_v63 = vor.u32 %v6639_v55, %v6636_v12  ;;  %v16730_v0 = vld [vmem:[%s18732_s2 + $0x4] sm:$0x3]  ;;  %v16735_v4 = vld [vmem:[#allocation2 + $0x40] sm:$0xf] }
 0x436   : > { %v11937_v47 = vcombine.low %v6622_v51, %v6632_v15  ;;  %v6649_v10 = vrot.slane %v6647_v56, 4  ;;  %v6658_v42 = vshrl.u32 %v16706_v30, 16  ;;  %v6655_v16 = vrot.slane %v6653_v14, 5  ;;  %v16740_v11 = vld [vmem:[#allocation2 + $0x44] sm:$0x1] }
 0x437   : > { %v6574_v1 = vsel %vm14158_vm12, %v6569_v17, %v16669_v62  ;;  %v6584_v48 = vsel %vm14158_vm12, %v6579_v31, %v6583_v26  ;;  %v6661_v34 = vshll.u32 %v16706_v30, 16  ;;  %v6641_v36 = vrot.slane %v6640_v63, 4  ;;  %v16745_v8 = vld [vmem:[#allocation2 + $0x48] sm:$0xf]  ;;  %v16753_v33 = vld [vmem:[#allocation2 + $0x4c] sm:$0xf] }
 0x438   : > { %v11935_v3 = vcombine.low %v6574_v1, %v6584_v48  ;;  %v6650_v37 = vor.u32 %v6649_v10, %v6645_v24  ;;  %v6660_v22 = vrot.slane %v6658_v42, 4  ;;  %v6667_v62 = vshll.u32 %v16714_v40, 16  ;;  %v16761_v17 = vld [vmem:[#allocation2 + $0x50] sm:$0x1]  ;;  %v16765_v10 = vld [vmem:[#allocation2 + $0x54] sm:$0xf] }
 0x439   : > { %v6663_v29 = vrot.slane %v6661_v34, 5  ;;  %v6671_v7 = vshrl.u32 %v16714_v40, 16  ;;  %v6677_v31 = vshll.u32 %v16716_v41, 16  ;;  %v6646_v61 = vsel %vm14158_vm12, %v6641_v36, %v6645_v24  ;;  %v16770_v34 = vld [vmem:[#allocation2 + $0x58] sm:$0xf] }
 0x43a   : > { %12960 = vmatprep.mubr.msk.bf16.mxu1 %vm1437_vm13, %v11935_v3  ;;  %v6651_v13 = vrot.slane %v6650_v37, 4  ;;  %v6682_v28 = vshrl.u32 %v16725_v43, 16  ;;  %v6685_v46 = vshll.u32 %v16725_v43, 16  ;;  %v6669_v49 = vrot.slane %v6667_v62, 5  ;;  %v16872_v52 = vld [vmem:[#allocation2 + $0xa4] sm:$0x1] }
 0x43b   : > { %12961 = vmatmul.mubr.msk.bf16.vlgmr.msra.gmra.mrb[0].mxu1 %vm1437_vm13, %v11936_v35  ;;  %v6664_v58 = vor.u32 %v6663_v29, %v6660_v22  ;;  %v6673_v5 = vrot.slane %v6671_v7, 4  ;;  %v6679_v44 = vrot.slane %v6677_v31, 5  ;;  %v6691_v19 = vshll.u32 %v16735_v4, 16  ;;  %v16776_v31 = vld [vmem:[#allocation2 + $0x5c] sm:$0x1]  ;;  %19043 = vst [vmem:[#allocation13_spill] sm:$0xff] %v16872_v52 }
 0x43c   : > { %12993 = vmatpush3.bf16.msra.mxu1 %v16682_v23  ;;  %12964 = vmatprep.mubr.msk.bf16.mxu1 %vm1437_vm13, %v11937_v47  ;;  %v6656_v32 = vsel %vm14158_vm12, %v6651_v13, %v6655_v16  ;;  %v6684_v60 = vrot.slane %v6682_v28, 4  ;;  %v6687_v2 = vrot.slane %v6685_v46, 5  ;;  %v6695_v20 = vshrl.u32 %v16735_v4, 16 }
 0x43d   : > { %v11938_v12 = vcombine.low %v6646_v61, %v6656_v32  ;;  %v6665_v9 = vrot.slane %v6664_v58, 4  ;;  %v6674_v50 = vor.u32 %v6673_v5, %v6669_v49  ;;  %13787 = vmatprep.subr.msk.bf16.mxu1 %vm1486_vm0, %v16730_v0  ;;  %v6693_v35 = vrot.slane %v6691_v19, 5 }
 0x43e   : > { %v6688_v23 = vor.u32 %v6687_v2, %v6684_v60  ;;  %v6701_v27 = vshll.u32 %v16740_v11, 16  ;;  %v6706_v51 = vshrl.u32 %v16745_v8, 16  ;;  %v6697_v56 = vrot.slane %v6695_v20, 4  ;;  %v16787_v2 = vld [vmem:[#allocation2 + $0x64] sm:$0xf] }
 0x43f   : > { %v6670_v55 = vsel %vm14158_vm12, %v6665_v9, %v6669_v49  ;;  %v6675_v24 = vrot.slane %v6674_v50, 4  ;;  %v6709_v26 = vshll.u32 %v16745_v8, 16  ;;  %v6715_v63 = vshll.u32 %v16753_v33, 16  ;;  %v16783_v49 = vld [vmem:[#allocation2 + $0x60] sm:$0xf] }
 0x440   : > { %v6689_v15 = vrot.slane %v6688_v23, 4  ;;  %v6703_v14 = vrot.slane %v6701_v27, 5  ;;  %v6708_v47 = vrot.slane %v6706_v51, 4  ;;  %v6698_v1 = vor.u32 %v6697_v56, %v6693_v35 }
 0x441   : > { %v6680_v42 = vsel %vm14158_vm12, %v6675_v24, %v6679_v44  ;;  %v6711_v48 = vrot.slane %v6709_v26, 5  ;;  %v6719_v16 = vshrl.u32 %v16753_v33, 16  ;;  %v6717_v37 = vrot.slane %v6715_v63, 5  ;;  %v16793_v24 = vld [vmem:[#allocation2 + $0x68] sm:$0x1] }
 0x442   : > { %v11939_v3 = vcombine.low %v6670_v55, %v6680_v42  ;;  %v6694_v36 = vsel %vm14158_vm12, %v6689_v15, %v6693_v35  ;;  %v6725_v22 = vshll.u32 %v16761_v17, 16  ;;  %v6699_v29 = vrot.slane %v6698_v1, 4  ;;  %v16797_v15 = vld [vmem:[#allocation2 + $0x6c] sm:$0xf]  ;;  %v16802_v1 = vld [vmem:[#allocation2 + $0x70] sm:$0xf] }
 0x443   : > { %12965 = vmatmul.mubr.msk.bf16.gmra.mrb[4].mxu1 %vm1437_vm13, %v11938_v12  ;;  %v6712_v62 = vor.u32 %v6711_v48, %v6708_v47  ;;  %v6721_v7 = vrot.slane %v6719_v16, 4  ;;  %v6730_v61 = vshrl.u32 %v16765_v10, 16  ;;  %v6733_v28 = vshll.u32 %v16765_v10, 16 }
 0x444   : > { %12968 = vmatprep.mubr.msk.bf16.mxu1 %vm1437_vm13, %v11939_v3  ;;  %v6727_v13 = vrot.slane %v6725_v22, 5  ;;  %v6739_v46 = vshll.u32 %v16770_v34, 16  ;;  %v6743_v58 = vshrl.u32 %v16770_v34, 16  ;;  %v6704_v5 = vsel %vm14158_vm12, %v6699_v29, %v6703_v14  ;;  %v16806_v22 = vld [vmem:[#allocation2 + $0x78] sm:$0xf] }
 0x445   : > { %v6713_v44 = vrot.slane %v6712_v62, 4  ;;  %v6722_v32 = vor.u32 %v6721_v7, %v6717_v37  ;;  %v6732_v60 = vrot.slane %v6730_v61, 4  ;;  %v11940_v19 = vcombine.low %v6694_v36, %v6704_v5 }
 0x446   : > { %v6735_v12 = vrot.slane %v6733_v28, 5  ;;  %v6741_v9 = vrot.slane %v6739_v46, 5  ;;  %v6745_v50 = vrot.slane %v6743_v58, 4  ;;  %v6749_v35 = vshll.u32 %v16776_v31, 16 }
 0x447   : > { %v6718_v20 = vsel %vm14158_vm12, %v6713_v44, %v6717_v37  ;;  %v6723_v23 = vrot.slane %v6722_v32, 4  ;;  %v6754_v27 = vshrl.u32 %v16783_v49, 16  ;;  %v6757_v56 = vshll.u32 %v16783_v49, 16  ;;  %v16804_v37 = vld [vmem:[#allocation2 + $0x74] sm:$0x1] }
 0x448   : > { %v6736_v51 = vor.u32 %v6735_v12, %v6732_v60  ;;  %v6746_v55 = vor.u32 %v6745_v50, %v6741_v9  ;;  %v6763_v26 = vshll.u32 %v16787_v2, 16  ;;  %v6751_v47 = vrot.slane %v6749_v35, 5  ;;  %19039 = vst [vmem:[#allocation9_spill] sm:$0xff] %v16804_v37  ;;  %v16821_v35 = vld [vmem:[#allocation2 + $0x80] sm:$0x1] }
 0x449   : > { %v6728_v14 = vsel %vm14158_vm12, %v6723_v23, %v6727_v13  ;;  %v6756_v63 = vrot.slane %v6754_v27, 4  ;;  %v6767_v42 = vshrl.u32 %v16787_v2, 16  ;;  %v6759_v36 = vrot.slane %v6757_v56, 5  ;;  %19040 = vst [vmem:[#allocation5_spill] sm:$0xff] %v16821_v35 }
 0x44a   : > { %v11941_v48 = vcombine.low %v6718_v20, %v6728_v14  ;;  %v6737_v16 = vrot.slane %v6736_v51, 4  ;;  %v6747_v3 = vrot.slane %v6746_v55, 4  ;;  %v6765_v29 = vrot.slane %v6763_v26, 5 }
 0x44b   : > { %12969 = vmatmul.mubr.msk.bf16.gmra.mrb[8].mxu1 %vm1437_vm13, %v11940_v19  ;;  %v6769_v62 = vrot.slane %v6767_v42, 4  ;;  %v6773_v7 = vshll.u32 %v16793_v24, 16  ;;  %v6778_v61 = vshrl.u32 %v16797_v15, 16  ;;  %v6760_v46 = vor.u32 %v6759_v36, %v6756_v63  ;;  %v16817_v19 = vld [vmem:[#allocation2 + $0x7c] sm:$0xf] }
 0x44c   : > { %12972 = vmatprep.mubr.msk.bf16.mxu1 %vm1437_vm13, %v11941_v48  ;;  %v6742_v13 = vsel %vm14158_vm12, %v6737_v16, %v6741_v9  ;;  %v6752_v28 = vsel %vm14158_vm12, %v6747_v3, %v6751_v47  ;;  %v6781_v58 = vshll.u32 %v16797_v15, 16  ;;  %v6787_v20 = vshll.u32 %v16802_v1, 16  ;;  %v16823_v9 = vld [vmem:[#allocation2 + $0x84] sm:$0xf]  ;;  %v16832_v36 = vld [vmem:[#allocation2 + $0x88] sm:$0xf] }
 0x44d   : > { %v11942_v5 = vcombine.low %v6742_v13, %v6752_v28  ;;  %v6770_v44 = vor.u32 %v6769_v62, %v6765_v29  ;;  %v6775_v32 = vrot.slane %v6773_v7, 5  ;;  %v6780_v60 = vrot.slane %v6778_v61, 4  ;;  %v16835_v28 = vld [vmem:[#allocation2 + $0x8c] sm:$0x1] }
 0x44e   : > { %v6761_v12 = vrot.slane %v6760_v46, 4  ;;  %v6783_v50 = vrot.slane %v6781_v58, 5  ;;  %v6791_v23 = vshrl.u32 %v16802_v1, 16  ;;  %v6797_v51 = vshll.u32 %v16804_v37, 16  ;;  %19041 = vst [vmem:[#allocation3_spill] sm:$0xff] %v16835_v28 }
 0x44f   : > { %v6771_v27 = vrot.slane %v6770_v44, 4  ;;  %v6802_v55 = vshrl.u32 %v16806_v22, 16  ;;  %v6805_v56 = vshll.u32 %v16806_v22, 16  ;;  %v6789_v47 = vrot.slane %v6787_v20, 5 }
 0x450   : > { %v6766_v26 = vsel %vm14158_vm12, %v6761_v12, %v6765_v29  ;;  %v6784_v14 = vor.u32 %v6783_v50, %v6780_v60  ;;  %v6793_v63 = vrot.slane %v6791_v23, 4  ;;  %v6799_v48 = vrot.slane %v6797_v51, 5  ;;  %v16847_v23 = vld [vmem:[#allocation2 + $0x94] sm:$0xf] }
 0x451   : > { %v6776_v42 = vsel %vm14158_vm12, %v6771_v27, %v6775_v32  ;;  %v6804_v16 = vrot.slane %v6802_v55, 4  ;;  %v6807_v3 = vrot.slane %v6805_v56, 5  ;;  %v6811_v13 = vshll.u32 %v16817_v19, 16  ;;  %v16841_v32 = vld [vmem:[#allocation2 + $0x90] sm:$0xf] }
 0x452   : > { %v11943_v62 = vcombine.low %v6766_v26, %v6776_v42  ;;  %v6785_v7 = vrot.slane %v6784_v14, 4  ;;  %v6794_v61 = vor.u32 %v6793_v63, %v6789_v47  ;;  %v6815_v46 = vshrl.u32 %v16817_v19, 16 }
 0x453   : > { %12973 = vmatmul.mubr.msk.bf16.gmra.mrb[12].mxu1 %vm1437_vm13, %v11942_v5  ;;  %v6808_v29 = vor.u32 %v6807_v3, %v6804_v16  ;;  %v6821_v58 = vshll.u32 %v16821_v35, 16  ;;  %v6826_v44 = vshrl.u32 %v16823_v9, 16  ;;  %v6813_v50 = vrot.slane %v6811_v13, 5  ;;  %v16856_v13 = vld [vmem:[#allocation2 + $0x98] sm:$0x1] }
 0x454   : > { %12976 = vmatprep.mubr.msk.bf16.mxu1 %vm1437_vm13, %v11943_v62  ;;  %v6790_v60 = vsel %vm14158_vm12, %v6785_v7, %v6789_v47  ;;  %v6795_v12 = vrot.slane %v6794_v61, 4  ;;  %v6829_v20 = vshll.u32 %v16823_v9, 16  ;;  %v6817_v27 = vrot.slane %v6815_v46, 4  ;;  %19042 = vst [vmem:[#allocation11_spill] sm:$0xff] %v16856_v13 }
 0x455   : > { %v6809_v5 = vrot.slane %v6808_v29, 4  ;;  %v6823_v51 = vrot.slane %v6821_v58, 5  ;;  %v6828_v55 = vrot.slane %v6826_v44, 4  ;;  %v6835_v14 = vshll.u32 %v16832_v36, 16 }
 0x456   : > { %v6800_v56 = vsel %vm14158_vm12, %v6795_v12, %v6799_v48  ;;  %v6831_v26 = vrot.slane %v6829_v20, 5  ;;  %v6839_v63 = vshrl.u32 %v16832_v36, 16  ;;  %v6818_v16 = vor.u32 %v6817_v27, %v6813_v50 }
 0x457   : > { %v11944_v42 = vcombine.low %v6790_v60, %v6800_v56  ;;  %v6814_v47 = vsel %vm14158_vm12, %v6809_v5, %v6813_v50  ;;  %v6845_v3 = vshll.u32 %v16835_v28, 16  ;;  %v6837_v7 = vrot.slane %v6835_v14, 5  ;;  %v16862_v5 = vld [vmem:[#allocation2 + $0x9c] sm:$0xf]  ;;  %v16868_v14 = vld [vmem:[#allocation2 + $0xa0] sm:$0xf] }
 0x458   : > { %v6832_v62 = vor.u32 %v6831_v26, %v6828_v55  ;;  %v6841_v61 = vrot.slane %v6839_v63, 4  ;;  %v6850_v29 = vshrl.u32 %v16841_v32, 16  ;;  %v6819_v48 = vrot.slane %v6818_v16, 4 }
 0x459   : > { %v6847_v46 = vrot.slane %v6845_v3, 5  ;;  %v6853_v58 = vshll.u32 %v16841_v32, 16  ;;  %v6859_v44 = vshll.u32 %v16847_v23, 16  ;;  %v6863_v50 = vshrl.u32 %v16847_v23, 16 }
 0x45a   : > { %v6833_v60 = vrot.slane %v6832_v62, 4  ;;  %v6842_v12 = vor.u32 %v6841_v61, %v6837_v7  ;;  %v6852_v20 = vrot.slane %v6850_v29, 4  ;;  %v6824_v27 = vsel %vm14158_vm12, %v6819_v48, %v6823_v51 }
 0x45b   : > { %12977 = vmatmul.mubr.msk.bf16.gmra.mrb[16].mxu1 %vm1437_vm13, %v11944_v42  ;;  %v6855_v55 = vrot.slane %v6853_v58, 5  ;;  %v6861_v56 = vrot.slane %v6859_v44, 5  ;;  %v6869_v26 = vshll.u32 %v16856_v13, 16  ;;  %v11945_v63 = vcombine.low %v6814_v47, %v6824_v27  ;;  %v16881_v44 = vld [vmem:[#allocation2 + $0xa8] sm:$0xf] }
 0x45c   : > { %v6838_v16 = vsel %vm14158_vm12, %v6833_v60, %v6837_v7  ;;  %v6843_v3 = vrot.slane %v6842_v12, 4  ;;  %v6865_v62 = vrot.slane %v6863_v50, 4  ;;  %v6874_v42 = vshrl.u32 %v16862_v5, 16  ;;  %v16883_v27 = vld [vmem:[#allocation2 + $0xac] sm:$0xf] }
 0x45d   : > { %v6856_v61 = vor.u32 %v6855_v55, %v6852_v20  ;;  %v6871_v29 = vrot.slane %v6869_v26, 5  ;;  %v6877_v51 = vshll.u32 %v16862_v5, 16  ;;  %12980 = vmatprep.mubr.msk.bf16.mxu1 %vm1437_vm13, %v11945_v63  ;;  %v6883_v47 = vshll.u32 %v16868_v14, 16 }
 0x45e   : > { %v6848_v48 = vsel %vm14158_vm12, %v6843_v3, %v6847_v46  ;;  %v6866_v58 = vor.u32 %v6865_v62, %v6861_v56  ;;  %v6887_v7 = vshrl.u32 %v16868_v14, 16  ;;  %v6876_v20 = vrot.slane %v6874_v42, 4  ;;  %v16888_v62 = vld [vmem:[#allocation2 + $0xb0] sm:$0x1] }
 0x45f   : > { %v11946_v60 = vcombine.low %v6838_v16, %v6848_v48  ;;  %v6857_v12 = vrot.slane %v6856_v61, 4  ;;  %v6879_v50 = vrot.slane %v6877_v51, 5  ;;  %v6885_v26 = vrot.slane %v6883_v47, 5  ;;  %19044 = vst [vmem:[#allocation15_spill] sm:$0xff] %v16888_v62 }
 0x460   : > { %v6867_v55 = vrot.slane %v6866_v58, 4  ;;  %v6889_v21 = vrot.slane %v6887_v7, 4  ;;  %v6893_v63 = vshll.u32 %v16872_v52, 16  ;;  %v6898_v6 = vshrl.u32 %v16881_v44, 16  ;;  %v16895_v58 = vld [vmem:[#allocation2 + $0xb4] sm:$0xf] }
 0x461   : > { %v6862_v46 = vsel %vm14158_vm12, %v6857_v12, %v6861_v56  ;;  %v6880_v3 = vor.u32 %v6879_v50, %v6876_v20  ;;  %v6901_v16 = vshll.u32 %v16881_v44, 16  ;;  %v6907_v48 = vshll.u32 %v16883_v27, 16  ;;  %v16898_v20 = vld [vmem:[#allocation2 + $0xb8] sm:$0xf] }
 0x462   : > { %v6872_v61 = vsel %vm14158_vm12, %v6867_v55, %v6871_v29  ;;  %v6890_v42 = vor.u32 %v6889_v21, %v6885_v26  ;;  %v6895_v51 = vrot.slane %v6893_v63, 5  ;;  %v6900_v7 = vrot.slane %v6898_v6, 4  ;;  %v16903_v55 = vld [vmem:[#allocation2 + $0xbc] sm:$0x1] }
 0x463   : > { %12981 = vmatmul.mubr.msk.bf16.gmra.mrb[20].mxu1 %vm1437_vm13, %v11946_v60  ;;  %v11947_v47 = vcombine.low %v6862_v46, %v6872_v61  ;;  %v6881_v56 = vrot.slane %v6880_v3, 4  ;;  %v6903_v12 = vrot.slane %v6901_v16, 5  ;;  %v6909_v52 = vrot.slane %v6907_v48, 5 }
 0x464   : > { %v6891_v50 = vrot.slane %v6890_v42, 4  ;;  %v6911_v13 = vshrl.u32 %v16883_v27, 16  ;;  %v6917_v29 = vshll.u32 %v16888_v62, 16  ;;  %v6922_v63 = vshrl.u32 %v16895_v58, 16 }
 0x465   : > { %12984 = vmatprep.mubr.msk.bf16.mxu1 %vm1437_vm13, %v11947_v47  ;;  %v6904_v21 = vor.u32 %v6903_v12, %v6900_v7  ;;  %v6925_v60 = vshll.u32 %v16895_v58, 16  ;;  %v6886_v6 = vsel %vm14158_vm12, %v6881_v56, %v6885_v26  ;;  %v6931_v16 = vshll.u32 %v16898_v20, 16 }
 0x466   : > { %v6896_v46 = vsel %vm14158_vm12, %v6891_v50, %v6895_v51  ;;  %v6913_v3 = vrot.slane %v6911_v13, 4  ;;  %v6919_v42 = vrot.slane %v6917_v29, 5  ;;  %v6924_v48 = vrot.slane %v6922_v63, 4 }
 0x467   : > { %v6905_v61 = vrot.slane %v6904_v21, 4  ;;  %v6927_v47 = vrot.slane %v6925_v60, 5  ;;  %v6933_v12 = vrot.slane %v6931_v16, 5  ;;  %v6935_v62 = vshrl.u32 %v16898_v20, 16  ;;  %v19047_v16 = vld [vmem:[#allocation5_spill] sm:$0xff] }
 0x468   : > { %v6914_v7 = vor.u32 %v6913_v3, %v6909_v52  ;;  %v6941_v28 = vshll.u32 %v16903_v55, 16  ;;  %v11948_v35 = vcombine.low %v6886_v6, %v6896_v46  ;;  %v11971_v29 = vcombine.low %v16706_v30, %v16714_v40  ;;  %v7513_v46 = vld [vmem:[#allocation2 + $0xa8] sm:$0xe]  ;;  %v6506_v6 = vld [vmem:[#allocation2 + $0xb4] sm:$0xf] }
 0x469   : > { %v6928_v37 = vor.u32 %v6927_v47, %v6924_v48  ;;  %v6910_v26 = vsel %vm14158_vm12, %v6905_v61, %v6909_v52  ;;  %v6937_v51 = vrot.slane %v6935_v62, 4  ;;  %v11972_v60 = vcombine.low %v16725_v43, %v16735_v4  ;;  %v7505_v47 = vld [vmem:[#allocation2 + $0x48] sm:$0xe]  ;;  %v7512_v61 = vld [vmem:[#allocation2 + $0x9c] sm:$0xe] }
 0x46a   : > { %v6915_v56 = vrot.slane %v6914_v7, 4  ;;  %v6943_v50 = vrot.slane %v6941_v28, 5  ;;  %v7640_v30 = vrot.slane %v16868_v14, 5  ;;  %6509 = vst.msk [vmem:[#allocation2 + $0xcc] sm:$0xf] %vm624_vm3, %v6506_v6 }
 0x46b   : > { %12985 = vmatmul.mubr.msk.bf16.gmra.mrb[24].mxu1 %vm1437_vm13, %v11948_v35  ;;  %v6929_v13 = vrot.slane %v6928_v37, 4  ;;  %v6938_v63 = vor.u32 %v6937_v51, %v6933_v12  ;;  %v7504_v51 = vld [vmem:[#allocation2 + $0x3c] sm:$0xe]  ;;  %v12013_v35 = vrot.slane %v7513_v46, 9 }
 0x46c   : > { %v6920_v21 = vsel %vm14158_vm12, %v6915_v56, %v6919_v42  ;;  %v7503_v56 = vld [vmem:[#allocation2 + $0x30] sm:$0xe] }
 0x46d   : > { %v11949_v52 = vcombine.low %v6910_v26, %v6920_v21  ;;  %v6934_v62 = vsel %vm14158_vm12, %v6929_v13, %v6933_v12  ;;  %v6939_v28 = vrot.slane %v6938_v63, 4  ;;  %v11967_v26 = vcombine.low %v16688_v59, %v16611_v39  ;;  %v7511_v42 = vld [vmem:[#allocation2 + $0x90] sm:$0xe] }
 0x46e   : > { %v11968_v13 = vcombine.low %v16659_v54, %v16623_v38  ;;  %v12003_v21 = vrot.slane %v7503_v56, 9  ;;  %v7577_v63 = vrot.slane %v16714_v40, 5  ;;  %v11969_v39 = vcombine.low %v16661_v45, %v16667_v57 }
 0x46f   : > { %12988 = vmatprep.mubr.msk.bf16.mxu1 %vm1437_vm13, %v11949_v52  ;;  %v6944_v7 = vsel %vm14158_vm12, %v6939_v28, %v6943_v50  ;;  %v7580_v52 = vrot.slane %v16716_v41, 5  ;;  %v7758_v50 = vsel %vm1486_vm0, %v16730_v0, 0  ;;  %v12004_v59 = vrot.slane %v7504_v51, 9  ;;  %v7506_v28 = vld [vmem:[#allocation2 + $0x54] sm:$0xe] }
 0x470   : > { %v11950_v12 = vcombine.low %v6934_v62, %v6944_v7  ;;  %v7584_v62 = vrot.slane %v16735_v4, 5  ;;  %v11970_v7 = vcombine.low %v16686_v53, %v16692_v18  ;;  %v16965_v54 = vsel %vm14726_vm1, %v12003_v21, %v7577_v63  ;;  %v16971_v0 = vld [vmem:[%s18732_s2 + $0x6] sm:$0x3] }
 0x471   : > { %v7587_v41 = vrot.slane %v16740_v11, 5  ;;  %v7591_v53 = vrot.slane %v16753_v33, 5  ;;  %v7594_v51 = vrot.slane %v16761_v17, 5  ;;  %v12006_v11 = vrot.slane %v7506_v28, 9  ;;  %v7510_v17 = vld [vmem:[#allocation2 + $0x84] sm:$0xe] }
 0x472   : > { %v16975_v45 = vsel %vm14726_vm1, %v12004_v59, %v7584_v62  ;;  %v7586_v57 = vrot.slane %v7584_v62, 4  ;;  %v7598_v21 = vrot.slane %v16770_v34, 5  ;;  %v7612_v59 = vrot.slane %v16802_v1, 5 }
 0x473   : > { %12989 = vmatmul.mubr.msk.bf16.gmra.mrb[28].mxu1 %vm1437_vm13, %v11950_v12  ;;  %v7579_v12 = vrot.slane %v7577_v63, 4  ;;  %v7507_v63 = vld [vmem:[#allocation2 + $0x60] sm:$0xe]  ;;  %v12010_v3 = vrot.slane %v7510_v17, 9  ;;  %v7654_v40 = vrot.slane %v16898_v20, 5 }
 0x474   : > { %12994 = vmatprep.mubr.msk.bf16.mxu1 %vm1437_vm13, %v11967_v26  ;;  %v12005_v26 = vrot.slane %v7505_v47, 9  ;;  %v16989_v47 = vsel %vm14726_vm1, %v7586_v57, %v7587_v41  ;;  %v7600_v28 = vrot.slane %v7598_v21, 4  ;;  %v7601_v41 = vrot.slane %v16776_v31, 5  ;;  %v7509_v57 = vld [vmem:[#allocation2 + $0x78] sm:$0xe] }
 0x475   : > { %v16980_v56 = vsel %vm14726_vm1, %v7579_v12, %v7580_v52  ;;  %v7593_v52 = vrot.slane %v7591_v53, 4  ;;  %v7508_v12 = vld [vmem:[#allocation2 + $0x6c] sm:$0xe] }
 0x476   : > { %v16993_v62 = vsel %vm14726_vm1, %v12005_v26, %v7591_v53  ;;  %v7608_v53 = vrot.slane %v16793_v24, 5  ;;  %v17015_v31 = vsel %vm14726_vm1, %v7600_v28, %v7601_v41  ;;  %v19046_v24 = vld [vmem:[#allocation9_spill] sm:$0xff]  ;;  %v7614_v28 = vrot.slane %v7612_v59, 4 }
 0x477   : > { %v17007_v26 = vsel %vm14726_vm1, %v7593_v52, %v7594_v51  ;;  %v7615_v48 = vrot.slane %v19046_v24, 5  ;;  %v12009_v41 = vrot.slane %v7509_v57, 9 }
 0x47b   : > { %12995 = vmatmul.mubr.msk.bf16.vlgmr.msra.gmra.mrb[0].mxu1 %vm1437_vm13, %v11968_v13  ;;  %v17000_v13 = vsel %vm14726_vm1, %v12006_v11, %v7598_v21  ;;  %v12008_v21 = vrot.slane %v7508_v12, 9  ;;  %v7619_v12 = vrot.slane %v16817_v19, 5 }
 0x47c   : > { %13027 = vmatpush3.bf16.msra.mxu1 %v7758_v50  ;;  %12998 = vmatprep.mubr.msk.bf16.mxu1 %vm1437_vm13, %v11969_v39  ;;  %v12007_v50 = vrot.slane %v7507_v63, 9  ;;  %v7605_v39 = vrot.slane %v16787_v2, 5 }
 0x47d   : > { %13788 = vmatprep.subr.msk.bf16.mxu1 %vm1486_vm0, %v16971_v0  ;;  %v17027_v11 = vsel %vm14726_vm1, %v12008_v21, %v7612_v59  ;;  %v17040_v21 = vsel %vm14726_vm1, %v7614_v28, %v7615_v48  ;;  %v17044_v59 = vsel %vm14726_vm1, %v12009_v41, %v7619_v12  ;;  %v7621_v57 = vrot.slane %v7619_v12, 4  ;;  %v7514_v48 = vld [vmem:[#allocation2 + $0xb4] sm:$0xe]  ;;  %v19049_v12 = vld [vmem:[#allocation11_spill] sm:$0xff] }
 0x47e   : > { %v17022_v63 = vsel %vm14726_vm1, %v12007_v50, %v7605_v39  ;;  %v7607_v52 = vrot.slane %v7605_v39, 4  ;;  %v7622_v50 = vrot.slane %v19047_v16, 5  ;;  %v7626_v39 = vrot.slane %v16832_v36, 5 }
 0x47f   : > { %v7633_v41 = vrot.slane %v16847_v23, 5  ;;  %v7636_v16 = vrot.slane %v19049_v12, 5  ;;  %v7642_v12 = vrot.slane %v7640_v30, 4  ;;  %v12014_v37 = vrot.slane %v7514_v48, 9 }
 0x480   : > { %v17032_v51 = vsel %vm14726_vm1, %v7607_v52, %v7608_v53  ;;  %v17051_v17 = vsel %vm14726_vm1, %v12010_v3, %v7626_v39  ;;  %v7628_v53 = vrot.slane %v7626_v39, 4  ;;  %v19048_v52 = vld [vmem:[#allocation3_spill] sm:$0xff]  ;;  %v17060_v28 = vsel %vm14726_vm1, %v7621_v57, %v7622_v50  ;;  %v19050_v50 = vld [vmem:[#allocation13_spill] sm:$0xff] }
 0x481   : > { %v7629_v24 = vrot.slane %v19048_v52, 5  ;;  %v12012_v52 = vrot.slane %v7512_v61, 9  ;;  %v7647_v3 = vrot.slane %v16883_v27, 5  ;;  %v19051_v61 = vld [vmem:[#allocation15_spill] sm:$0xff]  ;;  %v7657_v48 = vrot.slane %v16903_v55, 5 }
 0x482   : > { %v19052_v55 = vcombine.low %v16745_v8, %v16753_v33  ;;  %v17120_v4 = vsel %vm14726_vm1, %v12014_v37, %v7654_v40  ;;  %v19054_v8 = vcombine.low %v16783_v49, %v16787_v2  ;;  %v19055_v33 = vcombine.low %v16797_v15, %v16802_v1  ;;  %v7499_v49 = vld [vmem:[#allocation2] sm:$0xe]  ;;  %v13912_v2 = vld [vmem:[#allocation2 + $0x4] sm:$0xf]  ;;  %v19059_v1 = vld [vmem:[#allocation38_spill] sm:$0xff] }
 0x483   : > { %12999 = vmatmul.mubr.msk.bf16.gmra.mrb[4].mxu1 %vm1437_vm13, %v11970_v7  ;;  %v12011_v7 = vrot.slane %v7511_v42, 9  ;;  %v17068_v39 = vsel %vm14726_vm1, %v7628_v53, %v7629_v24  ;;  %v7643_v42 = vrot.slane %v19050_v50, 5  ;;  %v7650_v53 = vrot.slane %v19051_v61, 5  ;;  %v6507_v61 = vld [vmem:[#allocation2 + $0xb8] sm:$0xf] }
 0x484   : > { %13002 = vmatprep.mubr.msk.bf16.mxu1 %vm1437_vm13, %v11971_v29  ;;  %v7635_v29 = vrot.slane %v7633_v41, 4  ;;  %6510 = vst.msk [vmem:[#allocation2 + $0xd0] sm:$0xf] %vm624_vm3, %v6507_v61  ;;  %v19056_v37 = vcombine.low %v16806_v22, %v16817_v19  ;;  %v7549_v15 = vrot.slane %v13912_v2, 5  ;;  %v19060_v22 = vcombine.low %v16862_v5, %v16868_v14  ;;  %v13914_v5 = vld [vmem:[#allocation2 + $0x1c] sm:$0xf] }
 0x485   : > { %v17076_v57 = vsel %vm14726_vm1, %v12011_v7, %v7633_v41  ;;  %v17089_v7 = vsel %vm14726_vm1, %v12012_v52, %v7640_v30  ;;  %v17093_v46 = vsel %vm14726_vm1, %v7642_v12, %v7643_v42  ;;  %v7649_v41 = vrot.slane %v7647_v3, 4  ;;  %v6508_v12 = vld [vmem:[#allocation2 + $0xbc] sm:$0x1]  ;;  %v19063_v61 = vld [vmem:[#allocation4_spill] sm:$0xff]  ;;  %v17360_v50 = vld [vmem:[#allocation2 + $0xac] sm:$0xf] }
 0x486   : > { %v17081_v24 = vsel %vm14726_vm1, %v7635_v29, %v7636_v16  ;;  %v7656_v29 = vrot.slane %v7654_v40, 4  ;;  %v17105_v52 = vsel %vm14726_vm1, %v12013_v35, %v7647_v3  ;;  %v19053_v35 = vcombine.low %v16765_v10, %v16770_v34  ;;  %v13913_v40 = vld [vmem:[#allocation2 + $0x10] sm:$0xf]  ;;  %6511 = vst.msk [vmem:[#allocation2 + $0xd4] sm:$0x1] %vm632_vm5, %v6508_v12 }
 0x487   : > { %v17109_v30 = vsel %vm14726_vm1, %v7649_v41, %v7650_v53  ;;  %v19057_v10 = vcombine.low %v16823_v9, %v16832_v36  ;;  %v19058_v34 = vcombine.low %v16841_v32, %v16847_v23  ;;  %v7552_v3 = vrot.slane %v19059_v1, 5  ;;  %v7500_v53 = vld [vmem:[#allocation2 + $0xc] sm:$0xe]  ;;  %v13915_v41 = vld [vmem:[#allocation2 + $0x14] sm:$0x1] }
 0x488   : > { %v11999_v19 = vrot.slane %v7499_v49, 9  ;;  %v19061_v9 = vcombine.low %v16881_v44, %v16883_v27  ;;  %v7551_v36 = vrot.slane %v7549_v15, 4  ;;  %v7556_v42 = vrot.slane %v13913_v40, 5  ;;  %v7501_v27 = vld [vmem:[#allocation2 + $0x18] sm:$0xe] }
 0x489   : > { %v7563_v14 = vrot.slane %v13914_v5, 5  ;;  %v8116_v2 = vsel %vm1486_vm0, %v16971_v0, 0  ;;  %v7502_v1 = vld [vmem:[#allocation2 + $0x24] sm:$0xe]  ;;  %v19065_v40 = vcombine.low %v16965_v54, %v16980_v56  ;;  %v19067_v12 = vcombine.low %v16993_v62, %v17007_v26  ;;  %v17210_v5 = vld [vmem:[#allocation2 + $0x28] sm:$0xf] }
 0x48a   : > { %v7550_v32 = vsel %vm14726_vm1, %v11999_v19, %v7549_v15  ;;  %v7553_v23 = vsel %vm14726_vm1, %v7551_v36, %v7552_v3  ;;  %v17216_v54 = vld [vmem:[#allocation2 + $0x40] sm:$0xf]  ;;  %v9040_v56 = vld [vmem:[#allocation2 + $0x30] sm:$0xe]  ;;  %v19068_v62 = vcombine.low %v17000_v13, %v17015_v31  ;;  %v17226_v26 = vld [vmem:[#allocation2 + $0x4c] sm:$0xf] }
 0x48b   : > { %13003 = vmatmul.mubr.msk.bf16.gmra.mrb[8].mxu1 %vm1437_vm13, %v11972_v60  ;;  %v17124_v60 = vsel %vm14726_vm1, %v7656_v29, %v7657_v48  ;;  %v7559_v29 = vrot.slane %v13915_v41, 5  ;;  %v12016_v44 = vcombine.low %v7550_v32, %v7553_v23  ;;  %v19062_v48 = vcombine.low %v16895_v58, %v16898_v20  ;;  %v17214_v41 = vld [vmem:[#allocation2 + $0x34] sm:$0xf]  ;;  %v9042_v13 = vld [vmem:[#allocation2 + $0x48] sm:$0xe] }
 0x48c   : > { %13006 = vmatprep.mubr.msk.bf16.mxu1 %vm1437_vm13, %v19052_v55  ;;  %v7566_v55 = vrot.slane %v19063_v61, 5  ;;  %v7570_v58 = vrot.slane %v16692_v18, 5  ;;  %v12002_v18 = vrot.slane %v7502_v1, 9  ;;  %v19069_v61 = vcombine.low %v17022_v63, %v17032_v51  ;;  %v17237_v31 = vld [vmem:[#allocation2 + $0x58] sm:$0xf] }
 0x48d   : > { %v17246_v51 = vld [vmem:[#allocation2 + $0x64] sm:$0xf]  ;;  %v9049_v16 = vld [vmem:[#allocation2 + $0x9c] sm:$0xe] }
 0x48e   : > { %v7572_v36 = vrot.slane %v7570_v58, 4  ;;  %v7571_v32 = vsel %vm14726_vm1, %v12002_v18, %v7570_v58  ;;  %v17261_v18 = vld [vmem:[#allocation2 + $0x70] sm:$0xf] }
 0x493   : > { %13007 = vmatmul.mubr.msk.bf16.gmra.mrb[12].mxu1 %vm1437_vm13, %v19053_v35  ;;  %v12000_v35 = vrot.slane %v7500_v53, 9  ;;  %v9039_v53 = vld [vmem:[#allocation2 + $0x24] sm:$0xe] }
 0x494   : > { %13010 = vmatprep.mubr.msk.bf16.mxu1 %vm1437_vm13, %v19054_v8  ;;  %v7558_v8 = vrot.slane %v7556_v42, 4 }
 0x495   : > { %v7557_v49 = vsel %vm14726_vm1, %v12000_v35, %v7556_v42  ;;  %v19066_v42 = vcombine.low %v16975_v45, %v16989_v47  ;;  %v17220_v45 = vld [vmem:[#allocation2 + $0x44] sm:$0x1]  ;;  %v12116_v47 = vrot.slane %v9039_v53, 9  ;;  %v12117_v35 = vrot.slane %v9040_v56, 9  ;;  %v17343_v53 = vld [vmem:[#allocation2 + $0xa0] sm:$0xf] }
 0x496   : > { %v9134_v1 = vrot.slane %v17220_v45, 5 }
 0x49b   : > { %13011 = vmatmul.mubr.msk.bf16.gmra.mrb[16].mxu1 %vm1437_vm13, %v19055_v33  ;;  %v12001_v33 = vrot.slane %v7501_v27, 9 }
 0x49c   : > { %13014 = vmatprep.mubr.msk.bf16.mxu1 %vm1437_vm13, %v19056_v37  ;;  %v7565_v37 = vrot.slane %v7563_v14, 4 }
 0x49d   : > { %v7564_v15 = vsel %vm14726_vm1, %v12001_v33, %v7563_v14  ;;  %v17212_v14 = vld [vmem:[#allocation2 + $0x2c] sm:$0x1]  ;;  %v17239_v33 = vld [vmem:[#allocation2 + $0x5c] sm:$0x1] }
 0x49e   : > { %v9120_v27 = vrot.slane %v17212_v14, 5 }
 0x4a3   : > { %13015 = vmatmul.mubr.msk.bf16.gmra.mrb[20].mxu1 %vm1437_vm13, %v19057_v10  ;;  %v7560_v10 = vsel %vm14726_vm1, %v7558_v8, %v7559_v29  ;;  %v17218_v29 = vld [vmem:[#allocation2 + $0x38] sm:$0x1]  ;;  %v9124_v8 = vrot.slane %v17214_v41, 5 }
 0x4a4   : > { %13018 = vmatprep.mubr.msk.bf16.mxu1 %vm1437_vm13, %v19058_v34  ;;  %v7567_v34 = vsel %vm14726_vm1, %v7565_v37, %v7566_v55  ;;  %v12017_v20 = vcombine.low %v7557_v49, %v7560_v10  ;;  %v17234_v55 = vld [vmem:[#allocation2 + $0x50] sm:$0x1] }
 0x4a5   : > { %v12018_v3 = vcombine.low %v7564_v15, %v7567_v34  ;;  %v9127_v34 = vrot.slane %v17218_v29, 5  ;;  %v17250_v63 = vsel %vm14726_vm1, %v12117_v35, %v9124_v8  ;;  %v9126_v49 = vrot.slane %v9124_v8, 4  ;;  %v9045_v35 = vld [vmem:[#allocation2 + $0x6c] sm:$0xe] }
 0x4a6   : > { %19071 = vst [vmem:[#allocation17_spill] sm:$0xff] %v17250_v63  ;;  %v19077_v8 = vcombine.low %v17027_v11, %v17040_v21  ;;  %v17307_v11 = vld [vmem:[#allocation2 + $0x88] sm:$0xf]  ;;  %v17309_v21 = vld [vmem:[#allocation2 + $0x8c] sm:$0x1] }
 0x4a7   : > { %v9176_v43 = vrot.slane %v17309_v21, 5 }
 0x4ab   : > { %13019 = vmatmul.mubr.msk.bf16.gmra.mrb[24].mxu1 %vm1437_vm13, %v19060_v22  ;;  %v19064_v22 = vld [vmem:[#allocation37_spill] sm:$0xff] }
 0x4ac   : > { %13022 = vmatprep.mubr.msk.bf16.mxu1 %vm1437_vm13, %v19061_v9  ;;  %v7573_v19 = vrot.slane %v19064_v22, 5  ;;  %v17187_v9 = vld [vmem:[%s18732_s2 + $0x8] sm:$0x3]  ;;  %v9138_v22 = vrot.slane %v17226_v26, 5 }
 0x4ae   : > { %v7574_v0 = vsel %vm14726_vm1, %v7572_v36, %v7573_v19  ;;  %v9043_v19 = vld [vmem:[#allocation2 + $0x54] sm:$0xe]  ;;  %v12126_v36 = vrot.slane %v9049_v16, 9 }
 0x4af   : > { %v12019_v23 = vcombine.low %v7571_v32, %v7574_v0  ;;  %v17267_v0 = vsel %vm14726_vm1, %v9126_v49, %v9127_v34 }
 0x4b0   : > { %19073 = vst [vmem:[#allocation14_spill] sm:$0xff] %v17267_v0 }
 0x4b3   : > { %13023 = vmatmul.mubr.msk.bf16.gmra.mrb[28].mxu1 %vm1437_vm13, %v19062_v48  ;;  %v9041_v48 = vld [vmem:[#allocation2 + $0x3c] sm:$0xe] }
 0x4b4   : > { %13028 = vmatprep.mubr.msk.bf16.mxu1 %vm1437_vm13, %v12016_v44  ;;  %v9117_v44 = vrot.slane %v17210_v5, 5  ;;  %v12118_v58 = vrot.slane %v9041_v48, 9  ;;  %v9145_v48 = vrot.slane %v17237_v31, 5 }
 0x4b6   : > { %v17243_v37 = vsel %vm14726_vm1, %v12116_v47, %v9117_v44  ;;  %v9119_v10 = vrot.slane %v9117_v44, 4  ;;  %v9140_v47 = vrot.slane %v9138_v22, 4 }
 0x4b7   : > { %19070 = vst [vmem:[#allocation12_spill] sm:$0xff] %v17243_v37 }
 0x4b8   : > { %v17257_v15 = vsel %vm14726_vm1, %v9119_v10, %v9120_v27  ;;  %v12120_v27 = vrot.slane %v9043_v19, 9  ;;  %v9147_v19 = vrot.slane %v9145_v48, 4  ;;  %v17331_v10 = vld [vmem:[#allocation2 + $0x98] sm:$0x1] }
 0x4b9   : > { %19072 = vst [vmem:[#allocation19_spill] sm:$0xff] %v17257_v15 }
 0x4bb   : > { %13029 = vmatmul.mubr.msk.bf16.vlgmr.msra.gmra.mrb[0].mxu1 %vm1437_vm13, %v12017_v20  ;;  %v9131_v20 = vrot.slane %v17216_v54, 5 }
 0x4bc   : > { %13061 = vmatpush3.bf16.msra.mxu1 %v8116_v2  ;;  %13032 = vmatprep.mubr.msk.bf16.mxu1 %vm1437_vm13, %v12018_v3  ;;  %v17253_v2 = vld [vmem:[#allocation2 + $0x68] sm:$0x1]  ;;  %v12119_v3 = vrot.slane %v9042_v13, 9  ;;  %v17294_v13 = vld [vmem:[#allocation2 + $0x80] sm:$0x1] }
 0x4bd   : > { %13789 = vmatprep.subr.msk.bf16.mxu1 %vm1486_vm0, %v17187_v9  ;;  %v17271_v32 = vsel %vm14726_vm1, %v12118_v58, %v9131_v20  ;;  %v9152_v58 = vrot.slane %v17246_v51, 5 }
 0x4be   : > { %19074 = vst [vmem:[#allocation16_spill] sm:$0xff] %v17271_v32  ;;  %v17281_v56 = vsel %vm14726_vm1, %v12119_v3, %v9138_v22  ;;  %v17315_v22 = vsel %vm14726_vm1, %v12120_v27, %v9145_v48  ;;  %v9047_v3 = vld [vmem:[#allocation2 + $0x84] sm:$0xe] }
 0x4bf   : > { %19075 = vst [vmem:[#allocation21_spill] sm:$0xff] %v17281_v56  ;;  %19080 = vst [vmem:[#allocation20_spill] sm:$0xff] %v17315_v22  ;;  %v8417_v22 = vshll.u32 %v17210_v5, 16 }
 0x4c1   : > { %v8419_v0 = vrot.slane %v8417_v22, 5 }
 0x4c3   : > { %13033 = vmatmul.mubr.msk.bf16.gmra.mrb[4].mxu1 %vm1437_vm13, %v12019_v23  ;;  %v9133_v23 = vrot.slane %v9131_v20, 4  ;;  %v9046_v20 = vld [vmem:[#allocation2 + $0x78] sm:$0xe] }
 0x4c4   : > { %13036 = vmatprep.mubr.msk.bf16.mxu1 %vm1437_vm13, %v19065_v40  ;;  %v9044_v40 = vld [vmem:[#allocation2 + $0x60] sm:$0xe] }
 0x4c5   : > { %v17286_v44 = vsel %vm14726_vm1, %v9133_v23, %v9134_v1  ;;  %v12121_v49 = vrot.slane %v9044_v40, 9  ;;  %v19079_v1 = vcombine.low %v17044_v59, %v17060_v28  ;;  %v9155_v23 = vrot.slane %v17253_v2, 5  ;;  %v17318_v40 = vld [vmem:[#allocation2 + $0x94] sm:$0xf] }
 0x4c6   : > { %19076 = vst [vmem:[#allocation23_spill] sm:$0xff] %v17286_v44  ;;  %v9154_v28 = vrot.slane %v9152_v58, 4 }
 0x4c7   : > { %v17322_v59 = vsel %vm14726_vm1, %v12121_v49, %v9152_v58 }
 0x4c8   : > { %19081 = vst [vmem:[#allocation25_spill] sm:$0xff] %v17322_v59  ;;  %v17375_v59 = vld [vmem:[#allocation2 + $0xb8] sm:$0xf] }
 0x4cb   : > { %13037 = vmatmul.mubr.msk.bf16.gmra.mrb[8].mxu1 %vm1437_vm13, %v19066_v42  ;;  %v17273_v42 = vld [vmem:[#allocation2 + $0x74] sm:$0x1] }
 0x4cc   : > { %13040 = vmatprep.mubr.msk.bf16.mxu1 %vm1437_vm13, %v19067_v12  ;;  %v17275_v12 = vld [vmem:[#allocation2 + $0x7c] sm:$0xf]  ;;  %v9162_v27 = vrot.slane %v17273_v42, 5 }
 0x4cd   : > { %v9166_v48 = vrot.slane %v17275_v12, 5 }
 0x4cf   : > { %v9168_v6 = vrot.slane %v9166_v48, 4 }
 0x4d3   : > { %13041 = vmatmul.mubr.msk.bf16.gmra.mrb[12].mxu1 %vm1437_vm13, %v19068_v62  ;;  %v9141_v62 = vrot.slane %v17234_v55, 5 }
 0x4d4   : > { %13044 = vmatprep.mubr.msk.bf16.mxu1 %vm1437_vm13, %v19069_v61  ;;  %v9148_v61 = vrot.slane %v17239_v33, 5 }
 0x4d5   : > { %v17300_v34 = vsel %vm14726_vm1, %v9140_v47, %v9141_v62  ;;  %v12122_v47 = vrot.slane %v9045_v35, 9  ;;  %v9159_v62 = vrot.slane %v17261_v18, 5  ;;  %v17337_v35 = vsel %vm14726_vm1, %v9154_v28, %v9155_v23 }
 0x4d6   : > { %19078 = vst [vmem:[#allocation18_spill] sm:$0xff] %v17300_v34  ;;  %19083 = vst [vmem:[#allocation22_spill] sm:$0xff] %v17337_v35  ;;  %v9169_v23 = vrot.slane %v17294_v13, 5  ;;  %v9180_v35 = vrot.slane %v17318_v40, 5  ;;  %v8421_v34 = vshrl.u32 %v17210_v5, 16 }
 0x4d7   : > { %v17341_v58 = vsel %vm14726_vm1, %v12122_v47, %v9159_v62  ;;  %v12124_v47 = vrot.slane %v9047_v3, 9  ;;  %v19088_v3 = vcombine.low %v17051_v17, %v17068_v39  ;;  %v17388_v17 = vld [vmem:[#allocation2 + $0xbc] sm:$0x1] }
 0x4d8   : > { %19084 = vst [vmem:[#allocation24_spill] sm:$0xff] %v17341_v58  ;;  %v17413_v58 = vld [vmem:[#allocation2 + $0xc8] sm:$0x1] }
 0x4db   : > { %13045 = vmatmul.mubr.msk.bf16.gmra.mrb[16].mxu1 %vm1437_vm13, %v19077_v8  ;;  %v17327_v8 = vsel %vm14726_vm1, %v9147_v19, %v9148_v61  ;;  %v9161_v61 = vrot.slane %v9159_v62, 4  ;;  %v9048_v19 = vld [vmem:[#allocation2 + $0x90] sm:$0xe]  ;;  %v9173_v62 = vrot.slane %v17307_v11, 5 }
 0x4dc   : > { %13048 = vmatprep.mubr.msk.bf16.mxu1 %vm1437_vm13, %v19079_v1  ;;  %19082 = vst [vmem:[#allocation27_spill] sm:$0xff] %v17327_v8  ;;  %v12123_v1 = vrot.slane %v9046_v20, 9  ;;  %v17345_v20 = vld [vmem:[#allocation2 + $0xa4] sm:$0x1] }
 0x4dd   : > { %v17356_v28 = vsel %vm14726_vm1, %v9161_v61, %v9162_v27  ;;  %v9050_v27 = vld [vmem:[#allocation2 + $0xa8] sm:$0xe]  ;;  %v17373_v61 = vld [vmem:[#allocation2 + $0xb0] sm:$0x1] }
 0x4de   : > { %v17351_v49 = vsel %vm14726_vm1, %v12123_v1, %v9166_v48  ;;  %19086 = vst [vmem:[#allocation31_spill] sm:$0xff] %v17356_v28  ;;  %v17366_v1 = vsel %vm14726_vm1, %v9168_v6, %v9169_v23  ;;  %v12125_v48 = vrot.slane %v9048_v19, 9  ;;  %v17381_v6 = vsel %vm14726_vm1, %v12124_v47, %v9173_v62 }
 0x4df   : > { %19085 = vst [vmem:[#allocation29_spill] sm:$0xff] %v17351_v49  ;;  %19087 = vst [vmem:[#allocation26_spill] sm:$0xff] %v17366_v1  ;;  %v9175_v19 = vrot.slane %v9173_v62, 4  ;;  %v9183_v23 = vrot.slane %v17331_v10, 5  ;;  %v19090_v28 = vcombine.low %v17076_v57, %v17081_v24  ;;  %v9187_v1 = vrot.slane %v17343_v53, 5 }
 0x4e0   : > { %19089 = vst [vmem:[#allocation28_spill] sm:$0xff] %v17381_v6  ;;  %v17392_v39 = vsel %vm14726_vm1, %v12125_v48, %v9180_v35  ;;  %v9190_v62 = vrot.slane %v17345_v20, 5  ;;  %v12127_v49 = vrot.slane %v9050_v27, 9  ;;  %v9194_v57 = vrot.slane %v17360_v50, 5  ;;  %v9051_v24 = vld [vmem:[#allocation2 + $0xb4] sm:$0xe] }
 0x4e1   : > { %19091 = vst [vmem:[#allocation33_spill] sm:$0xff] %v17392_v39  ;;  %v17397_v47 = vsel %vm14726_vm1, %v9175_v19, %v9176_v43  ;;  %v9189_v43 = vrot.slane %v9187_v1, 4  ;;  %v9052_v19 = vld [vmem:[#allocation2 + $0xc0] sm:$0xe]  ;;  %v19099_v6 = vcombine.low %v17105_v52, %v17109_v30  ;;  %v13851_v30 = vld [vmem:[#allocation2 + $0xc] sm:$0xff]  }
 0x4e2   : > { %19092 = vst [vmem:[#allocation35_spill] sm:$0xff] %v17397_v47  ;;  %v17419_v8 = vsel %vm14726_vm1, %v12127_v49, %v9194_v57  ;;  %v9196_v48 = vrot.slane %v9194_v57, 4  ;;  %v9197_v47 = vrot.slane %v17373_v61, 5  ;;  %v12129_v49 = vrot.slane %v9052_v19, 9 }
 0x4e3   : > { %13049 = vmatmul.mubr.msk.bf16.gmra.mrb[20].mxu1 %vm1437_vm13, %v19088_v3  ;;  %v9182_v3 = vrot.slane %v9180_v35, 4  ;;  %v17411_v35 = vsel %vm14726_vm1, %v12126_v36, %v9187_v1  ;;  %19095 = vst [vmem:[#allocation6_spill] sm:$0xff] %v17419_v8  ;;  %v12128_v36 = vrot.slane %v9051_v24, 9  ;;  %v9201_v1 = vrot.slane %v17375_v59, 5 }
 0x4e4   : > { %13052 = vmatprep.mubr.msk.bf16.mxu1 %vm1437_vm13, %v19090_v28  ;;  %v17401_v28 = vld [vmem:[#allocation2 + $0xc4] sm:$0xf]  ;;  %19094 = vst [vmem:[#allocation32_spill] sm:$0xff] %v17411_v35  ;;  %v17432_v27 = vsel %vm14726_vm1, %v9196_v48, %v9197_v47  ;;  %v9211_v24 = vrot.slane %v17413_v58, 5 }
 0x4e5   : > { %v17407_v16 = vsel %vm14726_vm1, %v9182_v3, %v9183_v23  ;;  %v17424_v23 = vsel %vm14726_vm1, %v9189_v43, %v9190_v62  ;;  %v9204_v3 = vrot.slane %v17388_v17, 5  ;;  %19097 = vst [vmem:[#allocation10_spill] sm:$0xff] %v17432_v27  ;;  %v9208_v57 = vrot.slane %v17401_v28, 5 }
 0x4e6   : > { %19093 = vst [vmem:[#allocation30_spill] sm:$0xff] %v17407_v16  ;;  %19096 = vst [vmem:[#allocation34_spill] sm:$0xff] %v17424_v23  ;;  %v9203_v62 = vrot.slane %v9201_v1, 4  ;;  %v19098_v43 = vcombine.low %v17089_v7, %v17093_v46  ;;  %v17448_v47 = vsel %vm14726_vm1, %v12128_v36, %v9201_v1  ;;  %v13852_v36 = vld [vmem:[#allocation2 + $0x18] sm:$0xff]   ;;  %v8842_v1 = vsel %vm1486_vm0, %v17187_v9, 0  ;;  %v13856_v16 = vld [vmem:[#allocation2 + $0x48] sm:$0xff]  }
 0x4e7   : > { %v9210_v39 = vrot.slane %v9208_v57, 4  ;;  %19100 = vst [vmem:[#allocation36_spill] sm:$0xff] %v17448_v47  ;;  %v17458_v7 = vsel %vm14726_vm1, %v12129_v49, %v9208_v57  ;;  %v13855_v49 = vld [vmem:[#allocation2 + $0x3c] sm:$0xff]   ;;  %v17484_v9 = vld [vmem:[#allocation2 + $0x10] sm:$0xf] }
 0x4e8   : > { %v17452_v48 = vsel %vm14726_vm1, %v9203_v62, %v9204_v3  ;;  %19102 = vst [vmem:[#allocation8_spill] sm:$0xff] %v17458_v7  ;;  %v13853_v3 = vld [vmem:[#allocation2 + $0x24] sm:$0xff]   ;;  %19105 = vst [vmem:[#allocation5_spill] sm:$0xff] %v17484_v9  ;;  %v17496_v23 = vld [vmem:[#allocation2 + $0x20] sm:$0x1] }
 0x4e9   : > { %19101 = vst [vmem:[#allocation7_spill] sm:$0xff] %v17452_v48  ;;  %v17462_v46 = vsel %vm14726_vm1, %v9210_v39, %v9211_v24  ;;  %v17476_v39 = vld [vmem:[%s18732_s2 + $0xa] sm:$0x3]  ;;  %v8314_v24 = vld [vmem:[#allocation2 + $0x18] sm:$0xf]  ;;  %19108 = vst [vmem:[#allocation13_spill] sm:$0xff] %v17496_v23 }
 0x4ea   : > { %19103 = vst [vmem:[#allocation9_spill] sm:$0xff] %v17462_v46  ;;  %v8384_v52 = vshrl.u32 %v8314_v24, 16  ;;  %v8387_v19 = vshll.u32 %v8314_v24, 16  ;;  %v17493_v48 = vld [vmem:[#allocation2 + $0x14] sm:$0x1] }
 0x4eb   : > { %13053 = vmatmul.mubr.msk.bf16.gmra.mrb[24].mxu1 %vm1437_vm13, %v19098_v43  ;;  %v8317_v43 = vld [vmem:[#allocation2 + $0x24] sm:$0xf]  ;;  %19107 = vst [vmem:[#allocation11_spill] sm:$0xff] %v17493_v48  ;;  %v8320_v24 = vld [vmem:[#allocation2 + $0x30] sm:$0xf] }
 0x4ec   : > { %13056 = vmatprep.mubr.msk.bf16.mxu1 %vm1437_vm13, %v19099_v6  ;;  %v19104_v6 = vcombine.low %v17120_v4, %v17124_v60  ;;  %v13854_v4 = vld [vmem:[#allocation2 + $0x30] sm:$0xff]   ;;  %v8311_v60 = vld [vmem:[#allocation2 + $0xc] sm:$0xf]  ;;  %v8411_v46 = vshll.u32 %v8317_v43, 16  ;;  %v8389_v8 = vrot.slane %v8387_v19, 5  ;;  %v8435_v32 = vshll.u32 %v8320_v24, 16 }
 0x4ed   : > { %v8360_v57 = vshrl.u32 %v8311_v60, 16  ;;  %v8363_v62 = vshll.u32 %v8311_v60, 16  ;;  %v13858_v19 = vld [vmem:[#allocation2 + $0x60] sm:$0xff]  }
 0x4ee   : > { %v8413_v35 = vrot.slane %v8411_v46, 5  ;;  %v13859_v46 = vld [vmem:[#allocation2 + $0x6c] sm:$0xff]   ;;  %v8437_v37 = vrot.slane %v8435_v32, 5 }
 0x4f3   : > { %13057 = vmatmul.mubr.msk.bf16.gmra.mrb[28].mxu1 %vm1437_vm13, %v19104_v6  ;;  %v8373_v6 = vshrl.u32 %v17484_v9, 16 }
 0x4f4   : > { %13062 = vmatprep.mubr.msk.bf16.mxu1 %vm1437_vm13, %v13851_v30  ;;  %v8369_v30 = vshll.u32 %v17484_v9, 16  ;;  %v10598_v9 = vld [vmem:[#allocation2 + $0x6c] sm:$0xe] }
 0x4f6   : > { %v8371_v47 = vrot.slane %v8369_v30, 5  ;;  %v8432_v30 = vshrl.u32 %v8320_v24, 16 }
 0x4f8   : > { %v8434_v5 = vrot.slane %v8432_v30, 4 }
 0x4fb   : > { %13063 = vmatmul.mubr.msk.bf16.vlgmr.msra.gmra.mrb[0].mxu1 %vm1437_vm13, %v13852_v36  ;;  %v17488_v36 = vld [vmem:[#allocation2 + $0x1c] sm:$0xf] }
 0x4fc   : > { %13095 = vmatpush3.bf16.msra.mxu1 %v8842_v1  ;;  %13066 = vmatprep.mubr.msk.bf16.mxu1 %vm1437_vm13, %v13853_v3  ;;  %19106 = vst [vmem:[#allocation3_spill] sm:$0xff] %v17488_v36  ;;  %v8362_v1 = vrot.slane %v8360_v57, 4  ;;  %v8365_v3 = vrot.slane %v8363_v62, 5  ;;  %v8393_v7 = vshll.u32 %v17488_v36, 16  ;;  %v8397_v60 = vshrl.u32 %v17488_v36, 16 }
 0x4fd   : > { %13790 = vmatprep.subr.msk.bf16.mxu1 %vm1486_vm0, %v17476_v39  ;;  %v8375_v57 = vrot.slane %v8373_v6, 4  ;;  %v8386_v62 = vrot.slane %v8384_v52, 4  ;;  %v8403_v52 = vshll.u32 %v17496_v23, 16 }
 0x4fe   : > { %v8366_v27 = vor.u32 %v8365_v3, %v8362_v1  ;;  %v8395_v56 = vrot.slane %v8393_v7, 5  ;;  %v8399_v44 = vrot.slane %v8397_v60, 4  ;;  %v8441_v7 = vshll.u32 %v17214_v41, 16 }
 0x4ff   : > { %v8390_v1 = vor.u32 %v8389_v8, %v8386_v62  ;;  %v8445_v60 = vshrl.u32 %v17214_v41, 16  ;;  %v8405_v22 = vrot.slane %v8403_v52, 5  ;;  %v8438_v41 = vor.u32 %v8437_v37, %v8434_v5  ;;  %v13860_v52 = vld [vmem:[#allocation2 + $0x78] sm:$0xff]  }
 0x500   : > { %v8367_v6 = vrot.slane %v8366_v27, 4  ;;  %v8400_v15 = vor.u32 %v8399_v44, %v8395_v56  ;;  %v17511_v30 = vrot.slane %v8441_v7, 5  ;;  %v8451_v37 = vshll.u32 %v17218_v29, 16 }
 0x501   : > { %v8391_v62 = vrot.slane %v8390_v1, 4  ;;  %v8465_v5 = vshll.u32 %v17216_v54, 16  ;;  %v8469_v7 = vshrl.u32 %v17216_v54, 16 }
 0x503   : > { %13067 = vmatmul.mubr.msk.bf16.gmra.mrb[4].mxu1 %vm1437_vm13, %v13854_v4  ;;  %v8408_v4 = vshrl.u32 %v8317_v43, 16 }
 0x504   : > { %13070 = vmatprep.mubr.msk.bf16.mxu1 %vm1437_vm13, %v13855_v49  ;;  %v13857_v49 = vld [vmem:[#allocation2 + $0x54] sm:$0xff]  }
 0x505   : > { %v8410_v43 = vrot.slane %v8408_v4, 4  ;;  %v8423_v4 = vrot.slane %v8421_v34, 4  ;;  %v8372_v34 = vsel %vm14158_vm12, %v8367_v6, %v8371_v47  ;;  %v13861_v6 = vld [vmem:[#allocation2 + $0x84] sm:$0xff]  }
 0x507   : > { %v8414_v3 = vor.u32 %v8413_v35, %v8410_v43  ;;  %v8427_v35 = vshll.u32 %v17212_v14, 16  ;;  %v8424_v27 = vor.u32 %v8423_v4, %v8419_v0  ;;  %v8396_v14 = vsel %vm14158_vm12, %v8391_v62, %v8395_v56  ;;  %v8329_v56 = vld [vmem:[#allocation2 + $0x54] sm:$0xf] }
 0x509   : > { %v8415_v44 = vrot.slane %v8414_v3, 4  ;;  %v8429_v1 = vrot.slane %v8427_v35, 5  ;;  %v8489_v35 = vshll.u32 %v17226_v26, 16 }
 0x50b   : > { %13071 = vmatmul.mubr.msk.bf16.gmra.mrb[8].mxu1 %vm1437_vm13, %v13856_v16  ;;  %v8379_v16 = vshll.u32 %v17493_v48, 16 }
 0x50c   : > { %13074 = vmatprep.mubr.msk.bf16.mxu1 %vm1437_vm13, %v13857_v49  ;;  %v8376_v49 = vor.u32 %v8375_v57, %v8371_v47  ;;  %v8323_v57 = vld [vmem:[#allocation2 + $0x3c] sm:$0xf]  ;;  %v8326_v47 = vld [vmem:[#allocation2 + $0x48] sm:$0xf] }
 0x50d   : > { %v8381_v63 = vrot.slane %v8379_v16, 5  ;;  %v8456_v24 = vshrl.u32 %v8323_v57, 16  ;;  %v8459_v43 = vshll.u32 %v8323_v57, 16  ;;  %v8401_v16 = vrot.slane %v8400_v15, 4 }
 0x50e   : > { %v8377_v8 = vrot.slane %v8376_v49, 4  ;;  %v8425_v15 = vrot.slane %v8424_v27, 4  ;;  %v8483_v62 = vshll.u32 %v8326_v47, 16  ;;  %v8507_v27 = vshll.u32 %v8329_v56, 16 }
 0x50f   : > { %v8406_v3 = vsel %vm14158_vm12, %v8401_v16, %v8405_v22  ;;  %v8458_v4 = vrot.slane %v8456_v24, 4  ;;  %v8453_v22 = vrot.slane %v8451_v37, 5  ;;  %v17535_v24 = vrot.slane %v8465_v5, 5  ;;  %v13863_v5 = vld [vmem:[#allocation2 + $0x9c] sm:$0xff]  }
 0x510   : > { %v8382_v32 = vsel %vm14158_vm12, %v8377_v8, %v8381_v63  ;;  %v8420_v63 = vsel %vm14158_vm12, %v8415_v44, %v8419_v0  ;;  %v8480_v8 = vshrl.u32 %v8326_v47, 16  ;;  %v17527_v0 = vcombine.low %v8396_v14, %v8406_v3 }
 0x511   : > { %v17513_v49 = vcombine.low %v8372_v34, %v8382_v32  ;;  %v8430_v29 = vsel %vm14158_vm12, %v8425_v15, %v8429_v1  ;;  %v8493_v34 = vshrl.u32 %v17226_v26, 16  ;;  %v8504_v44 = vshrl.u32 %v8329_v56, 16  ;;  %v8335_v26 = vld [vmem:[#allocation2 + $0x6c] sm:$0xf]  ;;  %v13862_v15 = vld [vmem:[#allocation2 + $0x90] sm:$0xff]  }
 0x512   : > { %v17533_v54 = vcombine.low %v8420_v63, %v8430_v29  ;;  %v8475_v16 = vshll.u32 %v17220_v45, 16  ;;  %v8482_v1 = vrot.slane %v8480_v8, 4  ;;  %v8485_v47 = vrot.slane %v8483_v62, 5 }
 0x513   : > { %13075 = vmatmul.mubr.msk.bf16.gmra.mrb[12].mxu1 %vm1437_vm13, %v13858_v19  ;;  %v8447_v19 = vrot.slane %v8445_v60, 4  ;;  %v8439_v60 = vrot.slane %v8438_v41, 4  ;;  %v8332_v41 = vld [vmem:[#allocation2 + $0x60] sm:$0xf]  ;;  %v8513_v3 = vshll.u32 %v17237_v31, 16  ;;  %v8517_v63 = vshrl.u32 %v17237_v31, 16 }
 0x514   : > { %13078 = vmatprep.mubr.msk.bf16.mxu1 %vm1437_vm13, %v13859_v46  ;;  %v8461_v46 = vrot.slane %v8459_v43, 5  ;;  %v8471_v43 = vrot.slane %v8469_v7, 4  ;;  %v8506_v37 = vrot.slane %v8504_v44, 4  ;;  %v8528_v45 = vshrl.u32 %v8332_v41, 16 }
 0x515   : > { %v8448_v57 = vor.u32 %v8447_v19, %v17511_v30  ;;  %v8444_v19 = vsel %vm14158_vm12, %v8439_v60, %v17511_v30  ;;  %v8537_v7 = vshll.u32 %v17246_v51, 16  ;;  %v8541_v30 = vshrl.u32 %v17246_v51, 16 }
 0x516   : > { %v8462_v32 = vor.u32 %v8461_v46, %v8458_v4  ;;  %v8509_v4 = vrot.slane %v8507_v27, 5  ;;  %v8531_v46 = vshll.u32 %v8332_v41, 16  ;;  %v8552_v56 = vshrl.u32 %v8335_v26, 16 }
 0x517   : > { %v8449_v14 = vrot.slane %v8448_v57, 4  ;;  %v8555_v60 = vshll.u32 %v8335_v26, 16  ;;  %v8472_v31 = vor.u32 %v8471_v43, %v17535_v24  ;;  %v8499_v62 = vshll.u32 %v17234_v55, 16 }
 0x518   : > { %v8463_v8 = vrot.slane %v8462_v32, 4  ;;  %v8486_v29 = vor.u32 %v8485_v47, %v8482_v1  ;;  %v8519_v44 = vrot.slane %v8517_v63, 4  ;;  %v8510_v51 = vor.u32 %v8509_v4, %v8506_v37  ;;  %v8338_v63 = vld [vmem:[#allocation2 + $0x78] sm:$0xf]  ;;  %v13864_v37 = vld [vmem:[#allocation2 + $0xa8] sm:$0xff]  }
 0x519   : > { %v8454_v57 = vsel %vm14158_vm12, %v8449_v14, %v8453_v22  ;;  %v8523_v27 = vshll.u32 %v17239_v33, 16  ;;  %v8530_v41 = vrot.slane %v8528_v45, 4  ;;  %v8533_v26 = vrot.slane %v8531_v46, 5 }
 0x51a   : > { %v8543_v22 = vrot.slane %v8541_v30, 4  ;;  %v8554_v32 = vrot.slane %v8552_v56, 4  ;;  %v8557_v14 = vrot.slane %v8555_v60, 5  ;;  %v17557_v43 = vcombine.low %v8444_v19, %v8454_v57 }
 0x51b   : > { %13079 = vmatmul.mubr.msk.bf16.gmra.mrb[16].mxu1 %vm1437_vm13, %v13860_v52  ;;  %v17541_v52 = vrot.slane %v8489_v35, 5  ;;  %v8477_v55 = vrot.slane %v8475_v16, 5  ;;  %v8565_v1 = vshrl.u32 %v17261_v18, 16  ;;  %v8468_v47 = vsel %vm14158_vm12, %v8463_v8, %v17535_v24 }
 0x51c   : > { %13082 = vmatprep.mubr.msk.bf16.mxu1 %vm1437_vm13, %v13861_v6  ;;  %v8495_v6 = vrot.slane %v8493_v34, 4  ;;  %v8515_v34 = vrot.slane %v8513_v3, 5  ;;  %v8501_v33 = vrot.slane %v8499_v62, 5  ;;  %v8473_v4 = vrot.slane %v8472_v31, 4 }
 0x51d   : > { %v8511_v45 = vrot.slane %v8510_v51, 4  ;;  %v8534_v46 = vor.u32 %v8533_v26, %v8530_v41  ;;  %v8547_v19 = vshll.u32 %v17253_v2, 16  ;;  %v8525_v30 = vrot.slane %v8523_v27, 5  ;;  %v8341_v41 = vld [vmem:[#allocation2 + $0x84] sm:$0xf] }
 0x51e   : > { %v8496_v35 = vor.u32 %v8495_v6, %v17541_v52  ;;  %v8487_v6 = vrot.slane %v8486_v29, 4  ;;  %v8520_v3 = vor.u32 %v8519_v44, %v8515_v34  ;;  %v8567_v24 = vrot.slane %v8565_v1, 4 }
 0x51f   : > { %v8576_v57 = vshrl.u32 %v8338_v63, 16  ;;  %v8579_v8 = vshll.u32 %v8338_v63, 16  ;;  %v8478_v31 = vsel %vm14158_vm12, %v8473_v4, %v8477_v55  ;;  %v17579_v44 = vrot.slane %v8534_v46, 4  ;;  %v10593_v4 = vld [vmem:[#allocation2 + $0x30] sm:$0xe] }
 0x520   : > { %v8497_v16 = vrot.slane %v8496_v35, 4  ;;  %v8492_v2 = vsel %vm14158_vm12, %v8487_v6, %v17541_v52  ;;  %v8521_v29 = vrot.slane %v8520_v3, 4  ;;  %v8516_v35 = vsel %vm14158_vm12, %v8511_v45, %v8515_v34  ;;  %v13866_v6 = vld [vmem:[#allocation2 + $0xc0] sm:$0xff]  }
 0x521   : > { %v17581_v51 = vrot.slane %v8547_v19, 5  ;;  %v8571_v27 = vshll.u32 %v17273_v42, 16  ;;  %v8585_v52 = vshll.u32 %v17275_v12, 16  ;;  %v17597_v1 = vrot.slane %v8579_v8, 5  ;;  %v17599_v42 = vld [vmem:[#allocation2 + $0x38] sm:$0x1] }
 0x522   : > { %v8502_v62 = vsel %vm14158_vm12, %v8497_v16, %v8501_v33  ;;  %v8526_v26 = vsel %vm14158_vm12, %v8521_v29, %v8525_v30  ;;  %19110 = vst [vmem:[#allocation38_spill] sm:$0xff] %v17599_v42  ;;  %v17601_v33 = vcombine.low %v8468_v47, %v8478_v31  ;;  %v8603_v19 = vshll.u32 %v8341_v41, 16  ;;  %v17621_v16 = vld [vmem:[#allocation2 + $0x4c] sm:$0xf]  ;;  %v10594_v30 = vld [vmem:[#allocation2 + $0x3c] sm:$0xe] }
 0x523   : > { %13083 = vmatmul.mubr.msk.bf16.gmra.mrb[20].mxu1 %vm1437_vm13, %v13862_v15  ;;  %v17555_v15 = vrot.slane %v8537_v7, 5  ;;  %v13865_v7 = vld [vmem:[#allocation2 + $0xb4] sm:$0xff]   ;;  %v17603_v3 = vcombine.low %v8492_v2, %v8502_v62  ;;  %v17605_v63 = vcombine.low %v8516_v35, %v8526_v26  ;;  %v17617_v47 = vrot.slane %v8571_v27, 5  ;;  %19113 = vst [vmem:[#allocation39_spill] sm:$0xff] %v17621_v16  ;;  %v17632_v8 = vld [vmem:[#allocation2 + $0x50] sm:$0x1] }
 0x524   : > { %13086 = vmatprep.mubr.msk.bf16.mxu1 %vm1437_vm13, %v13863_v5  ;;  %v8561_v5 = vshll.u32 %v17261_v18, 16  ;;  %v8558_v18 = vor.u32 %v8557_v14, %v8554_v32  ;;  %v8589_v32 = vshrl.u32 %v17275_v12, 16  ;;  %v17590_v14 = vld [vmem:[#allocation2 + $0x34] sm:$0xf]  ;;  %v8600_v12 = vshrl.u32 %v8341_v41, 16  ;;  %19114 = vst [vmem:[#allocation40_spill] sm:$0xff] %v17632_v8 }
 0x525   : > { %v8544_v56 = vor.u32 %v8543_v22, %v17555_v15  ;;  %19109 = vst [vmem:[#allocation15_spill] sm:$0xff] %v17590_v14  ;;  %v17639_v62 = vld [vmem:[#allocation2 + $0x58] sm:$0xf]  ;;  %v12231_v29 = vrot.slane %v10593_v4, 9  ;;  %v10671_v35 = vrot.slane %v17590_v14, 5  ;;  %v17652_v4 = vrot.slane %v8603_v19, 5 }
 0x526   : > { %v17567_v60 = vrot.slane %v8561_v5, 5  ;;  %v17586_v22 = vrot.slane %v8558_v18, 4  ;;  %v17595_v5 = vrot.slane %v8576_v57, 4  ;;  %v17627_v18 = vrot.slane %v8585_v52, 5  ;;  %v10595_v27 = vld [vmem:[#allocation2 + $0x48] sm:$0xe] }
 0x527   : > { %v17592_v55 = vrot.slane %v8544_v56, 4  ;;  %v17644_v41 = vrot.slane %v8600_v12, 4  ;;  %v17647_v52 = vld [vmem:[#allocation2 + $0x5c] sm:$0x1]  ;;  %v9312_v57 = vsel %vm1486_vm0, %v17476_v39, 0  ;;  %v10673_v45 = vrot.slane %v10671_v35, 4 }
 0x528   : > { %v8568_v34 = vor.u32 %v8567_v24, %v17567_v60  ;;  %v17629_v24 = vrot.slane %v8589_v32, 4  ;;  %v10674_v32 = vrot.slane %v17599_v42, 5  ;;  %v17654_v56 = vld [vmem:[#allocation2 + $0x64] sm:$0xf]  ;;  %v12233_v46 = vrot.slane %v10595_v27, 9 }
 0x529   : > { %v10685_v2 = vrot.slane %v17621_v16, 5  ;;  %v10688_v26 = vrot.slane %v17632_v8, 5  ;;  %v10597_v42 = vld [vmem:[#allocation2 + $0x60] sm:$0xe]  ;;  %v17662_v14 = vld [vmem:[#allocation2 + $0x70] sm:$0xf]  ;;  %v17666_v39 = vsel %vm14726_vm1, %v12231_v29, %v10671_v35 }
 0x52a   : > { %v17635_v31 = vrot.slane %v8568_v34, 4  ;;  %v12232_v34 = vrot.slane %v10594_v30, 9  ;;  %v17660_v30 = vld [vmem:[#allocation2 + $0x68] sm:$0x1]  ;;  %19116 = vst [vmem:[#allocation42_spill] sm:$0xff] %v17662_v14  ;;  %19117 = vst [vmem:[#allocation43_spill] sm:$0xff] %v17666_v39  ;;  %v17670_v19 = vsel %vm14726_vm1, %v10673_v45, %v10674_v32 }
 0x52b   : > { %13087 = vmatmul.mubr.msk.bf16.gmra.mrb[24].mxu1 %vm1437_vm13, %v13864_v37  ;;  %v17607_v37 = vld [vmem:[#allocation2 + $0x40] sm:$0xf]  ;;  %19115 = vst [vmem:[#allocation41_spill] sm:$0xff] %v17660_v30  ;;  %19118 = vst [vmem:[#allocation44_spill] sm:$0xff] %v17670_v19  ;;  %v17672_v27 = vld [vmem:[#allocation2 + $0x74] sm:$0x1]  ;;  %v17700_v8 = vsel %vm14726_vm1, %v12233_v46, %v10685_v2 }
 0x52c   : > { %13090 = vmatprep.mubr.msk.bf16.mxu1 %vm1437_vm13, %v13865_v7  ;;  %19111 = vst [vmem:[#allocation4_spill] sm:$0xff] %v17607_v37  ;;  %v17619_v7 = vld [vmem:[#allocation2 + $0x44] sm:$0x1]  ;;  %19119 = vst [vmem:[#allocation45_spill] sm:$0xff] %v17672_v27  ;;  %v17674_v16 = vld [vmem:[#allocation2 + $0x7c] sm:$0xf] }
 0x52d   : > { %19112 = vst [vmem:[#allocation37_spill] sm:$0xff] %v17619_v7  ;;  %v10681_v12 = vrot.slane %v17619_v7, 5  ;;  %19120 = vst [vmem:[#allocation46_spill] sm:$0xff] %v17674_v16  ;;  %v10687_v36 = vrot.slane %v10685_v2, 4  ;;  %v10692_v29 = vrot.slane %v17639_v62, 5  ;;  %v10695_v32 = vrot.slane %v17647_v52, 5 }
 0x52e   : > { %v17683_v35 = vld [vmem:[#allocation2 + $0x80] sm:$0x1]  ;;  %v10699_v48 = vrot.slane %v17654_v56, 5  ;;  %19124 = vst [vmem:[#allocation50_spill] sm:$0xff] %v17700_v8  ;;  %v17708_v19 = vld [vmem:[#allocation2 + $0x88] sm:$0xf] }
 0x52f   : > { %19122 = vst [vmem:[#allocation48_spill] sm:$0xff] %v17683_v35  ;;  %v17710_v39 = vld [vmem:[#allocation2 + $0x8c] sm:$0x1]  ;;  %v10601_v8 = vld [vmem:[#allocation2 + $0x90] sm:$0xe] }
 0x530   : > { %19126 = vst [vmem:[#allocation52_spill] sm:$0xff] %v17710_v39  ;;  %v10701_v2 = vrot.slane %v10699_v48, 4 }
 0x533   : > { %13091 = vmatmul.mubr.msk.bf16.gmra.mrb[28].mxu1 %vm1437_vm13, %v13866_v6  ;;  %v10596_v6 = vld [vmem:[#allocation2 + $0x54] sm:$0xe] }
 0x534   : > { %13096 = vmatprep.mubr.msk.bf16.mxu1 %vm1437_vm13, %v17513_v49  ;;  %v10678_v49 = vrot.slane %v17607_v37, 5  ;;  %v12234_v7 = vrot.slane %v10596_v6, 9  ;;  %v12235_v6 = vrot.slane %v10597_v42, 9  ;;  %v10694_v42 = vrot.slane %v10692_v29, 4 }
 0x536   : > { %v10680_v37 = vrot.slane %v10678_v49, 4  ;;  %v17680_v23 = vsel %vm14726_vm1, %v12232_v34, %v10678_v49  ;;  %v17694_v34 = vld [vmem:[%s18732_s2 + $0xc] sm:$0x3]  ;;  %v17716_v46 = vsel %vm14726_vm1, %v12234_v7, %v10692_v29  ;;  %v10702_v49 = vrot.slane %v17660_v30, 5  ;;  %v10600_v29 = vld [vmem:[#allocation2 + $0x84] sm:$0xe] }
 0x537   : > { %19121 = vst [vmem:[#allocation47_spill] sm:$0xff] %v17680_v23  ;;  %19127 = vst [vmem:[#allocation53_spill] sm:$0xff] %v17716_v46  ;;  %v10706_v7 = vrot.slane %v17662_v14, 5  ;;  %v12239_v30 = vrot.slane %v10601_v8, 9  ;;  %v17767_v14 = vld [vmem:[#allocation2 + $0xb0] sm:$0x1] }
 0x538   : > { %v17687_v45 = vsel %vm14726_vm1, %v10680_v37, %v10681_v12  ;;  %v17704_v37 = vsel %vm14726_vm1, %v10687_v36, %v10688_v26  ;;  %v10599_v12 = vld [vmem:[#allocation2 + $0x78] sm:$0xe]  ;;  %v17720_v36 = vsel %vm14726_vm1, %v12235_v6, %v10699_v48  ;;  %v17728_v26 = vsel %vm14726_vm1, %v10694_v42, %v10695_v32  ;;  %v17738_v32 = vld [vmem:[#allocation2 + $0x98] sm:$0x1]  ;;  %v17740_v42 = vld [vmem:[#allocation2 + $0xa0] sm:$0xf] }
 0x539   : > { %19123 = vst [vmem:[#allocation49_spill] sm:$0xff] %v17687_v45  ;;  %19125 = vst [vmem:[#allocation51_spill] sm:$0xff] %v17704_v37  ;;  %v12236_v37 = vrot.slane %v10598_v9, 9  ;;  %v10713_v6 = vrot.slane %v17674_v16, 5  ;;  %v17744_v9 = vsel %vm14726_vm1, %v10701_v2, %v10702_v49  ;;  %v10708_v23 = vrot.slane %v10706_v7, 4 }
 0x53a   : > { %19128 = vst [vmem:[#allocation54_spill] sm:$0xff] %v17720_v36  ;;  %19129 = vst [vmem:[#allocation55_spill] sm:$0xff] %v17728_v26  ;;  %v10716_v48 = vrot.slane %v17683_v35, 5  ;;  %v17751_v26 = vld [vmem:[#allocation2 + $0xa4] sm:$0x1]  ;;  %v12238_v16 = vrot.slane %v10600_v29, 9 }
 0x53b   : > { %13097 = vmatmul.mubr.msk.bf16.vlgmr.msra.gmra.mrb[0].mxu1 %vm1437_vm13, %v17527_v0  ;;  %v17724_v0 = vld [vmem:[#allocation2 + $0x94] sm:$0xf]  ;;  %19130 = vst [vmem:[#allocation56_spill] sm:$0xff] %v17738_v32  ;;  %19131 = vst [vmem:[#allocation57_spill] sm:$0xff] %v17740_v42  ;;  %v17748_v45 = vsel %vm14726_vm1, %v12236_v37, %v10706_v7  ;;  %v10602_v49 = vld [vmem:[#allocation2 + $0x9c] sm:$0xe] }
 0x53c   : > { %13129 = vmatpush3.bf16.msra.mxu1 %v9312_v57  ;;  %13100 = vmatprep.mubr.msk.bf16.mxu1 %vm1437_vm13, %v17533_v54  ;;  %v10709_v54 = vrot.slane %v17672_v27, 5  ;;  %v12237_v57 = vrot.slane %v10599_v12, 9  ;;  %19132 = vst [vmem:[#allocation58_spill] sm:$0xff] %v17744_v9  ;;  %19133 = vst [vmem:[#allocation59_spill] sm:$0xff] %v17748_v45  ;;  %v10715_v27 = vrot.slane %v10713_v6, 4  ;;  %v10720_v7 = vrot.slane %v17708_v19, 5 }
 0x53d   : > { %13791 = vmatprep.subr.msk.bf16.mxu1 %vm1486_vm0, %v17694_v34  ;;  %19134 = vst [vmem:[#allocation60_spill] sm:$0xff] %v17751_v26  ;;  %v17759_v2 = vld [vmem:[#allocation2 + $0xac] sm:$0xf]  ;;  %v10723_v35 = vrot.slane %v17710_v39, 5  ;;  %19138 = vst [vmem:[#allocation64_spill] sm:$0xff] %v17767_v14  ;;  %v10730_v12 = vrot.slane %v17738_v32, 5 }
 0x53e   : > { %v17757_v46 = vsel %vm14726_vm1, %v12237_v57, %v10713_v6  ;;  %19136 = vst [vmem:[#allocation62_spill] sm:$0xff] %v17759_v2  ;;  %v17763_v37 = vsel %vm14726_vm1, %v10708_v23, %v10709_v54  ;;  %v17773_v29 = vsel %vm14726_vm1, %v10715_v27, %v10716_v48  ;;  %v10727_v6 = vrot.slane %v17724_v0, 5  ;;  %v10603_v23 = vld [vmem:[#allocation2 + $0xa8] sm:$0xe]  ;;  %v17777_v54 = vld [vmem:[#allocation2 + $0xb8] sm:$0xf] }
 0x53f   : > { %19135 = vst [vmem:[#allocation61_spill] sm:$0xff] %v17757_v46  ;;  %19137 = vst [vmem:[#allocation63_spill] sm:$0xff] %v17763_v37  ;;  %v9906_v9 = vld [vmem:[#allocation2 + $0xbc] sm:$0x1]  ;;  %v17783_v36 = vsel %vm14726_vm1, %v12238_v16, %v10720_v7  ;;  %v10722_v57 = vrot.slane %v10720_v7, 4  ;;  %v12240_v37 = vrot.slane %v10602_v49, 9 }
 0x540   : > { %19139 = vst [vmem:[#allocation65_spill] sm:$0xff] %v17773_v29  ;;  %19140 = vst [vmem:[#allocation66_spill] sm:$0xff] %v17783_v36  ;;  %v17789_v27 = vsel %vm14726_vm1, %v12239_v30, %v10727_v6  ;;  %v10729_v48 = vrot.slane %v10727_v6, 4  ;;  %v10734_v45 = vrot.slane %v17740_v42, 5  ;;  %v10737_v32 = vrot.slane %v17751_v26, 5  ;;  %v19224_v38 = vld [vmem:[#allocation53_spill] sm:$0xff] }
 0x541   : > { %19141 = vst [vmem:[#allocation67_spill] sm:$0xff] %v17789_v27  ;;  %v10604_v39 = vld [vmem:[#allocation2 + $0xb4] sm:$0xe]  ;;  %v17797_v16 = vsel %vm14726_vm1, %v10722_v57, %v10723_v35  ;;  %v12241_v49 = vrot.slane %v10603_v23, 9  ;;  %v10744_v7 = vrot.slane %v17767_v14, 5 }
 0x542   : > { %19142 = vst [vmem:[#allocation68_spill] sm:$0xff] %v17797_v16  ;;  %v10605_v30 = vld [vmem:[#allocation2 + $0xc0] sm:$0xe]  ;;  %v8344_v8 = vld [vmem:[#allocation2 + $0x90] sm:$0xf]  ;;  %v17813_v35 = vsel %vm14726_vm1, %v12240_v37, %v10734_v45  ;;  %v10736_v57 = vrot.slane %v10734_v45, 4 }
 0x543   : > { %13101 = vmatmul.mubr.msk.bf16.gmra.mrb[4].mxu1 %vm1437_vm13, %v17557_v43  ;;  %v10741_v43 = vrot.slane %v17759_v2, 5  ;;  %v17801_v6 = vld [vmem:[#allocation2 + $0xc4] sm:$0xf]  ;;  %v17803_v29 = vld [vmem:[#allocation2 + $0xc8] sm:$0x1]  ;;  %19144 = vst [vmem:[#allocation70_spill] sm:$0xff] %v17813_v35 }
 0x544   : > { %13104 = vmatprep.mubr.msk.bf16.mxu1 %vm1437_vm13, %v17601_v33  ;;  %v17809_v33 = vsel %vm14726_vm1, %v10729_v48, %v10730_v12  ;;  %v17815_v23 = vld [vmem:[#allocation2 + $0xd0] sm:$0xf]  ;;  %v12242_v46 = vrot.slane %v10604_v39, 9  ;;  %v10606_v16 = vld [vmem:[#allocation2 + $0xcc] sm:$0xe]  ;;  %v17825_v12 = vsel %vm14726_vm1, %v10736_v57, %v10737_v32  ;;  %v10748_v37 = vrot.slane %v17777_v54, 5 }
 0x545   : > { %19143 = vst [vmem:[#allocation69_spill] sm:$0xff] %v17809_v33  ;;  %v17821_v26 = vsel %vm14726_vm1, %v12241_v49, %v10741_v43  ;;  %v10743_v2 = vrot.slane %v10741_v43, 4  ;;  %v9912_v36 = vld [vmem:[#allocation2 + $0xd4] sm:$0x1]  ;;  %19145 = vst [vmem:[#allocation71_spill] sm:$0xff] %v17825_v12  ;;  %v10751_v45 = vrot.slane %v9906_v9, 5 }
 0x546   : > { %v12243_v48 = vrot.slane %v10605_v30, 9  ;;  %v10755_v49 = vrot.slane %v17801_v6, 5  ;;  %v10758_v39 = vrot.slane %v17803_v29, 5  ;;  %v8613_v43 = vshrl.u32 %v17307_v11, 16 }
 0x547   : > { %v17832_v14 = vsel %vm14726_vm1, %v10743_v2, %v10744_v7  ;;  %v10750_v57 = vrot.slane %v10748_v37, 4  ;;  %v12244_v33 = vrot.slane %v10606_v16, 9  ;;  %v8624_v9 = vshrl.u32 %v8344_v8, 16  ;;  %v8347_v7 = vld [vmem:[#allocation2 + $0x9c] sm:$0xf] }
 0x548   : > { %v12258_v32 = vcombine.low %v17821_v26, %v17832_v14  ;;  %v10757_v30 = vrot.slane %v10755_v49, 4  ;;  %v10762_v27 = vrot.slane %v17815_v23, 5  ;;  %v10765_v42 = vrot.slane %v9912_v36, 5 }
 0x549   : > { %v8627_v2 = vshll.u32 %v8344_v8, 16  ;;  %v17844_v12 = vsel %vm14726_vm1, %v12242_v46, %v10748_v37  ;;  %v17848_v35 = vsel %vm14726_vm1, %v10750_v57, %v10751_v45  ;;  %v17852_v16 = vsel %vm14726_vm1, %v12243_v48, %v10755_v49 }
 0x54a   : > { %v17860_v36 = vsel %vm14726_vm1, %v10757_v30, %v10758_v39  ;;  %v17864_v46 = vsel %vm14726_vm1, %v12244_v33, %v10762_v27  ;;  %v10764_v8 = vrot.slane %v10762_v27, 4  ;;  %v8592_v37 = vor.u32 %v17629_v24, %v17627_v18 }
 0x54b   : > { %13105 = vmatmul.mubr.msk.bf16.gmra.mrb[8].mxu1 %vm1437_vm13, %v17603_v3  ;;  %v12259_v3 = vcombine.low %v17844_v12, %v17848_v35  ;;  %v19146_v45 = vshll.u32 %v17307_v11, 16  ;;  %v8615_v49 = vrot.slane %v8613_v43, 4  ;;  %v8574_v39 = vsel %vm14158_vm12, %v17635_v31, %v17617_v47 }
 0x54c   : > { %13108 = vmatprep.mubr.msk.bf16.mxu1 %vm1437_vm13, %v17605_v63  ;;  %v8648_v57 = vshrl.u32 %v8347_v7, 16  ;;  %v8651_v30 = vshll.u32 %v8347_v7, 16  ;;  %v17878_v27 = vsel %vm14726_vm1, %v10764_v8, %v10765_v42  ;;  %v19147_v24 = vor.u32 %v17597_v1, %v17595_v5 }
 0x54d   : > { %v8611_v48 = vrot.slane %v19146_v45, 5  ;;  %v8606_v33 = vor.u32 %v17652_v4, %v17644_v41  ;;  %v8619_v43 = vshll.u32 %v17309_v21, 16  ;;  %v12261_v45 = vcombine.low %v17864_v46, %v17878_v27 }
 0x54e   : > { %v8583_v11 = vrot.slane %v19147_v24, 4  ;;  %v8626_v63 = vrot.slane %v8624_v9, 4  ;;  %v8629_v47 = vrot.slane %v8627_v2, 5  ;;  %v8633_v31 = vshll.u32 %v17318_v40, 16  ;;  %v8350_v24 = vld [vmem:[#allocation2 + $0xa8] sm:$0xf] }
 0x54f   : > { %v8637_v7 = vshrl.u32 %v17318_v40, 16  ;;  %v19148_v5 = vsel %vm14158_vm12, %v17592_v55, %v17581_v51  ;;  %v19149_v1 = vsel %vm14158_vm12, %v17579_v44, %v17555_v15  ;;  %v19150_v41 = vsel %vm14158_vm12, %v17586_v22, %v17567_v60 }
 0x550   : > { %v12089_v21 = vcombine.low %v19149_v1, %v19148_v5  ;;  %v12090_v4 = vcombine.low %v19150_v41, %v8574_v39  ;;  %v19151_v42 = vshll.u32 %v17294_v13, 16  ;;  %v8616_v9 = vor.u32 %v8615_v49, %v8611_v48 }
 0x551   : > { %v8650_v2 = vrot.slane %v8648_v57, 4  ;;  %v8653_v8 = vrot.slane %v8651_v30, 5  ;;  %v8657_v51 = vshll.u32 %v17343_v53, 16  ;;  %v8661_v55 = vshrl.u32 %v17343_v53, 16  ;;  %v8353_v57 = vld [vmem:[#allocation2 + $0xb4] sm:$0xf] }
 0x552   : > { %v8597_v40 = vrot.slane %v19151_v42, 5  ;;  %v8588_v15 = vsel %vm14158_vm12, %v8583_v11, %v17627_v18  ;;  %v8593_v44 = vrot.slane %v8592_v37, 4  ;;  %v8607_v60 = vrot.slane %v8606_v33, 4 }
 0x553   : > { %13109 = vmatmul.mubr.msk.bf16.gmra.mrb[12].mxu1 %vm1437_vm13, %v12089_v21  ;;  %v8621_v13 = vrot.slane %v8619_v43, 5  ;;  %v8630_v22 = vor.u32 %v8629_v47, %v8626_v63  ;;  %v8635_v49 = vrot.slane %v8633_v31, 5  ;;  %v8639_v39 = vrot.slane %v8637_v7, 4 }
 0x554   : > { %13112 = vmatprep.mubr.msk.bf16.mxu1 %vm1437_vm13, %v12090_v4  ;;  %v8598_v30 = vsel %vm14158_vm12, %v8593_v44, %v8597_v40  ;;  %v8617_v53 = vrot.slane %v8616_v9, 4  ;;  %v8672_v5 = vshrl.u32 %v8350_v24, 16  ;;  %v8675_v1 = vshll.u32 %v8350_v24, 16 }
 0x555   : > { %v8643_v21 = vshll.u32 %v17331_v10, 16  ;;  %v8654_v41 = vor.u32 %v8653_v8, %v8650_v2  ;;  %v8659_v42 = vrot.slane %v8657_v51, 5  ;;  %v8663_v18 = vrot.slane %v8661_v55, 4 }
 0x556   : > { %v12091_v37 = vcombine.low %v8588_v15, %v8598_v30  ;;  %v8612_v11 = vsel %vm14158_vm12, %v8607_v60, %v8611_v48  ;;  %v8696_v33 = vshrl.u32 %v8353_v57, 16  ;;  %v8699_v63 = vshll.u32 %v8353_v57, 16  ;;  %v8356_v60 = vld [vmem:[#allocation2 + $0xc0] sm:$0xf] }
 0x557   : > { %v8622_v43 = vsel %vm14158_vm12, %v8617_v53, %v8621_v13  ;;  %v8631_v47 = vrot.slane %v8630_v22, 4  ;;  %v8640_v31 = vor.u32 %v8639_v39, %v8635_v49  ;;  %v8667_v7 = vshll.u32 %v17345_v20, 16 }
 0x558   : > { %v8674_v4 = vrot.slane %v8672_v5, 4  ;;  %v8677_v40 = vrot.slane %v8675_v1, 5  ;;  %v8681_v10 = vshll.u32 %v17360_v50, 16  ;;  %v8685_v9 = vshrl.u32 %v17360_v50, 16 }
 0x559   : > { %v12092_v2 = vcombine.low %v8612_v11, %v8622_v43  ;;  %v8645_v8 = vrot.slane %v8643_v21, 5  ;;  %v8655_v51 = vrot.slane %v8654_v41, 4  ;;  %v8664_v55 = vor.u32 %v8663_v18, %v8659_v42 }
 0x55a   : > { %v8698_v48 = vrot.slane %v8696_v33, 4  ;;  %v8701_v24 = vrot.slane %v8699_v63, 5  ;;  %v8705_v15 = vshll.u32 %v17375_v59, 16  ;;  %v8709_v44 = vshrl.u32 %v17375_v59, 16 }
 0x55b   : > { %13113 = vmatmul.mubr.msk.bf16.gmra.mrb[16].mxu1 %vm1437_vm13, %v12091_v37  ;;  %v8636_v20 = vsel %vm14158_vm12, %v8631_v47, %v8635_v49  ;;  %v8669_v13 = vrot.slane %v8667_v7, 5  ;;  %v8641_v50 = vrot.slane %v8640_v31, 4  ;;  %v8678_v22 = vor.u32 %v8677_v40, %v8674_v4 }
 0x55c   : > { %13116 = vmatprep.mubr.msk.bf16.mxu1 %vm1437_vm13, %v12092_v2  ;;  %v8683_v39 = vrot.slane %v8681_v10, 5  ;;  %v8687_v57 = vrot.slane %v8685_v9, 4  ;;  %v8660_v30 = vsel %vm14158_vm12, %v8655_v51, %v8659_v42  ;;  %v8665_v53 = vrot.slane %v8664_v55, 4 }
 0x55d   : > { %v8720_v5 = vshrl.u32 %v8356_v60, 16  ;;  %v8723_v1 = vshll.u32 %v8356_v60, 16  ;;  %v8646_v59 = vsel %vm14158_vm12, %v8641_v50, %v8645_v8  ;;  %v8702_v21 = vor.u32 %v8701_v24, %v8698_v48 }
 0x55e   : > { %v8707_v41 = vrot.slane %v8705_v15, 5  ;;  %v8711_v18 = vrot.slane %v8709_v44, 4  ;;  %v12093_v37 = vcombine.low %v8636_v20, %v8646_v59  ;;  %v8670_v49 = vsel %vm14158_vm12, %v8665_v53, %v8669_v13  ;;  %v19152_v20 = vld [vmem:[#allocation5_spill] sm:$0xff] }
 0x55f   : > { %v8691_v11 = vshll.u32 %v17373_v61, 16  ;;  %v12094_v33 = vcombine.low %v8660_v30, %v8670_v49  ;;  %v8679_v63 = vrot.slane %v8678_v22, 4  ;;  %v8688_v43 = vor.u32 %v8687_v57, %v8683_v39  ;;  %v9037_v57 = vld [vmem:[#allocation2 + $0xc] sm:$0xe]  ;;  %v19153_v30 = vld [vmem:[#allocation11_spill] sm:$0xff] }
 0x560   : > { %v8715_v42 = vshll.u32 %v17388_v17, 16  ;;  %v8722_v47 = vrot.slane %v8720_v5, 4  ;;  %v8725_v31 = vrot.slane %v8723_v1, 5  ;;  %v8729_v7 = vshll.u32 %v17401_v28, 16 }
 0x561   : > { %v8733_v4 = vshrl.u32 %v17401_v28, 16  ;;  %v8703_v40 = vrot.slane %v8702_v21, 4  ;;  %v8712_v10 = vor.u32 %v8711_v18, %v8707_v41  ;;  %v8693_v9 = vrot.slane %v8691_v11, 5 }
 0x562   : > { %v8684_v61 = vsel %vm14158_vm12, %v8679_v63, %v8683_v39  ;;  %v8717_v2 = vrot.slane %v8715_v42, 5  ;;  %v8689_v8 = vrot.slane %v8688_v43, 4  ;;  %v8726_v51 = vor.u32 %v8725_v31, %v8722_v47  ;;  %v9038_v63 = vld [vmem:[#allocation2 + $0x18] sm:$0xe]  ;;  %v19155_v42 = vld [vmem:[#allocation13_spill] sm:$0xff] }
 0x563   : > { %13117 = vmatmul.mubr.msk.bf16.gmra.mrb[20].mxu1 %vm1437_vm13, %v12093_v37  ;;  %v8731_v17 = vrot.slane %v8729_v7, 5  ;;  %v8735_v55 = vrot.slane %v8733_v4, 4  ;;  %v8708_v48 = vsel %vm14158_vm12, %v8703_v40, %v8707_v41  ;;  %v8713_v24 = vrot.slane %v8712_v10, 4  ;;  %v19154_v37 = vld [vmem:[#allocation3_spill] sm:$0xff] }
 0x564   : > { %13120 = vmatprep.mubr.msk.bf16.mxu1 %vm1437_vm13, %v12094_v33  ;;  %v8694_v28 = vsel %vm14158_vm12, %v8689_v8, %v8693_v9  ;;  %v8739_v15 = vshll.u32 %v17413_v58, 16  ;;  %v9103_v13 = vrot.slane %v19152_v20, 5  ;;  %v8727_v22 = vrot.slane %v8726_v51, 4  ;;  %v19157_v8 = vld [vmem:[#allocation19_spill] sm:$0xff]  ;;  %v19168_v20 = vld [vmem:[#allocation20_spill] sm:$0xff] }
 0x565   : > { %v12095_v44 = vcombine.low %v8684_v61, %v8694_v28  ;;  %v8718_v60 = vsel %vm14158_vm12, %v8713_v24, %v8717_v2  ;;  %v8736_v39 = vor.u32 %v8735_v55, %v8731_v17  ;;  %v9106_v53 = vrot.slane %v19153_v30, 5  ;;  %v12196_v61 = vld [vmem:[%s18732_s2 + $0xe] sm:$0x3]  ;;  %v19156_v2 = vld [vmem:[#allocation12_spill] sm:$0xff]  ;;  %v19160_v55 = vld [vmem:[#allocation14_spill] sm:$0xff] }
 0x566   : > { %v12096_v50 = vcombine.low %v8708_v48, %v8718_v60  ;;  %v8741_v5 = vrot.slane %v8739_v15, 5  ;;  %v12114_v1 = vrot.slane %v9037_v57, 9  ;;  %v9105_v59 = vrot.slane %v9103_v13, 4  ;;  %v19163_v24 = vld [vmem:[#allocation23_spill] sm:$0xff]  ;;  %v19165_v15 = vld [vmem:[#allocation21_spill] sm:$0xff]  ;;  %v19174_v30 = vld [vmem:[#allocation24_spill] sm:$0xff] }
 0x567   : > { %v8732_v58 = vsel %vm14158_vm12, %v8727_v22, %v8731_v17  ;;  %v8737_v21 = vrot.slane %v8736_v39, 4  ;;  %v9110_v49 = vrot.slane %v19154_v37, 5  ;;  %v9113_v47 = vrot.slane %v19155_v42, 5  ;;  %v19159_v17 = vld [vmem:[#allocation17_spill] sm:$0xff]  ;;  %v19172_v39 = vld [vmem:[#allocation22_spill] sm:$0xff] }
 0x568   : > { %v9107_v41 = vsel %vm14726_vm1, %v9105_v59, %v9106_v53  ;;  %v9104_v33 = vsel %vm14726_vm1, %v12114_v1, %v9103_v13  ;;  %v12115_v31 = vrot.slane %v9038_v63, 9  ;;  %v9670_v9 = vsel %vm1486_vm0, %v17694_v34, 0  ;;  %v19162_v34 = vld [vmem:[#allocation16_spill] sm:$0xff]  ;;  %v19169_v13 = vld [vmem:[#allocation27_spill] sm:$0xff]  ;;  %v19171_v22 = vld [vmem:[#allocation25_spill] sm:$0xff] }
 0x569   : > { %v8742_v18 = vsel %vm14158_vm12, %v8737_v21, %v8741_v5  ;;  %v12131_v43 = vcombine.low %v9104_v33, %v9107_v41  ;;  %v9112_v7 = vrot.slane %v9110_v49, 4  ;;  %v19158_v51 = vcombine.low %v19156_v2, %v19157_v8  ;;  %v19175_v53 = vld [vmem:[#allocation31_spill] sm:$0xff]  ;;  %v19177_v1 = vld [vmem:[#allocation29_spill] sm:$0xff]  ;;  %v19178_v59 = vld [vmem:[#allocation26_spill] sm:$0xff] }
 0x56a   : > { %v12097_v11 = vcombine.low %v8732_v58, %v8742_v18  ;;  %v9111_v40 = vsel %vm14726_vm1, %v12115_v31, %v9110_v49  ;;  %v19161_v48 = vcombine.low %v19159_v17, %v19160_v55  ;;  %v19164_v28 = vcombine.low %v19162_v34, %v19163_v24  ;;  %v19180_v21 = vld [vmem:[#allocation28_spill] sm:$0xff]  ;;  %v19181_v41 = vld [vmem:[#allocation35_spill] sm:$0xff]  ;;  %v19183_v37 = vld [vmem:[#allocation33_spill] sm:$0xff] }
 0x56b   : > { %13121 = vmatmul.mubr.msk.bf16.gmra.mrb[24].mxu1 %vm1437_vm13, %v12095_v44  ;;  %v9114_v4 = vsel %vm14726_vm1, %v9112_v7, %v9113_v47  ;;  %v19166_v44 = vld [vmem:[#allocation18_spill] sm:$0xff]  ;;  %v19173_v57 = vcombine.low %v19171_v22, %v19172_v39  ;;  %v19176_v5 = vcombine.low %v19174_v30, %v19175_v53  ;;  %v19179_v58 = vcombine.low %v19177_v1, %v19178_v59  ;;  %v19186_v33 = vld [vmem:[#allocation32_spill] sm:$0xff]  ;;  %v19196_v2 = vld [vmem:[#allocation9_spill] sm:$0xff] }
 0x56c   : > { %13124 = vmatprep.mubr.msk.bf16.mxu1 %vm1437_vm13, %v12096_v50  ;;  %v12132_v10 = vcombine.low %v9111_v40, %v9114_v4  ;;  %v19167_v60 = vcombine.low %v19165_v15, %v19166_v44  ;;  %v19170_v50 = vcombine.low %v19168_v20, %v19169_v13  ;;  %v19182_v18 = vcombine.low %v19180_v21, %v19181_v41  ;;  %v19184_v49 = vld [vmem:[#allocation30_spill] sm:$0xff]  ;;  %v19192_v7 = vld [vmem:[#allocation36_spill] sm:$0xff]  ;;  %v19193_v4 = vld [vmem:[#allocation7_spill] sm:$0xff] }
 0x56d   : > { %v19187_v63 = vld [vmem:[#allocation34_spill] sm:$0xff]  ;;  %v19194_v40 = vcombine.low %v19192_v7, %v19193_v4  ;;  %v10396_v17 = vsel %vm1486_vm0, %v12196_v61, 0  ;;  %v13870_v34 = vld [vmem:[#allocation2 + $0x3c] sm:$0xff]   ;;  %v13871_v24 = vld [vmem:[#allocation2 + $0x48] sm:$0xff]  }
 0x56e   : > { %v19189_v42 = vld [vmem:[#allocation6_spill] sm:$0xff]  ;;  %v13875_v44 = vld [vmem:[#allocation2 + $0x78] sm:$0xff]  }
 0x56f   : > { %v19190_v47 = vld [vmem:[#allocation10_spill] sm:$0xff]  ;;  %v9865_v20 = vld [vmem:[#allocation2 + $0x18] sm:$0xf]  ;;  %v13878_v59 = vld [vmem:[#allocation2 + $0x9c] sm:$0xff]  }
 0x570   : > { %v19191_v31 = vcombine.low %v19189_v42, %v19190_v47  ;;  %v13869_v55 = vld [vmem:[#allocation2 + $0x30] sm:$0xff]   ;;  %v9914_v22 = vshrl.u32 %v9865_v20, 16  ;;  %v9917_v39 = vshll.u32 %v9865_v20, 16  ;;  %v9874_v47 = vld [vmem:[#allocation2 + $0x3c] sm:$0xf] }
 0x571   : > { %v13874_v15 = vld [vmem:[#allocation2 + $0x6c] sm:$0xff]  }
 0x572   : > { %v13877_v13 = vld [vmem:[#allocation2 + $0x90] sm:$0xff]   ;;  %v9916_v53 = vrot.slane %v9914_v22, 4 }
 0x573   : > { %13125 = vmatmul.mubr.msk.bf16.gmra.mrb[28].mxu1 %vm1437_vm13, %v12097_v11  ;;  %v19185_v11 = vcombine.low %v19183_v37, %v19184_v49  ;;  %v9871_v37 = vld [vmem:[#allocation2 + $0x30] sm:$0xf]  ;;  %v18060_v49 = vld [vmem:[#allocation2 + $0x20] sm:$0x1] }
 0x574   : > { %13130 = vmatprep.mubr.msk.bf16.mxu1 %vm1437_vm13, %v12131_v43  ;;  %v19188_v43 = vcombine.low %v19186_v33, %v19187_v63 }
 0x57b   : > { %13131 = vmatmul.mubr.msk.bf16.vlgmr.msra.gmra.mrb[0].mxu1 %vm1437_vm13, %v12132_v10  ;;  %v13867_v10 = vld [vmem:[#allocation2 + $0x18] sm:$0xff]  }
 0x57c   : > { %13163 = vmatpush3.bf16.msra.mxu1 %v9670_v9  ;;  %13134 = vmatprep.mubr.msk.bf16.mxu1 %vm1437_vm13, %v19158_v51  ;;  %v19195_v9 = vld [vmem:[#allocation8_spill] sm:$0xff] }
 0x57d   : > { %13792 = vmatprep.subr.msk.bf16.mxu1 %vm1486_vm0, %v12196_v61  ;;  %v19197_v8 = vcombine.low %v19195_v9, %v19196_v2  ;;  %v13868_v51 = vld [vmem:[#allocation2 + $0x24] sm:$0xff]   ;;  %v13872_v61 = vld [vmem:[#allocation2 + $0x54] sm:$0xff]  }
 0x57e   : > { %v19198_v9 = vld [vmem:[#allocation15_spill] sm:$0xff] }
 0x57f   : > { %v9971_v2 = vshll.u32 %v19198_v9, 16 }
 0x583   : > { %13135 = vmatmul.mubr.msk.bf16.gmra.mrb[4].mxu1 %vm1437_vm13, %v19161_v48  ;;  %v18039_v48 = vld [vmem:[%s18732_s2 + $0x10] sm:$0x3] }
 0x584   : > { %13138 = vmatprep.mubr.msk.bf16.mxu1 %vm1437_vm13, %v19164_v28  ;;  %v13873_v28 = vld [vmem:[#allocation2 + $0x60] sm:$0xff]  }
 0x58b   : > { %13139 = vmatmul.mubr.msk.bf16.gmra.mrb[8].mxu1 %vm1437_vm13, %v19167_v60  ;;  %v13876_v60 = vld [vmem:[#allocation2 + $0x84] sm:$0xff]  }
 0x58c   : > { %13142 = vmatprep.mubr.msk.bf16.mxu1 %vm1437_vm13, %v19170_v50  ;;  %v18053_v50 = vld [vmem:[#allocation2 + $0x1c] sm:$0xf] }
 0x58d   : > { %v9923_v30 = vshll.u32 %v18053_v50, 16  ;;  %v9927_v1 = vshrl.u32 %v18053_v50, 16 }
 0x58f   : > { %v9929_v63 = vrot.slane %v9927_v1, 4 }
 0x593   : > { %13143 = vmatmul.mubr.msk.bf16.gmra.mrb[12].mxu1 %vm1437_vm13, %v19173_v57  ;;  %v9868_v57 = vld [vmem:[#allocation2 + $0x24] sm:$0xf] }
 0x594   : > { %13146 = vmatprep.mubr.msk.bf16.mxu1 %vm1437_vm13, %v19176_v5  ;;  %v9919_v5 = vrot.slane %v9917_v39, 5  ;;  %v9938_v21 = vshrl.u32 %v9868_v57, 16  ;;  %v9941_v41 = vshll.u32 %v9868_v57, 16  ;;  %v13881_v39 = vld [vmem:[#allocation2 + $0xc0] sm:$0xff]   ;;  %v18071_v57 = vrot.slane %v9971_v2, 5 }
 0x596   : > { %v9920_v33 = vor.u32 %v9919_v5, %v9916_v53  ;;  %v9940_v7 = vrot.slane %v9938_v21, 4  ;;  %v9943_v4 = vrot.slane %v9941_v41, 5  ;;  %v19199_v53 = vld [vmem:[#allocation4_spill] sm:$0xff] }
 0x597   : > { %v9995_v5 = vshll.u32 %v19199_v53, 16  ;;  %v9999_v1 = vshrl.u32 %v19199_v53, 16 }
 0x598   : > { %v9944_v20 = vor.u32 %v9943_v4, %v9940_v7  ;;  %v19200_v7 = vld [vmem:[#allocation38_spill] sm:$0xff] }
 0x599   : > { %v9981_v4 = vshll.u32 %v19200_v7, 16  ;;  %v10001_v2 = vrot.slane %v9999_v1, 4  ;;  %v19202_v1 = vld [vmem:[#allocation37_spill] sm:$0xff] }
 0x59b   : > { %13147 = vmatmul.mubr.msk.bf16.gmra.mrb[16].mxu1 %vm1437_vm13, %v19179_v58  ;;  %v18057_v58 = vld [vmem:[#allocation2 + $0x28] sm:$0xf] }
 0x59c   : > { %13150 = vmatprep.mubr.msk.bf16.mxu1 %vm1437_vm13, %v19182_v18  ;;  %v13879_v18 = vld [vmem:[#allocation2 + $0xa8] sm:$0xff]   ;;  %v9951_v42 = vshrl.u32 %v18057_v58, 16 }
 0x5a3   : > { %13151 = vmatmul.mubr.msk.bf16.gmra.mrb[20].mxu1 %vm1437_vm13, %v19185_v11  ;;  %v9925_v11 = vrot.slane %v9923_v30, 5 }
 0x5a4   : > { %13154 = vmatprep.mubr.msk.bf16.mxu1 %vm1437_vm13, %v19188_v43  ;;  %v9947_v43 = vshll.u32 %v18057_v58, 16 }
 0x5ab   : > { %13155 = vmatmul.mubr.msk.bf16.gmra.mrb[24].mxu1 %vm1437_vm13, %v19191_v31  ;;  %v18065_v31 = vld [vmem:[#allocation2 + $0x2c] sm:$0x1] }
 0x5ac   : > { %13158 = vmatprep.mubr.msk.bf16.mxu1 %vm1437_vm13, %v19194_v40  ;;  %v9962_v40 = vshrl.u32 %v9871_v37, 16 }
 0x5b3   : > { %13159 = vmatmul.mubr.msk.bf16.gmra.mrb[28].mxu1 %vm1437_vm13, %v19197_v8  ;;  %v9975_v8 = vshrl.u32 %v19198_v9, 16  ;;  %v9997_v9 = vrot.slane %v9995_v5, 5 }
 0x5b4   : > { %13164 = vmatprep.mubr.msk.bf16.mxu1 %vm1437_vm13, %v13867_v10  ;;  %v9965_v10 = vshll.u32 %v9871_v37, 16 }
 0x5b5   : > { %v9977_v30 = vrot.slane %v9975_v8, 4  ;;  %v10002_v5 = vor.u32 %v10001_v2, %v9997_v9  ;;  %v10043_v2 = vshll.u32 %v17639_v62, 16 }
 0x5b6   : > { %v9967_v22 = vrot.slane %v9965_v10, 5 }
 0x5b7   : > { %v9978_v10 = vor.u32 %v9977_v30, %v18071_v57 }
 0x5b9   : > { %v9979_v53 = vrot.slane %v9978_v10, 4 }
 0x5bb   : > { %13165 = vmatmul.mubr.msk.bf16.vlgmr.msra.gmra.mrb[0].mxu1 %vm1437_vm13, %v13868_v51  ;;  %v9933_v51 = vshll.u32 %v18060_v49, 16 }
 0x5bc   : > { %13197 = vmatpush3.bf16.msra.mxu1 %v10396_v17  ;;  %13168 = vmatprep.mubr.msk.bf16.mxu1 %vm1437_vm13, %v13869_v55  ;;  %v9986_v17 = vshrl.u32 %v9874_v47, 16  ;;  %v9989_v55 = vshll.u32 %v9874_v47, 16 }
 0x5bd   : > { %13793 = vmatprep.subr.msk.bf16.mxu1 %vm1486_vm0, %v18039_v48 }
 0x5be   : > { %v9991_v21 = vrot.slane %v9989_v55, 5 }
 0x5c3   : > { %13169 = vmatmul.mubr.msk.bf16.gmra.mrb[4].mxu1 %vm1437_vm13, %v13870_v34  ;;  %v9930_v34 = vor.u32 %v9929_v63, %v9925_v11 }
 0x5c4   : > { %13172 = vmatprep.mubr.msk.bf16.mxu1 %vm1437_vm13, %v13871_v24  ;;  %v9949_v24 = vrot.slane %v9947_v43, 5  ;;  %v9945_v43 = vrot.slane %v9944_v20, 4  ;;  %v13882_v20 = vld [vmem:[#allocation2 + $0xcc] sm:$0xff]  }
 0x5c5   : > { %v9931_v37 = vrot.slane %v9930_v34, 4 }
 0x5cb   : > { %13173 = vmatmul.mubr.msk.bf16.gmra.mrb[8].mxu1 %vm1437_vm13, %v13872_v61  ;;  %v9953_v61 = vrot.slane %v9951_v42, 4 }
 0x5cc   : > { %13176 = vmatprep.mubr.msk.bf16.mxu1 %vm1437_vm13, %v13873_v28  ;;  %v9957_v28 = vshll.u32 %v18065_v31, 16 }
 0x5cd   : > { %v9954_v63 = vor.u32 %v9953_v61, %v9949_v24  ;;  %v19201_v61 = vld [vmem:[#allocation39_spill] sm:$0xff] }
 0x5ce   : > { %v9959_v42 = vrot.slane %v9957_v28, 5  ;;  %v10023_v28 = vshrl.u32 %v19201_v61, 16 }
 0x5d3   : > { %13177 = vmatmul.mubr.msk.bf16.gmra.mrb[12].mxu1 %vm1437_vm13, %v13874_v15  ;;  %v9877_v15 = vld [vmem:[#allocation2 + $0x48] sm:$0xf] }
 0x5d4   : > { %13180 = vmatprep.mubr.msk.bf16.mxu1 %vm1437_vm13, %v13875_v44  ;;  %v13880_v44 = vld [vmem:[#allocation2 + $0xb4] sm:$0xff]   ;;  %v10010_v41 = vshrl.u32 %v9877_v15, 16 }
 0x5db   : > { %13181 = vmatmul.mubr.msk.bf16.gmra.mrb[16].mxu1 %vm1437_vm13, %v13876_v60  ;;  %v9921_v60 = vrot.slane %v9920_v33, 4  ;;  %v9935_v33 = vrot.slane %v9933_v51, 5  ;;  %v9955_v51 = vrot.slane %v9954_v63, 4 }
 0x5dc   : > { %13184 = vmatprep.mubr.msk.bf16.mxu1 %vm1437_vm13, %v13877_v13  ;;  %v9964_v13 = vrot.slane %v9962_v40, 4 }
 0x5dd   : > { %v9926_v40 = vsel %vm14158_vm12, %v9921_v60, %v9925_v11  ;;  %v9936_v34 = vsel %vm14158_vm12, %v9931_v37, %v9935_v33  ;;  %v9950_v11 = vsel %vm14158_vm12, %v9945_v43, %v9949_v24  ;;  %v9960_v30 = vsel %vm14158_vm12, %v9955_v51, %v9959_v42 }
 0x5de   : > { %v9968_v47 = vor.u32 %v9967_v22, %v9964_v13  ;;  %v12197_v13 = vcombine.low %v9926_v40, %v9936_v34  ;;  %v9983_v22 = vrot.slane %v9981_v4, 5  ;;  %v10025_v24 = vrot.slane %v10023_v28, 4  ;;  %v19203_v40 = vld [vmem:[#allocation40_spill] sm:$0xff] }
 0x5df   : > { %v10029_v10 = vshll.u32 %v19203_v40, 16 }
 0x5e0   : > { %v9969_v60 = vrot.slane %v9968_v47, 4  ;;  %v12198_v47 = vcombine.low %v9950_v11, %v9960_v30  ;;  %v9984_v7 = vsel %vm14158_vm12, %v9979_v53, %v9983_v22  ;;  %v10071_v11 = vshrl.u32 %v17654_v56, 16 }
 0x5e1   : > { %v10031_v22 = vrot.slane %v10029_v10, 5  ;;  %v19205_v10 = vld [vmem:[#allocation41_spill] sm:$0xff] }
 0x5e2   : > { %v9974_v42 = vsel %vm14158_vm12, %v9969_v60, %v18071_v57  ;;  %v9886_v60 = vld [vmem:[#allocation2 + $0x6c] sm:$0xf] }
 0x5e3   : > { %13185 = vmatmul.mubr.msk.bf16.gmra.mrb[20].mxu1 %vm1437_vm13, %v13878_v59  ;;  %v9988_v59 = vrot.slane %v9986_v17, 4  ;;  %v10012_v17 = vrot.slane %v10010_v41, 4 }
 0x5e4   : > { %13188 = vmatprep.mubr.msk.bf16.mxu1 %vm1437_vm13, %v13879_v18  ;;  %v10013_v18 = vshll.u32 %v9877_v15, 16  ;;  %v10019_v15 = vshll.u32 %v19201_v61, 16 }
 0x5e5   : > { %v9992_v8 = vor.u32 %v9991_v21, %v9988_v59  ;;  %v10005_v59 = vshll.u32 %v19202_v1, 16  ;;  %v9889_v1 = vld [vmem:[#allocation2 + $0x78] sm:$0xf] }
 0x5e6   : > { %v10015_v55 = vrot.slane %v10013_v18, 5  ;;  %v10021_v33 = vrot.slane %v10019_v15, 5 }
 0x5e7   : > { %v9993_v21 = vrot.slane %v9992_v8, 4  ;;  %v10007_v4 = vrot.slane %v10005_v59, 5  ;;  %v10047_v8 = vshrl.u32 %v17639_v62, 16 }
 0x5e8   : > { %v10016_v41 = vor.u32 %v10015_v55, %v10012_v17  ;;  %v10003_v17 = vrot.slane %v10002_v5, 4  ;;  %v10026_v15 = vor.u32 %v10025_v24, %v10021_v33  ;;  %v19204_v24 = vld [vmem:[#allocation42_spill] sm:$0xff] }
 0x5e9   : > { %v9998_v61 = vsel %vm14158_vm12, %v9993_v21, %v9997_v9  ;;  %v10049_v30 = vrot.slane %v10047_v8, 4  ;;  %v10082_v21 = vshrl.u32 %v9886_v60, 16  ;;  %v9892_v8 = vld [vmem:[#allocation2 + $0x84] sm:$0xf] }
 0x5ea   : > { %v10017_v55 = vrot.slane %v10016_v41, 4  ;;  %v10008_v62 = vsel %vm14158_vm12, %v10003_v17, %v10007_v4  ;;  %v10085_v41 = vshll.u32 %v9886_v60, 16  ;;  %v10130_v60 = vshrl.u32 %v9892_v8, 16 }
 0x5eb   : > { %13189 = vmatmul.mubr.msk.bf16.gmra.mrb[24].mxu1 %vm1437_vm13, %v13880_v44  ;;  %v9880_v44 = vld [vmem:[#allocation2 + $0x54] sm:$0xf]  ;;  %v12200_v9 = vcombine.low %v9998_v61, %v10008_v62  ;;  %v10084_v17 = vrot.slane %v10082_v21, 4 }
 0x5ec   : > { %13192 = vmatprep.mubr.msk.bf16.mxu1 %vm1437_vm13, %v13881_v39  ;;  %v9883_v39 = vld [vmem:[#allocation2 + $0x60] sm:$0xf]  ;;  %v10034_v18 = vshrl.u32 %v9880_v44, 16  ;;  %v10037_v37 = vshll.u32 %v9880_v44, 16  ;;  %v10866_v44 = vsel %vm1486_vm0, %v18039_v48, 0  ;;  %v10022_v53 = vsel %vm14158_vm12, %v10017_v55, %v10021_v33 }
 0x5ed   : > { %v10058_v63 = vshrl.u32 %v9883_v39, 16  ;;  %v10061_v43 = vshll.u32 %v9883_v39, 16  ;;  %v10045_v39 = vrot.slane %v10043_v2, 5  ;;  %v10053_v48 = vshll.u32 %v17647_v52, 16 }
 0x5ee   : > { %v10036_v34 = vrot.slane %v10034_v18, 4  ;;  %v10039_v51 = vrot.slane %v10037_v37, 5  ;;  %v10073_v37 = vrot.slane %v10071_v11, 4  ;;  %v10109_v52 = vshll.u32 %v9889_v1, 16 }
 0x5ef   : > { %v10060_v28 = vrot.slane %v10058_v63, 4  ;;  %v10063_v57 = vrot.slane %v10061_v43, 5  ;;  %v10091_v63 = vshll.u32 %v19204_v24, 16  ;;  %v10095_v43 = vshrl.u32 %v19204_v24, 16  ;;  %v19208_v24 = vld [vmem:[#allocation48_spill] sm:$0xff] }
 0x5f0   : > { %v10040_v5 = vor.u32 %v10039_v51, %v10036_v34  ;;  %v10055_v40 = vrot.slane %v10053_v48, 5  ;;  %v10077_v2 = vshll.u32 %v19205_v10, 16  ;;  %v10087_v55 = vrot.slane %v10085_v41, 5  ;;  %v19206_v34 = vld [vmem:[#allocation46_spill] sm:$0xff]  ;;  %v19207_v41 = vld [vmem:[#allocation45_spill] sm:$0xff] }
 0x5f1   : > { %v10064_v59 = vor.u32 %v10063_v57, %v10060_v28  ;;  %v10115_v51 = vshll.u32 %v19206_v34, 16  ;;  %v10119_v61 = vshrl.u32 %v19206_v34, 16  ;;  %v18120_v57 = vrot.slane %v10091_v63, 5  ;;  %v9898_v34 = vld [vmem:[#allocation2 + $0x9c] sm:$0xf] }
 0x5f2   : > { %v10041_v4 = vrot.slane %v10040_v5, 4  ;;  %v10111_v11 = vrot.slane %v10109_v52, 5  ;;  %v10088_v5 = vor.u32 %v10087_v55, %v10084_v17  ;;  %v10125_v63 = vshll.u32 %v19208_v24, 16  ;;  %v19210_v24 = vld [vmem:[#allocation56_spill] sm:$0xff] }
 0x5f3   : > { %13193 = vmatmul.mubr.msk.bf16.gmra.mrb[28].mxu1 %vm1437_vm13, %v13882_v20  ;;  %v12199_v20 = vcombine.low %v9974_v42, %v9984_v7  ;;  %v10106_v42 = vshrl.u32 %v9889_v1, 16  ;;  %v10117_v48 = vrot.slane %v10115_v51, 5  ;;  %v10121_v1 = vrot.slane %v10119_v61, 4 }
 0x5f4   : > { %13198 = vmatprep.mubr.msk.bf16.mxu1 %vm1437_vm13, %v12197_v13  ;;  %v10067_v13 = vshll.u32 %v17654_v56, 16  ;;  %v10027_v56 = vrot.slane %v10026_v15, 4  ;;  %v10065_v15 = vrot.slane %v10064_v59, 4  ;;  %v10046_v62 = vsel %vm14158_vm12, %v10041_v4, %v10045_v39 }
 0x5f5   : > { %v10122_v10 = vor.u32 %v10121_v1, %v10117_v48  ;;  %v10163_v17 = vshll.u32 %v17724_v0, 16  ;;  %v10167_v55 = vshrl.u32 %v17724_v0, 16  ;;  %v10178_v0 = vshrl.u32 %v9898_v34, 16 }
 0x5f6   : > { %v10069_v18 = vrot.slane %v10067_v13, 5  ;;  %v10032_v33 = vsel %vm14158_vm12, %v10027_v56, %v10031_v22  ;;  %v10108_v13 = vrot.slane %v10106_v42, 4  ;;  %v10079_v22 = vrot.slane %v10077_v2, 5  ;;  %v9895_v56 = vld [vmem:[#allocation2 + $0x90] sm:$0xf] }
 0x5f7   : > { %v12201_v7 = vcombine.low %v10022_v53, %v10032_v33  ;;  %v10139_v33 = vshll.u32 %v17708_v19, 16  ;;  %v10143_v42 = vshrl.u32 %v17708_v19, 16  ;;  %v10154_v52 = vshrl.u32 %v9895_v56, 16 }
 0x5f8   : > { %v10074_v28 = vor.u32 %v10073_v37, %v10069_v18  ;;  %v10070_v59 = vsel %vm14158_vm12, %v10065_v15, %v10069_v18  ;;  %v10101_v37 = vshll.u32 %v19207_v41, 16  ;;  %v10127_v15 = vrot.slane %v10125_v63, 5 }
 0x5f9   : > { %v10165_v1 = vrot.slane %v10163_v17, 5  ;;  %v10173_v63 = vshll.u32 %v19210_v24, 16 }
 0x5fa   : > { %v10075_v21 = vrot.slane %v10074_v28, 4  ;;  %v10141_v28 = vrot.slane %v10139_v33, 5 }
 0x5fb   : > { %13199 = vmatmul.mubr.msk.bf16.vlgmr.msra.gmra.mrb[0].mxu1 %vm1437_vm13, %v12198_v47  ;;  %v10050_v47 = vor.u32 %v10049_v30, %v10045_v39  ;;  %v10133_v30 = vshll.u32 %v9892_v8, 16  ;;  %v10112_v39 = vor.u32 %v10111_v11, %v10108_v13  ;;  %v10103_v8 = vrot.slane %v10101_v37, 5  ;;  %v9901_v11 = vld [vmem:[#allocation2 + $0xa8] sm:$0xf] }
 0x5fc   : > { %13231 = vmatpush3.bf16.msra.mxu1 %v10866_v44  ;;  %13202 = vmatprep.mubr.msk.bf16.mxu1 %vm1437_vm13, %v12199_v20  ;;  %v10097_v44 = vrot.slane %v10095_v43, 4  ;;  %v10132_v43 = vrot.slane %v10130_v60, 4  ;;  %v10080_v18 = vsel %vm14158_vm12, %v10075_v21, %v10079_v22  ;;  %v10181_v22 = vshll.u32 %v9898_v34, 16 }
 0x5fd   : > { %v10051_v20 = vrot.slane %v10050_v47, 4  ;;  %v10135_v47 = vrot.slane %v10133_v30, 5  ;;  %v12203_v2 = vcombine.low %v10070_v59, %v10080_v18  ;;  %v10113_v61 = vrot.slane %v10112_v39, 4 }
 0x5fe   : > { %v10205_v41 = vshll.u32 %v9901_v11, 16  ;;  %v10183_v33 = vrot.slane %v10181_v22, 5  ;;  %v19213_v22 = vld [vmem:[#allocation60_spill] sm:$0xff] }
 0x5ff   : > { %v10056_v53 = vsel %vm14158_vm12, %v10051_v20, %v10055_v40  ;;  %v10089_v40 = vrot.slane %v10088_v5, 4  ;;  %v10136_v19 = vor.u32 %v10135_v47, %v10132_v43  ;;  %v10156_v20 = vrot.slane %v10154_v52, 4  ;;  %v19211_v47 = vld [vmem:[#allocation57_spill] sm:$0xff] }
 0x600   : > { %v12202_v4 = vcombine.low %v10046_v62, %v10056_v53  ;;  %v10123_v62 = vrot.slane %v10122_v10, 4  ;;  %v19209_v53 = vld [vmem:[#allocation52_spill] sm:$0xff]  ;;  %v10118_v59 = vsel %vm14158_vm12, %v10113_v61, %v10117_v48  ;;  %v10180_v43 = vrot.slane %v10178_v0, 4 }
 0x601   : > { %v10094_v60 = vsel %vm14158_vm12, %v10089_v40, %v18120_v57  ;;  %v10149_v5 = vshll.u32 %v19209_v53, 16  ;;  %v10137_v37 = vrot.slane %v10136_v19, 4  ;;  %v10191_v52 = vshrl.u32 %v19211_v47, 16 }
 0x602   : > { %v10128_v21 = vsel %vm14158_vm12, %v10123_v62, %v10127_v15  ;;  %v10207_v10 = vrot.slane %v10205_v41, 5  ;;  %v10175_v15 = vrot.slane %v10173_v63, 5  ;;  %v10184_v19 = vor.u32 %v10183_v33, %v10180_v43 }
 0x603   : > { %13203 = vmatmul.mubr.msk.bf16.gmra.mrb[4].mxu1 %vm1437_vm13, %v12200_v9  ;;  %v10098_v9 = vor.u32 %v10097_v44, %v18120_v57  ;;  %v10145_v44 = vrot.slane %v10143_v42, 4  ;;  %v10187_v42 = vshll.u32 %v19211_v47, 16  ;;  %v10151_v18 = vrot.slane %v10149_v5, 5 }
 0x604   : > { %13206 = vmatprep.mubr.msk.bf16.mxu1 %vm1437_vm13, %v12201_v7  ;;  %v10157_v7 = vshll.u32 %v9895_v56, 16  ;;  %v10169_v56 = vrot.slane %v10167_v55, 4  ;;  %v9904_v55 = vld [vmem:[#allocation2 + $0xb4] sm:$0xf]  ;;  %v10142_v34 = vsel %vm14158_vm12, %v10137_v37, %v10141_v28  ;;  %v10185_v37 = vrot.slane %v10184_v19, 4 }
 0x605   : > { %v10099_v51 = vrot.slane %v10098_v9, 4  ;;  %v10202_v9 = vshrl.u32 %v9901_v11, 16  ;;  %v10146_v57 = vor.u32 %v10145_v44, %v10141_v28  ;;  %v10189_v44 = vrot.slane %v10187_v42, 5 }
 0x606   : > { %v10159_v13 = vrot.slane %v10157_v7, 5  ;;  %v10170_v48 = vor.u32 %v10169_v56, %v10165_v1  ;;  %v10226_v62 = vshrl.u32 %v9904_v55, 16  ;;  %v10229_v0 = vshll.u32 %v9904_v55, 16 }
 0x607   : > { %v10104_v30 = vsel %vm14158_vm12, %v10099_v51, %v10103_v8  ;;  %v10204_v40 = vrot.slane %v10202_v9, 4  ;;  %v10147_v51 = vrot.slane %v10146_v57, 4  ;;  %v10235_v33 = vshll.u32 %v17777_v54, 16 }
 0x608   : > { %v10160_v39 = vor.u32 %v10159_v13, %v10156_v20  ;;  %v12204_v7 = vcombine.low %v10094_v60, %v10104_v30  ;;  %v10193_v20 = vrot.slane %v10191_v52, 4  ;;  %v9907_v13 = vld [vmem:[#allocation2 + $0xc0] sm:$0xf]  ;;  %v10171_v60 = vrot.slane %v10170_v48, 4 }
 0x609   : > { %v10152_v11 = vsel %vm14158_vm12, %v10147_v51, %v10151_v18  ;;  %v10197_v30 = vshll.u32 %v19213_v22, 16  ;;  %v10208_v53 = vor.u32 %v10207_v10, %v10204_v40  ;;  %v10253_v9 = vshll.u32 %v9907_v13, 16  ;;  %v9910_v10 = vld [vmem:[#allocation2 + $0xcc] sm:$0xf] }
 0x60a   : > { %v10161_v61 = vrot.slane %v10160_v39, 4  ;;  %v12206_v56 = vcombine.low %v10142_v34, %v10152_v11  ;;  %v10176_v41 = vsel %vm14158_vm12, %v10171_v60, %v10175_v15  ;;  %v10194_v57 = vor.u32 %v10193_v20, %v10189_v44  ;;  %v19214_v39 = vld [vmem:[#allocation64_spill] sm:$0xff] }
 0x60b   : > { %13207 = vmatmul.mubr.msk.bf16.gmra.mrb[8].mxu1 %vm1437_vm13, %v12202_v4  ;;  %v12205_v4 = vcombine.low %v10118_v59, %v10128_v21  ;;  %v10250_v21 = vshrl.u32 %v9907_v13, 16  ;;  %v10221_v24 = vshll.u32 %v19214_v39, 16  ;;  %v10228_v63 = vrot.slane %v10226_v62, 4  ;;  %v13916_v62 = vld [vmem:[#allocation2 + $0xbc] sm:$0x1] }
 0x60c   : > { %13210 = vmatprep.mubr.msk.bf16.mxu1 %vm1437_vm13, %v12203_v2  ;;  %v19212_v2 = vld [vmem:[#allocation62_spill] sm:$0xff]  ;;  %v10166_v59 = vsel %vm14158_vm12, %v10161_v61, %v10165_v1  ;;  %v10231_v43 = vrot.slane %v10229_v0, 5  ;;  %v10239_v47 = vshrl.u32 %v17777_v54, 16  ;;  %v10199_v52 = vrot.slane %v10197_v30, 5 }
 0x60d   : > { %v10211_v8 = vshll.u32 %v19212_v2, 16  ;;  %v10215_v17 = vshrl.u32 %v19212_v2, 16  ;;  %v12207_v42 = vcombine.low %v10166_v59, %v10176_v41  ;;  %v10252_v1 = vrot.slane %v10250_v21, 4 }
 0x60e   : > { %v10255_v18 = vrot.slane %v10253_v9, 5  ;;  %v10259_v48 = vshll.u32 %v17801_v6, 16  ;;  %v10263_v40 = vshrl.u32 %v17801_v6, 16  ;;  %v10190_v2 = vsel %vm14158_vm12, %v10185_v37, %v10189_v44 }
 0x60f   : > { %v10213_v5 = vrot.slane %v10211_v8, 5  ;;  %v10217_v28 = vrot.slane %v10215_v17, 4  ;;  %v10223_v8 = vrot.slane %v10221_v24, 5  ;;  %v10195_v54 = vrot.slane %v10194_v57, 4 }
 0x610   : > { %v10232_v17 = vor.u32 %v10231_v43, %v10228_v63  ;;  %v10237_v55 = vrot.slane %v10235_v33, 5  ;;  %v10241_v34 = vrot.slane %v10239_v47, 4  ;;  %v10274_v15 = vshrl.u32 %v9910_v10, 16 }
 0x611   : > { %v10277_v19 = vshll.u32 %v9910_v10, 16  ;;  %v10200_v6 = vsel %vm14158_vm12, %v10195_v54, %v10199_v52  ;;  %v10256_v20 = vor.u32 %v10255_v18, %v10252_v1  ;;  %v10261_v13 = vrot.slane %v10259_v48, 5  ;;  %v10591_v10 = vld [vmem:[#allocation2 + $0x18] sm:$0xe] }
 0x612   : > { %v10265_v11 = vrot.slane %v10263_v40, 4  ;;  %v12208_v60 = vcombine.low %v10190_v2, %v10200_v6  ;;  %v10245_v0 = vshll.u32 %v13916_v62, 16  ;;  %v10233_v30 = vrot.slane %v10232_v17, 4  ;;  %v19216_v62 = vld [vmem:[#allocation44_spill] sm:$0xff] }
 0x613   : > { %13211 = vmatmul.mubr.msk.bf16.gmra.mrb[12].mxu1 %vm1437_vm13, %v12204_v7  ;;  %v10209_v7 = vrot.slane %v10208_v53, 4  ;;  %v10242_v53 = vor.u32 %v10241_v34, %v10237_v55  ;;  %v10283_v59 = vshll.u32 %v17815_v23, 16  ;;  %v10287_v21 = vshrl.u32 %v17815_v23, 16 }
 0x614   : > { %13214 = vmatprep.mubr.msk.bf16.mxu1 %vm1437_vm13, %v12205_v4  ;;  %v10218_v4 = vor.u32 %v10217_v28, %v10213_v5  ;;  %v10276_v28 = vrot.slane %v10274_v15, 4  ;;  %v10257_v9 = vrot.slane %v10256_v20, 4  ;;  %v10266_v41 = vor.u32 %v10265_v11, %v10261_v13 }
 0x615   : > { %v10214_v51 = vsel %vm14158_vm12, %v10209_v7, %v10213_v5  ;;  %v10269_v5 = vshll.u32 %v17803_v29, 16  ;;  %v10247_v37 = vrot.slane %v10245_v0, 5  ;;  %v10238_v57 = vsel %vm14158_vm12, %v10233_v30, %v10237_v55 }
 0x616   : > { %v10219_v61 = vrot.slane %v10218_v4, 4  ;;  %v10243_v24 = vrot.slane %v10242_v53, 4  ;;  %v10285_v29 = vrot.slane %v10283_v59, 5  ;;  %v10289_v43 = vrot.slane %v10287_v21, 4  ;;  %v19221_v53 = vld [vmem:[#allocation50_spill] sm:$0xff] }
 0x617   : > { %v10271_v39 = vrot.slane %v10269_v5, 5  ;;  %v10262_v33 = vsel %vm14158_vm12, %v10257_v9, %v10261_v13  ;;  %v10267_v47 = vrot.slane %v10266_v41, 4  ;;  %v10657_v1 = vrot.slane %v18053_v50, 5  ;;  %v19222_v5 = vld [vmem:[#allocation51_spill] sm:$0xff]  ;;  %v19227_v21 = vld [vmem:[#allocation54_spill] sm:$0xff] }
 0x618   : > { %v10224_v44 = vsel %vm14158_vm12, %v10219_v61, %v10223_v8  ;;  %v10248_v23 = vsel %vm14158_vm12, %v10243_v24, %v10247_v37  ;;  %v10290_v40 = vor.u32 %v10289_v43, %v10285_v29  ;;  %v10660_v2 = vrot.slane %v18060_v49, 5  ;;  %v19228_v9 = vld [vmem:[#allocation58_spill] sm:$0xff]  ;;  %v19230_v37 = vld [vmem:[#allocation59_spill] sm:$0xff]  ;;  %v19233_v24 = vld [vmem:[#allocation61_spill] sm:$0xff] }
 0x619   : > { %v12209_v22 = vcombine.low %v10214_v51, %v10224_v44  ;;  %v12210_v7 = vcombine.low %v10238_v57, %v10248_v23  ;;  %v10272_v4 = vsel %vm14158_vm12, %v10267_v47, %v10271_v39  ;;  %v12229_v54 = vrot.slane %v10591_v10, 9  ;;  %v19215_v44 = vld [vmem:[#allocation43_spill] sm:$0xff]  ;;  %v19236_v43 = vld [vmem:[#allocation66_spill] sm:$0xff] }
 0x61a   : > { %v12211_v18 = vcombine.low %v10262_v33, %v10272_v4  ;;  %v10659_v17 = vrot.slane %v10657_v1, 4  ;;  %v10291_v34 = vrot.slane %v10290_v40, 4  ;;  %v10664_v61 = vrot.slane %v18057_v58, 5  ;;  %v19231_v57 = vld [vmem:[#allocation63_spill] sm:$0xff]  ;;  %v19237_v33 = vld [vmem:[#allocation68_spill] sm:$0xff] }
 0x61b   : > { %13215 = vmatmul.mubr.msk.bf16.gmra.mrb[16].mxu1 %vm1437_vm13, %v12206_v56  ;;  %v10279_v56 = vrot.slane %v10277_v19, 5  ;;  %v10658_v49 = vsel %vm14726_vm1, %v12229_v54, %v10657_v1  ;;  %v10592_v19 = vld [vmem:[#allocation2 + $0x24] sm:$0xe]  ;;  %v10667_v20 = vrot.slane %v18065_v31, 5  ;;  %v19217_v0 = vcombine.low %v19215_v44, %v19216_v62  ;;  %v19218_v31 = vld [vmem:[#allocation47_spill] sm:$0xff] }
 0x61c   : > { %13218 = vmatprep.mubr.msk.bf16.mxu1 %vm1437_vm13, %v12207_v42  ;;  %v13917_v42 = vld [vmem:[#allocation2 + $0xd4] sm:$0x1]  ;;  %v10661_v50 = vsel %vm14726_vm1, %v10659_v17, %v10660_v2  ;;  %v12230_v13 = vrot.slane %v10592_v19, 9  ;;  %v10666_v11 = vrot.slane %v10664_v61, 4  ;;  %v19229_v41 = vcombine.low %v19227_v21, %v19228_v9  ;;  %v19239_v23 = vld [vmem:[#allocation67_spill] sm:$0xff] }
 0x61d   : > { %v10280_v63 = vor.u32 %v10279_v56, %v10276_v28  ;;  %v10293_v52 = vshll.u32 %v13917_v42, 16  ;;  %v12246_v6 = vcombine.low %v10658_v49, %v10661_v50  ;;  %v19223_v28 = vcombine.low %v19221_v53, %v19222_v5  ;;  %v19225_v56 = vld [vmem:[#allocation55_spill] sm:$0xff]  ;;  %v19240_v42 = vld [vmem:[#allocation69_spill] sm:$0xff] }
 0x61e   : > { %v10668_v25 = vsel %vm14726_vm1, %v10666_v11, %v10667_v20  ;;  %v10665_v58 = vsel %vm14726_vm1, %v12230_v13, %v10664_v61  ;;  %v19226_v59 = vcombine.low %v19224_v38, %v19225_v56  ;;  %v19232_v39 = vcombine.low %v19230_v37, %v19231_v57  ;;  %v19243_v4 = vld [vmem:[#allocation71_spill] sm:$0xff] }
 0x61f   : > { %v10281_v48 = vrot.slane %v10280_v63, 4  ;;  %v10295_v8 = vrot.slane %v10293_v52, 5  ;;  %v19234_v63 = vld [vmem:[#allocation65_spill] sm:$0xff]  ;;  %v19238_v47 = vcombine.low %v19236_v43, %v19237_v33  ;;  %v19241_v52 = vcombine.low %v19239_v23, %v19240_v42 }
 0x621   : > { %v10286_v55 = vsel %vm14158_vm12, %v10281_v48, %v10285_v29  ;;  %v10296_v51 = vsel %vm14158_vm12, %v10291_v34, %v10295_v8  ;;  %v19235_v29 = vcombine.low %v19233_v24, %v19234_v63 }
 0x622   : > { %v12212_v15 = vcombine.low %v10286_v55, %v10296_v51 }
 0x623   : > { %13219 = vmatmul.mubr.msk.bf16.gmra.mrb[20].mxu1 %vm1437_vm13, %v12208_v60  ;;  %v12247_v60 = vcombine.low %v10665_v58, %v10668_v25 }
 0x624   : > { %13222 = vmatprep.mubr.msk.bf16.mxu1 %vm1437_vm13, %v12209_v22  ;;  %v19219_v22 = vld [vmem:[#allocation49_spill] sm:$0xff] }
 0x625   : > { %v19220_v30 = vcombine.low %v19218_v31, %v19219_v22 }
 0x62b   : > { %13223 = vmatmul.mubr.msk.bf16.gmra.mrb[24].mxu1 %vm1437_vm13, %v12210_v7  ;;  %v19242_v7 = vld [vmem:[#allocation70_spill] sm:$0xff] }
 0x62c   : > { %13226 = vmatprep.mubr.msk.bf16.mxu1 %vm1437_vm13, %v12211_v18  ;;  %v19244_v1 = vcombine.low %v19242_v7, %v19243_v4  ;;  %v19245_v18 = vcombine.low %v17852_v16, %v17860_v36 }
 0x633   : > { %13227 = vmatmul.mubr.msk.bf16.gmra.mrb[28].mxu1 %vm1437_vm13, %v12212_v15 }
 0x634   : > { %13232 = vmatprep.mubr.msk.bf16.mxu1 %vm1437_vm13, %v12246_v6 }
 0x63b   : > { %13233 = vmatmul.mubr.msk.bf16.vlgmr.msra.gmra.mrb[0].mxu1 %vm1437_vm13, %v12247_v60 }
 0x63c   : > { %13236 = vmatprep.mubr.msk.bf16.mxu1 %vm1437_vm13, %v19217_v0 }
 0x643   : > { %13237 = vmatmul.mubr.msk.bf16.gmra.mrb[4].mxu1 %vm1437_vm13, %v19220_v30 }
 0x644   : > { %13240 = vmatprep.mubr.msk.bf16.mxu1 %vm1437_vm13, %v19223_v28 }
 0x64b   : > { %13241 = vmatmul.mubr.msk.bf16.gmra.mrb[8].mxu1 %vm1437_vm13, %v19226_v59 }
 0x64c   : > { %13244 = vmatprep.mubr.msk.bf16.mxu1 %vm1437_vm13, %v19229_v41 }
 0x653   : > { %13245 = vmatmul.mubr.msk.bf16.gmra.mrb[12].mxu1 %vm1437_vm13, %v19232_v39 }
 0x654   : > { %13248 = vmatprep.mubr.msk.bf16.mxu1 %vm1437_vm13, %v19235_v29 }
 0x65b   : > { %13249 = vmatmul.mubr.msk.bf16.gmra.mrb[16].mxu1 %vm1437_vm13, %v19238_v47 }
 0x65c   : > { %13252 = vmatprep.mubr.msk.bf16.mxu1 %vm1437_vm13, %v19241_v52 }
 0x663   : > { %13253 = vmatmul.mubr.msk.bf16.gmra.mrb[20].mxu1 %vm1437_vm13, %v19244_v1 }
 0x664   : > { %13256 = vmatprep.mubr.msk.bf16.mxu1 %vm1437_vm13, %v12258_v32 }
 0x66b   : > { %13257 = vmatmul.mubr.msk.bf16.gmra.mrb[24].mxu1 %vm1437_vm13, %v12259_v3 }
 0x66c   : > { %13260 = vmatprep.mubr.msk.bf16.mxu1 %vm1437_vm13, %v19245_v18 }
 0x673   : > { %13261 = vmatmul.mubr.msk.bf16.gmra.mrb[28].mxu1 %vm1437_vm13, %v12261_v45 }
 0x70e   : > { %v18272_v48 = vpop.f32.mrb[0].mxu1 }
 0x70f   : > { %v18274_v14 = vpop.f32.mrb[1].mxu1  ;;  %v11133_v32 = vmul.f32 %v18272_v48, %v18272_v48  ;;  %v11064_v27 = vsel %vm1437_vm13, %v18272_v48, 0.0 }
 0x710   : > { %v11131_v26 = vmul.f32 %v18274_v14, %v18274_v14  ;;  %v18278_v35 = vpop.f32.mrb[2].mxu1  ;;  %v11061_v16 = vsel %vm1437_vm13, %v18274_v14, 0.0 }
 0x711   : > { %v18280_v12 = vpop.f32.mrb[3].mxu1  ;;  %v11134_v40 = vmul.f32 %v18278_v35, %v18278_v35  ;;  %v11166_v54 = vsel %vm1437_vm13, %v11133_v32, 0.0  ;;  %v11066_v17 = vsel %vm1437_vm13, %v18278_v35, 0.0 }
 0x712   : > { %v11062_v3 = vsel %vm1437_vm13, %v18280_v12, 0.0  ;;  %v11132_v36 = vmul.f32 %v18280_v12, %v18280_v12  ;;  %v11163_v45 = vsel %vm1437_vm13, %v11131_v26, 0.0 }
 0x713   : > { %v11063_v46 = vadd.f32 %v11062_v3, %v11061_v16  ;;  %v11168_v61 = vsel %vm1437_vm13, %v11134_v40, 0.0 }
 0x714   : > { %v11164_v10 = vsel %vm1437_vm13, %v11132_v36, 0.0 }
 0x715   : > { %v11065_v2 = vadd.f32 %v11064_v27, %v11063_v46  ;;  %v11165_v8 = vadd.f32 %v11164_v10, %v11163_v45 }
 0x716   : > { %v18299_v55 = vpop.f32.mrb[4].mxu1 }
 0x717   : > { %v11167_v34 = vadd.f32 %v11166_v54, %v11165_v8  ;;  %v18301_v50 = vpop.f32.mrb[5].mxu1  ;;  %v11067_v51 = vadd.f32 %v11066_v17, %v11065_v2  ;;  %v11137_v11 = vmul.f32 %v18299_v55, %v18299_v55  ;;  %v11072_v0 = vsel %vm1437_vm13, %v18299_v55, 0.0 }
 0x718   : > { %v11068_v15 = vsel %vm1437_vm13, %v18301_v50, 0.0  ;;  %v11135_v49 = vmul.f32 %v18301_v50, %v18301_v50  ;;  %v18308_v19 = vpop.f32.mrb[6].mxu1 }
 0x719   : > { %v11069_v6 = vadd.f32 %v11068_v15, %v11067_v51  ;;  %v11169_v20 = vadd.f32 %v11168_v61, %v11167_v34  ;;  %v18310_v13 = vpop.f32.mrb[7].mxu1  ;;  %v11138_v31 = vmul.f32 %v18308_v19, %v18308_v19  ;;  %v11174_v5 = vsel %vm1437_vm13, %v11137_v11, 0.0 }
 0x71a   : > { %v11170_v25 = vsel %vm1437_vm13, %v11135_v49, 0.0  ;;  %v11070_v58 = vsel %vm1437_vm13, %v18310_v13, 0.0  ;;  %v11136_v60 = vmul.f32 %v18310_v13, %v18310_v13  ;;  %v11074_v28 = vsel %vm1437_vm13, %v18308_v19, 0.0 }
 0x71b   : > { %v11171_v44 = vadd.f32 %v11170_v25, %v11169_v20  ;;  %v11071_v62 = vadd.f32 %v11070_v58, %v11069_v6  ;;  %v11176_v9 = vsel %vm1437_vm13, %v11138_v31, 0.0 }
 0x71c   : > { %v11172_v22 = vsel %vm1437_vm13, %v11136_v60, 0.0 }
 0x71d   : > { %v11073_v30 = vadd.f32 %v11072_v0, %v11071_v62  ;;  %v11173_v53 = vadd.f32 %v11172_v22, %v11171_v44 }
 0x71e   : > { %v18327_v38 = vpop.f32.mrb[8].mxu1 }
 0x71f   : > { %v11175_v56 = vadd.f32 %v11174_v5, %v11173_v53  ;;  %v18329_v59 = vpop.f32.mrb[9].mxu1  ;;  %v11075_v21 = vadd.f32 %v11074_v28, %v11073_v30  ;;  %v11141_v29 = vmul.f32 %v18327_v38, %v18327_v38  ;;  %v11080_v52 = vsel %vm1437_vm13, %v18327_v38, 0.0 }
 0x720   : > { %v11076_v41 = vsel %vm1437_vm13, %v18329_v59, 0.0  ;;  %v11139_v37 = vmul.f32 %v18329_v59, %v18329_v59  ;;  %v18336_v57 = vpop.f32.mrb[10].mxu1 }
 0x721   : > { %v11077_v39 = vadd.f32 %v11076_v41, %v11075_v21  ;;  %v11177_v24 = vadd.f32 %v11176_v9, %v11175_v56  ;;  %v18338_v63 = vpop.f32.mrb[11].mxu1  ;;  %v11142_v7 = vmul.f32 %v18336_v57, %v18336_v57  ;;  %v11182_v26 = vsel %vm1437_vm13, %v11141_v29, 0.0 }
 0x722   : > { %v11178_v43 = vsel %vm1437_vm13, %v11139_v37, 0.0  ;;  %v11078_v33 = vsel %vm1437_vm13, %v18338_v63, 0.0  ;;  %v11140_v47 = vmul.f32 %v18338_v63, %v18338_v63  ;;  %v11082_v32 = vsel %vm1437_vm13, %v18336_v57, 0.0 }
 0x723   : > { %v11179_v23 = vadd.f32 %v11178_v43, %v11177_v24  ;;  %v11079_v42 = vadd.f32 %v11078_v33, %v11077_v39  ;;  %v11184_v27 = vsel %vm1437_vm13, %v11142_v7, 0.0 }
 0x724   : > { %v11180_v4 = vsel %vm1437_vm13, %v11140_v47, 0.0 }
 0x725   : > { %v11081_v1 = vadd.f32 %v11080_v52, %v11079_v42  ;;  %v11181_v18 = vadd.f32 %v11180_v4, %v11179_v23 }
 0x726   : > { %v18355_v16 = vpop.f32.mrb[12].mxu1 }
 0x727   : > { %v11183_v3 = vadd.f32 %v11182_v26, %v11181_v18  ;;  %v18357_v36 = vpop.f32.mrb[13].mxu1  ;;  %v11083_v46 = vadd.f32 %v11082_v32, %v11081_v1  ;;  %v11145_v17 = vmul.f32 %v18355_v16, %v18355_v16  ;;  %v11088_v6 = vsel %vm1437_vm13, %v18355_v16, 0.0 }
 0x728   : > { %v11084_v45 = vsel %vm1437_vm13, %v18357_v36, 0.0  ;;  %v11143_v40 = vmul.f32 %v18357_v36, %v18357_v36  ;;  %v18364_v10 = vpop.f32.mrb[14].mxu1 }
 0x729   : > { %v11085_v2 = vadd.f32 %v11084_v45, %v11083_v46  ;;  %v11185_v8 = vadd.f32 %v11184_v27, %v11183_v3  ;;  %v18366_v54 = vpop.f32.mrb[15].mxu1  ;;  %v11146_v20 = vmul.f32 %v18364_v10, %v18364_v10  ;;  %v11190_v60 = vsel %vm1437_vm13, %v11145_v17, 0.0 }
 0x72a   : > { %v11186_v34 = vsel %vm1437_vm13, %v11143_v40, 0.0  ;;  %v11086_v51 = vsel %vm1437_vm13, %v18366_v54, 0.0  ;;  %v11144_v61 = vmul.f32 %v18366_v54, %v18366_v54  ;;  %v11090_v44 = vsel %vm1437_vm13, %v18364_v10, 0.0 }
 0x72b   : > { %v11187_v15 = vadd.f32 %v11186_v34, %v11185_v8  ;;  %v11087_v49 = vadd.f32 %v11086_v51, %v11085_v2  ;;  %v11192_v30 = vsel %vm1437_vm13, %v11146_v20, 0.0 }
 0x72c   : > { %v11188_v11 = vsel %vm1437_vm13, %v11144_v61, 0.0 }
 0x72d   : > { %v11089_v25 = vadd.f32 %v11088_v6, %v11087_v49  ;;  %v11189_v58 = vadd.f32 %v11188_v11, %v11187_v15 }
 0x72e   : > { %v18383_v62 = vpop.f32.mrb[16].mxu1 }
 0x72f   : > { %v11191_v0 = vadd.f32 %v11190_v60, %v11189_v58  ;;  %v18385_v31 = vpop.f32.mrb[17].mxu1  ;;  %v11091_v22 = vadd.f32 %v11090_v44, %v11089_v25  ;;  %v11149_v41 = vmul.f32 %v18383_v62, %v18383_v62  ;;  %v11096_v33 = vsel %vm1437_vm13, %v18383_v62, 0.0 }
 0x730   : > { %v11092_v53 = vsel %vm1437_vm13, %v18385_v31, 0.0  ;;  %v11147_v5 = vmul.f32 %v18385_v31, %v18385_v31  ;;  %v18392_v28 = vpop.f32.mrb[18].mxu1 }
 0x731   : > { %v11093_v56 = vadd.f32 %v11092_v53, %v11091_v22  ;;  %v11193_v21 = vadd.f32 %v11192_v30, %v11191_v0  ;;  %v18394_v9 = vpop.f32.mrb[19].mxu1  ;;  %v11150_v47 = vmul.f32 %v18392_v28, %v18392_v28  ;;  %v11198_v7 = vsel %vm1437_vm13, %v11149_v41, 0.0 }
 0x732   : > { %v11194_v37 = vsel %vm1437_vm13, %v11147_v5, 0.0  ;;  %v11094_v39 = vsel %vm1437_vm13, %v18394_v9, 0.0  ;;  %v11148_v24 = vmul.f32 %v18394_v9, %v18394_v9  ;;  %v11098_v4 = vsel %vm1437_vm13, %v18392_v28, 0.0 }
 0x733   : > { %v11195_v29 = vadd.f32 %v11194_v37, %v11193_v21  ;;  %v11095_v43 = vadd.f32 %v11094_v39, %v11093_v56  ;;  %v11200_v3 = vsel %vm1437_vm13, %v11150_v47, 0.0 }
 0x734   : > { %v11196_v23 = vsel %vm1437_vm13, %v11148_v24, 0.0 }
 0x735   : > { %v11097_v42 = vadd.f32 %v11096_v33, %v11095_v43  ;;  %v11197_v52 = vadd.f32 %v11196_v23, %v11195_v29 }
 0x736   : > { %v18411_v1 = vpop.f32.mrb[20].mxu1 }
 0x737   : > { %v11199_v18 = vadd.f32 %v11198_v7, %v11197_v52  ;;  %v18413_v26 = vpop.f32.mrb[21].mxu1  ;;  %v11099_v32 = vadd.f32 %v11098_v4, %v11097_v42  ;;  %v11153_v17 = vmul.f32 %v18411_v1, %v18411_v1  ;;  %v11104_v6 = vsel %vm1437_vm13, %v18411_v1, 0.0 }
 0x738   : > { %v11100_v46 = vsel %vm1437_vm13, %v18413_v26, 0.0  ;;  %v11151_v27 = vmul.f32 %v18413_v26, %v18413_v26  ;;  %v18420_v45 = vpop.f32.mrb[22].mxu1 }
 0x739   : > { %v11101_v40 = vadd.f32 %v11100_v46, %v11099_v32  ;;  %v11201_v2 = vadd.f32 %v11200_v3, %v11199_v18  ;;  %v18422_v8 = vpop.f32.mrb[23].mxu1  ;;  %v11154_v20 = vmul.f32 %v18420_v45, %v18420_v45  ;;  %v11206_v60 = vsel %vm1437_vm13, %v11153_v17, 0.0 }
 0x73a   : > { %v11202_v34 = vsel %vm1437_vm13, %v11151_v27, 0.0  ;;  %v11102_v51 = vsel %vm1437_vm13, %v18422_v8, 0.0  ;;  %v11152_v61 = vmul.f32 %v18422_v8, %v18422_v8  ;;  %v11106_v44 = vsel %vm1437_vm13, %v18420_v45, 0.0 }
 0x73b   : > { %v11203_v15 = vadd.f32 %v11202_v34, %v11201_v2  ;;  %v11103_v49 = vadd.f32 %v11102_v51, %v11101_v40  ;;  %v11208_v5 = vsel %vm1437_vm13, %v11154_v20, 0.0 }
 0x73c   : > { %v11204_v11 = vsel %vm1437_vm13, %v11152_v61, 0.0 }
 0x73d   : > { %v11105_v25 = vadd.f32 %v11104_v6, %v11103_v49  ;;  %v11205_v58 = vadd.f32 %v11204_v11, %v11203_v15 }
 0x73e   : > { %v18439_v0 = vpop.f32.mrb[24].mxu1 }
 0x73f   : > { %v11207_v22 = vadd.f32 %v11206_v60, %v11205_v58  ;;  %v18441_v30 = vpop.f32.mrb[25].mxu1  ;;  %v11107_v53 = vadd.f32 %v11106_v44, %v11105_v25  ;;  %v11157_v29 = vmul.f32 %v18439_v0, %v18439_v0  ;;  %v11112_v52 = vsel %vm1437_vm13, %v18439_v0, 0.0 }
 0x740   : > { %v11108_v56 = vsel %vm1437_vm13, %v18441_v30, 0.0  ;;  %v11155_v21 = vmul.f32 %v18441_v30, %v18441_v30  ;;  %v18448_v41 = vpop.f32.mrb[26].mxu1 }
 0x741   : > { %v11109_v37 = vadd.f32 %v11108_v56, %v11107_v53  ;;  %v11209_v39 = vadd.f32 %v11208_v5, %v11207_v22  ;;  %v18450_v24 = vpop.f32.mrb[27].mxu1  ;;  %v11158_v7 = vmul.f32 %v18448_v41, %v18448_v41  ;;  %v11214_v3 = vsel %vm1437_vm13, %v11157_v29, 0.0 }
 0x742   : > { %v11210_v43 = vsel %vm1437_vm13, %v11155_v21, 0.0  ;;  %v11110_v33 = vsel %vm1437_vm13, %v18450_v24, 0.0  ;;  %v11156_v47 = vmul.f32 %v18450_v24, %v18450_v24  ;;  %v11114_v46 = vsel %vm1437_vm13, %v18448_v41, 0.0 }
 0x743   : > { %v11211_v23 = vadd.f32 %v11210_v43, %v11209_v39  ;;  %v11111_v42 = vadd.f32 %v11110_v33, %v11109_v37  ;;  %v11216_v34 = vsel %vm1437_vm13, %v11158_v7, 0.0 }
 0x744   : > { %v11212_v4 = vsel %vm1437_vm13, %v11156_v47, 0.0 }
 0x745   : > { %v11113_v18 = vadd.f32 %v11112_v52, %v11111_v42  ;;  %v11213_v32 = vadd.f32 %v11212_v4, %v11211_v23 }
 0x746   : > { %v18467_v27 = vpop.f32.mrb[28].mxu1 }
 0x747   : > { %v11215_v40 = vadd.f32 %v11214_v3, %v11213_v32  ;;  %v18469_v2 = vpop.f32.mrb[29].mxu1  ;;  %v11115_v17 = vadd.f32 %v11114_v46, %v11113_v18  ;;  %v11161_v11 = vmul.f32 %v18467_v27, %v18467_v27  ;;  %v11120_v53 = vsel %vm1437_vm13, %v18467_v27, 0.0 }
 0x748   : > { %v11116_v51 = vsel %vm1437_vm13, %v18469_v2, 0.0  ;;  %v11159_v61 = vmul.f32 %v18469_v2, %v18469_v2  ;;  %v18476_v15 = vpop.f32.mrb[30].mxu1 }
 0x749   : > { %v11117_v49 = vadd.f32 %v11116_v51, %v11115_v17  ;;  %v11217_v6 = vadd.f32 %v11216_v34, %v11215_v40  ;;  %v18478_v20 = vpop.f32.mrb[31].mxu1  ;;  %v11162_v5 = vmul.f32 %v18476_v15, %v18476_v15  ;;  %v11222_v39 = vsel %vm1437_vm13, %v11161_v11, 0.0 }
 0x74a   : > { %v11218_v25 = vsel %vm1437_vm13, %v11159_v61, 0.0  ;;  %v11118_v58 = vsel %vm1437_vm13, %v18478_v20, 0.0  ;;  %v11160_v60 = vmul.f32 %v18478_v20, %v18478_v20  ;;  %v11122_v29 = vsel %vm1437_vm13, %v18476_v15, 0.0 }
 0x74b   : > { %v11219_v44 = vadd.f32 %v11218_v25, %v11217_v6  ;;  %v11119_v22 = vadd.f32 %v11118_v58, %v11117_v49  ;;  %v11224_v47 = vsel %vm1437_vm13, %v11162_v5, 0.0 }
 0x74c   : > { %v11220_v56 = vsel %vm1437_vm13, %v11160_v60, 0.0 }
 0x74d   : > { %v11121_v21 = vadd.f32 %v11120_v53, %v11119_v22  ;;  %v11221_v37 = vadd.f32 %v11220_v56, %v11219_v44 }
 0x74f   : > { %v11123_v43 = vadd.f32 %v11122_v29, %v11121_v21  ;;  %v11223_v33 = vadd.f32 %v11222_v39, %v11221_v37 }
 0x751   : > { %v11124_v23 = vrot.slane %v11123_v43, 4  ;;  %v11225_v42 = vadd.f32 %v11224_v47, %v11223_v33 }
 0x753   : > { %v11125_v52 = vadd.f32 %v11124_v23, %v11123_v43  ;;  %v11226_v7 = vrot.slane %v11225_v42, 4 }
 0x755   : > { %v11126_v4 = vrot.slane %v11125_v52, 2  ;;  %v11227_v18 = vadd.f32 %v11226_v7, %v11225_v42 }
 0x757   : > { %v11127_v32 = vadd.f32 %v11126_v4, %v11125_v52  ;;  %v11228_v3 = vrot.slane %v11227_v18, 2  ;;  %v11302_v4 = vld [vmem:[%s13972_s21] sm:$0xff] }
 0x759   : > { %v11128_v46 = vrot.slane %v11127_v32, 1  ;;  %v11229_v40 = vadd.f32 %v11228_v3, %v11227_v18  ;;  %v11303_v18 = vld [vmem:[%s13972_s21 + $0x8] sm:$0xff]  ;;  %v11305_v3 = vld [vmem:[%s13972_s21 + $0x18] sm:$0xff] }
 0x75b   : > { %v11129_v17 = vadd.f32 %v11128_v46, %v11127_v32  ;;  %v11230_v34 = vrot.slane %v11229_v40, 1  ;;  %v11304_v32 = vld [vmem:[%s13972_s21 + $0x10] sm:$0xff] }
 0x75d   : > { %v18496_v51 = vmul.f32 0.00390625, %v11129_v17  ;;  %v11231_v61 = vadd.f32 %v11230_v34, %v11229_v40 }
 0x75f   : > { %v11232_v49 = vmul.f32 0.00390625, %v11231_v61  ;;  %v11233_v6 = vmul.f32 %v18496_v51, %v18496_v51  ;;  %v11236_v11 = vsub.f32 %v18274_v14, %v18496_v51  ;;  %v11237_v25 = vsub.f32 %v18280_v12, %v18496_v51  ;;  %v11307_v61 = vld [vmem:[%s13972_s21 + $0x28] sm:$0xff] }
 0x760   : > { %v11238_v58 = vsub.f32 %v18272_v48, %v18496_v51  ;;  %v11239_v60 = vsub.f32 %v18278_v35, %v18496_v51  ;;  %v11240_v44 = vsub.f32 %v18301_v50, %v18496_v51  ;;  %v11241_v22 = vsub.f32 %v18310_v13, %v18496_v51 }
 0x761   : > { %v11234_v53 = vsub.f32 %v11232_v49, %v11233_v6  ;;  %v11242_v5 = vsub.f32 %v18299_v55, %v18496_v51  ;;  %v11243_v14 = vsub.f32 %v18308_v19, %v18496_v51  ;;  %v11244_v12 = vsub.f32 %v18329_v59, %v18496_v51  ;;  %v11308_v49 = vld [vmem:[%s13972_s21 + $0x30] sm:$0xff]  ;;  %v11309_v6 = vld [vmem:[%s13972_s21 + $0x38] sm:$0xff] }
 0x762   : > { %v11245_v48 = vsub.f32 %v18338_v63, %v18496_v51  ;;  %v11246_v35 = vsub.f32 %v18327_v38, %v18496_v51  ;;  %v11247_v50 = vsub.f32 %v18336_v57, %v18496_v51  ;;  %v11248_v13 = vsub.f32 %v18357_v36, %v18496_v51 }
 0x763   : > { %v11235_v56 = vmax.f32 %v11234_v53, 0.0  ;;  %v11249_v55 = vsub.f32 %v18366_v54, %v18496_v51  ;;  %v11250_v19 = vsub.f32 %v18355_v16, %v18496_v51  ;;  %v11251_v59 = vsub.f32 %v18364_v10, %v18496_v51  ;;  %v11312_v53 = vld [vmem:[%s13972_s21 + $0x50] sm:$0xff] }
 0x764   : > { %v11252_v63 = vsub.f32 %v18385_v31, %v18496_v51  ;;  %v11253_v38 = vsub.f32 %v18394_v9, %v18496_v51  ;;  %v11254_v57 = vsub.f32 %v18383_v62, %v18496_v51  ;;  %v11255_v36 = vsub.f32 %v18392_v28, %v18496_v51 }
 0x765   : > { %v11256_v54 = vsub.f32 %v18413_v26, %v18496_v51  ;;  %v11257_v16 = vsub.f32 %v18422_v8, %v18496_v51  ;;  %v11258_v10 = vsub.f32 %v18411_v1, %v18496_v51  ;;  %v11259_v31 = vsub.f32 %v18420_v45, %v18496_v51 }
 0x766   : > { %v11260_v9 = vsub.f32 %v18441_v30, %v18496_v51  ;;  %v11261_v62 = vsub.f32 %v18450_v24, %v18496_v51  ;;  %v11262_v28 = vsub.f32 %v18439_v0, %v18496_v51  ;;  %v11263_v26 = vsub.f32 %v18448_v41, %v18496_v51 }
 0x767   : > { %v11264_v8 = vsub.f32 %v18469_v2, %v18496_v51  ;;  %v11265_v1 = vsub.f32 %v18478_v20, %v18496_v51  ;;  %v11266_v45 = vsub.f32 %v18467_v27, %v18496_v51  ;;  %v11267_v30 = vsub.f32 %v18476_v15, %v18496_v51  ;;  %v11306_v51 = vld [vmem:[%s13972_s21 + $0x20] sm:$0xff] }
 0x768   : > { %v11268_v21 = vadd.f32 1e-05, %v11235_v56 }
 0x76a   : > { %13885 = vrsqrt.f32 %v11268_v21 }
 0x774   : > { %v13886_v24 = vpop.eup %13885 }
 0x775   : > { %v11270_v37 = vmul.f32 %v13886_v24, %v11236_v11  ;;  %v11271_v0 = vmul.f32 %v13886_v24, %v11237_v25  ;;  %v11272_v41 = vmul.f32 %v13886_v24, %v11238_v58  ;;  %v11273_v39 = vmul.f32 %v13886_v24, %v11239_v60 }
 0x776   : > { %v11274_v2 = vmul.f32 %v13886_v24, %v11240_v44  ;;  %v11275_v29 = vmul.f32 %v13886_v24, %v11241_v22  ;;  %v11276_v20 = vmul.f32 %v13886_v24, %v11242_v5  ;;  %v11277_v43 = vmul.f32 %v13886_v24, %v11243_v14  ;;  %v11310_v44 = vld [vmem:[%s13972_s21 + $0x40] sm:$0xff]  ;;  %v11311_v22 = vld [vmem:[%s13972_s21 + $0x48] sm:$0xff] }
 0x777   : > { %v11278_v33 = vmul.f32 %v13886_v24, %v11244_v12  ;;  %v11279_v27 = vmul.f32 %v13886_v24, %v11245_v48  ;;  %v11280_v15 = vmul.f32 %v13886_v24, %v11246_v35  ;;  %v11281_v47 = vmul.f32 %v13886_v24, %v11247_v50  ;;  %v11313_v35 = vld [vmem:[%s13972_s21 + $0x58] sm:$0xff]  ;;  %v11314_v50 = vld [vmem:[%s13972_s21 + $0x60] sm:$0xff] }
 0x778   : > { %v18564_v23 = vmul.f32 %v13886_v24, %v11248_v13  ;;  %v18566_v42 = vmul.f32 %v13886_v24, %v11249_v55  ;;  %v18568_v52 = vmul.f32 %v13886_v24, %v11250_v19  ;;  %v18570_v7 = vmul.f32 %v13886_v24, %v11251_v59  ;;  %v11315_v13 = vld [vmem:[%s13972_s21 + $0x68] sm:$0xff] }
 0x779   : > { %v18576_v46 = vmul.f32 %v13886_v24, %v11252_v63  ;;  %v18578_v40 = vmul.f32 %v13886_v24, %v11253_v38  ;;  %v18580_v17 = vmul.f32 %v13886_v24, %v11254_v57  ;;  %v18582_v34 = vmul.f32 %v13886_v24, %v11255_v36  ;;  %v11316_v63 = vld [vmem:[%s13972_s21 + $0x70] sm:$0xff]  ;;  %v11317_v38 = vld [vmem:[%s13972_s21 + $0x78] sm:$0xff]  ;;  %v11318_v57 = vld [vmem:[%s13972_s21 + $0x80] sm:$0xff] }
 0x77a   : > { %v18588_v11 = vmul.f32 %v13886_v24, %v11256_v54  ;;  %v18590_v25 = vmul.f32 %v13886_v24, %v11257_v16  ;;  %v18592_v58 = vmul.f32 %v13886_v24, %v11258_v10  ;;  %v18594_v60 = vmul.f32 %v13886_v24, %v11259_v31  ;;  %v11319_v36 = vld [vmem:[%s13972_s21 + $0x88] sm:$0xff]  ;;  %v11320_v54 = vld [vmem:[%s13972_s21 + $0x90] sm:$0xff]  ;;  %v11321_v16 = vld [vmem:[%s13972_s21 + $0x98] sm:$0xff] }
 0x77b   : > { %v18599_v5 = vmul.f32 %v13886_v24, %v11260_v9  ;;  %v18601_v14 = vmul.f32 %v13886_v24, %v11261_v62  ;;  %v18603_v12 = vmul.f32 %v13886_v24, %v11262_v28  ;;  %v18605_v48 = vmul.f32 %v13886_v24, %v11263_v26  ;;  %v11322_v28 = vld [vmem:[%s13972_s21 + $0xa0] sm:$0xff]  ;;  %v11323_v26 = vld [vmem:[%s13972_s21 + $0xa8] sm:$0xff] }
 0x77c   : > { %v18617_v56 = vmul.f32 %v13886_v24, %v11264_v8  ;;  %v18619_v55 = vmul.f32 %v13886_v24, %v11265_v1  ;;  %v18621_v19 = vmul.f32 %v13886_v24, %v11266_v45  ;;  %v18623_v59 = vmul.f32 %v13886_v24, %v11267_v30  ;;  %v11324_v8 = vld [vmem:[%s13972_s21 + $0xb0] sm:$0xff]  ;;  %v11325_v24 = vld [vmem:[%s13972_s21 + $0xb8] sm:$0xff] }
 0x77d   : > { %v11334_v10 = vadd.f32 %v11302_v4, %v11270_v37  ;;  %v11335_v31 = vadd.f32 %v11303_v18, %v11271_v0  ;;  %v11336_v9 = vadd.f32 %v11304_v32, %v11272_v41  ;;  %v11337_v62 = vadd.f32 %v11305_v3, %v11273_v39  ;;  %v11327_v37 = vld [vmem:[%s13972_s21 + $0xc8] sm:$0xff] }
 0x77e   : > { %19246 = vst [vmem:[#allocation5_spill] sm:$0xff] %v18623_v59  ;;  %v11338_v1 = vadd.f32 %v11306_v51, %v11274_v2  ;;  %v11339_v45 = vadd.f32 %v11307_v61, %v11275_v29  ;;  %v11340_v30 = vadd.f32 %v11308_v49, %v11276_v20  ;;  %v11341_v21 = vadd.f32 %v11309_v6, %v11277_v43  ;;  %v11326_v59 = vld [vmem:[%s13972_s21 + $0xc0] sm:$0xff]  ;;  %v11328_v2 = vld [vmem:[%s13972_s21 + $0xd0] sm:$0xff]  ;;  %v11329_v29 = vld [vmem:[%s13972_s21 + $0xd8] sm:$0xff] }
 0x77f   : > { %v11342_v0 = vadd.f32 %v11310_v44, %v11278_v33  ;;  %v11343_v41 = vadd.f32 %v11311_v22, %v11279_v27  ;;  %v11344_v39 = vadd.f32 %v11312_v53, %v11280_v15  ;;  %v11345_v4 = vadd.f32 %v11313_v35, %v11281_v47  ;;  %11366 = vst.msk [vmem:[%s18615_s10] sm:$0xff] %vm1437_vm13, %v11334_v10  ;;  %v11330_v20 = vld [vmem:[%s13972_s21 + $0xe0] sm:$0xff]  ;;  %v11331_v47 = vld [vmem:[%s13972_s21 + $0xe8] sm:$0xff] }
 0x780   : > { %11367 = vst.msk [vmem:[%s18615_s10 + $0x8] sm:$0xff] %vm1437_vm13, %v11335_v31  ;;  %11368 = vst.msk [vmem:[%s18615_s10 + $0x10] sm:$0xff] %vm1437_vm13, %v11336_v9  ;;  %v11346_v43 = vadd.f32 %v11314_v50, %v18564_v23  ;;  %v11347_v33 = vadd.f32 %v11315_v13, %v18566_v42  ;;  %v11348_v27 = vadd.f32 %v11316_v63, %v18568_v52  ;;  %v11332_v23 = vld [vmem:[%s13972_s21 + $0xf0] sm:$0xff]  ;;  %v11333_v42 = vld [vmem:[%s13972_s21 + $0xf8] sm:$0xff] }
 0x781   : > { %11369 = vst.msk [vmem:[%s18615_s10 + $0x18] sm:$0xff] %vm1437_vm13, %v11337_v62  ;;  %v11349_v15 = vadd.f32 %v11317_v38, %v18570_v7  ;;  %11370 = vst.msk [vmem:[%s18615_s10 + $0x20] sm:$0xff] %vm1437_vm13, %v11338_v1  ;;  %v11350_v52 = vadd.f32 %v11318_v57, %v18576_v46  ;;  %v11351_v18 = vadd.f32 %v11319_v36, %v18578_v40 }
 0x782   : > { %11371 = vst.msk [vmem:[%s18615_s10 + $0x28] sm:$0xff] %vm1437_vm13, %v11339_v45  ;;  %11372 = vst.msk [vmem:[%s18615_s10 + $0x30] sm:$0xff] %vm1437_vm13, %v11340_v30  ;;  %v11352_v7 = vadd.f32 %v11320_v54, %v18580_v17  ;;  %v11353_v32 = vadd.f32 %v11321_v16, %v18582_v34  ;;  %v11354_v3 = vadd.f32 %v11322_v28, %v18588_v11 }
 0x783   : > { %11373 = vst.msk [vmem:[%s18615_s10 + $0x38] sm:$0xff] %vm1437_vm13, %v11341_v21  ;;  %11374 = vst.msk [vmem:[%s18615_s10 + $0x40] sm:$0xff] %vm1437_vm13, %v11342_v0  ;;  %v11355_v46 = vadd.f32 %v11323_v26, %v18590_v25  ;;  %v11356_v40 = vadd.f32 %v11324_v8, %v18592_v58  ;;  %v11357_v17 = vadd.f32 %v11325_v24, %v18594_v60 }
 0x784   : > { %11375 = vst.msk [vmem:[%s18615_s10 + $0x48] sm:$0xff] %vm1437_vm13, %v11343_v41  ;;  %11376 = vst.msk [vmem:[%s18615_s10 + $0x50] sm:$0xff] %vm1437_vm13, %v11344_v39  ;;  %v11358_v34 = vadd.f32 %v11326_v59, %v18599_v5  ;;  %v11359_v51 = vadd.f32 %v11327_v37, %v18601_v14  ;;  %v11360_v61 = vadd.f32 %v11328_v2, %v18603_v12 }
 0x785   : > { %11377 = vst.msk [vmem:[%s18615_s10 + $0x58] sm:$0xff] %vm1437_vm13, %v11345_v4  ;;  %11378 = vst.msk [vmem:[%s18615_s10 + $0x60] sm:$0xff] %vm1437_vm13, %v11346_v43  ;;  %v11361_v49 = vadd.f32 %v11329_v29, %v18605_v48  ;;  %v11362_v6 = vadd.f32 %v11330_v20, %v18617_v56  ;;  %v11363_v11 = vadd.f32 %v11331_v47, %v18619_v55  ;;  %v19247_v58 = vld [vmem:[#allocation5_spill] sm:$0xff] }
 0x786   : > { %11379 = vst.msk [vmem:[%s18615_s10 + $0x68] sm:$0xff] %vm1437_vm13, %v11347_v33  ;;  %11380 = vst.msk [vmem:[%s18615_s10 + $0x70] sm:$0xff] %vm1437_vm13, %v11348_v27  ;;  %v11364_v25 = vadd.f32 %v11332_v23, %v18621_v19  ;;  %v11365_v60 = vadd.f32 %v11333_v42, %v19247_v58 }
 0x787   : > { %11381 = vst.msk [vmem:[%s18615_s10 + $0x78] sm:$0xff] %vm1437_vm13, %v11349_v15  ;;  %11382 = vst.msk [vmem:[%s18615_s10 + $0x80] sm:$0xff] %vm1437_vm13, %v11350_v52 }
 0x788   : > { %11383 = vst.msk [vmem:[%s18615_s10 + $0x88] sm:$0xff] %vm1437_vm13, %v11351_v18  ;;  %11384 = vst.msk [vmem:[%s18615_s10 + $0x90] sm:$0xff] %vm1437_vm13, %v11352_v7 }
 0x789   : > { %11385 = vst.msk [vmem:[%s18615_s10 + $0x98] sm:$0xff] %vm1437_vm13, %v11353_v32  ;;  %11386 = vst.msk [vmem:[%s18615_s10 + $0xa0] sm:$0xff] %vm1437_vm13, %v11354_v3 }
 0x78a   : > { %11387 = vst.msk [vmem:[%s18615_s10 + $0xa8] sm:$0xff] %vm1437_vm13, %v11355_v46  ;;  %11388 = vst.msk [vmem:[%s18615_s10 + $0xb0] sm:$0xff] %vm1437_vm13, %v11356_v40 }
 0x78b   : > { %11389 = vst.msk [vmem:[%s18615_s10 + $0xb8] sm:$0xff] %vm1437_vm13, %v11357_v17  ;;  %11390 = vst.msk [vmem:[%s18615_s10 + $0xc0] sm:$0xff] %vm1437_vm13, %v11358_v34 }
 0x78c   : > { %11391 = vst.msk [vmem:[%s18615_s10 + $0xc8] sm:$0xff] %vm1437_vm13, %v11359_v51  ;;  %11392 = vst.msk [vmem:[%s18615_s10 + $0xd0] sm:$0xff] %vm1437_vm13, %v11360_v61 }
 0x78d   : > { %11393 = vst.msk [vmem:[%s18615_s10 + $0xd8] sm:$0xff] %vm1437_vm13, %v11361_v49  ;;  %11394 = vst.msk [vmem:[%s18615_s10 + $0xe0] sm:$0xff] %vm1437_vm13, %v11362_v6 }
 0x78e   : > { %11395 = vst.msk [vmem:[%s18615_s10 + $0xe8] sm:$0xff] %vm1437_vm13, %v11363_v11  ;;  %11396 = vst.msk [vmem:[%s18615_s10 + $0xf0] sm:$0xff] %vm1437_vm13, %v11364_v25 }
 0x78f   : > { %11397 = vst.msk [vmem:[%s18615_s10 + $0xf8] sm:$0xff] %vm1437_vm13, %v11365_v60 }
 0x790 PF: > { %s13_s12 = sadd.s32 1, %s13924_s12  }
 0x791   : > { %p10_p4 = scmp.ge.s32.totalorder %s13_s12, 4  }
 0x793   :  { %12 = sbr.rel (!%p10_p4) target bundleno = 1 (0x1), region = 82 }

</bundles_post_ra>
